<compile_context>
chip_gen: v7x
topology: tpu7x:2x2x1
jax: 0.10.0
libtpu: 0.0.40
codegen_flags: <defaults>
</compile_context>

<pallas_src>
import numpy as np
import jax
import jax.numpy as jnp
from jax.experimental import pallas as pl
from jax.experimental.pallas import tpu as pltpu

HS = 512            # module-level `hs`
WS = 512            # module-level `ws`
EPS_BN = 1e-5       # BatchNorm2d default eps
MAP_DTYPE = jnp.float32   # set to jnp.bfloat16 on v5e to halve final-map HBM writes


def _round_up(x, m):
    return (x + m - 1) // m * m


# ---------------------------------------------------------------------------
# Bilinear interpolation matrices (PyTorch align_corners=False semantics).
# All coefficients are dyadic rationals for the sizes used here, so the bf16
# copies are exact.
# ---------------------------------------------------------------------------
def _bilinear_matrix(in_size, out_size):
    m = np.zeros((out_size, in_size), np.float32)
    scale = in_size / out_size
    for i in range(out_size):
        src = max((i + 0.5) * scale - 0.5, 0.0)
        lo = min(int(np.floor(src)), in_size - 1)
        hi = min(lo + 1, in_size - 1)
        f = src - lo
        m[i, lo] += 1.0 - f
        m[i, hi] += f
    return m


def _kron_interp_blockdiag(hin, win, hout, wout, hwp, b_blk):
    """B_BLK-block-diagonal kron(Rh, Rw)^T, (b_blk*hwp, b_blk*hout*wout), bf16.
    Rows hin*win..hwp of each diagonal block are zero, so the bias-filled
    padded lanes of the projection are annihilated."""
    k = np.kron(_bilinear_matrix(hin, hout), _bilinear_matrix(win, wout))  # (HWout, HWin)
    kt = k.T.astype(np.float32)                                            # (HWin, HWout)
    kp = np.zeros((hwp, hout * wout), np.float32)
    kp[: hin * win] = kt
    bd = np.kron(np.eye(b_blk, dtype=np.float32), kp)
    return jnp.asarray(bd, jnp.bfloat16)


# ---------------------------------------------------------------------------
# Kernel 1: batched MLP projections + bilinear upsample + fuse + pred.
# Inputs/weights are bf16 operands; all accumulation is f32.
# ---------------------------------------------------------------------------
def _decode_fuse_kernel(x5_ref, x4_ref, x3_ref, x2_ref,
                        w4_ref, b4_ref, w3_ref, b3_ref,
                        w2_ref, b2_ref, w1_ref, b1_ref,
                        k5_ref, k4_ref, k3_ref,
                        fw_ref, fb_ref, pw_ref, pb_ref,
                        c_ref, pred_ref):
    f32 = jnp.float32
    bf16 = jnp.bfloat16
    E = w4_ref.shape[0]

    def branch(w_ref, b_ref, x_ref, k_ref):
        # (E, C)bf16 @ (C, B*HWP)bf16 -> f32, + bias column.  Padded lanes of x
        # are zero so the padded columns of p carry only the bias; the zero
        # padded rows of the block-diagonal kron matrix annihilate them.
        p = jnp.dot(w_ref[...], x_ref[...], preferred_element_type=f32) + b_ref[...]
        return jnp.dot(p.astype(bf16), k_ref[...], preferred_element_type=f32)

    # _c5 branch (deepest scale) -> write into c, accumulate into fuse.
    u5 = branch(w4_ref, b4_ref, x5_ref, k5_ref)               # (E, B*HW2) f32
    c_ref[0:E, :] = u5
    f = jnp.dot(fw_ref[0], u5.astype(bf16), preferred_element_type=f32)

    # _c4 branch
    u4 = branch(w3_ref, b3_ref, x4_ref, k4_ref)
    c_ref[E:2 * E, :] = u4
    f = f + jnp.dot(fw_ref[1], u4.astype(bf16), preferred_element_type=f32)

    # _c3 branch
    u3 = branch(w2_ref, b2_ref, x3_ref, k3_ref)
    c_ref[2 * E:3 * E, :] = u3
    f = f + jnp.dot(fw_ref[2], u3.astype(bf16), preferred_element_type=f32)

    # _c2 branch (already at h2 resolution, no upsample)
    p2 = jnp.dot(w1_ref[...], x2_ref[...], preferred_element_type=f32) + b1_ref[...]
    c_ref[3 * E:4 * E, :] = p2
    f = f + jnp.dot(fw_ref[3], p2.astype(bf16), preferred_element_type=f32)

    # linear_fuse bias (eval-mode BN folded into weight AND bias) + ReLU.
    f = jnp.maximum(f + fb_ref[...], 0.0)

    # TODO(synk): nn.Dropout2d(0.1) is identity at inference; training-mode
    # channel dropout is not implemented.

    # linear_pred (1x1 conv); emitted in bf16 as the resize kernel's operand.
    pred_ref[...] = (jnp.dot(pw_ref[...], f.astype(bf16),
                             preferred_element_type=f32)
                     + pb_ref[...]).astype(pred_ref.dtype)


# ---------------------------------------------------------------------------
# Kernel 2: 16x16 -> (HS, WS) bilinear resize + fused sigmoid,
# row-tiled over HS so the live intermediate is (TH, WS) and the pipeliner
# gets N*nc*(HS//TH) steps to hide the output writeback.
# ---------------------------------------------------------------------------
def _resize_sigmoid_kernel(x_ref, rh_ref, rwt_ref, o_ref):
    bf16 = jnp.bfloat16
    x = x_ref[0, 0]                                                     # (H2, W2) bf16
    t = jnp.dot(x, rwt_ref[...], preferred_element_type=jnp.float32)   # (H2, WS)
    y = jnp.dot(rh_ref[...], t.astype(bf16),
                preferred_element_type=jnp.float32)                    # (TH, WS)
    # sigmoid(y) = 1 / (1 + exp(-y)): exp on the EUP, approx reciprocal (EUP)
    # instead of an exact VALU divide over 64K elements per step.
    o_ref[0, 0] = pl.reciprocal(1.0 + jnp.exp(-y), approx=True).astype(o_ref.dtype)


# ---------------------------------------------------------------------------
# Parameters (deterministic, matching DecoderNet._initialize_weights)
# ---------------------------------------------------------------------------
def _fold_bn(conv_w, conv_b, gamma, beta, mean, var, eps=EPS_BN):
    """Fold eval-mode BatchNorm2d into a preceding 1x1 conv (weight AND bias)."""
    scale = gamma / jnp.sqrt(var + eps)
    return conv_w * scale[:, None], beta + (conv_b - mean) * scale


def init_params(key, in_channels, embed_dim, num_classes):
    E = embed_dim
    ks = jax.random.split(key, 6)
    p = {}
    for i, name in enumerate(["c1", "c2", "c3", "c4"]):   # nn.Linear: N(0, 0.01), bias 0
        p[name + "_w"] = 0.01 * jax.random.normal(ks[i], (E, in_channels[i]), jnp.float32)
        p[name + "_b"] = jnp.zeros((E,), jnp.float32)
    # linear_fuse 1x1 conv: N(0, 0.001), bias 0, then eval-mode BatchNorm2d with
    # the _initialize_weights stats (gamma=1, beta=0, mean=0, var=1), folded.
    conv_w = 0.001 * jax.random.normal(ks[4], (E, 4 * E), jnp.float32)
    conv_b = jnp.zeros((E,), jnp.float32)
    p["fuse_w"], p["fuse_b"] = _fold_bn(
        conv_w, conv_b,
        gamma=jnp.ones((E,), jnp.float32), beta=jnp.zeros((E,), jnp.float32),
        mean=jnp.zeros((E,), jnp.float32), var=jnp.ones((E,), jnp.float32))
    # linear_pred 1x1 conv: N(0, 0.001), bias 0
    p["pred_w"] = 0.001 * jax.random.normal(ks[5], (num_classes, E), jnp.float32)
    p["pred_b"] = jnp.zeros((num_classes,), jnp.float32)
    return p


def prepare_params(params):
    """Kernel-layout params: bf16 MXU operands, fuse weight pre-split into the
    four (E,E) concat blocks, biases as f32 columns."""
    E = params["c4_w"].shape[0]
    col = lambda v: v.reshape(-1, 1)
    bf16 = jnp.bfloat16
    kp = {}
    for name in ["c1", "c2", "c3", "c4"]:
        kp[name + "_w"] = params[name + "_w"].astype(bf16)
        kp[name + "_b"] = col(params[name + "_b"])
    kp["fuse_w4"] = params["fuse_w"].reshape(E, 4, E).transpose(1, 0, 2).astype(bf16)
    kp["fuse_b"] = col(params["fuse_b"])
    kp["pred_w"] = params["pred_w"].astype(bf16)
    kp["pred_b"] = col(params["pred_b"])
    return kp


# ---------------------------------------------------------------------------
# Decoder forward
# ---------------------------------------------------------------------------
def _lane_pack(x, hwp):
    """(N, C, H, W) -> (C, N*hwp) bf16, per-batch zero padding to hwp lanes."""
    n_, c_, h_, w_ = x.shape
    hw = h_ * w_
    xf = x.reshape(n_, c_, hw)
    if hwp != hw:
        xf = jnp.pad(xf, ((0, 0), (0, 0), (0, hwp - hw)))
    return xf.transpose(1, 0, 2).reshape(c_, n_ * hwp).astype(jnp.bfloat16)


def _decode(kparams, h5, h4, h3, h2, map_dtype=jnp.float32):
    N = h5.shape[0]
    C4, C3, C2, C1 = h5.shape[1], h4.shape[1], h3.shape[1], h2.shape[1]
    H2s, W2s = h2.shape[2], h2.shape[3]
    HW2 = H2s * W2s
    E = kparams["c4_w"].shape[0]
    nc = kparams["pred_w"].shape[0]

    # Pack B_BLK batch elements along the lane axis per grid step (lane-dense
    # matmuls); keep >=2 "parallel" grid steps so both v7x TensorCores work.
    B_BLK = 2 if N % 2 == 0 else 1
    G = N // B_BLK
    lane_q = 128 // B_BLK
    # TODO(synk): odd h2 spatial sizes that violate this lane constraint would
    # need per-batch HW2 padding + output trimming; not needed for this module.
    assert (B_BLK * HW2) % 128 == 0, "B_BLK * H2*W2 must be a multiple of 128"

    hw5p = _round_up(h5.shape[2] * h5.shape[3], lane_q)
    hw4p = _round_up(h4.shape[2] * h4.shape[3], lane_q)
    hw3p = _round_up(h3.shape[2] * h3.shape[3], lane_q)

    x5 = _lane_pack(h5, hw5p)     # (C4, N*hw5p) bf16
    x4 = _lane_pack(h4, hw4p)
    x3 = _lane_pack(h3, hw3p)
    x2 = _lane_pack(h2, HW2)

    k5bd = _kron_interp_blockdiag(h5.shape[2], h5.shape[3], H2s, W2s, hw5p, B_BLK)
    k4bd = _kron_interp_blockdiag(h4.shape[2], h4.shape[3], H2s, W2s, hw4p, B_BLK)
    k3bd = _kron_interp_blockdiag(h3.shape[2], h3.shape[3], H2s, W2s, hw3p, B_BLK)

    c_flat, pred_flat = pl.pallas_call(
        _decode_fuse_kernel,
        out_shape=(
            jax.ShapeDtypeStruct((4 * E, N * HW2), jnp.float32),
            jax.ShapeDtypeStruct((nc, N * HW2), jnp.bfloat16),
        ),
        grid=(G,),
        in_specs=[
            pl.BlockSpec((C4, B_BLK * hw5p), lambda g: (0, g)),
            pl.BlockSpec((C3, B_BLK * hw4p), lambda g: (0, g)),
            pl.BlockSpec((C2, B_BLK * hw3p), lambda g: (0, g)),
            pl.BlockSpec((C1, B_BLK * HW2), lambda g: (0, g)),
            pl.BlockSpec((E, C4), lambda g: (0, 0)),
            pl.BlockSpec((E, 1), lambda g: (0, 0)),
            pl.BlockSpec((E, C3), lambda g: (0, 0)),
            pl.BlockSpec((E, 1), lambda g: (0, 0)),
            pl.BlockSpec((E, C2), lambda g: (0, 0)),
            pl.BlockSpec((E, 1), lambda g: (0, 0)),
            pl.BlockSpec((E, C1), lambda g: (0, 0)),
            pl.BlockSpec((E, 1), lambda g: (0, 0)),
            pl.BlockSpec((B_BLK * hw5p, B_BLK * HW2), lambda g: (0, 0)),
            pl.BlockSpec((B_BLK * hw4p, B_BLK * HW2), lambda g: (0, 0)),
            pl.BlockSpec((B_BLK * hw3p, B_BLK * HW2), lambda g: (0, 0)),
            pl.BlockSpec((4, E, E), lambda g: (0, 0, 0)),
            pl.BlockSpec((E, 1), lambda g: (0, 0)),
            pl.BlockSpec((nc, E), lambda g: (0, 0)),
            pl.BlockSpec((nc, 1), lambda g: (0, 0)),
        ],
        out_specs=(
            pl.BlockSpec((4 * E, B_BLK * HW2), lambda g: (0, g)),
            pl.BlockSpec((nc, B_BLK * HW2), lambda g: (0, g)),
        ),
        compiler_params=pltpu.CompilerParams(
            dimension_semantics=("parallel",)),
    )(
        x5, x4, x3, x2,
        kparams["c4_w"], kparams["c4_b"],
        kparams["c3_w"], kparams["c3_b"],
        kparams["c2_w"], kparams["c2_b"],
        kparams["c1_w"], kparams["c1_b"],
        k5bd, k4bd, k3bd,
        kparams["fuse_w4"], kparams["fuse_b"],
        kparams["pred_w"], kparams["pred_b"],
    )

    # Cheap XLA glue back to NCHW (c is the returned `_c` feature).
    c = (c_flat.reshape(4 * E, N, HW2).transpose(1, 0, 2)
         .reshape(N, 4 * E, H2s, W2s))
    pred_maps = pred_flat.reshape(nc, N, H2s, W2s).transpose(1, 0, 2, 3)

    # Final bilinear resize to (HS, WS) + fused sigmoid, row-tiled over HS.
    rh = jnp.asarray(_bilinear_matrix(H2s, HS), jnp.bfloat16)      # (HS, H2s)
    rwt = jnp.asarray(_bilinear_matrix(W2s, WS).T, jnp.bfloat16)   # (W2s, WS)
    TH = 128
    assert HS % TH == 0

    x = pl.pallas_call(
        _resize_sigmoid_kernel,
        out_shape=jax.ShapeDtypeStruct((N, nc, HS, WS), map_dtype),
        grid=(N, nc, HS // TH),
        in_specs=[
            pl.BlockSpec((1, 1, H2s, W2s), lambda b, k, i: (b, k, 0, 0)),
            pl.BlockSpec((TH, H2s), lambda b, k, i: (i, 0)),
            pl.BlockSpec((W2s, WS), lambda b, k, i: (0, 0)),
        ],
        out_specs=pl.BlockSpec((1, 1, TH, WS), lambda b, k, i: (b, k, i, 0)),
        compiler_params=pltpu.CompilerParams(
            dimension_semantics=("parallel", "parallel", "parallel")),
    )(pred_maps, rh, rwt)

    return x, c


@jax.jit
def decoder_forward(kparams, h5_1, h4_1, h3_1, h2_1, h5_2, h4_2, h3_2, h2_2):
    n = h5_1.shape[0]
    # Batch the two streams (shared weights): every Pallas kernel runs once.
    h5 = jnp.concatenate([h5_1, h5_2], axis=0)
    h4 = jnp.concatenate([h4_1, h4_2], axis=0)
    h3 = jnp.concatenate([h3_1, h3_2], axis=0)
    h2 = jnp.concatenate([h2_1, h2_2], axis=0)
    x, c = _decode(kparams, h5, h4, h3, h2, map_dtype=MAP_DTYPE)
    return x[:n], c[:n], x[n:], c[n:]


# ---------------------------------------------------------------------------
# Pure-JAX f32 reference (mirrors the PyTorch forward) for a correctness check
# ---------------------------------------------------------------------------
def _reference_forward(params, h5, h4, h3, h2):
    E = params["c4_w"].shape[0]
    H2s, W2s = h2.shape[2], h2.shape[3]

    def proj(x, w, b):
        n_, c_, hh, ww = x.shape
        t = x.reshape(n_, c_, hh * ww).transpose(0, 2, 1)
        y = jnp.einsum("npc,ec->nep", t, w, precision="highest") + b[None, :, None]
        return y.reshape(n_, E, hh, ww)

    def up(x, hout, wout):
        rh = jnp.asarray(_bilinear_matrix(x.shape[2], hout))
        rw = jnp.asarray(_bilinear_matrix(x.shape[3], wout))
        y = jnp.einsum("oh,nchw->ncow", rh, x, precision="highest")
        return jnp.einsum("pw,ncow->ncop", rw, y, precision="highest")

    c5 = up(proj(h5, params["c4_w"], params["c4_b"]), H2s, W2s)
    c4 = up(proj(h4, params["c3_w"], params["c3_b"]), H2s, W2s)
    c3 = up(proj(h3, params["c2_w"], params["c2_b"]), H2s, W2s)
    c2 = proj(h2, params["c1_w"], params["c1_b"])
    c = jnp.concatenate([c5, c4, c3, c2], axis=1)
    f = jnp.einsum("eq,nqhw->nehw", params["fuse_w"], c, precision="highest")
    f = jnp.maximum(f + params["fuse_b"][None, :, None, None], 0.0)
    p = jnp.einsum("ke,nehw->nkhw", params["pred_w"], f, precision="highest")
    p = p + params["pred_b"][None, :, None, None]
    return jax.nn.sigmoid(up(p, HS, WS)), c


if __name__ == "__main__":
    key = jax.random.PRNGKey(0)
    in_channels = [32, 64, 128, 256]   # [c1, c2, c3, c4]
    E = 128
    num_classes = 1
    n = 2

    pkey, dkey = jax.random.split(key)
    params = init_params(pkey, in_channels, E, num_classes)
    kparams = prepare_params(params)

    dks = jax.random.split(dkey, 8)
    h2_1 = jax.random.normal(dks[0], (n, in_channels[0], 16, 16), jnp.float32)
    h3_1 = jax.random.normal(dks[1], (n, in_channels[1], 8, 8), jnp.float32)
    h4_1 = jax.random.normal(dks[2], (n, in_channels[2], 4, 4), jnp.float32)
    h5_1 = jax.random.normal(dks[3], (n, in_channels[3], 2, 2), jnp.float32)
    h2_2 = jax.random.normal(dks[4], (n, in_channels[0], 16, 16), jnp.float32)
    h3_2 = jax.random.normal(dks[5], (n, in_channels[1], 8, 8), jnp.float32)
    h4_2 = jax.random.normal(dks[6], (n, in_channels[2], 4, 4), jnp.float32)
    h5_2 = jax.random.normal(dks[7], (n, in_channels[3], 2, 2), jnp.float32)

    x_1, c_1, x_2, c_2 = decoder_forward(
        kparams, h5_1, h4_1, h3_1, h2_1, h5_2, h4_2, h3_2, h2_2)
    jax.block_until_ready((x_1, c_1, x_2, c_2))

    assert x_1.shape == (n, num_classes, HS, WS)
    assert c_1.shape == (n, 4 * E, 16, 16)
    assert x_2.shape == (n, num_classes, HS, WS)
    assert c_2.shape == (n, 4 * E, 16, 16)
    assert bool(jnp.all((x_1 >= 0) & (x_1 <= 1)))
    assert bool(jnp.all((x_2 >= 0) & (x_2 <= 1)))

    # Correctness check vs. a pure-JAX f32 reference on stream 1.  bf16 MXU
    # operands throughout the kernels (weights, activations, interp matrices)
    # => relaxed tolerance.
    x_ref, c_ref = _reference_forward(params, h5_1, h4_1, h3_1, h2_1)
    assert bool(jnp.allclose(c_1, c_ref, atol=1e-2, rtol=1e-2))
    assert bool(jnp.allclose(x_1.astype(jnp.float32), x_ref, atol=1e-2, rtol=1e-2))

    print("KERNEL_OK")
</pallas_src>

<mosaic_0001>
module attributes {stable_mosaic.version = 11 : i64} {
  func.func @_decode_fuse_kernel(%arg0: i32, %arg1: memref<256x128xbf16, #tpu.memory_space<vmem>>, %arg2: memref<128x128xbf16, #tpu.memory_space<vmem>>, %arg3: memref<64x128xbf16, #tpu.memory_space<vmem>>, %arg4: memref<32x512xbf16, #tpu.memory_space<vmem>>, %arg5: memref<128x256xbf16, #tpu.memory_space<vmem>>, %arg6: memref<128x1xf32, #tpu.memory_space<vmem>>, %arg7: memref<128x128xbf16, #tpu.memory_space<vmem>>, %arg8: memref<128x1xf32, #tpu.memory_space<vmem>>, %arg9: memref<128x64xbf16, #tpu.memory_space<vmem>>, %arg10: memref<128x1xf32, #tpu.memory_space<vmem>>, %arg11: memref<128x32xbf16, #tpu.memory_space<vmem>>, %arg12: memref<128x1xf32, #tpu.memory_space<vmem>>, %arg13: memref<128x512xbf16, #tpu.memory_space<vmem>>, %arg14: memref<128x512xbf16, #tpu.memory_space<vmem>>, %arg15: memref<128x512xbf16, #tpu.memory_space<vmem>>, %arg16: memref<4x128x128xbf16, #tpu.memory_space<vmem>>, %arg17: memref<128x1xf32, #tpu.memory_space<vmem>>, %arg18: memref<1x128xbf16, #tpu.memory_space<vmem>>, %arg19: memref<1x1xf32, #tpu.memory_space<vmem>>, %arg20: memref<512x512xf32, #tpu.memory_space<vmem>>, %arg21: memref<1x512xbf16, #tpu.memory_space<vmem>>) attributes {dimension_semantics = [#tpu.dimension_semantics<parallel>], iteration_bounds = array<i64: 2>, scalar_prefetch = 0 : i64, scratch_operands = 0 : i64, tpu.core_type = #tpu.core_type<tc>, window_params = [{transform_indices = @transform_0, window_bounds = array<i64: 256, 128>}, {transform_indices = @transform_1, window_bounds = array<i64: 128, 128>}, {transform_indices = @transform_2, window_bounds = array<i64: 64, 128>}, {transform_indices = @transform_3, window_bounds = array<i64: 32, 512>}, {pipeline_mode = #tpu.pipeline_mode<synchronous>, transform_indices = @transform_4, window_bounds = array<i64: 128, 256>}, {pipeline_mode = #tpu.pipeline_mode<synchronous>, transform_indices = @transform_5, window_bounds = array<i64: 128, 1>}, {pipeline_mode = #tpu.pipeline_mode<synchronous>, transform_indices = @transform_6, window_bounds = array<i64: 128, 128>}, {pipeline_mode = #tpu.pipeline_mode<synchronous>, transform_indices = @transform_7, window_bounds = array<i64: 128, 1>}, {pipeline_mode = #tpu.pipeline_mode<synchronous>, transform_indices = @transform_8, window_bounds = array<i64: 128, 64>}, {pipeline_mode = #tpu.pipeline_mode<synchronous>, transform_indices = @transform_9, window_bounds = array<i64: 128, 1>}, {pipeline_mode = #tpu.pipeline_mode<synchronous>, transform_indices = @transform_10, window_bounds = array<i64: 128, 32>}, {pipeline_mode = #tpu.pipeline_mode<synchronous>, transform_indices = @transform_11, window_bounds = array<i64: 128, 1>}, {pipeline_mode = #tpu.pipeline_mode<synchronous>, transform_indices = @transform_12, window_bounds = array<i64: 128, 512>}, {pipeline_mode = #tpu.pipeline_mode<synchronous>, transform_indices = @transform_13, window_bounds = array<i64: 128, 512>}, {pipeline_mode = #tpu.pipeline_mode<synchronous>, transform_indices = @transform_14, window_bounds = array<i64: 128, 512>}, {pipeline_mode = #tpu.pipeline_mode<synchronous>, transform_indices = @transform_15, window_bounds = array<i64: 4, 128, 128>}, {pipeline_mode = #tpu.pipeline_mode<synchronous>, transform_indices = @transform_16, window_bounds = array<i64: 128, 1>}, {pipeline_mode = #tpu.pipeline_mode<synchronous>, transform_indices = @transform_17, window_bounds = array<i64: 1, 128>}, {pipeline_mode = #tpu.pipeline_mode<synchronous>, transform_indices = @transform_18, window_bounds = array<i64: 1, 1>}, {transform_indices = @transform_19, window_bounds = array<i64: 512, 512>}, {transform_indices = @transform_20, window_bounds = array<i64: 1, 512>}]} {
    %c0 = arith.constant 0 : index
    %c0_0 = arith.constant 0 : index
    %0 = vector.load %arg5[%c0, %c0_0] : memref<128x256xbf16, #tpu.memory_space<vmem>>, vector<128x256xbf16>
    %c0_1 = arith.constant 0 : index
    %c0_2 = arith.constant 0 : index
    %1 = vector.load %arg1[%c0_1, %c0_2] : memref<256x128xbf16, #tpu.memory_space<vmem>>, vector<256x128xbf16>
    %cst = arith.constant dense<0.000000e+00> : vector<128x128xf32>
    %2 = tpu.matmul %0, %1, %cst {dimension_numbers = #tpu.dot_dimension_numbers<[1], [0], [0], [1], [0, 0, 1, 1], [], []>} : vector<128x256xbf16>, vector<256x128xbf16>, vector<128x128xf32> -> vector<128x128xf32>
    %c0_3 = arith.constant 0 : index
    %c0_4 = arith.constant 0 : index
    %3 = vector.load %arg6[%c0_3, %c0_4] : memref<128x1xf32, #tpu.memory_space<vmem>>, vector<128x1xf32>
    %4 = vector.broadcast %3 : vector<128x1xf32> to vector<128x128xf32>
    %5 = arith.addf %2, %4 : vector<128x128xf32>
    %6 = arith.truncf %5 : vector<128x128xf32> to vector<128x128xbf16>
    %c0_5 = arith.constant 0 : index
    %c0_6 = arith.constant 0 : index
    %7 = vector.load %arg13[%c0_5, %c0_6] : memref<128x512xbf16, #tpu.memory_space<vmem>>, vector<128x512xbf16>
    %cst_7 = arith.constant dense<0.000000e+00> : vector<128x512xf32>
    %8 = tpu.matmul %6, %7, %cst_7 {dimension_numbers = #tpu.dot_dimension_numbers<[1], [0], [0], [1], [0, 0, 1, 1], [], []>} : vector<128x128xbf16>, vector<128x512xbf16>, vector<128x512xf32> -> vector<128x512xf32>
    %c0_8 = arith.constant 0 : index
    %c0_9 = arith.constant 0 : index
    %9 = vector.load %arg20[%c0_8, %c0_9] : memref<512x512xf32, #tpu.memory_space<vmem>>, vector<128x512xf32>
    tpu.vector_store %arg20[%c0_8, %c0_9], %8 {strides = array<i32>} : memref<512x512xf32, #tpu.memory_space<vmem>>, vector<128x512xf32>,
    %c0_10 = arith.constant 0 : index
    %c0_11 = arith.constant 0 : index
    %c0_12 = arith.constant 0 : index
    %10 = vector.load %arg16[%c0_10, %c0_11, %c0_12] : memref<4x128x128xbf16, #tpu.memory_space<vmem>>, vector<1x128x128xbf16>
    %11 = vector.shape_cast %10 : vector<1x128x128xbf16> to vector<128x128xbf16>
    %12 = arith.truncf %8 : vector<128x512xf32> to vector<128x512xbf16>
    %cst_13 = arith.constant dense<0.000000e+00> : vector<128x512xf32>
    %13 = tpu.matmul %11, %12, %cst_13 {dimension_numbers = #tpu.dot_dimension_numbers<[1], [0], [0], [1], [0, 0, 1, 1], [], []>} : vector<128x128xbf16>, vector<128x512xbf16>, vector<128x512xf32> -> vector<128x512xf32>
    %c0_14 = arith.constant 0 : index
    %c0_15 = arith.constant 0 : index
    %14 = vector.load %arg7[%c0_14, %c0_15] : memref<128x128xbf16, #tpu.memory_space<vmem>>, vector<128x128xbf16>
    %c0_16 = arith.constant 0 : index
    %c0_17 = arith.constant 0 : index
    %15 = vector.load %arg2[%c0_16, %c0_17] : memref<128x128xbf16, #tpu.memory_space<vmem>>, vector<128x128xbf16>
    %cst_18 = arith.constant dense<0.000000e+00> : vector<128x128xf32>
    %16 = tpu.matmul %14, %15, %cst_18 {dimension_numbers = #tpu.dot_dimension_numbers<[1], [0], [0], [1], [0, 0, 1, 1], [], []>} : vector<128x128xbf16>, vector<128x128xbf16>, vector<128x128xf32> -> vector<128x128xf32>
    %c0_19 = arith.constant 0 : index
    %c0_20 = arith.constant 0 : index
    %17 = vector.load %arg8[%c0_19, %c0_20] : memref<128x1xf32, #tpu.memory_space<vmem>>, vector<128x1xf32>
    %18 = vector.broadcast %17 : vector<128x1xf32> to vector<128x128xf32>
    %19 = arith.addf %16, %18 : vector<128x128xf32>
    %20 = arith.truncf %19 : vector<128x128xf32> to vector<128x128xbf16>
    %c0_21 = arith.constant 0 : index
    %c0_22 = arith.constant 0 : index
    %21 = vector.load %arg14[%c0_21, %c0_22] : memref<128x512xbf16, #tpu.memory_space<vmem>>, vector<128x512xbf16>
    %cst_23 = arith.constant dense<0.000000e+00> : vector<128x512xf32>
    %22 = tpu.matmul %20, %21, %cst_23 {dimension_numbers = #tpu.dot_dimension_numbers<[1], [0], [0], [1], [0, 0, 1, 1], [], []>} : vector<128x128xbf16>, vector<128x512xbf16>, vector<128x512xf32> -> vector<128x512xf32>
    %c128 = arith.constant 128 : index
    %c0_24 = arith.constant 0 : index
    %23 = vector.load %arg20[%c128, %c0_24] : memref<512x512xf32, #tpu.memory_space<vmem>>, vector<128x512xf32>
    tpu.vector_store %arg20[%c128, %c0_24], %22 {strides = array<i32>} : memref<512x512xf32, #tpu.memory_space<vmem>>, vector<128x512xf32>,
    %c1 = arith.constant 1 : index
    %c0_25 = arith.constant 0 : index
    %c0_26 = arith.constant 0 : index
    %24 = vector.load %arg16[%c1, %c0_25, %c0_26] : memref<4x128x128xbf16, #tpu.memory_space<vmem>>, vector<1x128x128xbf16>
    %25 = vector.shape_cast %24 : vector<1x128x128xbf16> to vector<128x128xbf16>
    %26 = arith.truncf %22 : vector<128x512xf32> to vector<128x512xbf16>
    %cst_27 = arith.constant dense<0.000000e+00> : vector<128x512xf32>
    %27 = tpu.matmul %25, %26, %cst_27 {dimension_numbers = #tpu.dot_dimension_numbers<[1], [0], [0], [1], [0, 0, 1, 1], [], []>} : vector<128x128xbf16>, vector<128x512xbf16>, vector<128x512xf32> -> vector<128x512xf32>
    %28 = arith.addf %13, %27 : vector<128x512xf32>
    %c0_28 = arith.constant 0 : index
    %c0_29 = arith.constant 0 : index
    %29 = vector.load %arg9[%c0_28, %c0_29] : memref<128x64xbf16, #tpu.memory_space<vmem>>, vector<128x64xbf16>
    %c0_30 = arith.constant 0 : index
    %c0_31 = arith.constant 0 : index
    %30 = vector.load %arg3[%c0_30, %c0_31] : memref<64x128xbf16, #tpu.memory_space<vmem>>, vector<64x128xbf16>
    %cst_32 = arith.constant dense<0.000000e+00> : vector<128x128xf32>
    %31 = tpu.matmul %29, %30, %cst_32 {dimension_numbers = #tpu.dot_dimension_numbers<[1], [0], [0], [1], [0, 0, 1, 1], [], []>} : vector<128x64xbf16>, vector<64x128xbf16>, vector<128x128xf32> -> vector<128x128xf32>
    %c0_33 = arith.constant 0 : index
    %c0_34 = arith.constant 0 : index
    %32 = vector.load %arg10[%c0_33, %c0_34] : memref<128x1xf32, #tpu.memory_space<vmem>>, vector<128x1xf32>
    %33 = vector.broadcast %32 : vector<128x1xf32> to vector<128x128xf32>
    %34 = arith.addf %31, %33 : vector<128x128xf32>
    %35 = arith.truncf %34 : vector<128x128xf32> to vector<128x128xbf16>
    %c0_35 = arith.constant 0 : index
    %c0_36 = arith.constant 0 : index
    %36 = vector.load %arg15[%c0_35, %c0_36] : memref<128x512xbf16, #tpu.memory_space<vmem>>, vector<128x512xbf16>
    %cst_37 = arith.constant dense<0.000000e+00> : vector<128x512xf32>
    %37 = tpu.matmul %35, %36, %cst_37 {dimension_numbers = #tpu.dot_dimension_numbers<[1], [0], [0], [1], [0, 0, 1, 1], [], []>} : vector<128x128xbf16>, vector<128x512xbf16>, vector<128x512xf32> -> vector<128x512xf32>
    %c256 = arith.constant 256 : index
    %c0_38 = arith.constant 0 : index
    %38 = vector.load %arg20[%c256, %c0_38] : memref<512x512xf32, #tpu.memory_space<vmem>>, vector<128x512xf32>
    tpu.vector_store %arg20[%c256, %c0_38], %37 {strides = array<i32>} : memref<512x512xf32, #tpu.memory_space<vmem>>, vector<128x512xf32>,
    %c2 = arith.constant 2 : index
    %c0_39 = arith.constant 0 : index
    %c0_40 = arith.constant 0 : index
    %39 = vector.load %arg16[%c2, %c0_39, %c0_40] : memref<4x128x128xbf16, #tpu.memory_space<vmem>>, vector<1x128x128xbf16>
    %40 = vector.shape_cast %39 : vector<1x128x128xbf16> to vector<128x128xbf16>
    %41 = arith.truncf %37 : vector<128x512xf32> to vector<128x512xbf16>
    %cst_41 = arith.constant dense<0.000000e+00> : vector<128x512xf32>
    %42 = tpu.matmul %40, %41, %cst_41 {dimension_numbers = #tpu.dot_dimension_numbers<[1], [0], [0], [1], [0, 0, 1, 1], [], []>} : vector<128x128xbf16>, vector<128x512xbf16>, vector<128x512xf32> -> vector<128x512xf32>
    %43 = arith.addf %28, %42 : vector<128x512xf32>
    %c0_42 = arith.constant 0 : index
    %c0_43 = arith.constant 0 : index
    %44 = vector.load %arg11[%c0_42, %c0_43] : memref<128x32xbf16, #tpu.memory_space<vmem>>, vector<128x32xbf16>
    %c0_44 = arith.constant 0 : index
    %c0_45 = arith.constant 0 : index
    %45 = vector.load %arg4[%c0_44, %c0_45] : memref<32x512xbf16, #tpu.memory_space<vmem>>, vector<32x512xbf16>
    %cst_46 = arith.constant dense<0.000000e+00> : vector<128x512xf32>
    %46 = tpu.matmul %44, %45, %cst_46 {dimension_numbers = #tpu.dot_dimension_numbers<[1], [0], [0], [1], [0, 0, 1, 1], [], []>} : vector<128x32xbf16>, vector<32x512xbf16>, vector<128x512xf32> -> vector<128x512xf32>
    %c0_47 = arith.constant 0 : index
    %c0_48 = arith.constant 0 : index
    %47 = vector.load %arg12[%c0_47, %c0_48] : memref<128x1xf32, #tpu.memory_space<vmem>>, vector<128x1xf32>
    %48 = vector.broadcast %47 : vector<128x1xf32> to vector<128x512xf32>
    %49 = arith.addf %46, %48 : vector<128x512xf32>
    %c384 = arith.constant 384 : index
    %c0_49 = arith.constant 0 : index
    %50 = vector.load %arg20[%c384, %c0_49] : memref<512x512xf32, #tpu.memory_space<vmem>>, vector<128x512xf32>
    tpu.vector_store %arg20[%c384, %c0_49], %49 {strides = array<i32>} : memref<512x512xf32, #tpu.memory_space<vmem>>, vector<128x512xf32>,
    %c3 = arith.constant 3 : index
    %c0_50 = arith.constant 0 : index
    %c0_51 = arith.constant 0 : index
    %51 = vector.load %arg16[%c3, %c0_50, %c0_51] : memref<4x128x128xbf16, #tpu.memory_space<vmem>>, vector<1x128x128xbf16>
    %52 = vector.shape_cast %51 : vector<1x128x128xbf16> to vector<128x128xbf16>
    %53 = arith.truncf %49 : vector<128x512xf32> to vector<128x512xbf16>
    %cst_52 = arith.constant dense<0.000000e+00> : vector<128x512xf32>
    %54 = tpu.matmul %52, %53, %cst_52 {dimension_numbers = #tpu.dot_dimension_numbers<[1], [0], [0], [1], [0, 0, 1, 1], [], []>} : vector<128x128xbf16>, vector<128x512xbf16>, vector<128x512xf32> -> vector<128x512xf32>
    %55 = arith.addf %43, %54 : vector<128x512xf32>
    %c0_53 = arith.constant 0 : index
    %c0_54 = arith.constant 0 : index
    %56 = vector.load %arg17[%c0_53, %c0_54] : memref<128x1xf32, #tpu.memory_space<vmem>>, vector<128x1xf32>
    %57 = vector.broadcast %56 : vector<128x1xf32> to vector<128x512xf32>
    %58 = arith.addf %55, %57 : vector<128x512xf32>
    %cst_55 = arith.constant 0.000000e+00 : f32
    %59 = vector.broadcast %cst_55 : f32 to vector<128x512xf32>
    %60 = arith.maximumf %58, %59 : vector<128x512xf32>
    %c0_56 = arith.constant 0 : index
    %c0_57 = arith.constant 0 : index
    %61 = vector.load %arg18[%c0_56, %c0_57] : memref<1x128xbf16, #tpu.memory_space<vmem>>, vector<1x128xbf16>
    %62 = arith.truncf %60 : vector<128x512xf32> to vector<128x512xbf16>
    %cst_58 = arith.constant dense<0.000000e+00> : vector<1x512xf32>
    %63 = tpu.matmul %61, %62, %cst_58 {dimension_numbers = #tpu.dot_dimension_numbers<[1], [0], [0], [1], [0, 0, 1, 1], [], []>} : vector<1x128xbf16>, vector<128x512xbf16>, vector<1x512xf32> -> vector<1x512xf32>
    %c0_59 = arith.constant 0 : index
    %c0_60 = arith.constant 0 : index
    %64 = vector.load %arg19[%c0_59, %c0_60] : memref<1x1xf32, #tpu.memory_space<vmem>>, vector<1x1xf32>
    %65 = vector.broadcast %64 : vector<1x1xf32> to vector<1x512xf32>
    %66 = arith.addf %63, %65 : vector<1x512xf32>
    %67 = arith.truncf %66 : vector<1x512xf32> to vector<1x512xbf16>
    %c0_61 = arith.constant 0 : index
    %c0_62 = arith.constant 0 : index
    %68 = vector.load %arg21[%c0_61, %c0_62] : memref<1x512xbf16, #tpu.memory_space<vmem>>, vector<1x512xbf16>
    tpu.vector_store %arg21[%c0_61, %c0_62], %67 {strides = array<i32>} : memref<1x512xbf16, #tpu.memory_space<vmem>>, vector<1x512xbf16>,
    return
  }
  func.func @transform_0(%arg0: i32) -> (i32, i32) {
    %c0_i32 = arith.constant 0 : i32
    %c0_i32_0 = arith.constant 0 : i32
    return %c0_i32, %arg0 : i32, i32
  }
  func.func @transform_1(%arg0: i32) -> (i32, i32) {
    %c0_i32 = arith.constant 0 : i32
    %c0_i32_0 = arith.constant 0 : i32
    return %c0_i32, %arg0 : i32, i32
  }
  func.func @transform_2(%arg0: i32) -> (i32, i32) {
    %c0_i32 = arith.constant 0 : i32
    %c0_i32_0 = arith.constant 0 : i32
    return %c0_i32, %arg0 : i32, i32
  }
  func.func @transform_3(%arg0: i32) -> (i32, i32) {
    %c0_i32 = arith.constant 0 : i32
    %c0_i32_0 = arith.constant 0 : i32
    return %c0_i32, %arg0 : i32, i32
  }
  func.func @transform_4(%arg0: i32) -> (i32, i32) {
    %c0_i32 = arith.constant 0 : i32
    %c0_i32_0 = arith.constant 0 : i32
    %c0_i32_1 = arith.constant 0 : i32
    return %c0_i32, %c0_i32_0 : i32, i32
  }
  func.func @transform_5(%arg0: i32) -> (i32, i32) {
    %c0_i32 = arith.constant 0 : i32
    %c0_i32_0 = arith.constant 0 : i32
    %c0_i32_1 = arith.constant 0 : i32
    return %c0_i32, %c0_i32_0 : i32, i32
  }
  func.func @transform_6(%arg0: i32) -> (i32, i32) {
    %c0_i32 = arith.constant 0 : i32
    %c0_i32_0 = arith.constant 0 : i32
    %c0_i32_1 = arith.constant 0 : i32
    return %c0_i32, %c0_i32_0 : i32, i32
  }
  func.func @transform_7(%arg0: i32) -> (i32, i32) {
    %c0_i32 = arith.constant 0 : i32
    %c0_i32_0 = arith.constant 0 : i32
    %c0_i32_1 = arith.constant 0 : i32
    return %c0_i32, %c0_i32_0 : i32, i32
  }
  func.func @transform_8(%arg0: i32) -> (i32, i32) {
    %c0_i32 = arith.constant 0 : i32
    %c0_i32_0 = arith.constant 0 : i32
    %c0_i32_1 = arith.constant 0 : i32
    return %c0_i32, %c0_i32_0 : i32, i32
  }
  func.func @transform_9(%arg0: i32) -> (i32, i32) {
    %c0_i32 = arith.constant 0 : i32
    %c0_i32_0 = arith.constant 0 : i32
    %c0_i32_1 = arith.constant 0 : i32
    return %c0_i32, %c0_i32_0 : i32, i32
  }
  func.func @transform_10(%arg0: i32) -> (i32, i32) {
    %c0_i32 = arith.constant 0 : i32
    %c0_i32_0 = arith.constant 0 : i32
    %c0_i32_1 = arith.constant 0 : i32
    return %c0_i32, %c0_i32_0 : i32, i32
  }
  func.func @transform_11(%arg0: i32) -> (i32, i32) {
    %c0_i32 = arith.constant 0 : i32
    %c0_i32_0 = arith.constant 0 : i32
    %c0_i32_1 = arith.constant 0 : i32
    return %c0_i32, %c0_i32_0 : i32, i32
  }
  func.func @transform_12(%arg0: i32) -> (i32, i32) {
    %c0_i32 = arith.constant 0 : i32
    %c0_i32_0 = arith.constant 0 : i32
    %c0_i32_1 = arith.constant 0 : i32
    return %c0_i32, %c0_i32_0 : i32, i32
  }
  func.func @transform_13(%arg0: i32) -> (i32, i32) {
    %c0_i32 = arith.constant 0 : i32
    %c0_i32_0 = arith.constant 0 : i32
    %c0_i32_1 = arith.constant 0 : i32
    return %c0_i32, %c0_i32_0 : i32, i32
  }
  func.func @transform_14(%arg0: i32) -> (i32, i32) {
    %c0_i32 = arith.constant 0 : i32
    %c0_i32_0 = arith.constant 0 : i32
    %c0_i32_1 = arith.constant 0 : i32
    return %c0_i32, %c0_i32_0 : i32, i32
  }
  func.func @transform_15(%arg0: i32) -> (i32, i32, i32) {
    %c0_i32 = arith.constant 0 : i32
    %c0_i32_0 = arith.constant 0 : i32
    %c0_i32_1 = arith.constant 0 : i32
    %c0_i32_2 = arith.constant 0 : i32
    return %c0_i32, %c0_i32_0, %c0_i32_1 : i32, i32, i32
  }
  func.func @transform_16(%arg0: i32) -> (i32, i32) {
    %c0_i32 = arith.constant 0 : i32
    %c0_i32_0 = arith.constant 0 : i32
    %c0_i32_1 = arith.constant 0 : i32
    return %c0_i32, %c0_i32_0 : i32, i32
  }
  func.func @transform_17(%arg0: i32) -> (i32, i32) {
    %c0_i32 = arith.constant 0 : i32
    %c0_i32_0 = arith.constant 0 : i32
    %c0_i32_1 = arith.constant 0 : i32
    return %c0_i32, %c0_i32_0 : i32, i32
  }
  func.func @transform_18(%arg0: i32) -> (i32, i32) {
    %c0_i32 = arith.constant 0 : i32
    %c0_i32_0 = arith.constant 0 : i32
    %c0_i32_1 = arith.constant 0 : i32
    return %c0_i32, %c0_i32_0 : i32, i32
  }
  func.func @transform_19(%arg0: i32) -> (i32, i32) {
    %c0_i32 = arith.constant 0 : i32
    %c0_i32_0 = arith.constant 0 : i32
    return %c0_i32, %arg0 : i32, i32
  }
  func.func @transform_20(%arg0: i32) -> (i32, i32) {
    %c0_i32 = arith.constant 0 : i32
    %c0_i32_0 = arith.constant 0 : i32
    return %c0_i32, %arg0 : i32, i32
  }
}

module attributes {stable_mosaic.version = 11 : i64} {
  func.func @_resize_sigmoid_kernel(%arg0: i32, %arg1: i32, %arg2: i32, %arg3: memref<1x1x16x16xbf16, #tpu.memory_space<vmem>>, %arg4: memref<128x16xbf16, #tpu.memory_space<vmem>>, %arg5: memref<16x512xbf16, #tpu.memory_space<vmem>>, %arg6: memref<1x1x128x512xf32, #tpu.memory_space<vmem>>) attributes {dimension_semantics = [#tpu.dimension_semantics<parallel>, #tpu.dimension_semantics<parallel>, #tpu.dimension_semantics<parallel>], iteration_bounds = array<i64: 4, 1, 4>, scalar_prefetch = 0 : i64, scratch_operands = 0 : i64, tpu.core_type = #tpu.core_type<tc>, window_params = [{transform_indices = @transform_0, window_bounds = array<i64: 1, 1, 16, 16>}, {transform_indices = @transform_1, window_bounds = array<i64: 128, 16>}, {pipeline_mode = #tpu.pipeline_mode<synchronous>, transform_indices = @transform_2, window_bounds = array<i64: 16, 512>}, {transform_indices = @transform_3, window_bounds = array<i64: 1, 1, 128, 512>}]} {
    %c0 = arith.constant 0 : index
    %c0_0 = arith.constant 0 : index
    %c0_1 = arith.constant 0 : index
    %c0_2 = arith.constant 0 : index
    %0 = vector.load %arg3[%c0, %c0_0, %c0_1, %c0_2] : memref<1x1x16x16xbf16, #tpu.memory_space<vmem>>, vector<1x1x16x16xbf16>
    %1 = vector.shape_cast %0 : vector<1x1x16x16xbf16> to vector<16x16xbf16>
    %c0_3 = arith.constant 0 : index
    %c0_4 = arith.constant 0 : index
    %2 = vector.load %arg5[%c0_3, %c0_4] : memref<16x512xbf16, #tpu.memory_space<vmem>>, vector<16x512xbf16>
    %cst = arith.constant dense<0.000000e+00> : vector<16x512xf32>
    %3 = tpu.matmul %1, %2, %cst {dimension_numbers = #tpu.dot_dimension_numbers<[1], [0], [0], [1], [0, 0, 1, 1], [], []>} : vector<16x16xbf16>, vector<16x512xbf16>, vector<16x512xf32> -> vector<16x512xf32>
    %c0_5 = arith.constant 0 : index
    %c0_6 = arith.constant 0 : index
    %4 = vector.load %arg4[%c0_5, %c0_6] : memref<128x16xbf16, #tpu.memory_space<vmem>>, vector<128x16xbf16>
    %5 = arith.truncf %3 : vector<16x512xf32> to vector<16x512xbf16>
    %cst_7 = arith.constant dense<0.000000e+00> : vector<128x512xf32>
    %6 = tpu.matmul %4, %5, %cst_7 {dimension_numbers = #tpu.dot_dimension_numbers<[1], [0], [0], [1], [0, 0, 1, 1], [], []>} : vector<128x16xbf16>, vector<16x512xbf16>, vector<128x512xf32> -> vector<128x512xf32>
    %cst_8 = arith.constant 0.000000e+00 : f32
    %7 = vector.broadcast %cst_8 : f32 to vector<128x512xf32>
    %8 = arith.subf %7, %6 : vector<128x512xf32>
    %9 = math.exp %8 : vector<128x512xf32>
    %cst_9 = arith.constant 1.000000e+00 : f32
    %10 = vector.broadcast %cst_9 : f32 to vector<128x512xf32>
    %11 = arith.addf %10, %9 : vector<128x512xf32>
    %12 = tpu.reciprocal %11 {approx = true} : vector<128x512xf32> -> vector<128x512xf32>
    %c0_10 = arith.constant 0 : index
    %c0_11 = arith.constant 0 : index
    %c0_12 = arith.constant 0 : index
    %c0_13 = arith.constant 0 : index
    %13 = vector.load %arg6[%c0_10, %c0_11, %c0_12, %c0_13] : memref<1x1x128x512xf32, #tpu.memory_space<vmem>>, vector<1x1x128x512xf32>
    %14 = vector.shape_cast %13 : vector<1x1x128x512xf32> to vector<128x512xf32>
    %15 = vector.shape_cast %12 : vector<128x512xf32> to vector<1x1x128x512xf32>
    tpu.vector_store %arg6[%c0_10, %c0_11, %c0_12, %c0_13], %15 {strides = array<i32>} : memref<1x1x128x512xf32, #tpu.memory_space<vmem>>, vector<1x1x128x512xf32>,
    return
  }
  func.func @transform_0(%arg0: i32, %arg1: i32, %arg2: i32) -> (i32, i32, i32, i32) {
    %c0_i32 = arith.constant 0 : i32
    %c0_i32_0 = arith.constant 0 : i32
    %c0_i32_1 = arith.constant 0 : i32
    return %arg0, %arg1, %c0_i32, %c0_i32_0 : i32, i32, i32, i32
  }
  func.func @transform_1(%arg0: i32, %arg1: i32, %arg2: i32) -> (i32, i32) {
    %c0_i32 = arith.constant 0 : i32
    %c0_i32_0 = arith.constant 0 : i32
    return %arg2, %c0_i32 : i32, i32
  }
  func.func @transform_2(%arg0: i32, %arg1: i32, %arg2: i32) -> (i32, i32) {
    %c0_i32 = arith.constant 0 : i32
    %c0_i32_0 = arith.constant 0 : i32
    %c0_i32_1 = arith.constant 0 : i32
    return %c0_i32, %c0_i32_0 : i32, i32
  }
  func.func @transform_3(%arg0: i32, %arg1: i32, %arg2: i32) -> (i32, i32, i32, i32) {
    %c0_i32 = arith.constant 0 : i32
    %c0_i32_0 = arith.constant 0 : i32
    return %arg0, %arg1, %arg2, %c0_i32 : i32, i32, i32, i32
  }
}

</mosaic_0001>

<bundles_post_ra>
// kernel: decoder_forward.2
= control target key start
LH: loop header
LB: loop body
LE: loop exit
PB: predicated region body
PF: predicated region fallthrough
CT: control target
= control target key end

     0   :  { %s9943_s0 = inlined_call_operand.vmem [shape: bf16[256,256], index: 0, kind: input, shape index: {}]   ;;  %s9944_s1 = inlined_call_operand.vmem [shape: bf16[128,256], index: 1, kind: input, shape index: {}]   ;;  %s9945_s2 = inlined_call_operand.vmem [shape: bf16[64,256], index: 2, kind: input, shape index: {}]   ;;  %s9946_s3 = inlined_call_operand.vmem [shape: bf16[32,1024], index: 3, kind: input, shape index: {}]   ;;  %s9947_s4 = inlined_call_operand.vmem [shape: bf16[128,256], index: 4, kind: input, shape index: {}]   ;;  %s9948_s5 = inlined_call_operand.vmem [shape: f32[128,1], index: 5, kind: input, shape index: {}]   ;;  %s9949_s6 = inlined_call_operand.vmem [shape: bf16[128,128], index: 6, kind: input, shape index: {}]   ;;  %s9950_s7 = inlined_call_operand.vmem [shape: f32[128,1], index: 7, kind: input, shape index: {}]   ;;  %s9951_s8 = inlined_call_operand.vmem [shape: bf16[128,64], index: 8, kind: input, shape index: {}]   ;;  %s9952_s9 = inlined_call_operand.vmem [shape: f32[128,1], index: 9, kind: input, shape index: {}]   ;;  %s9953_s10 = inlined_call_operand.vmem [shape: bf16[128,32], index: 10, kind: input, shape index: {}]   ;;  %s9954_s11 = inlined_call_operand.vmem [shape: f32[128,1], index: 11, kind: input, shape index: {}]   ;;  %s9955_s12 = inlined_call_operand.vmem [shape: bf16[128,512], index: 12, kind: input, shape index: {}]   ;;  %s9956_s13 = inlined_call_operand.vmem [shape: bf16[128,512], index: 13, kind: input, shape index: {}]   ;;  %s9957_s14 = inlined_call_operand.vmem [shape: bf16[128,512], index: 14, kind: input, shape index: {}]   ;;  %s9958_s15 = inlined_call_operand.vmem [shape: bf16[4,128,128], index: 15, kind: input, shape index: {}]   ;;  %s9959_s16 = inlined_call_operand.vmem [shape: f32[128,1], index: 16, kind: input, shape index: {}]   ;;  %s9960_s17 = inlined_call_operand.vmem [shape: bf16[1,128], index: 17, kind: input, shape index: {}]   ;;  %s9961_s18 = inlined_call_operand.<no memory space> [shape: f32[1,1], index: 18, kind: input, shape index: {}]   ;;  %s9962_s19 = inlined_call_operand.vmem [shape: f32[512,1024], index: 19, kind: output, shape index: {0}]   ;;  %s9963_s20 = inlined_call_operand.vmem [shape: bf16[1,1024], index: 20, kind: output, shape index: {1}]  }
   0x1   :  { %9994 = sst [smem:[#allocation35_spill]] %s9943_s0  ;;  %v26_v0 = vstv %s9961_s18 }
   0x2   :  { %9995 = sst [smem:[#allocation36_spill]] %s9944_s1  ;;  %27 = vst [vmem:[#allocation2] sm:$0x1] %v26_v0 }
   0x3   :  { %9996 = sst [smem:[#allocation37_spill]] %s9945_s2 }
   0x4   :  { %9997 = sst [smem:[#allocation38_spill]] %s9946_s3 }
   0x5   :  { %9998 = sst [smem:[#allocation39_spill]] %s9947_s4 }
   0x6   :  { %9999 = sst [smem:[#allocation40_spill]] %s9948_s5 }
   0x7   :  { %s7664_s23 = smov 0   ;;  %s7666_s24 = smov 0  }
   0x8   :  { %s7668_s2 = smov 0  }
   0x9 LB: > { %s7680_s18 = sadd.s32 4294967295, %s7552_s2   ;;  %s7683_s25 = sadd.s32 1, %s7552_s2   ;;  %s7552_s2 = sphi %s7668_s2, %s10099_s2   ;;  %s7548_s24 = sphi %s7666_s24, %s10102_s24   ;;  %s7544_s23 = sphi %s7664_s23, %s10101_s23  }
   0xa   : > { %10000 = sst [smem:[#allocation8_spill]] %s7683_s25  ;;  %s37_s3 = ssub.s32 %s7552_s2, %s7683_s25 }
   0xb   : > { %s40_s26 = sadd.s32 1, %s7548_s24  ;;  %p38_p0 = scmp.eq.s32.totalorder %s37_s3, 0 }
   0xc   : > { %p47_p1 = scmp.ne.s32.totalorder %s7548_s24, %s7544_s23  ;;  %p48_p2 = scmp.eq.s32.totalorder %s7552_s2, 0 }
   0xd   : > { %p470_p3 = scmp.eq.s32.totalorder %s7680_s18, 1  ;;  %p6596_p6 = scmp.ge.s32.totalorder %s7552_s2, 2 }
   0xe   : > { %s7693_s27 = scalar_select %p38_p0, %s7548_s24, %s40_s26  }
   0xf   : > { %p7695_p4 = por %p48_p2, %p47_p1  ;;  %p7699_p5 = por %p470_p3, %p47_p1 }
  0x10   : > { %10001 = sst [smem:[#allocation9_spill]] %s7693_s27  ;;  %563 = sbr.rel (%p6596_p6) target bundleno = 103 (0x67), region = 76 }
  0x17   : > { %566 = sbr.rel (!%p7695_p4) target bundleno = 54 (0x36), region = 80  ;;  %s568_s29 = sand.u32 (%p7695_p4), 1, %s7548_s24  }
  0x18   : > { %s6598_s30 = sshll.u32 (%p7695_p4), %s7552_s2, 2  ;;  %s6597_s0 = sshll.u32 (%p7695_p4), %s568_s29, 7 }
  0x19   : > { %s10004_s22 = sld [smem:[#allocation35_spill]] (%p7695_p4)  ;;  %s7715_s26 = scalar_lea.vmem (%p7695_p4), [#allocation3], %s6597_s0 }
  0x1f   : > { %s7711_s3 = scalar_lea.vmem %s10004_s22, %s6598_s30 }
  0x20   : > { %v588_v1 = vld [vmem:[%s7711_s3] sm:$0xf]  ;;  %v590_v2 = vld [vmem:[%s7711_s3 + $0x8] sm:$0xf]  ;;  %v592_v3 = vld [vmem:[%s7711_s3 + $0x10] sm:$0xf] }
  0x21   : > { %589 = vst [vmem:[%s7715_s26] sm:$0xf] %v588_v1  ;;  %591 = vst [vmem:[%s7715_s26 + $0x4] sm:$0xf] %v590_v2  ;;  %v594_v4 = vld [vmem:[%s7711_s3 + $0x18] sm:$0xf] }
  0x22   : > { %v596_v5 = vld [vmem:[%s7711_s3 + $0x20] sm:$0xf]  ;;  %593 = vst [vmem:[%s7715_s26 + $0x8] sm:$0xf] %v592_v3  ;;  %595 = vst [vmem:[%s7715_s26 + $0xc] sm:$0xf] %v594_v4 }
  0x23   : > { %597 = vst [vmem:[%s7715_s26 + $0x10] sm:$0xf] %v596_v5  ;;  %v598_v6 = vld [vmem:[%s7711_s3 + $0x28] sm:$0xf]  ;;  %v600_v7 = vld [vmem:[%s7711_s3 + $0x30] sm:$0xf] }
  0x24   : > { %v602_v8 = vld [vmem:[%s7711_s3 + $0x38] sm:$0xf]  ;;  %599 = vst [vmem:[%s7715_s26 + $0x14] sm:$0xf] %v598_v6  ;;  %601 = vst [vmem:[%s7715_s26 + $0x18] sm:$0xf] %v600_v7 }
  0x25   : > { %603 = vst [vmem:[%s7715_s26 + $0x1c] sm:$0xf] %v602_v8  ;;  %v604_v9 = vld [vmem:[%s7711_s3 + $0x40] sm:$0xf]  ;;  %v606_v10 = vld [vmem:[%s7711_s3 + $0x48] sm:$0xf] }
  0x26   : > { %v608_v11 = vld [vmem:[%s7711_s3 + $0x50] sm:$0xf]  ;;  %605 = vst [vmem:[%s7715_s26 + $0x20] sm:$0xf] %v604_v9  ;;  %607 = vst [vmem:[%s7715_s26 + $0x24] sm:$0xf] %v606_v10 }
  0x27   : > { %609 = vst [vmem:[%s7715_s26 + $0x28] sm:$0xf] %v608_v11  ;;  %v610_v12 = vld [vmem:[%s7711_s3 + $0x58] sm:$0xf]  ;;  %v612_v13 = vld [vmem:[%s7711_s3 + $0x60] sm:$0xf] }
  0x28   : > { %v614_v14 = vld [vmem:[%s7711_s3 + $0x68] sm:$0xf]  ;;  %611 = vst [vmem:[%s7715_s26 + $0x2c] sm:$0xf] %v610_v12  ;;  %613 = vst [vmem:[%s7715_s26 + $0x30] sm:$0xf] %v612_v13 }
  0x29   : > { %615 = vst [vmem:[%s7715_s26 + $0x34] sm:$0xf] %v614_v14  ;;  %v616_v15 = vld [vmem:[%s7711_s3 + $0x70] sm:$0xf]  ;;  %v618_v16 = vld [vmem:[%s7711_s3 + $0x78] sm:$0xf] }
  0x2a   : > { %v620_v17 = vld [vmem:[%s7711_s3 + $0x80] sm:$0xf]  ;;  %617 = vst [vmem:[%s7715_s26 + $0x38] sm:$0xf] %v616_v15  ;;  %619 = vst [vmem:[%s7715_s26 + $0x3c] sm:$0xf] %v618_v16 }
  0x2b   : > { %621 = vst [vmem:[%s7715_s26 + $0x40] sm:$0xf] %v620_v17  ;;  %v622_v18 = vld [vmem:[%s7711_s3 + $0x88] sm:$0xf]  ;;  %v624_v19 = vld [vmem:[%s7711_s3 + $0x90] sm:$0xf] }
  0x2c   : > { %v626_v20 = vld [vmem:[%s7711_s3 + $0x98] sm:$0xf]  ;;  %623 = vst [vmem:[%s7715_s26 + $0x44] sm:$0xf] %v622_v18  ;;  %625 = vst [vmem:[%s7715_s26 + $0x48] sm:$0xf] %v624_v19 }
  0x2d   : > { %627 = vst [vmem:[%s7715_s26 + $0x4c] sm:$0xf] %v626_v20  ;;  %v628_v21 = vld [vmem:[%s7711_s3 + $0xa0] sm:$0xf]  ;;  %v630_v22 = vld [vmem:[%s7711_s3 + $0xa8] sm:$0xf] }
  0x2e   : > { %v632_v23 = vld [vmem:[%s7711_s3 + $0xb0] sm:$0xf]  ;;  %629 = vst [vmem:[%s7715_s26 + $0x50] sm:$0xf] %v628_v21  ;;  %631 = vst [vmem:[%s7715_s26 + $0x54] sm:$0xf] %v630_v22 }
  0x2f   : > { %633 = vst [vmem:[%s7715_s26 + $0x58] sm:$0xf] %v632_v23  ;;  %v634_v24 = vld [vmem:[%s7711_s3 + $0xb8] sm:$0xf]  ;;  %v636_v25 = vld [vmem:[%s7711_s3 + $0xc0] sm:$0xf] }
  0x30   : > { %v638_v26 = vld [vmem:[%s7711_s3 + $0xc8] sm:$0xf]  ;;  %635 = vst [vmem:[%s7715_s26 + $0x5c] sm:$0xf] %v634_v24  ;;  %637 = vst [vmem:[%s7715_s26 + $0x60] sm:$0xf] %v636_v25 }
  0x31   : > { %639 = vst [vmem:[%s7715_s26 + $0x64] sm:$0xf] %v638_v26  ;;  %v640_v27 = vld [vmem:[%s7711_s3 + $0xd0] sm:$0xf]  ;;  %v642_v28 = vld [vmem:[%s7711_s3 + $0xd8] sm:$0xf] }
  0x32   : > { %v644_v29 = vld [vmem:[%s7711_s3 + $0xe0] sm:$0xf]  ;;  %641 = vst [vmem:[%s7715_s26 + $0x68] sm:$0xf] %v640_v27  ;;  %643 = vst [vmem:[%s7715_s26 + $0x6c] sm:$0xf] %v642_v28 }
  0x33   : > { %645 = vst [vmem:[%s7715_s26 + $0x70] sm:$0xf] %v644_v29  ;;  %v646_v30 = vld [vmem:[%s7711_s3 + $0xe8] sm:$0xf]  ;;  %v648_v31 = vld [vmem:[%s7711_s3 + $0xf0] sm:$0xf] }
  0x34   : > { %v650_v32 = vld [vmem:[%s7711_s3 + $0xf8] sm:$0xf]  ;;  %647 = vst [vmem:[%s7715_s26 + $0x74] sm:$0xf] %v646_v30  ;;  %649 = vst [vmem:[%s7715_s26 + $0x78] sm:$0xf] %v648_v31 }
  0x35   : > { %651 = vst [vmem:[%s7715_s26 + $0x7c] sm:$0xf] %v650_v32 }
  0x36 PF: > { %738 = sbr.rel (!%p7695_p4) target bundleno = 74 (0x4a), region = 121  ;;  %s740_s29 = sand.u32 (%p7695_p4), 1, %s7548_s24  }
  0x37   : > { %s6600_s30 = sshll.u32 (%p7695_p4), %s7552_s2, 2  ;;  %s6599_s0 = sshll.u32 (%p7695_p4), %s740_s29, 6 }
  0x38   : > { %s10005_s22 = sld [smem:[#allocation36_spill]] (%p7695_p4)  ;;  %s742_s3 = scalar_lea.vmem (%p7695_p4), [#allocation4], %s6599_s0 }
  0x3e   : > { %s7786_s27 = scalar_lea.vmem %s10005_s22, %s6600_s30 }
  0x3f   : > { %v760_v33 = vld [vmem:[%s7786_s27] sm:$0xf]  ;;  %v762_v34 = vld [vmem:[%s7786_s27 + $0x8] sm:$0xf]  ;;  %v764_v35 = vld [vmem:[%s7786_s27 + $0x10] sm:$0xf] }
  0x40   : > { %761 = vst [vmem:[%s742_s3] sm:$0xf] %v760_v33  ;;  %763 = vst [vmem:[%s742_s3 + $0x4] sm:$0xf] %v762_v34  ;;  %v766_v36 = vld [vmem:[%s7786_s27 + $0x18] sm:$0xf] }
  0x41   : > { %v768_v37 = vld [vmem:[%s7786_s27 + $0x20] sm:$0xf]  ;;  %765 = vst [vmem:[%s742_s3 + $0x8] sm:$0xf] %v764_v35  ;;  %767 = vst [vmem:[%s742_s3 + $0xc] sm:$0xf] %v766_v36 }
  0x42   : > { %769 = vst [vmem:[%s742_s3 + $0x10] sm:$0xf] %v768_v37  ;;  %v770_v38 = vld [vmem:[%s7786_s27 + $0x28] sm:$0xf]  ;;  %v772_v39 = vld [vmem:[%s7786_s27 + $0x30] sm:$0xf] }
  0x43   : > { %v774_v40 = vld [vmem:[%s7786_s27 + $0x38] sm:$0xf]  ;;  %771 = vst [vmem:[%s742_s3 + $0x14] sm:$0xf] %v770_v38  ;;  %773 = vst [vmem:[%s742_s3 + $0x18] sm:$0xf] %v772_v39 }
  0x44   : > { %775 = vst [vmem:[%s742_s3 + $0x1c] sm:$0xf] %v774_v40  ;;  %v776_v41 = vld [vmem:[%s7786_s27 + $0x40] sm:$0xf]  ;;  %v778_v42 = vld [vmem:[%s7786_s27 + $0x48] sm:$0xf] }
  0x45   : > { %v780_v43 = vld [vmem:[%s7786_s27 + $0x50] sm:$0xf]  ;;  %777 = vst [vmem:[%s742_s3 + $0x20] sm:$0xf] %v776_v41  ;;  %779 = vst [vmem:[%s742_s3 + $0x24] sm:$0xf] %v778_v42 }
  0x46   : > { %781 = vst [vmem:[%s742_s3 + $0x28] sm:$0xf] %v780_v43  ;;  %v782_v44 = vld [vmem:[%s7786_s27 + $0x58] sm:$0xf]  ;;  %v784_v45 = vld [vmem:[%s7786_s27 + $0x60] sm:$0xf] }
  0x47   : > { %v786_v46 = vld [vmem:[%s7786_s27 + $0x68] sm:$0xf]  ;;  %783 = vst [vmem:[%s742_s3 + $0x2c] sm:$0xf] %v782_v44  ;;  %785 = vst [vmem:[%s742_s3 + $0x30] sm:$0xf] %v784_v45 }
  0x48   : > { %787 = vst [vmem:[%s742_s3 + $0x34] sm:$0xf] %v786_v46  ;;  %v788_v47 = vld [vmem:[%s7786_s27 + $0x70] sm:$0xf]  ;;  %v790_v48 = vld [vmem:[%s7786_s27 + $0x78] sm:$0xf] }
  0x49   : > { %789 = vst [vmem:[%s742_s3 + $0x38] sm:$0xf] %v788_v47  ;;  %791 = vst [vmem:[%s742_s3 + $0x3c] sm:$0xf] %v790_v48 }
  0x4a PF: > { %846 = sbr.rel (!%p7695_p4) target bundleno = 89 (0x59), region = 162  ;;  %s848_s26 = sand.u32 (%p7695_p4), 1, %s7548_s24  }
  0x4b   : > { %s6602_s29 = sshll.u32 (%p7695_p4), %s7552_s2, 2  ;;  %s6601_s30 = sshll.u32 (%p7695_p4), %s848_s26, 5 }
  0x4c   : > { %s10006_s1 = sld [smem:[#allocation37_spill]] (%p7695_p4)  ;;  %s850_s25 = scalar_lea.vmem (%p7695_p4), [#allocation5], %s6601_s30 }
  0x52   : > { %s852_s22 = scalar_lea.vmem %s10006_s1, %s6602_s29 }
  0x53   : > { %v868_v49 = vld [vmem:[%s852_s22] sm:$0xf]  ;;  %v870_v50 = vld [vmem:[%s852_s22 + $0x8] sm:$0xf]  ;;  %v872_v51 = vld [vmem:[%s852_s22 + $0x10] sm:$0xf] }
  0x54   : > { %869 = vst [vmem:[%s850_s25] sm:$0xf] %v868_v49  ;;  %871 = vst [vmem:[%s850_s25 + $0x4] sm:$0xf] %v870_v50  ;;  %v874_v52 = vld [vmem:[%s852_s22 + $0x18] sm:$0xf] }
  0x55   : > { %v876_v53 = vld [vmem:[%s852_s22 + $0x20] sm:$0xf]  ;;  %873 = vst [vmem:[%s850_s25 + $0x8] sm:$0xf] %v872_v51  ;;  %875 = vst [vmem:[%s850_s25 + $0xc] sm:$0xf] %v874_v52 }
  0x56   : > { %877 = vst [vmem:[%s850_s25 + $0x10] sm:$0xf] %v876_v53  ;;  %v878_v54 = vld [vmem:[%s852_s22 + $0x28] sm:$0xf]  ;;  %v880_v55 = vld [vmem:[%s852_s22 + $0x30] sm:$0xf] }
  0x57   : > { %v882_v56 = vld [vmem:[%s852_s22 + $0x38] sm:$0xf]  ;;  %879 = vst [vmem:[%s850_s25 + $0x14] sm:$0xf] %v878_v54  ;;  %881 = vst [vmem:[%s850_s25 + $0x18] sm:$0xf] %v880_v55 }
  0x58   : > { %883 = vst [vmem:[%s850_s25 + $0x1c] sm:$0xf] %v882_v56 }
  0x59 PF: > { %922 = sbr.rel (!%p7695_p4) target bundleno = 103 (0x67), region = 203  ;;  %s924_s27 = sand.u32 (%p7695_p4), 1, %s7548_s24  }
  0x5a   : > { %s6896_s3 = sshll.u32 (%p7695_p4), %s7552_s2, 4  ;;  %s6603_s26 = sshll.u32 (%p7695_p4), %s924_s27, 6 }
  0x5b   : > { %s10007_s0 = sld [smem:[#allocation38_spill]] (%p7695_p4)  ;;  %s926_s1 = scalar_lea.vmem (%p7695_p4), [#allocation6], %s6603_s26 }
  0x61   : > { %s929_s21 = scalar_lea.vmem %s10007_s0, %s6896_s3 }
  0x62   : > { %v942_v57 = vld [vmem:[%s929_s21] sm:$0xff]  ;;  %v944_v58 = vld [vmem:[%s929_s21 + $0x8] sm:$0xff] }
  0x63   : > { %v946_v59 = vld [vmem:[%s929_s21 + $0x20] sm:$0xff]  ;;  %943 = vst [vmem:[%s926_s1] sm:$0xff] %v942_v57  ;;  %945 = vst [vmem:[%s926_s1 + $0x8] sm:$0xff] %v944_v58  ;;  %v948_v60 = vld [vmem:[%s929_s21 + $0x28] sm:$0xff] }
  0x64   : > { %947 = vst [vmem:[%s926_s1 + $0x10] sm:$0xff] %v946_v59  ;;  %v950_v61 = vld [vmem:[%s929_s21 + $0x40] sm:$0xff]  ;;  %v952_v62 = vld [vmem:[%s929_s21 + $0x48] sm:$0xff]  ;;  %949 = vst [vmem:[%s926_s1 + $0x18] sm:$0xff] %v948_v60 }
  0x65   : > { %951 = vst [vmem:[%s926_s1 + $0x20] sm:$0xff] %v950_v61  ;;  %953 = vst [vmem:[%s926_s1 + $0x28] sm:$0xff] %v952_v62  ;;  %v954_v63 = vld [vmem:[%s929_s21 + $0x60] sm:$0xff]  ;;  %v956_v0 = vld [vmem:[%s929_s21 + $0x68] sm:$0xff] }
  0x66   : > { %955 = vst [vmem:[%s926_s1 + $0x30] sm:$0xff] %v954_v63  ;;  %957 = vst [vmem:[%s926_s1 + $0x38] sm:$0xff] %v956_v0 }
  0x67 PF: > { %p6606_p7 = scmp.ge.s32.totalorder %s7552_s2, 1  ;;  %p962_p8 = scmp.lt.s32.totalorder %s7552_s2, 3 }
  0x69   : > { %p963_p9 = pnand %p6606_p7, %p962_p8 }
  0x6b   : > { %966 = sbr.rel (%p963_p9) target bundleno = 2437 (0x985), region = 226 }
  0x72   : > { %s10008_s5 = sld [smem:[#allocation40_spill]]  ;;  %s7827_s3 = sand.u32 1, %s7544_s23   ;;  %v9967_v3 = vmov 0   ;;  %v2058_v34 = vld [vmem:[%s9950_s7 + $0x8] sm:$0xff]  ;;  %v2057_v35 = vld [vmem:[%s9950_s7] sm:$0xff]  ;;  %v2060_v38 = vld [vmem:[%s9950_s7 + $0x18] sm:$0xff] }
  0x73   : > { %7265 = vset.pattern.permute.xlu1 %v9967_v3  ;;  %7264 = vset.pattern.permute.xlu0 %v9967_v3  ;;  %s6607_s2 = sshll.u32 %s7827_s3, 7  ;;  %s10009_s23 = sld [smem:[#allocation39_spill]]  ;;  %v2059_v39 = vld [vmem:[%s9950_s7 + $0x10] sm:$0xff]  ;;  %v2062_v41 = vld [vmem:[%s9950_s7 + $0x28] sm:$0xff]  ;;  %v2061_v42 = vld [vmem:[%s9950_s7 + $0x20] sm:$0xff]  ;;  %vm3617_vm0 = vcmask 523264  }
  0x74   : > { %s7838_s21 = scalar_lea.vmem [#allocation3], %s6607_s2  ;;  %1719 = vmatprep.mubr.bf16.mxu1 %v9967_v3  ;;  %v2064_v43 = vld [vmem:[%s9950_s7 + $0x38] sm:$0xff]  ;;  %v2063_v44 = vld [vmem:[%s9950_s7 + $0x30] sm:$0xff]  ;;  %v2066_v47 = vld [vmem:[%s9950_s7 + $0x48] sm:$0xff]  ;;  %s6611_s30 = sshll.u32 %s7827_s3, 11  ;;  %vm4816_vm1 = vcmask 261120  }
  0x75   : > { %v7266_v6 = vld [vmem:[%s7838_s21 + $0x40] sm:$0xff]   ;;  %v7268_v9 = vld [vmem:[%s7838_s21 + $0x48] sm:$0xff]   ;;  %v7270_v12 = vld [vmem:[%s7838_s21 + $0x50] sm:$0xff]   ;;  %s8384_s0 = scalar_lea.vmem [#allocation7], %s6611_s30  ;;  %s6609_s25 = sshll.u32 %s7827_s3, 5  ;;  %vm5900_vm2 = vcmask 1040384  }
  0x76   : > { %v7267_v7 = vld [vmem:[%s7838_s21] sm:$0xff]   ;;  %6898 = vmatprep.subr.bf16.mxu0 %v7266_v6  ;;  %v7269_v11 = vld [vmem:[%s7838_s21 + $0x8] sm:$0xff]   ;;  %v7271_v15 = vld [vmem:[%s7838_s21 + $0x10] sm:$0xff]   ;;  %s8730_s28 = scalar_lea.vmem [#allocation5], %s6609_s25  ;;  %vm5901_vm3 = vsmask.f32 256 }
  0x77   : > { %6899 = vmatpush3.bf16.msra.mxu0 %v7267_v7  ;;  %v7272_v16 = vld [vmem:[%s7838_s21 + $0x58] sm:$0xff]   ;;  %v7274_v20 = vld [vmem:[%s7838_s21 + $0x60] sm:$0xff]   ;;  %v7276_v24 = vld [vmem:[%s7838_s21 + $0x68] sm:$0xff]   ;;  %s6612_s29 = sshll.u32 %s7680_s18, 2  ;;  %vm5903_vm4 = vcmask 1041409   ;;  %vm5907_vm8 = vcmask 1042434  }
  0x78   : > { %v1120_v1 = vld [vmem:[%s10008_s5 + $0x10] sm:$0xff]  ;;  %v1118_v2 = vld [vmem:[%s10008_s5] sm:$0xff]  ;;  %v1121_v4 = vld [vmem:[%s10008_s5 + $0x18] sm:$0xff]  ;;  %6900 = vmatprep.subr.bf16.mxu0 %v7268_v9  ;;  %vm5904_vm5 = vsmask.f32 1280  ;;  %p9396_p10 = scmp.lt.s32.totalorder %s6612_s29, 7 }
  0x79   : > { %1146 = vperm.xlu1 %7265, %v1120_v1   ;;  %1136 = vperm.xlu0 %7264, %v1118_v2   ;;  %v1119_v5 = vld [vmem:[%s10008_s5 + $0x8] sm:$0xff]  ;;  %v1122_v10 = vld [vmem:[%s10008_s5 + $0x20] sm:$0xff]  ;;  %v1125_v13 = vld [vmem:[%s10008_s5 + $0x38] sm:$0xff]  ;;  %s10010_s1 = smov %s10009_s23  ;;  %vm5908_vm9 = vsmask.f32 2304  ;;  %vm5911_vm12 = vcmask 1043459  }
  0x7a   : > { %v1123_v8 = vld [vmem:[%s10008_s5 + $0x28] sm:$0xff]  ;;  %v1124_v14 = vld [vmem:[%s10008_s5 + $0x30] sm:$0xff]  ;;  %v1126_v18 = vld [vmem:[%s10008_s5 + $0x40] sm:$0xff]  ;;  %s10104_s29 = smov (!%p9396_p10, %s6612_s29), 7  ;;  %vm5912_vm13 = vsmask.f32 3328 }
  0x7b   : > { %6901 = vmatpush3.bf16.msra.mxu0 %v7269_v11  ;;  %v1127_v17 = vld [vmem:[%s10008_s5 + $0x48] sm:$0xff]  ;;  %v7273_v19 = vld [vmem:[%s7838_s21 + $0x18] sm:$0xff]   ;;  %v1128_v22 = vld [vmem:[%s10008_s5 + $0x50] sm:$0xff]  ;;  %s1067_s22 = scalar_lea.vmem %s9963_s20, %s10104_s29  ;;  %s6897_s27 = sshll.u32 (%p7699_p5), %s7680_s18, 5 }
  0x7c   : > { %6902 = vmatprep.subr.bf16.mxu0 %v7270_v12  ;;  %v1129_v21 = vld [vmem:[%s10008_s5 + $0x58] sm:$0xff]  ;;  %v7275_v23 = vld [vmem:[%s7838_s21 + $0x20] sm:$0xff]   ;;  %v7277_v27 = vld [vmem:[%s7838_s21 + $0x28] sm:$0xff]  }
  0x7d   : > { %1151 = vperm.xlu1 %7265, %v1121_v4   ;;  %1141 = vperm.xlu0 %7264, %v1119_v5   ;;  %v1131_v25 = vld [vmem:[%s10008_s5 + $0x68] sm:$0xff]  ;;  %v1130_v26 = vld [vmem:[%s10008_s5 + $0x60] sm:$0xff]  ;;  %v7278_v29 = vld [vmem:[%s7838_s21 + $0x70] sm:$0xff]  }
  0x7e   : > { %v7284_v28 = vld [vmem:[%s10009_s23 + $0x4] ss:$8 sps:$4 sm:$0xff]   ;;  %v1133_v30 = vld [vmem:[%s10008_s5 + $0x78] sm:$0xff]  ;;  %v1132_v31 = vld [vmem:[%s10008_s5 + $0x70] sm:$0xff]  ;;  %s6608_s5 = sshll.u32 %s7827_s3, 6 }
  0x7f   : > { %6903 = vmatpush3.bf16.msra.mxu0 %v7271_v15  ;;  %1422 = vmatprep.mubr.bf16.mxu0 %v7284_v28  ;;  %v7279_v32 = vld [vmem:[%s7838_s21 + $0x30] sm:$0xff]   ;;  %v7280_v33 = vld [vmem:[%s7838_s21 + $0x78] sm:$0xff]   ;;  %v7288_v46 = vld [vmem:[%s10010_s1 + $0x24] ss:$8 sps:$4 sm:$0xff]   ;;  %s8209_s23 = scalar_lea.vmem [#allocation4], %s6608_s5 }
  0x80   : > { %6904 = vmatprep.subr.bf16.mxu0 %v7272_v16  ;;  %v7281_v36 = vld [vmem:[%s7838_s21 + $0x38] sm:$0xff]   ;;  %v2067_v50 = vld [vmem:[%s9950_s7 + $0x50] sm:$0xff]  ;;  %v2070_v53 = vld [vmem:[%s9950_s7 + $0x68] sm:$0xff]  ;;  %s9114_s21 = scalar_lea.vmem [#allocation6], %s6608_s5 }
  0x81   : > { %1161 = vperm.xlu1 %7265, %v1123_v8   ;;  %1156 = vperm.xlu0 %7264, %v1122_v10   ;;  %v7282_v37 = vld [vmem:[%s10010_s1] ss:$8 sps:$4 sm:$0xff]   ;;  %v7285_v40 = vld [vmem:[%s10010_s1 + $0x14] ss:$8 sps:$4 sm:$0xff]   ;;  %v7287_v45 = vld [vmem:[%s10010_s1 + $0x10] ss:$8 sps:$4 sm:$0xff]  }
  0x82   : > { %v2065_v48 = vld [vmem:[%s9950_s7 + $0x40] sm:$0xff]  ;;  %v2068_v49 = vld [vmem:[%s9950_s7 + $0x58] sm:$0xff]  ;;  %v2071_v56 = vld [vmem:[%s9950_s7 + $0x70] sm:$0xff] }
  0x83   : > { %6905 = vmatpush3.bf16.msra.mxu0 %v7273_v19  ;;  %v7290_v51 = vld [vmem:[%s10010_s1 + $0x20] ss:$8 sps:$4 sm:$0xff]   ;;  %v7291_v52 = vld [vmem:[%s10010_s1 + $0x34] ss:$8 sps:$4 sm:$0xff]   ;;  %v7293_v57 = vld [vmem:[%s10010_s1 + $0x30] ss:$8 sps:$4 sm:$0xff]  }
  0x84   : > { %6906 = vmatprep.subr.bf16.mxu0 %v7274_v20  ;;  %v2069_v54 = vld [vmem:[%s9950_s7 + $0x60] sm:$0xff]  ;;  %v2072_v55 = vld [vmem:[%s9950_s7 + $0x78] sm:$0xff]  ;;  %v3458_v59 = vld [vmem:[%s9952_s9 + $0x8] sm:$0xff] }
  0x85   : > { %1171 = vperm.xlu1 %7265, %v1125_v13   ;;  %1166 = vperm.xlu0 %7264, %v1124_v14   ;;  %v7294_v58 = vld [vmem:[%s10010_s1 + $0x44] ss:$8 sps:$4 sm:$0xff]   ;;  %v3460_v61 = vld [vmem:[%s9952_s9 + $0x18] sm:$0xff]  ;;  %v3459_v62 = vld [vmem:[%s9952_s9 + $0x10] sm:$0xff] }
  0x86   : > { %v3457_v60 = vld [vmem:[%s9952_s9] sm:$0xff]  ;;  %v7297_v0 = vld [vmem:[%s10010_s1 + $0x54] ss:$8 sps:$4 sm:$0xff]   ;;  %v3462_v1 = vld [vmem:[%s9952_s9 + $0x28] sm:$0xff] }
  0x87   : > { %6907 = vmatpush3.bf16.msra.mxu0 %v7275_v23  ;;  %v7296_v63 = vld [vmem:[%s10010_s1 + $0x40] ss:$8 sps:$4 sm:$0xff]   ;;  %v3464_v4 = vld [vmem:[%s9952_s9 + $0x38] sm:$0xff]  ;;  %v3463_v5 = vld [vmem:[%s9952_s9 + $0x30] sm:$0xff] }
  0x88   : > { %6908 = vmatprep.subr.bf16.mxu0 %v7276_v24  ;;  %v3461_v2 = vld [vmem:[%s9952_s9 + $0x20] sm:$0xff]  ;;  %v7299_v6 = vld [vmem:[%s10010_s1 + $0x50] ss:$8 sps:$4 sm:$0xff]   ;;  %v3466_v8 = vld [vmem:[%s9952_s9 + $0x48] sm:$0xff] }
  0x89   : > { %1181 = vperm.xlu1 %7265, %v1127_v17   ;;  %1176 = vperm.xlu0 %7264, %v1126_v18   ;;  %v7300_v7 = vld [vmem:[%s10010_s1 + $0x64] ss:$8 sps:$4 sm:$0xff]   ;;  %v3468_v10 = vld [vmem:[%s9952_s9 + $0x58] sm:$0xff]  ;;  %v3467_v11 = vld [vmem:[%s9952_s9 + $0x50] sm:$0xff] }
  0x8a   : > { %v3465_v9 = vld [vmem:[%s9952_s9 + $0x40] sm:$0xff]  ;;  %v7303_v13 = vld [vmem:[%s10010_s1 + $0x74] ss:$8 sps:$4 sm:$0xff]   ;;  %v3470_v14 = vld [vmem:[%s9952_s9 + $0x68] sm:$0xff] }
  0x8b   : > { %6909 = vmatpush3.bf16.msra.mxu0 %v7277_v27  ;;  %v7302_v12 = vld [vmem:[%s10010_s1 + $0x60] ss:$8 sps:$4 sm:$0xff]   ;;  %v3472_v16 = vld [vmem:[%s9952_s9 + $0x78] sm:$0xff]  ;;  %v3471_v17 = vld [vmem:[%s9952_s9 + $0x70] sm:$0xff] }
  0x8c   : > { %6910 = vmatprep.subr.bf16.mxu0 %v7278_v29  ;;  %v3469_v15 = vld [vmem:[%s9952_s9 + $0x60] sm:$0xff]  ;;  %v7305_v18 = vld [vmem:[%s10010_s1 + $0x70] ss:$8 sps:$4 sm:$0xff]   ;;  %v4641_v19 = vld [vmem:[%s9954_s11 + $0x8] sm:$0xff] }
  0x8d   : > { %1191 = vperm.xlu1 %7265, %v1129_v21   ;;  %1186 = vperm.xlu0 %7264, %v1128_v22   ;;  %v4640_v20 = vld [vmem:[%s9954_s11] sm:$0xff]  ;;  %v4643_v21 = vld [vmem:[%s9954_s11 + $0x18] sm:$0xff]  ;;  %v4642_v22 = vld [vmem:[%s9954_s11 + $0x10] sm:$0xff] }
  0x8e   : > { %v7306_v23 = vld [vmem:[%s9955_s12 + $0x4] ss:$16 sps:$4 sm:$0xff]   ;;  %v7308_v24 = vld [vmem:[%s9955_s12 + $0x8] ss:$16 sps:$4 sm:$0xff]   ;;  %vm9392_vm6 = vmand %vm5900_vm2, %vm5901_vm3 }
  0x8f   : > { %6911 = vmatpush3.bf16.msra.mxu0 %v7279_v32  ;;  %1687 = vmatprep.subr.bf16.mxu1 %v7306_v23  ;;  %v4645_v27 = vld [vmem:[%s9954_s11 + $0x28] sm:$0xff]  ;;  %v4644_v28 = vld [vmem:[%s9954_s11 + $0x20] sm:$0xff]  ;;  %vm9400_vm7 = vmand %vm5903_vm4, %vm5904_vm5 }
  0x90   : > { %6912 = vmatprep.subr.bf16.mxu0 %v7280_v33  ;;  %v7312_v29 = vld [vmem:[%s9955_s12 + $0x24] ss:$16 sps:$4 sm:$0xff]   ;;  %v7317_v32 = vld [vmem:[%s9955_s12 + $0x20] ss:$16 sps:$4 sm:$0xff]   ;;  %v4647_v33 = vld [vmem:[%s9954_s11 + $0x38] sm:$0xff] }
  0x91   : > { %1201 = vperm.xlu1 %7265, %v1131_v25   ;;  %1196 = vperm.xlu0 %7264, %v1130_v26   ;;  %v7310_v25 = vld [vmem:[%s9955_s12 + $0xc] ss:$16 sps:$4 sm:$0xff]   ;;  %v7311_v26 = vld [vmem:[%s9955_s12] ss:$16 sps:$4 sm:$0xff]   ;;  %vm5906_vm10 = vmor %vm9400_vm7, %vm9392_vm6 }
  0x92   : > { %1688 = vmatpush1.bf16.msra.mxu1 %v7311_v26  ;;  %vm5909_vm11 = vmand %vm5907_vm8, %vm5908_vm9 }
  0x93   : > { %6913 = vmatpush3.bf16.msra.mxu0 %v7281_v36  ;;  %1689 = vmatprep.subr.bf16.mxu1 %v7312_v29  ;;  %v7320_v36 = vld [vmem:[%s9955_s12 + $0x48] ss:$16 sps:$4 sm:$0xff]   ;;  %vm5910_vm14 = vmor %vm5909_vm11, %vm5906_vm10 }
  0x94   : > { %1800 = vmatprep.subr.bf16.mxu0 %v7310_v25  ;;  %vm5913_vm15 = vmand %vm5911_vm12, %vm5912_vm13 }
  0x95   : > { %1211 = vperm.xlu1 %7265, %v1133_v30   ;;  %1206 = vperm.xlu0 %7264, %v1132_v31   ;;  %v7314_v30 = vld [vmem:[%s9955_s12 + $0x28] ss:$16 sps:$4 sm:$0xff]   ;;  %v7316_v31 = vld [vmem:[%s9955_s12 + $0x2c] ss:$16 sps:$4 sm:$0xff]  }
  0x96   : > { %1423 = vmatmul.mubr.bf16.vlgmr.msra.gmra.mrb[0].mxu0 %v7282_v37  ;;  %1690 = vmatpush1.bf16.msra.mxu1 %v7317_v32  ;;  %v7322_v37 = vld [vmem:[%s9955_s12 + $0x4c] ss:$16 sps:$4 sm:$0xff]  }
  0x97   : > { %1430 = vmatprep.mubr.bf16.mxu0 %v7285_v40  ;;  %1801 = vmatpush1.bf16.msra.mxu0 %v7308_v24  ;;  %v4648_v40 = vld [vmem:[%s9954_s11 + $0x40] sm:$0xff] }
  0x98   : > { %1802 = vmatprep.subr.bf16.mxu0 %v7316_v31 }
  0x99   : > { %2080 = vperm.xlu1 %7265, %v2058_v34   ;;  %2075 = vperm.xlu0 %7264, %v2057_v35   ;;  %v4646_v34 = vld [vmem:[%s9954_s11 + $0x30] sm:$0xff] }
  0x9a   : > { %v7318_v35 = vld [vmem:[%s9955_s12 + $0x44] ss:$16 sps:$4 sm:$0xff]  }
  0x9b   : > { %1803 = vmatpush1.bf16.msra.mxu0 %v7314_v30  ;;  %1691 = vmatprep.subr.bf16.mxu1 %v7318_v35  ;;  %v7355_v35 = vld [vmem:[%s8209_s23 + $0x8] sm:$0xff]  }
  0x9c   : > { %1804 = vmatprep.subr.bf16.mxu0 %v7322_v37 }
  0x9d   : > { %2090 = vperm.xlu1 %7265, %v2060_v38   ;;  %2085 = vperm.xlu0 %7264, %v2059_v39   ;;  %v7323_v38 = vld [vmem:[%s9955_s12 + $0x40] ss:$16 sps:$4 sm:$0xff]   ;;  %v4649_v39 = vld [vmem:[%s9954_s11 + $0x48] sm:$0xff] }
  0x9e   : > { %1431 = vmatmul.mubr.bf16.gmra.mrb[4].mxu0 %v7287_v45  ;;  %1692 = vmatpush1.bf16.msra.mxu1 %v7323_v38  ;;  %v4651_v45 = vld [vmem:[%s9954_s11 + $0x58] sm:$0xff] }
  0x9f   : > { %1438 = vmatprep.mubr.bf16.mxu0 %v7288_v46  ;;  %1805 = vmatpush1.bf16.msra.mxu0 %v7320_v36  ;;  %v4650_v46 = vld [vmem:[%s9954_s11 + $0x50] sm:$0xff] }
  0xa1   : > { %2100 = vperm.xlu1 %7265, %v2062_v41   ;;  %2095 = vperm.xlu0 %7264, %v2061_v42   ;;  %v7324_v41 = vld [vmem:[%s9955_s12 + $0x64] ss:$16 sps:$4 sm:$0xff]   ;;  %v7326_v42 = vld [vmem:[%s9955_s12 + $0x68] ss:$16 sps:$4 sm:$0xff]  }
  0xa2   : > { %1693 = vmatprep.subr.bf16.mxu1 %v7324_v41  ;;  %v7356_v41 = vld [vmem:[%s8209_s23 + $0x10] sm:$0xff]  }
  0xa5   : > { %2110 = vperm.xlu1 %7265, %v2064_v43   ;;  %2105 = vperm.xlu0 %7264, %v2063_v44   ;;  %v7328_v43 = vld [vmem:[%s9955_s12 + $0x6c] ss:$16 sps:$4 sm:$0xff]   ;;  %v7329_v44 = vld [vmem:[%s9955_s12 + $0x60] ss:$16 sps:$4 sm:$0xff]  }
  0xa6   : > { %1439 = vmatmul.mubr.bf16.gmra.mrb[8].mxu0 %v7290_v51  ;;  %1806 = vmatprep.subr.bf16.mxu0 %v7328_v43  ;;  %v4653_v51 = vld [vmem:[%s9954_s11 + $0x68] sm:$0xff] }
  0xa7   : > { %1446 = vmatprep.mubr.bf16.mxu0 %v7291_v52  ;;  %1694 = vmatpush1.bf16.msra.mxu1 %v7329_v44  ;;  %v4652_v52 = vld [vmem:[%s9954_s11 + $0x60] sm:$0xff] }
  0xa8   : > { %1807 = vmatpush1.bf16.msra.mxu0 %v7326_v42 }
  0xa9   : > { %2120 = vperm.xlu1 %7265, %v2066_v47   ;;  %2115 = vperm.xlu0 %7264, %v2065_v48   ;;  %v7330_v47 = vld [vmem:[%s9955_s12 + $0x84] ss:$16 sps:$4 sm:$0xff]   ;;  %v7332_v48 = vld [vmem:[%s9955_s12 + $0x88] ss:$16 sps:$4 sm:$0xff]  }
  0xaa   : > { %1695 = vmatprep.subr.bf16.mxu1 %v7330_v47 }
  0xad   : > { %2130 = vperm.xlu1 %7265, %v2068_v49   ;;  %2125 = vperm.xlu0 %7264, %v2067_v50   ;;  %v7334_v49 = vld [vmem:[%s9955_s12 + $0x8c] ss:$16 sps:$4 sm:$0xff]   ;;  %v7335_v50 = vld [vmem:[%s9955_s12 + $0x80] ss:$16 sps:$4 sm:$0xff]  }
  0xae   : > { %1447 = vmatmul.mubr.bf16.gmra.mrb[12].mxu0 %v7293_v57  ;;  %1808 = vmatprep.subr.bf16.mxu0 %v7334_v49  ;;  %v4655_v57 = vld [vmem:[%s9954_s11 + $0x78] sm:$0xff] }
  0xaf   : > { %1454 = vmatprep.mubr.bf16.mxu0 %v7294_v58  ;;  %1696 = vmatpush1.bf16.msra.mxu1 %v7335_v50  ;;  %v4654_v58 = vld [vmem:[%s9954_s11 + $0x70] sm:$0xff] }
  0xb0   : > { %1809 = vmatpush1.bf16.msra.mxu0 %v7332_v48  ;;  %v7357_v48 = vld [vmem:[%s8209_s23 + $0x18] sm:$0xff]  }
  0xb1   : > { %2140 = vperm.xlu1 %7265, %v2070_v53   ;;  %2135 = vperm.xlu0 %7264, %v2069_v54   ;;  %v7336_v53 = vld [vmem:[%s9955_s12 + $0xa4] ss:$16 sps:$4 sm:$0xff]   ;;  %v7338_v54 = vld [vmem:[%s9955_s12 + $0xa8] ss:$16 sps:$4 sm:$0xff]  }
  0xb2   : > { %1697 = vmatprep.subr.bf16.mxu1 %v7336_v53 }
  0xb5   : > { %2150 = vperm.xlu1 %7265, %v2072_v55   ;;  %2145 = vperm.xlu0 %7264, %v2071_v56   ;;  %v7340_v55 = vld [vmem:[%s9955_s12 + $0xac] ss:$16 sps:$4 sm:$0xff]   ;;  %v7341_v56 = vld [vmem:[%s9955_s12 + $0xa0] ss:$16 sps:$4 sm:$0xff]  }
  0xb6   : > { %1455 = vmatmul.mubr.bf16.gmra.mrb[16].mxu0 %v7296_v63  ;;  %1810 = vmatprep.subr.bf16.mxu0 %v7340_v55  ;;  %v5519_v63 = vld [vmem:[%s9959_s16 + $0x8] sm:$0xff] }
  0xb7   : > { %1462 = vmatprep.mubr.bf16.mxu0 %v7297_v0  ;;  %1698 = vmatpush1.bf16.msra.mxu1 %v7341_v56  ;;  %v5518_v0 = vld [vmem:[%s9959_s16] sm:$0xff] }
  0xb8   : > { %1811 = vmatpush1.bf16.msra.mxu0 %v7338_v54  ;;  %v7358_v55 = vld [vmem:[%s8209_s23 + $0x20] sm:$0xff]  }
  0xb9   : > { %3480 = vperm.xlu1 %7265, %v3458_v59   ;;  %3475 = vperm.xlu0 %7264, %v3457_v60   ;;  %v7342_v59 = vld [vmem:[%s9955_s12 + $0xc4] ss:$16 sps:$4 sm:$0xff]   ;;  %v7346_v60 = vld [vmem:[%s9955_s12 + $0xcc] ss:$16 sps:$4 sm:$0xff]  }
  0xba   : > { %1699 = vmatprep.subr.bf16.mxu1 %v7342_v59  ;;  %1812 = vmatprep.subr.bf16.mxu0 %v7346_v60 }
  0xbd   : > { %3490 = vperm.xlu1 %7265, %v3460_v61   ;;  %3485 = vperm.xlu0 %7264, %v3459_v62   ;;  %v7344_v61 = vld [vmem:[%s9955_s12 + $0xc8] ss:$16 sps:$4 sm:$0xff]   ;;  %v7347_v62 = vld [vmem:[%s9955_s12 + $0xc0] ss:$16 sps:$4 sm:$0xff]  }
  0xbe   : > { %1463 = vmatmul.mubr.bf16.gmra.mrb[20].mxu0 %v7299_v6  ;;  %1700 = vmatpush1.bf16.msra.mxu1 %v7347_v62  ;;  %v5521_v6 = vld [vmem:[%s9959_s16 + $0x18] sm:$0xff] }
  0xbf   : > { %1470 = vmatprep.mubr.bf16.mxu0 %v7300_v7  ;;  %1813 = vmatpush1.bf16.msra.mxu0 %v7344_v61  ;;  %v5520_v7 = vld [vmem:[%s9959_s16 + $0x10] sm:$0xff] }
  0xc0   : > { %v7359_v61 = vld [vmem:[%s8209_s23 + $0x28] sm:$0xff]  }
  0xc1   : > { %3500 = vperm.xlu1 %7265, %v3462_v1   ;;  %3495 = vperm.xlu0 %7264, %v3461_v2   ;;  %v7348_v1 = vld [vmem:[%s9955_s12 + $0xe4] ss:$16 sps:$4 sm:$0xff]   ;;  %v7352_v2 = vld [vmem:[%s9955_s12 + $0xec] ss:$16 sps:$4 sm:$0xff]  }
  0xc2   : > { %1701 = vmatprep.subr.bf16.mxu1 %v7348_v1  ;;  %1814 = vmatprep.subr.bf16.mxu0 %v7352_v2 }
  0xc5   : > { %3510 = vperm.xlu1 %7265, %v3464_v4   ;;  %3505 = vperm.xlu0 %7264, %v3463_v5   ;;  %v7350_v4 = vld [vmem:[%s9955_s12 + $0xe8] ss:$16 sps:$4 sm:$0xff]   ;;  %v7353_v5 = vld [vmem:[%s9955_s12 + $0xe0] ss:$16 sps:$4 sm:$0xff]  }
  0xc6   : > { %1471 = vmatmul.mubr.bf16.gmra.mrb[24].mxu0 %v7302_v12  ;;  %1702 = vmatpush1.bf16.msra.mxu1 %v7353_v5  ;;  %v7354_v12 = vld [vmem:[%s8209_s23] sm:$0xff]   ;;  %v7360_v5 = vld [vmem:[%s8209_s23 + $0x30] sm:$0xff]  }
  0xc7   : > { %1478 = vmatprep.mubr.bf16.mxu0 %v7303_v13  ;;  %1815 = vmatpush1.bf16.msra.mxu0 %v7350_v4  ;;  %v5527_v13 = vld [vmem:[%s9959_s16 + $0x48] sm:$0xff] }
  0xc8   : > { %6990 = vmatprep.subr.bf16.mxu1 %v7354_v12 }
  0xc9   : > { %3520 = vperm.xlu1 %7265, %v3466_v8   ;;  %3515 = vperm.xlu0 %7264, %v3465_v9   ;;  %v5523_v8 = vld [vmem:[%s9959_s16 + $0x28] sm:$0xff]  ;;  %v5522_v9 = vld [vmem:[%s9959_s16 + $0x20] sm:$0xff] }
  0xcd   : > { %3530 = vperm.xlu1 %7265, %v3468_v10   ;;  %3525 = vperm.xlu0 %7264, %v3467_v11   ;;  %v5525_v10 = vld [vmem:[%s9959_s16 + $0x38] sm:$0xff]  ;;  %v5524_v11 = vld [vmem:[%s9959_s16 + $0x30] sm:$0xff] }
  0xce   : > { %1479 = vmatmul.mubr.bf16.gmra.mrb[28].mxu0 %v7305_v18  ;;  %v5530_v18 = vld [vmem:[%s9959_s16 + $0x60] sm:$0xff] }
  0xcf   : > { %1832 = vmatprep.mubr.bf16.mxu0 %v9967_v3 }
  0xd1   : > { %3540 = vperm.xlu1 %7265, %v3470_v14   ;;  %3535 = vperm.xlu0 %7264, %v3469_v15   ;;  %v5526_v14 = vld [vmem:[%s9959_s16 + $0x40] sm:$0xff]  ;;  %v5529_v15 = vld [vmem:[%s9959_s16 + $0x58] sm:$0xff] }
  0xd5   : > { %3550 = vperm.xlu1 %7265, %v3472_v16   ;;  %3545 = vperm.xlu0 %7264, %v3471_v17   ;;  %v5528_v16 = vld [vmem:[%s9959_s16 + $0x50] sm:$0xff]  ;;  %v5531_v17 = vld [vmem:[%s9959_s16 + $0x68] sm:$0xff] }
  0xd9   : > { %4663 = vperm.xlu1 %7265, %v4641_v19   ;;  %4658 = vperm.xlu0 %7264, %v4640_v20   ;;  %v5533_v19 = vld [vmem:[%s9959_s16 + $0x78] sm:$0xff]  ;;  %v5532_v20 = vld [vmem:[%s9959_s16 + $0x70] sm:$0xff] }
  0xdd   : > { %4673 = vperm.xlu1 %7265, %v4643_v21   ;;  %4668 = vperm.xlu0 %7264, %v4642_v22   ;;  %v5775_v21 = vld [vmem:[#allocation2] sm:$0x1] }
  0xe1   : > { %4683 = vperm.xlu1 %7265, %v4645_v27   ;;  %4678 = vperm.xlu0 %7264, %v4644_v28  }
  0xe5   : > { %4693 = vperm.xlu1 %7265, %v4647_v33   ;;  %4688 = vperm.xlu0 %7264, %v4646_v34  }
  0xe9   : > { %4703 = vperm.xlu1 %7265, %v4649_v39   ;;  %4698 = vperm.xlu0 %7264, %v4648_v40  }
  0xed   : > { %4713 = vperm.xlu1 %7265, %v4651_v45   ;;  %4708 = vperm.xlu0 %7264, %v4650_v46  }
  0xf1   : > { %4723 = vperm.xlu1 %7265, %v4653_v51   ;;  %4718 = vperm.xlu0 %7264, %v4652_v52  }
  0xf5   : > { %4733 = vperm.xlu1 %7265, %v4655_v57   ;;  %4728 = vperm.xlu0 %7264, %v4654_v58  }
  0xf8   : > { %v1137_v22 = vpop.permute.xlu0 %1136  ;;  %v1147_v32 = vpop.permute.xlu1 %1146 }
  0xf9   : > { %5541 = vperm.xlu1 %7265, %v5519_v63   ;;  %5536 = vperm.xlu0 %7264, %v5518_v0  }
  0xfc   : > { %v1142_v29 = vpop.permute.xlu0 %1141  ;;  %v1152_v42 = vpop.permute.xlu1 %1151 }
  0xfd   : > { %5551 = vperm.xlu1 %7265, %v5521_v6   ;;  %5546 = vperm.xlu0 %7264, %v5520_v7  }
 0x100   : > { %v1162_v53 = vpop.permute.xlu1 %1161  ;;  %v1157_v54 = vpop.permute.xlu0 %1156 }
 0x101   : > { %5561 = vperm.xlu1 %7265, %v5523_v8   ;;  %5556 = vperm.xlu0 %7264, %v5522_v9  }
 0x104   : > { %v1172_v2 = vpop.permute.xlu1 %1171  ;;  %v1167_v4 = vpop.permute.xlu0 %1166 }
 0x105   : > { %5571 = vperm.xlu1 %7265, %v5525_v10   ;;  %5566 = vperm.xlu0 %7264, %v5524_v11   ;;  %v7361_v11 = vld [vmem:[%s8209_s23 + $0x38] sm:$0xff]   ;;  %s9422_s23 = scalar_lea.vmem (%p7699_p5), %s9962_s19, %s6897_s27 }
 0x109   : > { %5581 = vperm.xlu1 %7265, %v5527_v13   ;;  %5576 = vperm.xlu0 %7264, %v5526_v14  }
 0x10d   : > { %5591 = vperm.xlu1 %7265, %v5529_v15   ;;  %5586 = vperm.xlu0 %7264, %v5528_v16   ;;  %v1182_v16 = vpop.permute.xlu1 %1181 }
 0x111   : > { %5601 = vperm.xlu1 %7265, %v5531_v17   ;;  %5596 = vperm.xlu0 %7264, %v5530_v18   ;;  %v1177_v17 = vpop.permute.xlu0 %1176 }
 0x115   : > { %5611 = vperm.xlu1 %7265, %v5533_v19   ;;  %5606 = vperm.xlu0 %7264, %v5532_v20  }
 0x119   : > { %5778 = vperm.xlu0 %7264, %v5775_v21  }
 0x169   : > { %v6914_v23 = vpop.f32.mrb[0].mxu0 }
 0x16a   : > { %v6915_v24 = vpop.f32.mrb[1].mxu0 }
 0x16b   : > { %v6916_v25 = vadd.f32 %v6915_v24, %v6914_v23  ;;  %v6917_v26 = vpop.f32.mrb[2].mxu0 }
 0x16c   : > { %v6918_v27 = vpop.f32.mrb[3].mxu0 }
 0x16d   : > { %v6919_v28 = vadd.f32 %v6918_v27, %v6917_v26  ;;  %v1425_v30 = vadd.f32 %v6916_v25, %v1137_v22  ;;  %v1192_v27 = vpop.permute.xlu1 %1191 }
 0x16f   : > { %v1428_v31 = vadd.f32 %v6919_v28, %v1142_v29  ;;  %v1187_v28 = vpop.permute.xlu0 %1186 }
 0x171   : > { %v6920_v33 = vpop.f32.mrb[4].mxu0  ;;  %v1487_v34 = vpack.c.bf16 %v1428_v31, %v1425_v30 }
 0x172   : > { %v6921_v36 = vpop.f32.mrb[5].mxu0 }
 0x173   : > { %v6922_v37 = vadd.f32 %v6921_v36, %v6920_v33  ;;  %v6923_v38 = vpop.f32.mrb[6].mxu0  ;;  %1720 = vmatmul.mubr.bf16.vlgmr.msra.gmra.mrb[0].mxu1 %v1487_v34  ;;  %1833 = vmatmul.mubr.bf16.vlgmr.msra.gmra.mrb[32].mxu0 %v1487_v34 }
 0x174   : > { %v6924_v39 = vpop.f32.mrb[7].mxu0  ;;  %6991 = vmatpush3.bf16.msra.mxu1 %v7354_v12  ;;  %1729 = vmatprep.mubr.bf16.mxu1 %v9967_v3 }
 0x175   : > { %v6925_v40 = vadd.f32 %v6924_v39, %v6923_v38  ;;  %1842 = vmatprep.mubr.bf16.mxu0 %v9967_v3  ;;  %6992 = vmatprep.subr.bf16.mxu1 %v7355_v35  ;;  %v1433_v43 = vadd.f32 %v6922_v37, %v1147_v32  ;;  %v1202_v38 = vpop.permute.xlu1 %1201  ;;  %v1197_v39 = vpop.permute.xlu0 %1196 }
 0x177   : > { %v1436_v44 = vadd.f32 %v6925_v40, %v1152_v42 }
 0x178   : > { %6993 = vmatpush3.bf16.msra.mxu1 %v7355_v35 }
 0x179   : > { %v6926_v45 = vpop.f32.mrb[8].mxu0  ;;  %v1488_v46 = vpack.c.bf16 %v1436_v44, %v1433_v43  ;;  %6994 = vmatprep.subr.bf16.mxu1 %v7356_v41 }
 0x17a   : > { %v6927_v47 = vpop.f32.mrb[9].mxu0 }
 0x17b   : > { %v6928_v49 = vadd.f32 %v6927_v47, %v6926_v45  ;;  %v6929_v50 = vpop.f32.mrb[10].mxu0  ;;  %1730 = vmatmul.mubr.bf16.gmra.mrb[4].mxu1 %v1488_v46  ;;  %1843 = vmatmul.mubr.bf16.gmra.mrb[36].mxu0 %v1488_v46 }
 0x17c   : > { %v6930_v51 = vpop.f32.mrb[11].mxu0  ;;  %1739 = vmatprep.mubr.bf16.mxu1 %v9967_v3  ;;  %1852 = vmatprep.mubr.bf16.mxu0 %v9967_v3 }
 0x17d   : > { %v6931_v52 = vadd.f32 %v6930_v51, %v6929_v50  ;;  %6995 = vmatpush3.bf16.msra.mxu1 %v7356_v41  ;;  %v1441_v56 = vadd.f32 %v6928_v49, %v1157_v54  ;;  %v1212_v49 = vpop.permute.xlu1 %1211  ;;  %v1207_v50 = vpop.permute.xlu0 %1206 }
 0x17e   : > { %6996 = vmatprep.subr.bf16.mxu1 %v7357_v48 }
 0x17f   : > { %v1444_v57 = vadd.f32 %v6931_v52, %v1162_v53  ;;  %v7362_v53 = vld [vmem:[%s9949_s6] sm:$0xff]  }
 0x181   : > { %v6932_v58 = vpop.f32.mrb[12].mxu0  ;;  %v1489_v59 = vpack.c.bf16 %v1444_v57, %v1441_v56  ;;  %6997 = vmatpush3.bf16.msra.mxu1 %v7357_v48  ;;  %v7364_v56 = vld [vmem:[%s9949_s6 + $0x10] sm:$0xff]   ;;  %v7365_v57 = vld [vmem:[%s9949_s6 + $0x18] sm:$0xff]  }
 0x182   : > { %v6933_v60 = vpop.f32.mrb[13].mxu0  ;;  %6998 = vmatprep.subr.bf16.mxu1 %v7358_v55 }
 0x183   : > { %v6934_v62 = vadd.f32 %v6933_v60, %v6932_v58  ;;  %v6935_v63 = vpop.f32.mrb[14].mxu0  ;;  %1740 = vmatmul.mubr.bf16.gmra.mrb[8].mxu1 %v1489_v59  ;;  %1853 = vmatmul.mubr.bf16.gmra.mrb[40].mxu0 %v1489_v59  ;;  %v7366_v58 = vld [vmem:[%s9949_s6 + $0x20] sm:$0xff]   ;;  %v7367_v59 = vld [vmem:[%s9949_s6 + $0x28] sm:$0xff]   ;;  %v7368_v60 = vld [vmem:[%s9949_s6 + $0x30] sm:$0xff]  }
 0x184   : > { %v6936_v0 = vpop.f32.mrb[15].mxu0  ;;  %1749 = vmatprep.mubr.bf16.mxu1 %v9967_v3  ;;  %1862 = vmatprep.mubr.bf16.mxu0 %v9967_v3 }
 0x185   : > { %v6937_v1 = vadd.f32 %v6936_v0, %v6935_v63  ;;  %6999 = vmatpush3.bf16.msra.mxu1 %v7358_v55  ;;  %v1449_v6 = vadd.f32 %v6934_v62, %v1167_v4  ;;  %v7363_v55 = vld [vmem:[%s9949_s6 + $0x8] sm:$0xff]   ;;  %v7372_v62 = vld [vmem:[%s9956_s13 + $0x4] ss:$16 sps:$4 sm:$0xff]   ;;  %v7370_v0 = vld [vmem:[%s9956_s13] ss:$16 sps:$4 sm:$0xff]  }
 0x186   : > { %7000 = vmatprep.subr.bf16.mxu1 %v7359_v61  ;;  %v7375_v63 = vld [vmem:[%s9956_s13 + $0xc] ss:$16 sps:$4 sm:$0xff]  }
 0x187   : > { %v1452_v7 = vadd.f32 %v6937_v1, %v1172_v2  ;;  %v7373_v1 = vld [vmem:[%s9956_s13 + $0x8] ss:$16 sps:$4 sm:$0xff]   ;;  %2659 = vmatprep.subr.bf16.mxu0 %v7375_v63  ;;  %v7378_v2 = vld [vmem:[%s9956_s13 + $0x24] ss:$16 sps:$4 sm:$0xff]   ;;  %v7381_v4 = vld [vmem:[%s9956_s13 + $0x2c] ss:$16 sps:$4 sm:$0xff]  }
 0x188   : > { %2660 = vmatpush1.bf16.msra.mxu0 %v7373_v1 }
 0x189   : > { %v6938_v8 = vpop.f32.mrb[16].mxu0  ;;  %v1490_v9 = vpack.c.bf16 %v1452_v7, %v1449_v6  ;;  %7001 = vmatpush3.bf16.msra.mxu1 %v7359_v61  ;;  %v7369_v61 = vld [vmem:[%s9949_s6 + $0x38] sm:$0xff]   ;;  %2661 = vmatprep.subr.bf16.mxu0 %v7381_v4  ;;  %v7384_v7 = vld [vmem:[%s9956_s13 + $0x44] ss:$16 sps:$4 sm:$0xff]  }
 0x18a   : > { %v6939_v10 = vpop.f32.mrb[17].mxu0  ;;  %7002 = vmatprep.subr.bf16.mxu1 %v7360_v5  ;;  %v7379_v6 = vld [vmem:[%s9956_s13 + $0x28] ss:$16 sps:$4 sm:$0xff]  }
 0x18b   : > { %v6940_v12 = vadd.f32 %v6939_v10, %v6938_v8  ;;  %v6941_v13 = vpop.f32.mrb[18].mxu0  ;;  %1750 = vmatmul.mubr.bf16.gmra.mrb[12].mxu1 %v1490_v9  ;;  %1863 = vmatmul.mubr.bf16.gmra.mrb[44].mxu0 %v1490_v9  ;;  %v7387_v8 = vld [vmem:[%s9956_s13 + $0x4c] ss:$16 sps:$4 sm:$0xff]   ;;  %v7382_v9 = vld [vmem:[%s9956_s13 + $0x40] ss:$16 sps:$4 sm:$0xff]  }
 0x18c   : > { %v6942_v14 = vpop.f32.mrb[19].mxu0  ;;  %1759 = vmatprep.mubr.bf16.mxu1 %v9967_v3  ;;  %1872 = vmatprep.mubr.bf16.mxu0 %v9967_v3  ;;  %v7385_v10 = vld [vmem:[%s9956_s13 + $0x48] ss:$16 sps:$4 sm:$0xff]  }
 0x18d   : > { %v6943_v15 = vadd.f32 %v6942_v14, %v6941_v13  ;;  %7003 = vmatpush3.bf16.msra.mxu1 %v7360_v5  ;;  %v1457_v18 = vadd.f32 %v6940_v12, %v1177_v17  ;;  %v7376_v5 = vld [vmem:[%s9956_s13 + $0x20] ss:$16 sps:$4 sm:$0xff]   ;;  %2662 = vmatpush1.bf16.msra.mxu0 %v7379_v6  ;;  %v7393_v12 = vld [vmem:[%s9956_s13 + $0x6c] ss:$16 sps:$4 sm:$0xff]   ;;  %v7391_v14 = vld [vmem:[%s9956_s13 + $0x68] ss:$16 sps:$4 sm:$0xff]  }
 0x18e   : > { %7004 = vmatprep.subr.bf16.mxu1 %v7361_v11  ;;  %2663 = vmatprep.subr.bf16.mxu0 %v7387_v8  ;;  %v7388_v13 = vld [vmem:[%s9956_s13 + $0x60] ss:$16 sps:$4 sm:$0xff]  }
 0x18f   : > { %v1460_v19 = vadd.f32 %v6943_v15, %v1182_v16  ;;  %v7396_v15 = vld [vmem:[%s9956_s13 + $0x84] ss:$16 sps:$4 sm:$0xff]   ;;  %v7399_v16 = vld [vmem:[%s9956_s13 + $0x8c] ss:$16 sps:$4 sm:$0xff]   ;;  %v7394_v17 = vld [vmem:[%s9956_s13 + $0x80] ss:$16 sps:$4 sm:$0xff]  }
 0x191   : > { %v6944_v20 = vpop.f32.mrb[20].mxu0  ;;  %v1491_v21 = vpack.c.bf16 %v1460_v19, %v1457_v18  ;;  %7005 = vmatpush3.bf16.msra.mxu1 %v7361_v11  ;;  %2664 = vmatpush1.bf16.msra.mxu0 %v7385_v10  ;;  %v7390_v11 = vld [vmem:[%s9956_s13 + $0x64] ss:$16 sps:$4 sm:$0xff]   ;;  %v7397_v18 = vld [vmem:[%s9956_s13 + $0x88] ss:$16 sps:$4 sm:$0xff]  }
 0x192   : > { %v6945_v22 = vpop.f32.mrb[21].mxu0  ;;  %2546 = vmatprep.subr.bf16.mxu1 %v7372_v62  ;;  %2665 = vmatprep.subr.bf16.mxu0 %v7393_v12  ;;  %v7402_v19 = vld [vmem:[%s9956_s13 + $0xa4] ss:$16 sps:$4 sm:$0xff]  }
 0x193   : > { %v6946_v23 = vadd.f32 %v6945_v22, %v6944_v20  ;;  %v6947_v24 = vpop.f32.mrb[22].mxu0  ;;  %1760 = vmatmul.mubr.bf16.gmra.mrb[16].mxu1 %v1491_v21  ;;  %1873 = vmatmul.mubr.bf16.gmra.mrb[48].mxu0 %v1491_v21  ;;  %v7405_v20 = vld [vmem:[%s9956_s13 + $0xac] ss:$16 sps:$4 sm:$0xff]   ;;  %v7400_v21 = vld [vmem:[%s9956_s13 + $0xa0] ss:$16 sps:$4 sm:$0xff]  }
 0x194   : > { %v6948_v25 = vpop.f32.mrb[23].mxu0  ;;  %1769 = vmatprep.mubr.bf16.mxu1 %v9967_v3  ;;  %1882 = vmatprep.mubr.bf16.mxu0 %v9967_v3  ;;  %v7403_v22 = vld [vmem:[%s9956_s13 + $0xa8] ss:$16 sps:$4 sm:$0xff]  }
 0x195   : > { %v6949_v26 = vadd.f32 %v6948_v25, %v6947_v24  ;;  %v1465_v29 = vadd.f32 %v6946_v23, %v1187_v28  ;;  %2666 = vmatpush1.bf16.msra.mxu0 %v7391_v14  ;;  %v7408_v23 = vld [vmem:[%s9956_s13 + $0xc4] ss:$16 sps:$4 sm:$0xff]   ;;  %v7411_v24 = vld [vmem:[%s9956_s13 + $0xcc] ss:$16 sps:$4 sm:$0xff]   ;;  %v7406_v25 = vld [vmem:[%s9956_s13 + $0xc0] ss:$16 sps:$4 sm:$0xff]  }
 0x196   : > { %2667 = vmatprep.subr.bf16.mxu0 %v7399_v16  ;;  %v7417_v28 = vld [vmem:[%s9956_s13 + $0xec] ss:$16 sps:$4 sm:$0xff]  }
 0x197   : > { %v1468_v30 = vadd.f32 %v6949_v26, %v1192_v27  ;;  %v7409_v26 = vld [vmem:[%s9956_s13 + $0xc8] ss:$16 sps:$4 sm:$0xff]   ;;  %v7414_v27 = vld [vmem:[%s9956_s13 + $0xe4] ss:$16 sps:$4 sm:$0xff]  }
 0x199   : > { %v6950_v31 = vpop.f32.mrb[24].mxu0  ;;  %v1492_v32 = vpack.c.bf16 %v1468_v30, %v1465_v29  ;;  %2668 = vmatpush1.bf16.msra.mxu0 %v7397_v18  ;;  %v7412_v29 = vld [vmem:[%s9956_s13 + $0xe0] ss:$16 sps:$4 sm:$0xff]   ;;  %v7415_v30 = vld [vmem:[%s9956_s13 + $0xe8] ss:$16 sps:$4 sm:$0xff]  }
 0x19a   : > { %v6951_v33 = vpop.f32.mrb[25].mxu0  ;;  %2669 = vmatprep.subr.bf16.mxu0 %v7405_v20 }
 0x19b   : > { %v6952_v34 = vadd.f32 %v6951_v33, %v6950_v31  ;;  %v6953_v35 = vpop.f32.mrb[26].mxu0  ;;  %1770 = vmatmul.mubr.bf16.gmra.mrb[20].mxu1 %v1492_v32  ;;  %1883 = vmatmul.mubr.bf16.gmra.mrb[52].mxu0 %v1492_v32 }
 0x19c   : > { %v6954_v36 = vpop.f32.mrb[27].mxu0  ;;  %1779 = vmatprep.mubr.bf16.mxu1 %v9967_v3  ;;  %1892 = vmatprep.mubr.bf16.mxu0 %v9967_v3 }
 0x19d   : > { %v6955_v37 = vadd.f32 %v6954_v36, %v6953_v35  ;;  %v1473_v40 = vadd.f32 %v6952_v34, %v1197_v39  ;;  %2670 = vmatpush1.bf16.msra.mxu0 %v7403_v22 }
 0x19e   : > { %2671 = vmatprep.subr.bf16.mxu0 %v7411_v24 }
 0x19f   : > { %v1476_v41 = vadd.f32 %v6955_v37, %v1202_v38 }
 0x1a1   : > { %v6956_v42 = vpop.f32.mrb[28].mxu0  ;;  %v1493_v43 = vpack.c.bf16 %v1476_v41, %v1473_v40  ;;  %2672 = vmatpush1.bf16.msra.mxu0 %v7409_v26 }
 0x1a2   : > { %v6957_v44 = vpop.f32.mrb[29].mxu0  ;;  %2673 = vmatprep.subr.bf16.mxu0 %v7417_v28  ;;  %v8582_v28 = vpop.permute.xlu1 %2080 }
 0x1a3   : > { %v6958_v45 = vadd.f32 %v6957_v44, %v6956_v42  ;;  %v6959_v46 = vpop.f32.mrb[30].mxu0  ;;  %1780 = vmatmul.mubr.bf16.gmra.mrb[24].mxu1 %v1493_v43  ;;  %1893 = vmatmul.mubr.bf16.gmra.mrb[56].mxu0 %v1493_v43 }
 0x1a4   : > { %v6960_v47 = vpop.f32.mrb[31].mxu0  ;;  %1789 = vmatprep.mubr.bf16.mxu1 %v9967_v3  ;;  %1902 = vmatprep.mubr.bf16.mxu0 %v9967_v3 }
 0x1a5   : > { %v6961_v48 = vadd.f32 %v6960_v47, %v6959_v46  ;;  %v1481_v51 = vadd.f32 %v6958_v45, %v1207_v50  ;;  %2674 = vmatpush1.bf16.msra.mxu0 %v7415_v30 }
 0x1a7   : > { %v1484_v52 = vadd.f32 %v6961_v48, %v1212_v49 }
 0x1a9   : > { %v1494_v54 = vpack.c.bf16 %v1484_v52, %v1481_v51 }
 0x1ab   : > { %1790 = vmatmul.mubr.bf16.gmra.mrb[28].mxu1 %v1494_v54  ;;  %1903 = vmatmul.mubr.bf16.gmra.mrb[60].mxu0 %v1494_v54 }
 0x1ac   : > { %7006 = vmatprep.mubr.bf16.mxu1 %v7362_v53  ;;  %2691 = vmatprep.mubr.bf16.mxu0 %v9967_v3 }
 0x1b3   : > { %7007 = vmatmul.mubr.bf16.vlgmr.msra.gmra.mrb[32].mxu1 %v7363_v55 }
 0x1b4   : > { %7010 = vmatprep.mubr.bf16.mxu1 %v7364_v56  ;;  %2547 = vmatpush1.bf16.msra.mxu1 %v7370_v0 }
 0x1b5   : > { %2548 = vmatprep.subr.bf16.mxu1 %v7378_v2  ;;  %v2091_v2 = vpop.permute.xlu1 %2090 }
 0x1b8   : > { %2549 = vmatpush1.bf16.msra.mxu1 %v7376_v5 }
 0x1b9   : > { %2550 = vmatprep.subr.bf16.mxu1 %v7384_v7 }
 0x1bb   : > { %7011 = vmatmul.mubr.bf16.gmra.mrb[36].mxu1 %v7365_v57 }
 0x1bc   : > { %7014 = vmatprep.mubr.bf16.mxu1 %v7366_v58  ;;  %2551 = vmatpush1.bf16.msra.mxu1 %v7382_v9 }
 0x1bd   : > { %2552 = vmatprep.subr.bf16.mxu1 %v7390_v11 }
 0x1c0   : > { %2553 = vmatpush1.bf16.msra.mxu1 %v7388_v13 }
 0x1c1   : > { %2554 = vmatprep.subr.bf16.mxu1 %v7396_v15 }
 0x1c3   : > { %7015 = vmatmul.mubr.bf16.gmra.mrb[40].mxu1 %v7367_v59 }
 0x1c4   : > { %7018 = vmatprep.mubr.bf16.mxu1 %v7368_v60  ;;  %2555 = vmatpush1.bf16.msra.mxu1 %v7394_v17 }
 0x1c5   : > { %2556 = vmatprep.subr.bf16.mxu1 %v7402_v19 }
 0x1c8   : > { %2557 = vmatpush1.bf16.msra.mxu1 %v7400_v21 }
 0x1c9   : > { %2558 = vmatprep.subr.bf16.mxu1 %v7408_v23 }
 0x1cb   : > { %7019 = vmatmul.mubr.bf16.gmra.mrb[44].mxu1 %v7369_v61  ;;  %v2076_v61 = vpop.permute.xlu0 %2075 }
 0x1cc   : > { %2578 = vmatprep.mubr.bf16.mxu1 %v9967_v3  ;;  %2559 = vmatpush1.bf16.msra.mxu1 %v7406_v25  ;;  %v2101_v3 = vpop.permute.xlu1 %2100 }
 0x1cd   : > { %2560 = vmatprep.subr.bf16.mxu1 %v7414_v27 }
 0x1cf   : > { %v2086_v41 = vpop.permute.xlu0 %2085 }
 0x1d0   : > { %2561 = vmatpush1.bf16.msra.mxu1 %v7412_v29 }
 0x246   : > { %v8380_v31 = vpop.f32.mrb[0].mxu1  ;;  %v8382_v32 = vpop.f32.mrb[32].mxu0 }
 0x247   : > { %1913 = vst [vmem:[%s8384_s0] sm:$0xff] %v8380_v31  ;;  %1915 = vst [vmem:[%s8384_s0 + $0x10] sm:$0xff] %v8382_v32  ;;  %v8390_v33 = vpop.f32.mrb[1].mxu1  ;;  %v8392_v34 = vpop.f32.mrb[33].mxu0 }
 0x248   : > { %1914 = vst [vmem:[%s8384_s0 + $0x8] sm:$0xff] %v8390_v33  ;;  %1916 = vst [vmem:[%s8384_s0 + $0x18] sm:$0xff] %v8392_v34  ;;  %v8398_v35 = vpop.f32.mrb[2].mxu1  ;;  %v8400_v36 = vpop.f32.mrb[34].mxu0 }
 0x249   : > { %1917 = vst [vmem:[%s8384_s0 + $0x20] sm:$0xff] %v8398_v35  ;;  %1919 = vst [vmem:[%s8384_s0 + $0x30] sm:$0xff] %v8400_v36  ;;  %v8410_v39 = vpop.f32.mrb[3].mxu1  ;;  %v8412_v40 = vpop.f32.mrb[35].mxu0 }
 0x24a   : > { %1918 = vst [vmem:[%s8384_s0 + $0x28] sm:$0xff] %v8410_v39  ;;  %1920 = vst [vmem:[%s8384_s0 + $0x38] sm:$0xff] %v8412_v40 }
 0x24e   : > { %v8422_v43 = vpop.f32.mrb[4].mxu1  ;;  %v8424_v44 = vpop.f32.mrb[36].mxu0 }
 0x24f   : > { %1921 = vst [vmem:[%s8384_s0 + $0x40] sm:$0xff] %v8422_v43  ;;  %1923 = vst [vmem:[%s8384_s0 + $0x50] sm:$0xff] %v8424_v44  ;;  %v8430_v45 = vpop.f32.mrb[5].mxu1  ;;  %v8432_v46 = vpop.f32.mrb[37].mxu0 }
 0x250   : > { %1922 = vst [vmem:[%s8384_s0 + $0x48] sm:$0xff] %v8430_v45  ;;  %1924 = vst [vmem:[%s8384_s0 + $0x58] sm:$0xff] %v8432_v46  ;;  %v8438_v47 = vpop.f32.mrb[6].mxu1  ;;  %v8440_v48 = vpop.f32.mrb[38].mxu0 }
 0x251   : > { %1925 = vst [vmem:[%s8384_s0 + $0x60] sm:$0xff] %v8438_v47  ;;  %1927 = vst [vmem:[%s8384_s0 + $0x70] sm:$0xff] %v8440_v48  ;;  %v8450_v51 = vpop.f32.mrb[7].mxu1  ;;  %v8452_v52 = vpop.f32.mrb[39].mxu0 }
 0x252   : > { %1926 = vst [vmem:[%s8384_s0 + $0x68] sm:$0xff] %v8450_v51  ;;  %1928 = vst [vmem:[%s8384_s0 + $0x78] sm:$0xff] %v8452_v52 }
 0x256   : > { %v8462_v55 = vpop.f32.mrb[8].mxu1  ;;  %v8464_v56 = vpop.f32.mrb[40].mxu0 }
 0x257   : > { %1929 = vst [vmem:[%s8384_s0 + $0x80] sm:$0xff] %v8462_v55  ;;  %1931 = vst [vmem:[%s8384_s0 + $0x90] sm:$0xff] %v8464_v56  ;;  %v8470_v57 = vpop.f32.mrb[9].mxu1  ;;  %v8472_v58 = vpop.f32.mrb[41].mxu0 }
 0x258   : > { %1930 = vst [vmem:[%s8384_s0 + $0x88] sm:$0xff] %v8470_v57  ;;  %1932 = vst [vmem:[%s8384_s0 + $0x98] sm:$0xff] %v8472_v58  ;;  %v8478_v59 = vpop.f32.mrb[10].mxu1  ;;  %v8480_v60 = vpop.f32.mrb[42].mxu0 }
 0x259   : > { %1933 = vst [vmem:[%s8384_s0 + $0xa0] sm:$0xff] %v8478_v59  ;;  %1935 = vst [vmem:[%s8384_s0 + $0xb0] sm:$0xff] %v8480_v60  ;;  %v8490_v63 = vpop.f32.mrb[11].mxu1  ;;  %v8492_v0 = vpop.f32.mrb[43].mxu0 }
 0x25a   : > { %1934 = vst [vmem:[%s8384_s0 + $0xa8] sm:$0xff] %v8490_v63  ;;  %1936 = vst [vmem:[%s8384_s0 + $0xb8] sm:$0xff] %v8492_v0 }
 0x25e   : > { %v8502_v4 = vpop.f32.mrb[12].mxu1  ;;  %v8504_v5 = vpop.f32.mrb[44].mxu0 }
 0x25f   : > { %1937 = vst [vmem:[%s8384_s0 + $0xc0] sm:$0xff] %v8502_v4  ;;  %1939 = vst [vmem:[%s8384_s0 + $0xd0] sm:$0xff] %v8504_v5  ;;  %v8510_v6 = vpop.f32.mrb[13].mxu1  ;;  %v8512_v7 = vpop.f32.mrb[45].mxu0 }
 0x260   : > { %1938 = vst [vmem:[%s8384_s0 + $0xc8] sm:$0xff] %v8510_v6  ;;  %1940 = vst [vmem:[%s8384_s0 + $0xd8] sm:$0xff] %v8512_v7  ;;  %v8518_v8 = vpop.f32.mrb[14].mxu1  ;;  %v8520_v9 = vpop.f32.mrb[46].mxu0 }
 0x261   : > { %1941 = vst [vmem:[%s8384_s0 + $0xe0] sm:$0xff] %v8518_v8  ;;  %1943 = vst [vmem:[%s8384_s0 + $0xf0] sm:$0xff] %v8520_v9  ;;  %v8530_v12 = vpop.f32.mrb[15].mxu1  ;;  %v8532_v13 = vpop.f32.mrb[47].mxu0 }
 0x262   : > { %1942 = vst [vmem:[%s8384_s0 + $0xe8] sm:$0xff] %v8530_v12  ;;  %1944 = vst [vmem:[%s8384_s0 + $0xf8] sm:$0xff] %v8532_v13 }
 0x266   : > { %v8542_v16 = vpop.f32.mrb[16].mxu1  ;;  %v8544_v17 = vpop.f32.mrb[48].mxu0 }
 0x267   : > { %10011 = vst [vmem:[#allocation10_spill] sm:$0xff] %v8544_v17  ;;  %1945 = vst [vmem:[%s8384_s0 + $0x100] sm:$0xff] %v8542_v16  ;;  %v8550_v18 = vpop.f32.mrb[17].mxu1  ;;  %v8552_v19 = vpop.f32.mrb[49].mxu0 }
 0x268   : > { %1947 = vst [vmem:[%s8384_s0 + $0x110] sm:$0xff] %v8544_v17  ;;  %1946 = vst [vmem:[%s8384_s0 + $0x108] sm:$0xff] %v8550_v18  ;;  %v8558_v20 = vpop.f32.mrb[18].mxu1  ;;  %v8560_v21 = vpop.f32.mrb[50].mxu0 }
 0x269   : > { %1948 = vst [vmem:[%s8384_s0 + $0x118] sm:$0xff] %v8552_v19  ;;  %1949 = vst [vmem:[%s8384_s0 + $0x120] sm:$0xff] %v8558_v20  ;;  %v8570_v24 = vpop.f32.mrb[19].mxu1  ;;  %v8572_v25 = vpop.f32.mrb[51].mxu0 }
 0x26a   : > { %1951 = vst [vmem:[%s8384_s0 + $0x130] sm:$0xff] %v8560_v21  ;;  %1950 = vst [vmem:[%s8384_s0 + $0x128] sm:$0xff] %v8570_v24 }
 0x26b   : > { %1952 = vst [vmem:[%s8384_s0 + $0x138] sm:$0xff] %v8572_v25 }
 0x26e   : > { %v8584_v29 = vpop.f32.mrb[20].mxu1  ;;  %v8586_v30 = vpop.f32.mrb[52].mxu0 }
 0x26f   : > { %10012 = vst [vmem:[#allocation11_spill] sm:$0xff] %v8584_v29  ;;  %10013 = vst [vmem:[#allocation12_spill] sm:$0xff] %v8586_v30  ;;  %v8592_v23 = vpop.f32.mrb[21].mxu1  ;;  %v8594_v22 = vpop.f32.mrb[53].mxu0 }
 0x270   : > { %1953 = vst [vmem:[%s8384_s0 + $0x140] sm:$0xff] %v8584_v29  ;;  %1955 = vst [vmem:[%s8384_s0 + $0x150] sm:$0xff] %v8586_v30  ;;  %v8600_v27 = vpop.f32.mrb[22].mxu1  ;;  %v8602_v26 = vpop.f32.mrb[54].mxu0 }
 0x271   : > { %10014 = vst [vmem:[#allocation13_spill] sm:$0xff] %v8592_v23  ;;  %10015 = vst [vmem:[#allocation14_spill] sm:$0xff] %v8594_v22  ;;  %v8612_v15 = vpop.f32.mrb[23].mxu1  ;;  %v8614_v14 = vpop.f32.mrb[55].mxu0 }
 0x272   : > { %1954 = vst [vmem:[%s8384_s0 + $0x148] sm:$0xff] %v8592_v23  ;;  %1956 = vst [vmem:[%s8384_s0 + $0x158] sm:$0xff] %v8594_v22 }
 0x273   : > { %10016 = vst [vmem:[#allocation15_spill] sm:$0xff] %v8600_v27  ;;  %10017 = vst [vmem:[#allocation16_spill] sm:$0xff] %v8602_v26 }
 0x274   : > { %1957 = vst [vmem:[%s8384_s0 + $0x160] sm:$0xff] %v8600_v27  ;;  %1959 = vst [vmem:[%s8384_s0 + $0x170] sm:$0xff] %v8602_v26 }
 0x275   : > { %10018 = vst [vmem:[#allocation17_spill] sm:$0xff] %v8612_v15  ;;  %10019 = vst [vmem:[#allocation18_spill] sm:$0xff] %v8614_v14 }
 0x276   : > { %1958 = vst [vmem:[%s8384_s0 + $0x168] sm:$0xff] %v8612_v15  ;;  %1960 = vst [vmem:[%s8384_s0 + $0x178] sm:$0xff] %v8614_v14  ;;  %v8624_v10 = vpop.f32.mrb[24].mxu1  ;;  %v8626_v1 = vpop.f32.mrb[56].mxu0 }
 0x277   : > { %10020 = vst [vmem:[#allocation19_spill] sm:$0xff] %v8624_v10  ;;  %10021 = vst [vmem:[#allocation20_spill] sm:$0xff] %v8626_v1  ;;  %v8632_v50 = vpop.f32.mrb[25].mxu1  ;;  %v8634_v62 = vpop.f32.mrb[57].mxu0 }
 0x278   : > { %1961 = vst [vmem:[%s8384_s0 + $0x180] sm:$0xff] %v8624_v10  ;;  %1963 = vst [vmem:[%s8384_s0 + $0x190] sm:$0xff] %v8626_v1  ;;  %v8640_v11 = vpop.f32.mrb[26].mxu1  ;;  %v8642_v49 = vpop.f32.mrb[58].mxu0 }
 0x279   : > { %10022 = vst [vmem:[#allocation21_spill] sm:$0xff] %v8632_v50  ;;  %10023 = vst [vmem:[#allocation22_spill] sm:$0xff] %v8634_v62  ;;  %v8652_v38 = vpop.f32.mrb[27].mxu1  ;;  %v8654_v37 = vpop.f32.mrb[59].mxu0 }
 0x27a   : > { %1962 = vst [vmem:[%s8384_s0 + $0x188] sm:$0xff] %v8632_v50  ;;  %1964 = vst [vmem:[%s8384_s0 + $0x198] sm:$0xff] %v8634_v62 }
 0x27b   : > { %10024 = vst [vmem:[#allocation23_spill] sm:$0xff] %v8640_v11  ;;  %10025 = vst [vmem:[#allocation24_spill] sm:$0xff] %v8642_v49 }
 0x27c   : > { %1965 = vst [vmem:[%s8384_s0 + $0x1a0] sm:$0xff] %v8640_v11  ;;  %1967 = vst [vmem:[%s8384_s0 + $0x1b0] sm:$0xff] %v8642_v49  ;;  %v10036_v11 = vmov 0  }
 0x27d   : > { %10026 = vst [vmem:[#allocation25_spill] sm:$0xff] %v8652_v38  ;;  %10027 = vst [vmem:[#allocation26_spill] sm:$0xff] %v8654_v37 }
 0x27e   : > { %1966 = vst [vmem:[%s8384_s0 + $0x1a8] sm:$0xff] %v8652_v38  ;;  %1968 = vst [vmem:[%s8384_s0 + $0x1b8] sm:$0xff] %v8654_v37  ;;  %v8664_v53 = vpop.f32.mrb[28].mxu1  ;;  %v8666_v1 = vpop.f32.mrb[60].mxu0 }
 0x27f   : > { %10028 = vst [vmem:[#allocation27_spill] sm:$0xff] %v8664_v53  ;;  %10029 = vst [vmem:[#allocation28_spill] sm:$0xff] %v8666_v1  ;;  %v8672_v49 = vpop.f32.mrb[29].mxu1  ;;  %v8674_v42 = vpop.f32.mrb[61].mxu0 }
 0x280   : > { %1969 = vst [vmem:[%s8384_s0 + $0x1c0] sm:$0xff] %v8664_v53  ;;  %1971 = vst [vmem:[%s8384_s0 + $0x1d0] sm:$0xff] %v8666_v1  ;;  %v8680_v54 = vpop.f32.mrb[30].mxu1  ;;  %v8682_v10 = vpop.f32.mrb[62].mxu0 }
 0x281   : > { %10030 = vst [vmem:[#allocation29_spill] sm:$0xff] %v8672_v49  ;;  %10031 = vst [vmem:[#allocation30_spill] sm:$0xff] %v8674_v42  ;;  %v8692_v37 = vpop.f32.mrb[31].mxu1  ;;  %v8694_v50 = vpop.f32.mrb[63].mxu0 }
 0x282   : > { %1970 = vst [vmem:[%s8384_s0 + $0x1c8] sm:$0xff] %v8672_v49  ;;  %1972 = vst [vmem:[%s8384_s0 + $0x1d8] sm:$0xff] %v8674_v42  ;;  %v2096_v38 = vpop.permute.xlu0 %2095 }
 0x283   : > { %10032 = vst [vmem:[#allocation31_spill] sm:$0xff] %v8680_v54  ;;  %10033 = vst [vmem:[#allocation32_spill] sm:$0xff] %v8682_v10 }
 0x284   : > { %1973 = vst [vmem:[%s8384_s0 + $0x1e0] sm:$0xff] %v8680_v54  ;;  %1975 = vst [vmem:[%s8384_s0 + $0x1f0] sm:$0xff] %v8682_v10  ;;  %v2111_v54 = vpop.permute.xlu1 %2110 }
 0x285   : > { %10034 = vst [vmem:[#allocation33_spill] sm:$0xff] %v8692_v37  ;;  %10035 = vst [vmem:[#allocation34_spill] sm:$0xff] %v8694_v50 }
 0x286   : > { %1974 = vst [vmem:[%s8384_s0 + $0x1e8] sm:$0xff] %v8692_v37  ;;  %1976 = vst [vmem:[%s8384_s0 + $0x1f8] sm:$0xff] %v8694_v50  ;;  %v7008_v53 = vpop.f32.mrb[32].mxu1  ;;  %v2106_v29 = vpop.permute.xlu0 %2105 }
 0x287   : > { %v2283_v26 = vpop.f32.mrb[33].mxu1  ;;  %v2292_v1 = vadd.f32 %v7008_v53, %v2086_v41 }
 0x288   : > { %v7009_v62 = vpop.f32.mrb[34].mxu1  ;;  %v2284_v22 = vadd.f32 %v2283_v26, %v2076_v61  ;;  %v2121_v17 = vpop.permute.xlu1 %2120 }
 0x289   : > { %v2295_v10 = vadd.f32 %v7009_v62, %v2091_v2  ;;  %v2286_v27 = vpop.f32.mrb[35].mxu1 }
 0x28a   : > { %v2287_v14 = vadd.f32 %v2286_v27, %v8582_v28  ;;  %v2116_v30 = vpop.permute.xlu0 %2115 }
 0x28b   : > { %v2347_v23 = vpack.c.bf16 %v2295_v10, %v2292_v1 }
 0x28c   : > { %v2346_v15 = vpack.c.bf16 %v2287_v14, %v2284_v22  ;;  %v2131_v2 = vpop.permute.xlu1 %2130 }
 0x28e   : > { %v7012_v49 = vpop.f32.mrb[36].mxu1  ;;  %2579 = vmatmul.mubr.bf16.vlgmr.msra.gmra.mrb[48].mxu1 %v2346_v15  ;;  %2692 = vmatmul.mubr.bf16.vlgmr.msra.gmra.mrb[64].mxu0 %v2346_v15  ;;  %v2126_v1 = vpop.permute.xlu0 %2125 }
 0x28f   : > { %v2299_v37 = vpop.f32.mrb[37].mxu1  ;;  %2588 = vmatprep.mubr.bf16.mxu1 %v10036_v11  ;;  %2701 = vmatprep.mubr.bf16.mxu0 %v10036_v11  ;;  %v2308_v50 = vadd.f32 %v7012_v49, %v2106_v29 }
 0x290   : > { %v7013_v42 = vpop.f32.mrb[38].mxu1  ;;  %v2300_v62 = vadd.f32 %v2299_v37, %v2096_v38  ;;  %v2141_v27 = vpop.permute.xlu1 %2140 }
 0x291   : > { %v2311_v41 = vadd.f32 %v7013_v42, %v2111_v54  ;;  %v2302_v53 = vpop.f32.mrb[39].mxu1 }
 0x292   : > { %v2303_v61 = vadd.f32 %v2302_v53, %v2101_v3  ;;  %v2136_v54 = vpop.permute.xlu0 %2135 }
 0x293   : > { %v2349_v26 = vpack.c.bf16 %v2311_v41, %v2308_v50 }
 0x294   : > { %v2348_v10 = vpack.c.bf16 %v2303_v61, %v2300_v62  ;;  %v2151_v41 = vpop.permute.xlu1 %2150 }
 0x296   : > { %v7016_v14 = vpop.f32.mrb[40].mxu1  ;;  %2589 = vmatmul.mubr.bf16.gmra.mrb[52].mxu1 %v2347_v23  ;;  %2702 = vmatmul.mubr.bf16.gmra.mrb[68].mxu0 %v2347_v23  ;;  %v2146_v53 = vpop.permute.xlu0 %2145 }
 0x297   : > { %v2315_v22 = vpop.f32.mrb[41].mxu1  ;;  %2598 = vmatprep.mubr.bf16.mxu1 %v10036_v11  ;;  %2711 = vmatprep.mubr.bf16.mxu0 %v10036_v11  ;;  %v2324_v28 = vadd.f32 %v7016_v14, %v2126_v1 }
 0x298   : > { %v7017_v15 = vpop.f32.mrb[42].mxu1  ;;  %v2316_v37 = vadd.f32 %v2315_v22, %v2116_v30 }
 0x299   : > { %v2327_v49 = vadd.f32 %v7017_v15, %v2131_v2  ;;  %v2318_v42 = vpop.f32.mrb[43].mxu1 }
 0x29a   : > { %v2319_v3 = vadd.f32 %v2318_v42, %v2121_v17 }
 0x29b   : > { %v2351_v38 = vpack.c.bf16 %v2327_v49, %v2324_v28 }
 0x29c   : > { %v2350_v50 = vpack.c.bf16 %v2319_v3, %v2316_v37 }
 0x29e   : > { %v7020_v29 = vpop.f32.mrb[44].mxu1  ;;  %2599 = vmatmul.mubr.bf16.gmra.mrb[56].mxu1 %v2348_v10  ;;  %2712 = vmatmul.mubr.bf16.gmra.mrb[72].mxu0 %v2348_v10 }
 0x29f   : > { %v2331_v23 = vpop.f32.mrb[45].mxu1  ;;  %2608 = vmatprep.mubr.bf16.mxu1 %v10036_v11  ;;  %2721 = vmatprep.mubr.bf16.mxu0 %v10036_v11  ;;  %v2340_v61 = vadd.f32 %v7020_v29, %v2146_v53 }
 0x2a0   : > { %v7021_v62 = vpop.f32.mrb[46].mxu1  ;;  %v2332_v14 = vadd.f32 %v2331_v23, %v2136_v54 }
 0x2a1   : > { %v2343_v1 = vadd.f32 %v7021_v62, %v2151_v41  ;;  %v2334_v2 = vpop.f32.mrb[47].mxu1 }
 0x2a2   : > { %v2335_v15 = vadd.f32 %v2334_v2, %v2141_v27 }
 0x2a3   : > { %v2353_v30 = vpack.c.bf16 %v2343_v1, %v2340_v61 }
 0x2a4   : > { %v2352_v17 = vpack.c.bf16 %v2335_v15, %v2332_v14 }
 0x2a6   : > { %2609 = vmatmul.mubr.bf16.gmra.mrb[60].mxu1 %v2349_v26  ;;  %2722 = vmatmul.mubr.bf16.gmra.mrb[76].mxu0 %v2349_v26 }
 0x2a7   : > { %2618 = vmatprep.mubr.bf16.mxu1 %v10036_v11  ;;  %2731 = vmatprep.mubr.bf16.mxu0 %v10036_v11 }
 0x2ae   : > { %2619 = vmatmul.mubr.bf16.gmra.mrb[64].mxu1 %v2350_v50  ;;  %2732 = vmatmul.mubr.bf16.gmra.mrb[80].mxu0 %v2350_v50 }
 0x2af   : > { %2628 = vmatprep.mubr.bf16.mxu1 %v10036_v11  ;;  %2741 = vmatprep.mubr.bf16.mxu0 %v10036_v11 }
 0x2b6   : > { %2629 = vmatmul.mubr.bf16.gmra.mrb[68].mxu1 %v2351_v38  ;;  %2742 = vmatmul.mubr.bf16.gmra.mrb[84].mxu0 %v2351_v38 }
 0x2b7   : > { %2638 = vmatprep.mubr.bf16.mxu1 %v10036_v11  ;;  %2751 = vmatprep.mubr.bf16.mxu0 %v10036_v11 }
 0x2be   : > { %2639 = vmatmul.mubr.bf16.gmra.mrb[72].mxu1 %v2352_v17  ;;  %2752 = vmatmul.mubr.bf16.gmra.mrb[88].mxu0 %v2352_v17 }
 0x2bf   : > { %2648 = vmatprep.mubr.bf16.mxu1 %v10036_v11  ;;  %2761 = vmatprep.mubr.bf16.mxu0 %v10036_v11 }
 0x2c6   : > { %2649 = vmatmul.mubr.bf16.gmra.mrb[76].mxu1 %v2353_v30  ;;  %2762 = vmatmul.mubr.bf16.gmra.mrb[92].mxu0 %v2353_v30 }
 0x2c7   : > { %2965 = vmatprep.mubr.bf16.mxu1 %v10036_v11  ;;  %3078 = vmatprep.mubr.bf16.mxu0 %v10036_v11 }
 0x361   : > { %v2580_v26 = vpop.f32.mrb[48].mxu1  ;;  %v2693_v10 = vpop.f32.mrb[64].mxu0 }
 0x362   : > { %2772 = vst [vmem:[%s8384_s0 + $0x200] sm:$0xff] %v2580_v26  ;;  %2774 = vst [vmem:[%s8384_s0 + $0x210] sm:$0xff] %v2693_v10  ;;  %v2582_v22 = vpop.f32.mrb[49].mxu1  ;;  %v2695_v27 = vpop.f32.mrb[65].mxu0 }
 0x363   : > { %2773 = vst [vmem:[%s8384_s0 + $0x208] sm:$0xff] %v2582_v22  ;;  %2775 = vst [vmem:[%s8384_s0 + $0x218] sm:$0xff] %v2695_v27  ;;  %v2584_v28 = vpop.f32.mrb[50].mxu1  ;;  %v2697_v49 = vpop.f32.mrb[66].mxu0 }
 0x364   : > { %2776 = vst [vmem:[%s8384_s0 + $0x220] sm:$0xff] %v2584_v28  ;;  %v2853_v42 = vpack.c.bf16 %v2584_v28, %v2580_v26  ;;  %2778 = vst [vmem:[%s8384_s0 + $0x230] sm:$0xff] %v2697_v49  ;;  %v2855_v54 = vpack.c.bf16 %v2697_v49, %v2693_v10  ;;  %v2586_v37 = vpop.f32.mrb[51].mxu1  ;;  %v2699_v3 = vpop.f32.mrb[67].mxu0 }
 0x365   : > { %2777 = vst [vmem:[%s8384_s0 + $0x228] sm:$0xff] %v2586_v37  ;;  %v2854_v38 = vpack.c.bf16 %v2586_v37, %v2582_v22  ;;  %2779 = vst [vmem:[%s8384_s0 + $0x238] sm:$0xff] %v2699_v3  ;;  %v2856_v50 = vpack.c.bf16 %v2699_v3, %v2695_v27 }
 0x367   : > { %2933 = vmatprep.subr.bf16.mxu1 %v2854_v38  ;;  %3046 = vmatprep.subr.bf16.mxu0 %v2856_v50 }
 0x368   : > { %2934 = vmatpush1.bf16.msra.mxu1 %v2853_v42  ;;  %3047 = vmatpush1.bf16.msra.mxu0 %v2855_v54 }
 0x369   : > { %v2590_v29 = vpop.f32.mrb[52].mxu1  ;;  %v2703_v41 = vpop.f32.mrb[68].mxu0 }
 0x36a   : > { %2780 = vst [vmem:[%s8384_s0 + $0x240] sm:$0xff] %v2590_v29  ;;  %2782 = vst [vmem:[%s8384_s0 + $0x250] sm:$0xff] %v2703_v41  ;;  %v2592_v23 = vpop.f32.mrb[53].mxu1  ;;  %v2705_v53 = vpop.f32.mrb[69].mxu0 }
 0x36b   : > { %2781 = vst [vmem:[%s8384_s0 + $0x248] sm:$0xff] %v2592_v23  ;;  %2783 = vst [vmem:[%s8384_s0 + $0x258] sm:$0xff] %v2705_v53  ;;  %v2594_v62 = vpop.f32.mrb[54].mxu1  ;;  %v2707_v61 = vpop.f32.mrb[70].mxu0 }
 0x36c   : > { %2784 = vst [vmem:[%s8384_s0 + $0x260] sm:$0xff] %v2594_v62  ;;  %v2857_v1 = vpack.c.bf16 %v2594_v62, %v2590_v29  ;;  %2786 = vst [vmem:[%s8384_s0 + $0x270] sm:$0xff] %v2707_v61  ;;  %v2859_v2 = vpack.c.bf16 %v2707_v61, %v2703_v41  ;;  %v2596_v14 = vpop.f32.mrb[55].mxu1  ;;  %v2709_v15 = vpop.f32.mrb[71].mxu0 }
 0x36d   : > { %2785 = vst [vmem:[%s8384_s0 + $0x268] sm:$0xff] %v2596_v14  ;;  %v2858_v30 = vpack.c.bf16 %v2596_v14, %v2592_v23  ;;  %2787 = vst [vmem:[%s8384_s0 + $0x278] sm:$0xff] %v2709_v15  ;;  %v2860_v17 = vpack.c.bf16 %v2709_v15, %v2705_v53 }
 0x36f   : > { %2935 = vmatprep.subr.bf16.mxu1 %v2858_v30  ;;  %3048 = vmatprep.subr.bf16.mxu0 %v2860_v17 }
 0x370   : > { %2936 = vmatpush1.bf16.msra.mxu1 %v2857_v1  ;;  %3049 = vmatpush1.bf16.msra.mxu0 %v2859_v2 }
 0x371   : > { %v2600_v26 = vpop.f32.mrb[56].mxu1  ;;  %v2713_v10 = vpop.f32.mrb[72].mxu0 }
 0x372   : > { %2788 = vst [vmem:[%s8384_s0 + $0x280] sm:$0xff] %v2600_v26  ;;  %2790 = vst [vmem:[%s8384_s0 + $0x290] sm:$0xff] %v2713_v10  ;;  %v2602_v22 = vpop.f32.mrb[57].mxu1  ;;  %v2715_v27 = vpop.f32.mrb[73].mxu0 }
 0x373   : > { %2789 = vst [vmem:[%s8384_s0 + $0x288] sm:$0xff] %v2602_v22  ;;  %2791 = vst [vmem:[%s8384_s0 + $0x298] sm:$0xff] %v2715_v27  ;;  %v2604_v28 = vpop.f32.mrb[58].mxu1  ;;  %v2717_v49 = vpop.f32.mrb[74].mxu0 }
 0x374   : > { %2792 = vst [vmem:[%s8384_s0 + $0x2a0] sm:$0xff] %v2604_v28  ;;  %v2861_v42 = vpack.c.bf16 %v2604_v28, %v2600_v26  ;;  %2794 = vst [vmem:[%s8384_s0 + $0x2b0] sm:$0xff] %v2717_v49  ;;  %v2863_v54 = vpack.c.bf16 %v2717_v49, %v2713_v10  ;;  %v2606_v37 = vpop.f32.mrb[59].mxu1  ;;  %v2719_v3 = vpop.f32.mrb[75].mxu0 }
 0x375   : > { %2793 = vst [vmem:[%s8384_s0 + $0x2a8] sm:$0xff] %v2606_v37  ;;  %v2862_v38 = vpack.c.bf16 %v2606_v37, %v2602_v22  ;;  %2795 = vst [vmem:[%s8384_s0 + $0x2b8] sm:$0xff] %v2719_v3  ;;  %v2864_v50 = vpack.c.bf16 %v2719_v3, %v2715_v27 }
 0x377   : > { %2937 = vmatprep.subr.bf16.mxu1 %v2862_v38  ;;  %3050 = vmatprep.subr.bf16.mxu0 %v2864_v50 }
 0x378   : > { %2938 = vmatpush1.bf16.msra.mxu1 %v2861_v42  ;;  %3051 = vmatpush1.bf16.msra.mxu0 %v2863_v54 }
 0x379   : > { %v2610_v29 = vpop.f32.mrb[60].mxu1  ;;  %v2723_v41 = vpop.f32.mrb[76].mxu0 }
 0x37a   : > { %2796 = vst [vmem:[%s8384_s0 + $0x2c0] sm:$0xff] %v2610_v29  ;;  %2798 = vst [vmem:[%s8384_s0 + $0x2d0] sm:$0xff] %v2723_v41  ;;  %v2612_v23 = vpop.f32.mrb[61].mxu1  ;;  %v2725_v53 = vpop.f32.mrb[77].mxu0 }
 0x37b   : > { %2797 = vst [vmem:[%s8384_s0 + $0x2c8] sm:$0xff] %v2612_v23  ;;  %2799 = vst [vmem:[%s8384_s0 + $0x2d8] sm:$0xff] %v2725_v53  ;;  %v2614_v62 = vpop.f32.mrb[62].mxu1  ;;  %v2727_v61 = vpop.f32.mrb[78].mxu0 }
 0x37c   : > { %2800 = vst [vmem:[%s8384_s0 + $0x2e0] sm:$0xff] %v2614_v62  ;;  %v2865_v1 = vpack.c.bf16 %v2614_v62, %v2610_v29  ;;  %2802 = vst [vmem:[%s8384_s0 + $0x2f0] sm:$0xff] %v2727_v61  ;;  %v2867_v2 = vpack.c.bf16 %v2727_v61, %v2723_v41  ;;  %v2616_v14 = vpop.f32.mrb[63].mxu1  ;;  %v2729_v15 = vpop.f32.mrb[79].mxu0 }
 0x37d   : > { %2801 = vst [vmem:[%s8384_s0 + $0x2e8] sm:$0xff] %v2616_v14  ;;  %v2866_v30 = vpack.c.bf16 %v2616_v14, %v2612_v23  ;;  %2803 = vst [vmem:[%s8384_s0 + $0x2f8] sm:$0xff] %v2729_v15  ;;  %v2868_v17 = vpack.c.bf16 %v2729_v15, %v2725_v53 }
 0x37f   : > { %2939 = vmatprep.subr.bf16.mxu1 %v2866_v30  ;;  %3052 = vmatprep.subr.bf16.mxu0 %v2868_v17 }
 0x380   : > { %2940 = vmatpush1.bf16.msra.mxu1 %v2865_v1  ;;  %3053 = vmatpush1.bf16.msra.mxu0 %v2867_v2 }
 0x381   : > { %v2620_v26 = vpop.f32.mrb[64].mxu1  ;;  %v2733_v10 = vpop.f32.mrb[80].mxu0 }
 0x382   : > { %2804 = vst [vmem:[%s8384_s0 + $0x300] sm:$0xff] %v2620_v26  ;;  %2806 = vst [vmem:[%s8384_s0 + $0x310] sm:$0xff] %v2733_v10  ;;  %v2622_v22 = vpop.f32.mrb[65].mxu1  ;;  %v2735_v27 = vpop.f32.mrb[81].mxu0 }
 0x383   : > { %2805 = vst [vmem:[%s8384_s0 + $0x308] sm:$0xff] %v2622_v22  ;;  %2807 = vst [vmem:[%s8384_s0 + $0x318] sm:$0xff] %v2735_v27  ;;  %v2624_v28 = vpop.f32.mrb[66].mxu1  ;;  %v2737_v49 = vpop.f32.mrb[82].mxu0 }
 0x384   : > { %2808 = vst [vmem:[%s8384_s0 + $0x320] sm:$0xff] %v2624_v28  ;;  %v2869_v42 = vpack.c.bf16 %v2624_v28, %v2620_v26  ;;  %2810 = vst [vmem:[%s8384_s0 + $0x330] sm:$0xff] %v2737_v49  ;;  %v2871_v54 = vpack.c.bf16 %v2737_v49, %v2733_v10  ;;  %v2626_v37 = vpop.f32.mrb[67].mxu1  ;;  %v2739_v3 = vpop.f32.mrb[83].mxu0 }
 0x385   : > { %2809 = vst [vmem:[%s8384_s0 + $0x328] sm:$0xff] %v2626_v37  ;;  %v2870_v38 = vpack.c.bf16 %v2626_v37, %v2622_v22  ;;  %2811 = vst [vmem:[%s8384_s0 + $0x338] sm:$0xff] %v2739_v3  ;;  %v2872_v50 = vpack.c.bf16 %v2739_v3, %v2735_v27 }
 0x387   : > { %2941 = vmatprep.subr.bf16.mxu1 %v2870_v38  ;;  %3054 = vmatprep.subr.bf16.mxu0 %v2872_v50 }
 0x388   : > { %2942 = vmatpush1.bf16.msra.mxu1 %v2869_v42  ;;  %3055 = vmatpush1.bf16.msra.mxu0 %v2871_v54 }
 0x389   : > { %v2630_v29 = vpop.f32.mrb[68].mxu1  ;;  %v2743_v41 = vpop.f32.mrb[84].mxu0 }
 0x38a   : > { %2812 = vst [vmem:[%s8384_s0 + $0x340] sm:$0xff] %v2630_v29  ;;  %2814 = vst [vmem:[%s8384_s0 + $0x350] sm:$0xff] %v2743_v41  ;;  %v2632_v23 = vpop.f32.mrb[69].mxu1  ;;  %v2745_v53 = vpop.f32.mrb[85].mxu0 }
 0x38b   : > { %2813 = vst [vmem:[%s8384_s0 + $0x348] sm:$0xff] %v2632_v23  ;;  %2815 = vst [vmem:[%s8384_s0 + $0x358] sm:$0xff] %v2745_v53  ;;  %v2634_v62 = vpop.f32.mrb[70].mxu1  ;;  %v2747_v61 = vpop.f32.mrb[86].mxu0 }
 0x38c   : > { %2816 = vst [vmem:[%s8384_s0 + $0x360] sm:$0xff] %v2634_v62  ;;  %v2873_v1 = vpack.c.bf16 %v2634_v62, %v2630_v29  ;;  %2818 = vst [vmem:[%s8384_s0 + $0x370] sm:$0xff] %v2747_v61  ;;  %v2875_v2 = vpack.c.bf16 %v2747_v61, %v2743_v41  ;;  %v2636_v14 = vpop.f32.mrb[71].mxu1  ;;  %v2749_v15 = vpop.f32.mrb[87].mxu0 }
 0x38d   : > { %2817 = vst [vmem:[%s8384_s0 + $0x368] sm:$0xff] %v2636_v14  ;;  %v2874_v30 = vpack.c.bf16 %v2636_v14, %v2632_v23  ;;  %2819 = vst [vmem:[%s8384_s0 + $0x378] sm:$0xff] %v2749_v15  ;;  %v2876_v17 = vpack.c.bf16 %v2749_v15, %v2745_v53 }
 0x38f   : > { %2943 = vmatprep.subr.bf16.mxu1 %v2874_v30  ;;  %3056 = vmatprep.subr.bf16.mxu0 %v2876_v17 }
 0x390   : > { %2944 = vmatpush1.bf16.msra.mxu1 %v2873_v1  ;;  %3057 = vmatpush1.bf16.msra.mxu0 %v2875_v2 }
 0x391   : > { %v2640_v26 = vpop.f32.mrb[72].mxu1  ;;  %v2753_v10 = vpop.f32.mrb[88].mxu0 }
 0x392   : > { %2820 = vst [vmem:[%s8384_s0 + $0x380] sm:$0xff] %v2640_v26  ;;  %2822 = vst [vmem:[%s8384_s0 + $0x390] sm:$0xff] %v2753_v10  ;;  %v2642_v22 = vpop.f32.mrb[73].mxu1  ;;  %v2755_v27 = vpop.f32.mrb[89].mxu0 }
 0x393   : > { %2821 = vst [vmem:[%s8384_s0 + $0x388] sm:$0xff] %v2642_v22  ;;  %2823 = vst [vmem:[%s8384_s0 + $0x398] sm:$0xff] %v2755_v27  ;;  %v2644_v28 = vpop.f32.mrb[74].mxu1  ;;  %v2757_v49 = vpop.f32.mrb[90].mxu0 }
 0x394   : > { %2824 = vst [vmem:[%s8384_s0 + $0x3a0] sm:$0xff] %v2644_v28  ;;  %v2877_v42 = vpack.c.bf16 %v2644_v28, %v2640_v26  ;;  %2826 = vst [vmem:[%s8384_s0 + $0x3b0] sm:$0xff] %v2757_v49  ;;  %v2879_v54 = vpack.c.bf16 %v2757_v49, %v2753_v10  ;;  %v2646_v37 = vpop.f32.mrb[75].mxu1  ;;  %v2759_v3 = vpop.f32.mrb[91].mxu0  ;;  %v7418_v26 = vld [vmem:[%s9958_s15 + $0x40] sm:$0xff]   ;;  %v10037_v10 = vpack.c.bf16 %v8410_v39, %v8390_v33 }
 0x395   : > { %2825 = vst [vmem:[%s8384_s0 + $0x3a8] sm:$0xff] %v2646_v37  ;;  %v2878_v38 = vpack.c.bf16 %v2646_v37, %v2642_v22  ;;  %2827 = vst [vmem:[%s8384_s0 + $0x3b8] sm:$0xff] %v2759_v3  ;;  %v2880_v50 = vpack.c.bf16 %v2759_v3, %v2755_v27  ;;  %v10038_v22 = vpack.c.bf16 %v8412_v40, %v8392_v34  ;;  %v10080_v37 = vld [vmem:[#allocation20_spill] sm:$0xff] }
 0x396   : > { %v10039_v27 = vpack.c.bf16 %v8398_v35, %v8380_v31  ;;  %v10040_v28 = vpack.c.bf16 %v8400_v36, %v8382_v32  ;;  %v10041_v49 = vpack.c.bf16 %v8450_v51, %v8430_v45  ;;  %v10042_v33 = vpack.c.bf16 %v8452_v52, %v8432_v46  ;;  %v7419_v31 = vld [vmem:[%s9958_s15 + $0x48] sm:$0xff]   ;;  %v7420_v45 = vld [vmem:[%s9958_s15 + $0x50] sm:$0xff]  }
 0x397   : > { %2945 = vmatprep.subr.bf16.mxu1 %v2878_v38  ;;  %3058 = vmatprep.subr.bf16.mxu0 %v2880_v50  ;;  %v10043_v32 = vpack.c.bf16 %v8438_v47, %v8422_v43  ;;  %v10044_v34 = vpack.c.bf16 %v8440_v48, %v8424_v44  ;;  %v10045_v35 = vpack.c.bf16 %v8490_v63, %v8470_v57  ;;  %v10058_v57 = vld [vmem:[#allocation17_spill] sm:$0xff]  ;;  %v10062_v63 = vld [vmem:[#allocation14_spill] sm:$0xff] }
 0x398   : > { %2946 = vmatpush1.bf16.msra.mxu1 %v2877_v42  ;;  %3059 = vmatpush1.bf16.msra.mxu0 %v2879_v54  ;;  %v10046_v36 = vpack.c.bf16 %v8492_v0, %v8472_v58  ;;  %v10047_v39 = vpack.c.bf16 %v8478_v59, %v8462_v55  ;;  %v10048_v40 = vpack.c.bf16 %v8480_v60, %v8464_v56  ;;  %v10056_v55 = vld [vmem:[#allocation10_spill] sm:$0xff]  ;;  %v10059_v58 = vld [vmem:[#allocation13_spill] sm:$0xff]  ;;  %v10079_v54 = vld [vmem:[#allocation24_spill] sm:$0xff] }
 0x399   : > { %v2650_v29 = vpop.f32.mrb[76].mxu1  ;;  %v2763_v41 = vpop.f32.mrb[92].mxu0  ;;  %v10049_v43 = vpack.c.bf16 %v8530_v12, %v8510_v6  ;;  %v10050_v44 = vpack.c.bf16 %v8532_v13, %v8512_v7  ;;  %v10051_v46 = vpack.c.bf16 %v8518_v8, %v8502_v4  ;;  %v10052_v47 = vpack.c.bf16 %v8520_v9, %v8504_v5  ;;  %v10061_v60 = vld [vmem:[#allocation18_spill] sm:$0xff]  ;;  %v7421_v4 = vld [vmem:[%s9958_s15 + $0x58] sm:$0xff]   ;;  %v10064_v5 = vld [vmem:[#allocation15_spill] sm:$0xff] }
 0x39a   : > { %2828 = vst [vmem:[%s8384_s0 + $0x3c0] sm:$0xff] %v2650_v29  ;;  %2830 = vst [vmem:[%s8384_s0 + $0x3d0] sm:$0xff] %v2763_v41  ;;  %v2652_v23 = vpop.f32.mrb[77].mxu1  ;;  %v2765_v53 = vpop.f32.mrb[93].mxu0  ;;  %v10053_v48 = vpack.c.bf16 %v8570_v24, %v8550_v18  ;;  %v10054_v51 = vpack.c.bf16 %v8572_v25, %v8552_v19  ;;  %v10055_v52 = vpack.c.bf16 %v8558_v20, %v8542_v16  ;;  %v10065_v6 = vld [vmem:[#allocation11_spill] sm:$0xff]  ;;  %v10067_v8 = vld [vmem:[#allocation16_spill] sm:$0xff] }
 0x39b   : > { %2829 = vst [vmem:[%s8384_s0 + $0x3c8] sm:$0xff] %v2652_v23  ;;  %2831 = vst [vmem:[%s8384_s0 + $0x3d8] sm:$0xff] %v2765_v53  ;;  %v2654_v62 = vpop.f32.mrb[78].mxu1  ;;  %v2767_v61 = vpop.f32.mrb[94].mxu0  ;;  %v10057_v56 = vpack.c.bf16 %v8560_v21, %v10056_v55  ;;  %v10060_v59 = vpack.c.bf16 %v10058_v57, %v10059_v58  ;;  %v10063_v0 = vpack.c.bf16 %v10061_v60, %v10062_v63  ;;  %v10068_v9 = vld [vmem:[#allocation12_spill] sm:$0xff]  ;;  %v10070_v13 = vld [vmem:[#allocation25_spill] sm:$0xff] }
 0x39c   : > { %2832 = vst [vmem:[%s8384_s0 + $0x3e0] sm:$0xff] %v2654_v62  ;;  %v2881_v1 = vpack.c.bf16 %v2654_v62, %v2650_v29  ;;  %2834 = vst [vmem:[%s8384_s0 + $0x3f0] sm:$0xff] %v2767_v61  ;;  %v2883_v2 = vpack.c.bf16 %v2767_v61, %v2763_v41  ;;  %v2656_v14 = vpop.f32.mrb[79].mxu1  ;;  %v2769_v15 = vpop.f32.mrb[95].mxu0  ;;  %v10066_v7 = vpack.c.bf16 %v10064_v5, %v10065_v6  ;;  %v10071_v16 = vld [vmem:[#allocation21_spill] sm:$0xff]  ;;  %v10073_v19 = vld [vmem:[#allocation26_spill] sm:$0xff] }
 0x39d   : > { %2833 = vst [vmem:[%s8384_s0 + $0x3e8] sm:$0xff] %v2656_v14  ;;  %v2882_v30 = vpack.c.bf16 %v2656_v14, %v2652_v23  ;;  %2835 = vst [vmem:[%s8384_s0 + $0x3f8] sm:$0xff] %v2769_v15  ;;  %v2884_v17 = vpack.c.bf16 %v2769_v15, %v2765_v53  ;;  %v10069_v12 = vpack.c.bf16 %v10067_v8, %v10068_v9  ;;  %v10074_v20 = vld [vmem:[#allocation22_spill] sm:$0xff]  ;;  %v10076_v24 = vld [vmem:[#allocation23_spill] sm:$0xff] }
 0x39e   : > { %v10072_v18 = vpack.c.bf16 %v10070_v13, %v10071_v16  ;;  %v10075_v21 = vpack.c.bf16 %v10073_v19, %v10074_v20  ;;  %v10077_v25 = vld [vmem:[#allocation19_spill] sm:$0xff]  ;;  %v10081_v3 = vpack.c.bf16 %v10079_v54, %v10080_v37  ;;  %v10082_v38 = vld [vmem:[#allocation33_spill] sm:$0xff]  ;;  %v10085_v41 = vld [vmem:[#allocation34_spill] sm:$0xff] }
 0x39f   : > { %2947 = vmatprep.subr.bf16.mxu1 %v2882_v30  ;;  %3060 = vmatprep.subr.bf16.mxu0 %v2884_v17  ;;  %v10078_v42 = vpack.c.bf16 %v10076_v24, %v10077_v25  ;;  %v10083_v50 = vld [vmem:[#allocation29_spill] sm:$0xff]  ;;  %v10086_v23 = vld [vmem:[#allocation30_spill] sm:$0xff]  ;;  %v10089_v14 = vld [vmem:[#allocation27_spill] sm:$0xff] }
 0x3a0   : > { %2948 = vmatpush1.bf16.msra.mxu1 %v2881_v1  ;;  %3061 = vmatpush1.bf16.msra.mxu0 %v2883_v2  ;;  %v10084_v29 = vpack.c.bf16 %v10082_v38, %v10083_v50  ;;  %v10087_v53 = vpack.c.bf16 %v10085_v41, %v10086_v23  ;;  %v7427_v62 = vld [vmem:[%s8730_s28] sm:$0xff]   ;;  %v10088_v2 = vld [vmem:[#allocation31_spill] sm:$0xff]  ;;  %v10091_v30 = vld [vmem:[#allocation32_spill] sm:$0xff] }
 0x3a1   : > { %3207 = vmatprep.subr.bf16.mxu1 %v10037_v10  ;;  %3320 = vmatprep.subr.bf16.mxu0 %v10038_v22  ;;  %v7448_v61 = vld [vmem:[%s9957_s14 + $0x4] ss:$16 sps:$4 sm:$0xff]   ;;  %v10090_v15 = vpack.c.bf16 %v10088_v2, %v10089_v14  ;;  %v7423_v10 = vld [vmem:[%s9958_s15 + $0x68] sm:$0xff]   ;;  %v7431_v55 = vld [vmem:[%s9958_s15 + $0x18] sm:$0xff]  }
 0x3a2   : > { %v7422_v1 = vld [vmem:[%s9958_s15 + $0x60] sm:$0xff]   ;;  %v10092_v17 = vld [vmem:[#allocation28_spill] sm:$0xff]  ;;  %v7469_v9 = vld [vmem:[%s9957_s14 + $0x4c] ss:$16 sps:$4 sm:$0xff]  }
 0x3a3   : > { %2966 = vmatmul.mubr.bf16.vlgmr.msra.gmra.mrb[80].mxu1 %v7418_v26  ;;  %3079 = vmatmul.mubr.bf16.vlgmr.msra.gmra.mrb[96].mxu0 %v7418_v26  ;;  %v10093_v26 = vpack.c.bf16 %v10091_v30, %v10092_v17  ;;  %v7424_v22 = vld [vmem:[%s9958_s15 + $0x70] sm:$0xff]   ;;  %v7432_v58 = vld [vmem:[%s9958_s15 + $0x20] sm:$0xff]   ;;  %v7437_v63 = vld [vmem:[%s9958_s15 + $0x38] sm:$0xff]  }
 0x3a4   : > { %3208 = vmatpush1.bf16.msra.mxu1 %v10039_v27  ;;  %3321 = vmatpush1.bf16.msra.mxu0 %v10040_v28  ;;  %v7425_v27 = vld [vmem:[%s9958_s15 + $0x78] sm:$0xff]   ;;  %v7426_v28 = vld [vmem:[%s9958_s15] sm:$0xff]   ;;  %v7435_v60 = vld [vmem:[%s9958_s15 + $0x30] sm:$0xff]  }
 0x3a5   : > { %3209 = vmatprep.subr.bf16.mxu1 %v10041_v49  ;;  %3322 = vmatprep.subr.bf16.mxu0 %v10042_v33  ;;  %v7430_v49 = vld [vmem:[%s8730_s28 + $0x8] sm:$0xff]   ;;  %v7442_v13 = vld [vmem:[%s9951_s8 + $0x20] sm:$0xff]   ;;  %v7445_v37 = vld [vmem:[%s9951_s8 + $0x38] sm:$0xff]  }
 0x3a6   : > { %2975 = vmatprep.mubr.bf16.mxu1 %v10036_v11  ;;  %3088 = vmatprep.mubr.bf16.mxu0 %v10036_v11  ;;  %v7446_v33 = vld [vmem:[%s9957_s14] ss:$16 sps:$4 sm:$0xff]   ;;  %v7458_v6 = vld [vmem:[%s9957_s14 + $0x8] ss:$16 sps:$4 sm:$0xff]   ;;  %v7478_v20 = vld [vmem:[%s9957_s14 + $0x8c] ss:$16 sps:$4 sm:$0xff]  }
 0x3a7   : > { %v7479_v57 = vld [vmem:[%s9957_s14 + $0xc0] ss:$16 sps:$4 sm:$0xff]   ;;  %v7464_v8 = vld [vmem:[%s9957_s14 + $0x28] ss:$16 sps:$4 sm:$0xff]   ;;  %v7490_v50 = vld [vmem:[%s9957_s14 + $0xe4] ss:$16 sps:$4 sm:$0xff]  }
 0x3a8   : > { %3210 = vmatpush1.bf16.msra.mxu1 %v10043_v32  ;;  %3323 = vmatpush1.bf16.msra.mxu0 %v10044_v34  ;;  %v7433_v32 = vld [vmem:[%s8730_s28 + $0x10] sm:$0xff]  }
 0x3a9   : > { %3211 = vmatprep.subr.bf16.mxu1 %v10045_v35  ;;  %3324 = vmatprep.subr.bf16.mxu0 %v10046_v36  ;;  %v7449_v34 = vld [vmem:[%s9957_s14 + $0x20] ss:$16 sps:$4 sm:$0xff]   ;;  %v7454_v35 = vld [vmem:[%s9957_s14 + $0x44] ss:$16 sps:$4 sm:$0xff]   ;;  %v7428_v36 = vld [vmem:[%s9958_s15 + $0x8] sm:$0xff]  }
 0x3aa   : > { %v7440_v5 = vld [vmem:[%s9951_s8 + $0x10] sm:$0xff]   ;;  %v7467_v16 = vld [vmem:[%s9957_s14 + $0x48] ss:$16 sps:$4 sm:$0xff]  }
 0x3ab   : > { %2976 = vmatmul.mubr.bf16.gmra.mrb[84].mxu1 %v7419_v31  ;;  %3089 = vmatmul.mubr.bf16.gmra.mrb[100].mxu0 %v7419_v31  ;;  %v7451_v31 = vld [vmem:[%s9957_s14 + $0x24] ss:$16 sps:$4 sm:$0xff]   ;;  %v7473_v19 = vld [vmem:[%s9957_s14 + $0x68] ss:$16 sps:$4 sm:$0xff]   ;;  %v7488_v41 = vld [vmem:[%s9957_s14 + $0xe0] ss:$16 sps:$4 sm:$0xff]  }
 0x3ac   : > { %3212 = vmatpush1.bf16.msra.mxu1 %v10047_v39  ;;  %3325 = vmatpush1.bf16.msra.mxu0 %v10048_v40  ;;  %v7436_v39 = vld [vmem:[%s8730_s28 + $0x18] sm:$0xff]   ;;  %v7444_v24 = vld [vmem:[%s9951_s8 + $0x30] sm:$0xff]  }
 0x3ad   : > { %3213 = vmatprep.subr.bf16.mxu1 %v10049_v43  ;;  %3326 = vmatprep.subr.bf16.mxu0 %v10050_v44  ;;  %v7452_v40 = vld [vmem:[%s9957_s14 + $0x40] ss:$16 sps:$4 sm:$0xff]   ;;  %v7457_v43 = vld [vmem:[%s9957_s14 + $0x64] ss:$16 sps:$4 sm:$0xff]   ;;  %v7460_v44 = vld [vmem:[%s9957_s14 + $0xc] ss:$16 sps:$4 sm:$0xff]  }
 0x3ae   : > { %2985 = vmatprep.mubr.bf16.mxu1 %v10036_v11  ;;  %3098 = vmatprep.mubr.bf16.mxu0 %v10036_v11  ;;  %v7476_v25 = vld [vmem:[%s9957_s14 + $0x88] ss:$16 sps:$4 sm:$0xff]  }
 0x3af   : > { %v7482_v54 = vld [vmem:[%s9957_s14 + $0xa8] ss:$16 sps:$4 sm:$0xff]  }
 0x3b0   : > { %3214 = vmatpush1.bf16.msra.mxu1 %v10051_v46  ;;  %3327 = vmatpush1.bf16.msra.mxu0 %v10052_v47  ;;  %v7429_v46 = vld [vmem:[%s9958_s15 + $0x10] sm:$0xff]   ;;  %v7485_v38 = vld [vmem:[%s9957_s14 + $0xc8] ss:$16 sps:$4 sm:$0xff]  }
 0x3b1   : > { %3215 = vmatprep.subr.bf16.mxu1 %v10053_v48  ;;  %3328 = vmatprep.subr.bf16.mxu0 %v10054_v51  ;;  %v7463_v47 = vld [vmem:[%s9957_s14 + $0x84] ss:$16 sps:$4 sm:$0xff]   ;;  %v7461_v48 = vld [vmem:[%s9957_s14 + $0x80] ss:$16 sps:$4 sm:$0xff]   ;;  %v7491_v23 = vld [vmem:[%s9957_s14 + $0xe8] ss:$16 sps:$4 sm:$0xff]  }
 0x3b2   : > { %v7472_v51 = vld [vmem:[%s9957_s14 + $0xa4] ss:$16 sps:$4 sm:$0xff]  }
 0x3b3   : > { %2986 = vmatmul.mubr.bf16.gmra.mrb[88].mxu1 %v7420_v45  ;;  %3099 = vmatmul.mubr.bf16.gmra.mrb[104].mxu0 %v7420_v45  ;;  %v7455_v45 = vld [vmem:[%s9957_s14 + $0x60] ss:$16 sps:$4 sm:$0xff]  }
 0x3b4   : > { %3216 = vmatpush1.bf16.msra.mxu1 %v10055_v52  ;;  %3329 = vmatpush1.bf16.msra.mxu0 %v10057_v56  ;;  %v7470_v52 = vld [vmem:[%s9957_s14 + $0xa0] ss:$16 sps:$4 sm:$0xff]   ;;  %v7481_v56 = vld [vmem:[%s9957_s14 + $0xc4] ss:$16 sps:$4 sm:$0xff]  }
 0x3b5   : > { %3217 = vmatprep.subr.bf16.mxu1 %v10060_v59  ;;  %3330 = vmatprep.subr.bf16.mxu0 %v10063_v0  ;;  %v7434_v59 = vld [vmem:[%s9958_s15 + $0x28] sm:$0xff]   ;;  %v7438_v0 = vld [vmem:[%s9951_s8] sm:$0xff]  }
 0x3b6   : > { %2995 = vmatprep.mubr.bf16.mxu1 %v10036_v11  ;;  %3108 = vmatprep.mubr.bf16.mxu0 %v10036_v11 }
 0x3b8   : > { %3218 = vmatpush1.bf16.msra.mxu1 %v10066_v7  ;;  %3331 = vmatpush1.bf16.msra.mxu0 %v10069_v12  ;;  %v7466_v7 = vld [vmem:[%s9957_s14 + $0x2c] ss:$16 sps:$4 sm:$0xff]  }
 0x3b9   : > { %3219 = vmatprep.subr.bf16.mxu1 %v10072_v18  ;;  %3332 = vmatprep.subr.bf16.mxu0 %v10075_v21  ;;  %v7441_v12 = vld [vmem:[%s9951_s8 + $0x18] sm:$0xff]   ;;  %v7443_v21 = vld [vmem:[%s9951_s8 + $0x28] sm:$0xff]  }
 0x3ba   : > { %v7475_v18 = vld [vmem:[%s9957_s14 + $0x6c] ss:$16 sps:$4 sm:$0xff]  }
 0x3bb   : > { %2996 = vmatmul.mubr.bf16.gmra.mrb[92].mxu1 %v7421_v4  ;;  %3109 = vmatmul.mubr.bf16.gmra.mrb[108].mxu0 %v7421_v4  ;;  %v7439_v4 = vld [vmem:[%s9951_s8 + $0x8] sm:$0xff]  }
 0x3bc   : > { %3220 = vmatpush1.bf16.msra.mxu1 %v10078_v42  ;;  %3333 = vmatpush1.bf16.msra.mxu0 %v10081_v3  ;;  %v7484_v42 = vld [vmem:[%s9957_s14 + $0xac] ss:$16 sps:$4 sm:$0xff]  }
 0x3bd   : > { %3221 = vmatprep.subr.bf16.mxu1 %v10084_v29  ;;  %3334 = vmatprep.subr.bf16.mxu0 %v10087_v53  ;;  %v7487_v3 = vld [vmem:[%s9957_s14 + $0xcc] ss:$16 sps:$4 sm:$0xff]   ;;  %v3481_v53 = vpop.permute.xlu1 %3480 }
 0x3be   : > { %3005 = vmatprep.mubr.bf16.mxu1 %v10036_v11  ;;  %3118 = vmatprep.mubr.bf16.mxu0 %v10036_v11  ;;  %v7493_v29 = vld [vmem:[%s9957_s14 + $0xec] ss:$16 sps:$4 sm:$0xff]  }
 0x3c0   : > { %3222 = vmatpush1.bf16.msra.mxu1 %v10090_v15  ;;  %3335 = vmatpush1.bf16.msra.mxu0 %v10093_v26 }
 0x3c1   : > { %7022 = vmatprep.subr.bf16.mxu1 %v7427_v62  ;;  %3939 = vmatprep.subr.bf16.mxu0 %v7448_v61  ;;  %v3491_v61 = vpop.permute.xlu1 %3490 }
 0x3c3   : > { %3006 = vmatmul.mubr.bf16.gmra.mrb[96].mxu1 %v7422_v1  ;;  %3119 = vmatmul.mubr.bf16.gmra.mrb[112].mxu0 %v7422_v1 }
 0x3c4   : > { %3015 = vmatprep.mubr.bf16.mxu1 %v10036_v11  ;;  %3128 = vmatprep.mubr.bf16.mxu0 %v10036_v11 }
 0x3c5   : > { %v3501_v2 = vpop.permute.xlu1 %3500 }
 0x3c9   : > { %v3511_v30 = vpop.permute.xlu1 %3510 }
 0x3cb   : > { %3016 = vmatmul.mubr.bf16.gmra.mrb[100].mxu1 %v7423_v10  ;;  %3129 = vmatmul.mubr.bf16.gmra.mrb[116].mxu0 %v7423_v10 }
 0x3cc   : > { %3025 = vmatprep.mubr.bf16.mxu1 %v10036_v11  ;;  %3138 = vmatprep.mubr.bf16.mxu0 %v10036_v11 }
 0x3d3   : > { %3026 = vmatmul.mubr.bf16.gmra.mrb[104].mxu1 %v7424_v22  ;;  %3139 = vmatmul.mubr.bf16.gmra.mrb[120].mxu0 %v7424_v22 }
 0x3d4   : > { %3035 = vmatprep.mubr.bf16.mxu1 %v10036_v11  ;;  %3148 = vmatprep.mubr.bf16.mxu0 %v10036_v11 }
 0x3db   : > { %3036 = vmatmul.mubr.bf16.gmra.mrb[108].mxu1 %v7425_v27  ;;  %3149 = vmatmul.mubr.bf16.gmra.mrb[124].mxu0 %v7425_v27 }
 0x3dc   : > { %3239 = vmatprep.mubr.bf16.mxu1 %v10036_v11  ;;  %3352 = vmatprep.mubr.bf16.mxu0 %v10036_v11 }
 0x3e3   : > { %3240 = vmatmul.mubr.bf16.vlgmr.msra.gmra.mrb[80].mxu1 %v7426_v28  ;;  %3353 = vmatmul.mubr.bf16.vlgmr.msra.gmra.mrb[96].mxu0 %v7426_v28 }
 0x3e4   : > { %7023 = vmatpush3.bf16.msra.mxu1 %v7427_v62  ;;  %3249 = vmatprep.mubr.bf16.mxu1 %v10036_v11  ;;  %v3476_v62 = vpop.permute.xlu0 %3475 }
 0x3e5   : > { %7024 = vmatprep.subr.bf16.mxu1 %v7430_v49  ;;  %3940 = vmatpush1.bf16.msra.mxu0 %v7446_v33 }
 0x3e6   : > { %3362 = vmatprep.mubr.bf16.mxu0 %v10036_v11  ;;  %3941 = vmatprep.subr.bf16.mxu0 %v7451_v31 }
 0x3e8   : > { %7025 = vmatpush3.bf16.msra.mxu1 %v7430_v49  ;;  %v3486_v1 = vpop.permute.xlu0 %3485 }
 0x3e9   : > { %7026 = vmatprep.subr.bf16.mxu1 %v7433_v32  ;;  %3942 = vmatpush1.bf16.msra.mxu0 %v7449_v34  ;;  %v3521_v34 = vpop.permute.xlu1 %3520 }
 0x3ea   : > { %3943 = vmatprep.subr.bf16.mxu0 %v7454_v35 }
 0x3eb   : > { %3250 = vmatmul.mubr.bf16.gmra.mrb[84].mxu1 %v7428_v36  ;;  %3363 = vmatmul.mubr.bf16.gmra.mrb[100].mxu0 %v7428_v36 }
 0x3ec   : > { %3259 = vmatprep.mubr.bf16.mxu1 %v10036_v11  ;;  %7027 = vmatpush3.bf16.msra.mxu1 %v7433_v32  ;;  %v3496_v14 = vpop.permute.xlu0 %3495 }
 0x3ed   : > { %7028 = vmatprep.subr.bf16.mxu1 %v7436_v39  ;;  %3372 = vmatprep.mubr.bf16.mxu0 %v10036_v11 }
 0x3ee   : > { %3944 = vmatpush1.bf16.msra.mxu0 %v7452_v40 }
 0x3ef   : > { %3945 = vmatprep.subr.bf16.mxu0 %v7457_v43 }
 0x3f0   : > { %7029 = vmatpush3.bf16.msra.mxu1 %v7436_v39  ;;  %v3506_v26 = vpop.permute.xlu0 %3505 }
 0x3f1   : > { %4052 = vmatprep.subr.bf16.mxu1 %v7460_v44 }
 0x3f2   : > { %3946 = vmatpush1.bf16.msra.mxu0 %v7455_v45 }
 0x3f3   : > { %3260 = vmatmul.mubr.bf16.gmra.mrb[88].mxu1 %v7429_v46  ;;  %3373 = vmatmul.mubr.bf16.gmra.mrb[104].mxu0 %v7429_v46 }
 0x3f4   : > { %3269 = vmatprep.mubr.bf16.mxu1 %v10036_v11  ;;  %3382 = vmatprep.mubr.bf16.mxu0 %v10036_v11  ;;  %v3516_v35 = vpop.permute.xlu0 %3515 }
 0x3f5   : > { %3947 = vmatprep.subr.bf16.mxu0 %v7463_v47 }
 0x3f6   : > { %3948 = vmatpush1.bf16.msra.mxu0 %v7461_v48  ;;  %v3531_v48 = vpop.permute.xlu1 %3530 }
 0x3f7   : > { %3949 = vmatprep.subr.bf16.mxu0 %v7472_v51 }
 0x3fa   : > { %3950 = vmatpush1.bf16.msra.mxu0 %v7470_v52  ;;  %v3526_v52 = vpop.permute.xlu0 %3525 }
 0x3fb   : > { %3270 = vmatmul.mubr.bf16.gmra.mrb[92].mxu1 %v7431_v55  ;;  %3383 = vmatmul.mubr.bf16.gmra.mrb[108].mxu0 %v7431_v55 }
 0x3fc   : > { %3279 = vmatprep.mubr.bf16.mxu1 %v10036_v11  ;;  %3392 = vmatprep.mubr.bf16.mxu0 %v10036_v11 }
 0x3fd   : > { %3951 = vmatprep.subr.bf16.mxu0 %v7481_v56 }
 0x3fe   : > { %3952 = vmatpush1.bf16.msra.mxu0 %v7479_v57 }
 0x3ff   : > { %3953 = vmatprep.subr.bf16.mxu0 %v7490_v50 }
 0x402   : > { %3954 = vmatpush1.bf16.msra.mxu0 %v7488_v41 }
 0x403   : > { %3280 = vmatmul.mubr.bf16.gmra.mrb[96].mxu1 %v7432_v58  ;;  %3393 = vmatmul.mubr.bf16.gmra.mrb[112].mxu0 %v7432_v58 }
 0x404   : > { %3289 = vmatprep.mubr.bf16.mxu1 %v10036_v11  ;;  %3402 = vmatprep.mubr.bf16.mxu0 %v10036_v11 }
 0x40b   : > { %3290 = vmatmul.mubr.bf16.gmra.mrb[100].mxu1 %v7434_v59  ;;  %3403 = vmatmul.mubr.bf16.gmra.mrb[116].mxu0 %v7434_v59  ;;  %v3541_v59 = vpop.permute.xlu1 %3540 }
 0x40c   : > { %3299 = vmatprep.mubr.bf16.mxu1 %v10036_v11  ;;  %3412 = vmatprep.mubr.bf16.mxu0 %v10036_v11 }
 0x413   : > { %3300 = vmatmul.mubr.bf16.gmra.mrb[104].mxu1 %v7435_v60  ;;  %3413 = vmatmul.mubr.bf16.gmra.mrb[120].mxu0 %v7435_v60 }
 0x414   : > { %3309 = vmatprep.mubr.bf16.mxu1 %v10036_v11  ;;  %3422 = vmatprep.mubr.bf16.mxu0 %v10036_v11 }
 0x41b   : > { %3310 = vmatmul.mubr.bf16.gmra.mrb[108].mxu1 %v7437_v63  ;;  %3423 = vmatmul.mubr.bf16.gmra.mrb[124].mxu0 %v7437_v63 }
 0x41c   : > { %7030 = vmatprep.mubr.msk.bf16.mxu1 %vm3617_vm0, %v7438_v0  ;;  %3971 = vmatprep.mubr.bf16.mxu0 %v10036_v11 }
 0x423   : > { %7031 = vmatmul.mubr.msk.bf16.vlgmr.msra.gmra.mrb[112].mxu1 %vm3617_vm0, %v7439_v4  ;;  %v3536_v4 = vpop.permute.xlu0 %3535 }
 0x424   : > { %7034 = vmatprep.mubr.msk.bf16.mxu1 %vm3617_vm0, %v7440_v5  ;;  %4053 = vmatpush1.bf16.msra.mxu1 %v7458_v6 }
 0x425   : > { %4054 = vmatprep.subr.bf16.mxu1 %v7466_v7 }
 0x428   : > { %4055 = vmatpush1.bf16.msra.mxu1 %v7464_v8 }
 0x429   : > { %4056 = vmatprep.subr.bf16.mxu1 %v7469_v9 }
 0x42b   : > { %7035 = vmatmul.mubr.msk.bf16.gmra.mrb[116].mxu1 %vm3617_vm0, %v7441_v12  ;;  %v3551_v12 = vpop.permute.xlu1 %3550 }
 0x42c   : > { %7038 = vmatprep.mubr.msk.bf16.mxu1 %vm3617_vm0, %v7442_v13  ;;  %4057 = vmatpush1.bf16.msra.mxu1 %v7467_v16  ;;  %v3546_v16 = vpop.permute.xlu0 %3545 }
 0x42d   : > { %4058 = vmatprep.subr.bf16.mxu1 %v7475_v18 }
 0x430   : > { %4059 = vmatpush1.bf16.msra.mxu1 %v7473_v19 }
 0x431   : > { %4060 = vmatprep.subr.bf16.mxu1 %v7478_v20 }
 0x433   : > { %7039 = vmatmul.mubr.msk.bf16.gmra.mrb[120].mxu1 %vm3617_vm0, %v7443_v21 }
 0x434   : > { %7042 = vmatprep.mubr.msk.bf16.mxu1 %vm3617_vm0, %v7444_v24  ;;  %4061 = vmatpush1.bf16.msra.mxu1 %v7476_v25 }
 0x435   : > { %4062 = vmatprep.subr.bf16.mxu1 %v7484_v42 }
 0x438   : > { %4063 = vmatpush1.bf16.msra.mxu1 %v7482_v54 }
 0x439   : > { %4064 = vmatprep.subr.bf16.mxu1 %v7487_v3 }
 0x43b   : > { %7043 = vmatmul.mubr.msk.bf16.gmra.mrb[124].mxu1 %vm3617_vm0, %v7445_v37  ;;  %vm5914_vm0 = vmor %vm5913_vm15, %vm5910_vm14 }
 0x43c   : > { %4084 = vmatprep.mubr.bf16.mxu1 %v10036_v11  ;;  %4065 = vmatpush1.bf16.msra.mxu1 %v7485_v38 }
 0x43d   : > { %4066 = vmatprep.subr.bf16.mxu1 %v7493_v29 }
 0x440   : > { %4067 = vmatpush1.bf16.msra.mxu1 %v7491_v23 }
 0x4f6   : > { %v7032_v15 = vpop.f32.mrb[112].mxu1 }
 0x4f7   : > { %v3676_v17 = vpop.f32.mrb[113].mxu1  ;;  %v3685_v22 = vadd.f32 %v7032_v15, %v3486_v1 }
 0x4f8   : > { %v7033_v10 = vpop.f32.mrb[114].mxu1  ;;  %v3677_v49 = vadd.f32 %v3676_v17, %v3476_v62 }
 0x4f9   : > { %v3688_v27 = vadd.f32 %v7033_v10, %v3491_v61  ;;  %v3679_v28 = vpop.f32.mrb[115].mxu1 }
 0x4fa   : > { %v3680_v33 = vadd.f32 %v3679_v28, %v3481_v53 }
 0x4fb   : > { %v3740_v31 = vpack.c.bf16 %v3688_v27, %v3685_v22 }
 0x4fc   : > { %v3739_v32 = vpack.c.bf16 %v3680_v33, %v3677_v49 }
 0x4fe   : > { %v7036_v36 = vpop.f32.mrb[116].mxu1  ;;  %3972 = vmatmul.mubr.bf16.vlgmr.msra.gmra.mrb[128].mxu0 %v3739_v32  ;;  %4085 = vmatmul.mubr.bf16.vlgmr.msra.gmra.mrb[128].mxu1 %v3739_v32 }
 0x4ff   : > { %v3692_v39 = vpop.f32.mrb[117].mxu1  ;;  %3981 = vmatprep.mubr.bf16.mxu0 %v10036_v11  ;;  %4094 = vmatprep.mubr.bf16.mxu1 %v10036_v11  ;;  %v3701_v43 = vadd.f32 %v7036_v36, %v3506_v26 }
 0x500   : > { %v7037_v40 = vpop.f32.mrb[118].mxu1  ;;  %v3693_v46 = vadd.f32 %v3692_v39, %v3496_v14 }
 0x501   : > { %v3704_v44 = vadd.f32 %v7037_v40, %v3511_v30  ;;  %v3695_v45 = vpop.f32.mrb[119].mxu1 }
 0x502   : > { %v3696_v47 = vadd.f32 %v3695_v45, %v3501_v2 }
 0x503   : > { %v3742_v51 = vpack.c.bf16 %v3704_v44, %v3701_v43 }
 0x504   : > { %v3741_v55 = vpack.c.bf16 %v3696_v47, %v3693_v46 }
 0x506   : > { %v7040_v56 = vpop.f32.mrb[120].mxu1  ;;  %3982 = vmatmul.mubr.bf16.gmra.mrb[132].mxu0 %v3740_v31  ;;  %4095 = vmatmul.mubr.bf16.gmra.mrb[132].mxu1 %v3740_v31 }
 0x507   : > { %v3708_v57 = vpop.f32.mrb[121].mxu1  ;;  %3991 = vmatprep.mubr.bf16.mxu0 %v10036_v11  ;;  %4104 = vmatprep.mubr.bf16.mxu1 %v10036_v11  ;;  %v3717_v60 = vadd.f32 %v7040_v56, %v3526_v52 }
 0x508   : > { %v7041_v58 = vpop.f32.mrb[122].mxu1  ;;  %v3709_v5 = vadd.f32 %v3708_v57, %v3516_v35 }
 0x509   : > { %v3720_v63 = vadd.f32 %v7041_v58, %v3531_v48  ;;  %v3711_v0 = vpop.f32.mrb[123].mxu1 }
 0x50a   : > { %v3712_v6 = vadd.f32 %v3711_v0, %v3521_v34 }
 0x50b   : > { %v3744_v7 = vpack.c.bf16 %v3720_v63, %v3717_v60 }
 0x50c   : > { %v3743_v8 = vpack.c.bf16 %v3712_v6, %v3709_v5 }
 0x50e   : > { %v7044_v9 = vpop.f32.mrb[124].mxu1  ;;  %3992 = vmatmul.mubr.bf16.gmra.mrb[136].mxu0 %v3741_v55  ;;  %4105 = vmatmul.mubr.bf16.gmra.mrb[136].mxu1 %v3741_v55 }
 0x50f   : > { %v3724_v13 = vpop.f32.mrb[125].mxu1  ;;  %4001 = vmatprep.mubr.bf16.mxu0 %v10036_v11  ;;  %4114 = vmatprep.mubr.bf16.mxu1 %v10036_v11  ;;  %v3733_v19 = vadd.f32 %v7044_v9, %v3546_v16 }
 0x510   : > { %v7045_v18 = vpop.f32.mrb[126].mxu1  ;;  %v3725_v24 = vadd.f32 %v3724_v13, %v3536_v4 }
 0x511   : > { %v3736_v20 = vadd.f32 %v7045_v18, %v3551_v12  ;;  %v3727_v21 = vpop.f32.mrb[127].mxu1 }
 0x512   : > { %v3728_v25 = vadd.f32 %v3727_v21, %v3541_v59 }
 0x513   : > { %v3746_v42 = vpack.c.bf16 %v3736_v20, %v3733_v19 }
 0x514   : > { %v3745_v54 = vpack.c.bf16 %v3728_v25, %v3725_v24 }
 0x516   : > { %4002 = vmatmul.mubr.bf16.gmra.mrb[140].mxu0 %v3742_v51  ;;  %4115 = vmatmul.mubr.bf16.gmra.mrb[140].mxu1 %v3742_v51 }
 0x517   : > { %4011 = vmatprep.mubr.bf16.mxu0 %v10036_v11  ;;  %4124 = vmatprep.mubr.bf16.mxu1 %v10036_v11 }
 0x51e   : > { %4012 = vmatmul.mubr.bf16.gmra.mrb[144].mxu0 %v3743_v8  ;;  %4125 = vmatmul.mubr.bf16.gmra.mrb[144].mxu1 %v3743_v8 }
 0x51f   : > { %4021 = vmatprep.mubr.bf16.mxu0 %v10036_v11  ;;  %4134 = vmatprep.mubr.bf16.mxu1 %v10036_v11 }
 0x526   : > { %4022 = vmatmul.mubr.bf16.gmra.mrb[148].mxu0 %v3744_v7  ;;  %4135 = vmatmul.mubr.bf16.gmra.mrb[148].mxu1 %v3744_v7 }
 0x527   : > { %4031 = vmatprep.mubr.bf16.mxu0 %v10036_v11  ;;  %4144 = vmatprep.mubr.bf16.mxu1 %v10036_v11 }
 0x52e   : > { %4032 = vmatmul.mubr.bf16.gmra.mrb[152].mxu0 %v3745_v54  ;;  %4145 = vmatmul.mubr.bf16.gmra.mrb[152].mxu1 %v3745_v54 }
 0x52f   : > { %4041 = vmatprep.mubr.bf16.mxu0 %v10036_v11  ;;  %4154 = vmatprep.mubr.bf16.mxu1 %v10036_v11 }
 0x536   : > { %4042 = vmatmul.mubr.bf16.gmra.mrb[156].mxu0 %v3746_v42  ;;  %4155 = vmatmul.mubr.bf16.gmra.mrb[156].mxu1 %v3746_v42 }
 0x537   : > { %4358 = vmatprep.mubr.bf16.mxu1 %v10036_v11  ;;  %4471 = vmatprep.mubr.bf16.mxu0 %v10036_v11 }
 0x5d1   : > { %v3973_v37 = vpop.f32.mrb[128].mxu0  ;;  %v4086_v3 = vpop.f32.mrb[128].mxu1 }
 0x5d2   : > { %4165 = vst [vmem:[%s8384_s0 + $0x400] sm:$0xff] %v3973_v37  ;;  %4167 = vst [vmem:[%s8384_s0 + $0x410] sm:$0xff] %v4086_v3  ;;  %v3975_v38 = vpop.f32.mrb[129].mxu0  ;;  %v4088_v50 = vpop.f32.mrb[129].mxu1 }
 0x5d3   : > { %4166 = vst [vmem:[%s8384_s0 + $0x408] sm:$0xff] %v3975_v38  ;;  %4168 = vst [vmem:[%s8384_s0 + $0x418] sm:$0xff] %v4088_v50  ;;  %v3977_v29 = vpop.f32.mrb[130].mxu0  ;;  %v4090_v41 = vpop.f32.mrb[130].mxu1 }
 0x5d4   : > { %4169 = vst [vmem:[%s8384_s0 + $0x420] sm:$0xff] %v3977_v29  ;;  %v4246_v23 = vpack.c.bf16 %v3977_v29, %v3973_v37  ;;  %4171 = vst [vmem:[%s8384_s0 + $0x430] sm:$0xff] %v4090_v41  ;;  %v4248_v53 = vpack.c.bf16 %v4090_v41, %v4086_v3  ;;  %v3979_v62 = vpop.f32.mrb[131].mxu0  ;;  %v4092_v61 = vpop.f32.mrb[131].mxu1 }
 0x5d5   : > { %4170 = vst [vmem:[%s8384_s0 + $0x428] sm:$0xff] %v3979_v62  ;;  %v4247_v1 = vpack.c.bf16 %v3979_v62, %v3975_v38  ;;  %4172 = vst [vmem:[%s8384_s0 + $0x438] sm:$0xff] %v4092_v61  ;;  %v4249_v2 = vpack.c.bf16 %v4092_v61, %v4088_v50 }
 0x5d7   : > { %4326 = vmatprep.subr.bf16.mxu1 %v4247_v1  ;;  %4439 = vmatprep.subr.bf16.mxu0 %v4249_v2 }
 0x5d8   : > { %4327 = vmatpush1.bf16.msra.mxu1 %v4246_v23  ;;  %4440 = vmatpush1.bf16.msra.mxu0 %v4248_v53 }
 0x5d9   : > { %v3983_v14 = vpop.f32.mrb[132].mxu0  ;;  %v4096_v15 = vpop.f32.mrb[132].mxu1 }
 0x5da   : > { %4173 = vst [vmem:[%s8384_s0 + $0x440] sm:$0xff] %v3983_v14  ;;  %4175 = vst [vmem:[%s8384_s0 + $0x450] sm:$0xff] %v4096_v15  ;;  %v3985_v30 = vpop.f32.mrb[133].mxu0  ;;  %v4098_v17 = vpop.f32.mrb[133].mxu1 }
 0x5db   : > { %4174 = vst [vmem:[%s8384_s0 + $0x448] sm:$0xff] %v3985_v30  ;;  %4176 = vst [vmem:[%s8384_s0 + $0x458] sm:$0xff] %v4098_v17  ;;  %v3987_v26 = vpop.f32.mrb[134].mxu0  ;;  %v4100_v10 = vpop.f32.mrb[134].mxu1 }
 0x5dc   : > { %4177 = vst [vmem:[%s8384_s0 + $0x460] sm:$0xff] %v3987_v26  ;;  %v4250_v22 = vpack.c.bf16 %v3987_v26, %v3983_v14  ;;  %4179 = vst [vmem:[%s8384_s0 + $0x470] sm:$0xff] %v4100_v10  ;;  %v4252_v27 = vpack.c.bf16 %v4100_v10, %v4096_v15  ;;  %v3989_v28 = vpop.f32.mrb[135].mxu0  ;;  %v4102_v49 = vpop.f32.mrb[135].mxu1 }
 0x5dd   : > { %4178 = vst [vmem:[%s8384_s0 + $0x468] sm:$0xff] %v3989_v28  ;;  %v4251_v33 = vpack.c.bf16 %v3989_v28, %v3985_v30  ;;  %4180 = vst [vmem:[%s8384_s0 + $0x478] sm:$0xff] %v4102_v49  ;;  %v4253_v31 = vpack.c.bf16 %v4102_v49, %v4098_v17 }
 0x5df   : > { %4328 = vmatprep.subr.bf16.mxu1 %v4251_v33  ;;  %4441 = vmatprep.subr.bf16.mxu0 %v4253_v31 }
 0x5e0   : > { %4329 = vmatpush1.bf16.msra.mxu1 %v4250_v22  ;;  %4442 = vmatpush1.bf16.msra.mxu0 %v4252_v27 }
 0x5e1   : > { %v3993_v32 = vpop.f32.mrb[136].mxu0  ;;  %v4106_v34 = vpop.f32.mrb[136].mxu1 }
 0x5e2   : > { %4181 = vst [vmem:[%s8384_s0 + $0x480] sm:$0xff] %v3993_v32  ;;  %4183 = vst [vmem:[%s8384_s0 + $0x490] sm:$0xff] %v4106_v34  ;;  %v3995_v35 = vpop.f32.mrb[137].mxu0  ;;  %v4108_v36 = vpop.f32.mrb[137].mxu1 }
 0x5e3   : > { %4182 = vst [vmem:[%s8384_s0 + $0x488] sm:$0xff] %v3995_v35  ;;  %4184 = vst [vmem:[%s8384_s0 + $0x498] sm:$0xff] %v4108_v36  ;;  %v3997_v39 = vpop.f32.mrb[138].mxu0  ;;  %v4110_v40 = vpop.f32.mrb[138].mxu1 }
 0x5e4   : > { %4185 = vst [vmem:[%s8384_s0 + $0x4a0] sm:$0xff] %v3997_v39  ;;  %v4254_v43 = vpack.c.bf16 %v3997_v39, %v3993_v32  ;;  %4187 = vst [vmem:[%s8384_s0 + $0x4b0] sm:$0xff] %v4110_v40  ;;  %v4256_v44 = vpack.c.bf16 %v4110_v40, %v4106_v34  ;;  %v3999_v45 = vpop.f32.mrb[139].mxu0  ;;  %v4112_v46 = vpop.f32.mrb[139].mxu1 }
 0x5e5   : > { %4186 = vst [vmem:[%s8384_s0 + $0x4a8] sm:$0xff] %v3999_v45  ;;  %v4255_v47 = vpack.c.bf16 %v3999_v45, %v3995_v35  ;;  %4188 = vst [vmem:[%s8384_s0 + $0x4b8] sm:$0xff] %v4112_v46  ;;  %v4257_v48 = vpack.c.bf16 %v4112_v46, %v4108_v36  ;;  %v7497_v46 = vld [vmem:[%s9114_s21 + $0x4] ss:$16 sps:$4 sm:$0xff]  }
 0x5e7   : > { %4330 = vmatprep.subr.bf16.mxu1 %v4255_v47  ;;  %4443 = vmatprep.subr.bf16.mxu0 %v4257_v48  ;;  %v7500_v47 = vld [vmem:[%s9114_s21 + $0xc] ss:$16 sps:$4 sm:$0xff]  }
 0x5e8   : > { %4331 = vmatpush1.bf16.msra.mxu1 %v4254_v43  ;;  %4444 = vmatpush1.bf16.msra.mxu0 %v4256_v44  ;;  %v7494_v48 = vld [vmem:[%s9958_s15 + $0x80] sm:$0xff]  }
 0x5e9   : > { %v4003_v51 = vpop.f32.mrb[140].mxu0  ;;  %v4116_v52 = vpop.f32.mrb[140].mxu1 }
 0x5ea   : > { %4189 = vst [vmem:[%s8384_s0 + $0x4c0] sm:$0xff] %v4003_v51  ;;  %4191 = vst [vmem:[%s8384_s0 + $0x4d0] sm:$0xff] %v4116_v52  ;;  %v4005_v55 = vpop.f32.mrb[141].mxu0  ;;  %v4118_v56 = vpop.f32.mrb[141].mxu1 }
 0x5eb   : > { %4190 = vst [vmem:[%s8384_s0 + $0x4c8] sm:$0xff] %v4005_v55  ;;  %4192 = vst [vmem:[%s8384_s0 + $0x4d8] sm:$0xff] %v4118_v56  ;;  %v4007_v57 = vpop.f32.mrb[142].mxu0  ;;  %v4120_v58 = vpop.f32.mrb[142].mxu1 }
 0x5ec   : > { %4193 = vst [vmem:[%s8384_s0 + $0x4e0] sm:$0xff] %v4007_v57  ;;  %v4258_v59 = vpack.c.bf16 %v4007_v57, %v4003_v51  ;;  %4195 = vst [vmem:[%s8384_s0 + $0x4f0] sm:$0xff] %v4120_v58  ;;  %v4260_v60 = vpack.c.bf16 %v4120_v58, %v4116_v52  ;;  %v4009_v63 = vpop.f32.mrb[143].mxu0  ;;  %v4122_v0 = vpop.f32.mrb[143].mxu1  ;;  %v7495_v51 = vld [vmem:[%s9114_s21] ss:$16 sps:$4 sm:$0xff]  }
 0x5ed   : > { %4194 = vst [vmem:[%s8384_s0 + $0x4e8] sm:$0xff] %v4009_v63  ;;  %v4259_v4 = vpack.c.bf16 %v4009_v63, %v4005_v55  ;;  %4196 = vst [vmem:[%s8384_s0 + $0x4f8] sm:$0xff] %v4122_v0  ;;  %v4261_v5 = vpack.c.bf16 %v4122_v0, %v4118_v56  ;;  %v7498_v52 = vld [vmem:[%s9114_s21 + $0x8] ss:$16 sps:$4 sm:$0xff]   ;;  %v7507_v55 = vld [vmem:[%s9114_s21 + $0x24] ss:$16 sps:$4 sm:$0xff]  }
 0x5ee   : > { %v7510_v56 = vld [vmem:[%s9114_s21 + $0x2c] ss:$16 sps:$4 sm:$0xff]   ;;  %v7505_v57 = vld [vmem:[%s9114_s21 + $0x20] ss:$16 sps:$4 sm:$0xff]   ;;  %v7508_v58 = vld [vmem:[%s9114_s21 + $0x28] ss:$16 sps:$4 sm:$0xff]  }
 0x5ef   : > { %4332 = vmatprep.subr.bf16.mxu1 %v4259_v4  ;;  %4445 = vmatprep.subr.bf16.mxu0 %v4261_v5  ;;  %v7503_v63 = vld [vmem:[%s9958_s15 + $0x98] sm:$0xff]   ;;  %v7504_v0 = vld [vmem:[%s9958_s15 + $0xa0] sm:$0xff]   ;;  %v7511_v4 = vld [vmem:[%s9958_s15 + $0xa8] sm:$0xff]  }
 0x5f0   : > { %4333 = vmatpush1.bf16.msra.mxu1 %v4258_v59  ;;  %4446 = vmatpush1.bf16.msra.mxu0 %v4260_v60  ;;  %v7501_v59 = vld [vmem:[%s9958_s15 + $0x88] sm:$0xff]   ;;  %v7502_v60 = vld [vmem:[%s9958_s15 + $0x90] sm:$0xff]  }
 0x5f1   : > { %v4013_v6 = vpop.f32.mrb[144].mxu0  ;;  %v4126_v7 = vpop.f32.mrb[144].mxu1  ;;  %v7512_v5 = vld [vmem:[%s9958_s15 + $0xb0] sm:$0xff]  }
 0x5f2   : > { %4197 = vst [vmem:[%s8384_s0 + $0x500] sm:$0xff] %v4013_v6  ;;  %4199 = vst [vmem:[%s8384_s0 + $0x510] sm:$0xff] %v4126_v7  ;;  %v4015_v8 = vpop.f32.mrb[145].mxu0  ;;  %v4128_v9 = vpop.f32.mrb[145].mxu1 }
 0x5f3   : > { %4198 = vst [vmem:[%s8384_s0 + $0x508] sm:$0xff] %v4015_v8  ;;  %4200 = vst [vmem:[%s8384_s0 + $0x518] sm:$0xff] %v4128_v9  ;;  %v4017_v12 = vpop.f32.mrb[146].mxu0  ;;  %v4130_v13 = vpop.f32.mrb[146].mxu1 }
 0x5f4   : > { %4201 = vst [vmem:[%s8384_s0 + $0x520] sm:$0xff] %v4017_v12  ;;  %v4262_v16 = vpack.c.bf16 %v4017_v12, %v4013_v6  ;;  %4203 = vst [vmem:[%s8384_s0 + $0x530] sm:$0xff] %v4130_v13  ;;  %v4264_v18 = vpack.c.bf16 %v4130_v13, %v4126_v7  ;;  %v4019_v19 = vpop.f32.mrb[147].mxu0  ;;  %v4132_v20 = vpop.f32.mrb[147].mxu1  ;;  %v7513_v6 = vld [vmem:[%s9958_s15 + $0xb8] sm:$0xff]   ;;  %v7514_v7 = vld [vmem:[%s9953_s10] sm:$0xff]  }
 0x5f5   : > { %4202 = vst [vmem:[%s8384_s0 + $0x528] sm:$0xff] %v4019_v19  ;;  %v4263_v21 = vpack.c.bf16 %v4019_v19, %v4015_v8  ;;  %4204 = vst [vmem:[%s8384_s0 + $0x538] sm:$0xff] %v4132_v20  ;;  %v4265_v24 = vpack.c.bf16 %v4132_v20, %v4128_v9  ;;  %v7515_v8 = vld [vmem:[%s9953_s10 + $0x8] sm:$0xff]   ;;  %v7516_v9 = vld [vmem:[%s9953_s10 + $0x10] sm:$0xff]   ;;  %v4664_v20 = vpop.permute.xlu1 %4663 }
 0x5f6   : > { %v7517_v12 = vld [vmem:[%s9953_s10 + $0x18] sm:$0xff]   ;;  %v7518_v13 = vld [vmem:[%s9953_s10 + $0x20] sm:$0xff]  }
 0x5f7   : > { %4334 = vmatprep.subr.bf16.mxu1 %v4263_v21  ;;  %4447 = vmatprep.subr.bf16.mxu0 %v4265_v24  ;;  %v7521_v19 = vld [vmem:[%s9953_s10 + $0x38] sm:$0xff]   ;;  %v4659_v21 = vpop.permute.xlu0 %4658 }
 0x5f8   : > { %4335 = vmatpush1.bf16.msra.mxu1 %v4262_v16  ;;  %4448 = vmatpush1.bf16.msra.mxu0 %v4264_v18  ;;  %v7519_v16 = vld [vmem:[%s9953_s10 + $0x28] sm:$0xff]   ;;  %v7520_v18 = vld [vmem:[%s9953_s10 + $0x30] sm:$0xff]  }
 0x5f9   : > { %v4023_v25 = vpop.f32.mrb[148].mxu0  ;;  %v4136_v42 = vpop.f32.mrb[148].mxu1 }
 0x5fa   : > { %4205 = vst [vmem:[%s8384_s0 + $0x540] sm:$0xff] %v4023_v25  ;;  %4207 = vst [vmem:[%s8384_s0 + $0x550] sm:$0xff] %v4136_v42  ;;  %v4025_v54 = vpop.f32.mrb[149].mxu0  ;;  %v4138_v37 = vpop.f32.mrb[149].mxu1 }
 0x5fb   : > { %4206 = vst [vmem:[%s8384_s0 + $0x548] sm:$0xff] %v4025_v54  ;;  %4208 = vst [vmem:[%s8384_s0 + $0x558] sm:$0xff] %v4138_v37  ;;  %v4027_v3 = vpop.f32.mrb[150].mxu0  ;;  %v4140_v38 = vpop.f32.mrb[150].mxu1 }
 0x5fc   : > { %4209 = vst [vmem:[%s8384_s0 + $0x560] sm:$0xff] %v4027_v3  ;;  %v4266_v50 = vpack.c.bf16 %v4027_v3, %v4023_v25  ;;  %4211 = vst [vmem:[%s8384_s0 + $0x570] sm:$0xff] %v4140_v38  ;;  %v4268_v29 = vpack.c.bf16 %v4140_v38, %v4136_v42  ;;  %v4029_v41 = vpop.f32.mrb[151].mxu0  ;;  %v4142_v23 = vpop.f32.mrb[151].mxu1 }
 0x5fd   : > { %4210 = vst [vmem:[%s8384_s0 + $0x568] sm:$0xff] %v4029_v41  ;;  %v4267_v53 = vpack.c.bf16 %v4029_v41, %v4025_v54  ;;  %4212 = vst [vmem:[%s8384_s0 + $0x578] sm:$0xff] %v4142_v23  ;;  %v4269_v62 = vpack.c.bf16 %v4142_v23, %v4138_v37 }
 0x5ff   : > { %4336 = vmatprep.subr.bf16.mxu1 %v4267_v53  ;;  %4449 = vmatprep.subr.bf16.mxu0 %v4269_v62 }
 0x600   : > { %4337 = vmatpush1.bf16.msra.mxu1 %v4266_v50  ;;  %4450 = vmatpush1.bf16.msra.mxu0 %v4268_v29 }
 0x601   : > { %v4033_v61 = vpop.f32.mrb[152].mxu0  ;;  %v4146_v1 = vpop.f32.mrb[152].mxu1 }
 0x602   : > { %4213 = vst [vmem:[%s8384_s0 + $0x580] sm:$0xff] %v4033_v61  ;;  %4215 = vst [vmem:[%s8384_s0 + $0x590] sm:$0xff] %v4146_v1  ;;  %v4035_v2 = vpop.f32.mrb[153].mxu0  ;;  %v4148_v14 = vpop.f32.mrb[153].mxu1 }
 0x603   : > { %4214 = vst [vmem:[%s8384_s0 + $0x588] sm:$0xff] %v4035_v2  ;;  %4216 = vst [vmem:[%s8384_s0 + $0x598] sm:$0xff] %v4148_v14  ;;  %v4037_v15 = vpop.f32.mrb[154].mxu0  ;;  %v4150_v30 = vpop.f32.mrb[154].mxu1 }
 0x604   : > { %4217 = vst [vmem:[%s8384_s0 + $0x5a0] sm:$0xff] %v4037_v15  ;;  %v4270_v17 = vpack.c.bf16 %v4037_v15, %v4033_v61  ;;  %4219 = vst [vmem:[%s8384_s0 + $0x5b0] sm:$0xff] %v4150_v30  ;;  %v4272_v26 = vpack.c.bf16 %v4150_v30, %v4146_v1  ;;  %v4039_v10 = vpop.f32.mrb[155].mxu0  ;;  %v4152_v22 = vpop.f32.mrb[155].mxu1 }
 0x605   : > { %4218 = vst [vmem:[%s8384_s0 + $0x5a8] sm:$0xff] %v4039_v10  ;;  %v4271_v27 = vpack.c.bf16 %v4039_v10, %v4035_v2  ;;  %4220 = vst [vmem:[%s8384_s0 + $0x5b8] sm:$0xff] %v4152_v22  ;;  %v4273_v28 = vpack.c.bf16 %v4152_v22, %v4148_v14  ;;  %v4669_v10 = vpop.permute.xlu0 %4668 }
 0x607   : > { %4338 = vmatprep.subr.bf16.mxu1 %v4271_v27  ;;  %4451 = vmatprep.subr.bf16.mxu0 %v4273_v28 }
 0x608   : > { %4339 = vmatpush1.bf16.msra.mxu1 %v4270_v17  ;;  %4452 = vmatpush1.bf16.msra.mxu0 %v4272_v26  ;;  %v4674_v26 = vpop.permute.xlu1 %4673 }
 0x609   : > { %v4043_v49 = vpop.f32.mrb[156].mxu0  ;;  %v4156_v33 = vpop.f32.mrb[156].mxu1 }
 0x60a   : > { %4221 = vst [vmem:[%s8384_s0 + $0x5c0] sm:$0xff] %v4043_v49  ;;  %4223 = vst [vmem:[%s8384_s0 + $0x5d0] sm:$0xff] %v4156_v33  ;;  %v4045_v31 = vpop.f32.mrb[157].mxu0  ;;  %v4158_v32 = vpop.f32.mrb[157].mxu1 }
 0x60b   : > { %4222 = vst [vmem:[%s8384_s0 + $0x5c8] sm:$0xff] %v4045_v31  ;;  %4224 = vst [vmem:[%s8384_s0 + $0x5d8] sm:$0xff] %v4158_v32  ;;  %v4047_v34 = vpop.f32.mrb[158].mxu0  ;;  %v4160_v35 = vpop.f32.mrb[158].mxu1 }
 0x60c   : > { %4225 = vst [vmem:[%s8384_s0 + $0x5e0] sm:$0xff] %v4047_v34  ;;  %v4274_v36 = vpack.c.bf16 %v4047_v34, %v4043_v49  ;;  %4227 = vst [vmem:[%s8384_s0 + $0x5f0] sm:$0xff] %v4160_v35  ;;  %v4276_v39 = vpack.c.bf16 %v4160_v35, %v4156_v33  ;;  %v4049_v40 = vpop.f32.mrb[159].mxu0  ;;  %v4162_v43 = vpop.f32.mrb[159].mxu1 }
 0x60d   : > { %4226 = vst [vmem:[%s8384_s0 + $0x5e8] sm:$0xff] %v4049_v40  ;;  %v4275_v44 = vpack.c.bf16 %v4049_v40, %v4045_v31  ;;  %4228 = vst [vmem:[%s8384_s0 + $0x5f8] sm:$0xff] %v4162_v43  ;;  %v4277_v45 = vpack.c.bf16 %v4162_v43, %v4158_v32 }
 0x60f   : > { %4340 = vmatprep.subr.bf16.mxu1 %v4275_v44  ;;  %4453 = vmatprep.subr.bf16.mxu0 %v4277_v45 }
 0x610   : > { %4341 = vmatpush1.bf16.msra.mxu1 %v4274_v36  ;;  %4454 = vmatpush1.bf16.msra.mxu0 %v4276_v39 }
 0x611   : > { %4841 = vmatprep.subr.bf16.mxu0 %v7497_v46  ;;  %4954 = vmatprep.subr.bf16.mxu1 %v7500_v47 }
 0x613   : > { %4359 = vmatmul.mubr.bf16.vlgmr.msra.gmra.mrb[80].mxu1 %v7494_v48  ;;  %4472 = vmatmul.mubr.bf16.vlgmr.msra.gmra.mrb[96].mxu0 %v7494_v48 }
 0x614   : > { %4842 = vmatpush1.bf16.msra.mxu0 %v7495_v51  ;;  %4955 = vmatpush1.bf16.msra.mxu1 %v7498_v52 }
 0x615   : > { %4368 = vmatprep.mubr.bf16.mxu1 %v10036_v11  ;;  %4481 = vmatprep.mubr.bf16.mxu0 %v10036_v11 }
 0x616   : > { %4843 = vmatprep.subr.bf16.mxu0 %v7507_v55  ;;  %4956 = vmatprep.subr.bf16.mxu1 %v7510_v56  ;;  %v4684_v55 = vpop.permute.xlu1 %4683  ;;  %v4679_v56 = vpop.permute.xlu0 %4678 }
 0x618   : > { %4844 = vmatpush1.bf16.msra.mxu0 %v7505_v57  ;;  %4957 = vmatpush1.bf16.msra.mxu1 %v7508_v58 }
 0x61b   : > { %4369 = vmatmul.mubr.bf16.gmra.mrb[84].mxu1 %v7501_v59  ;;  %4482 = vmatmul.mubr.bf16.gmra.mrb[100].mxu0 %v7501_v59 }
 0x61c   : > { %4378 = vmatprep.mubr.bf16.mxu1 %v10036_v11  ;;  %4491 = vmatprep.mubr.bf16.mxu0 %v10036_v11 }
 0x623   : > { %4379 = vmatmul.mubr.bf16.gmra.mrb[88].mxu1 %v7502_v60  ;;  %4492 = vmatmul.mubr.bf16.gmra.mrb[104].mxu0 %v7502_v60 }
 0x624   : > { %4388 = vmatprep.mubr.bf16.mxu1 %v10036_v11  ;;  %4501 = vmatprep.mubr.bf16.mxu0 %v10036_v11 }
 0x62b   : > { %4389 = vmatmul.mubr.bf16.gmra.mrb[92].mxu1 %v7503_v63  ;;  %4502 = vmatmul.mubr.bf16.gmra.mrb[108].mxu0 %v7503_v63 }
 0x62c   : > { %4398 = vmatprep.mubr.bf16.mxu1 %v10036_v11  ;;  %4511 = vmatprep.mubr.bf16.mxu0 %v10036_v11 }
 0x633   : > { %4399 = vmatmul.mubr.bf16.gmra.mrb[96].mxu1 %v7504_v0  ;;  %4512 = vmatmul.mubr.bf16.gmra.mrb[112].mxu0 %v7504_v0 }
 0x634   : > { %4408 = vmatprep.mubr.bf16.mxu1 %v10036_v11  ;;  %4521 = vmatprep.mubr.bf16.mxu0 %v10036_v11 }
 0x63b   : > { %4409 = vmatmul.mubr.bf16.gmra.mrb[100].mxu1 %v7511_v4  ;;  %4522 = vmatmul.mubr.bf16.gmra.mrb[116].mxu0 %v7511_v4 }
 0x63c   : > { %4418 = vmatprep.mubr.bf16.mxu1 %v10036_v11  ;;  %4531 = vmatprep.mubr.bf16.mxu0 %v10036_v11 }
 0x643   : > { %4419 = vmatmul.mubr.bf16.gmra.mrb[104].mxu1 %v7512_v5  ;;  %4532 = vmatmul.mubr.bf16.gmra.mrb[120].mxu0 %v7512_v5 }
 0x644   : > { %4428 = vmatprep.mubr.bf16.mxu1 %v10036_v11  ;;  %4541 = vmatprep.mubr.bf16.mxu0 %v10036_v11 }
 0x64b   : > { %4429 = vmatmul.mubr.bf16.gmra.mrb[108].mxu1 %v7513_v6  ;;  %4542 = vmatmul.mubr.bf16.gmra.mrb[124].mxu0 %v7513_v6 }
 0x64c   : > { %4873 = vmatprep.mubr.bf16.mxu0 %v10036_v11  ;;  %4986 = vmatprep.mubr.bf16.mxu1 %v10036_v11 }
 0x653   : > { %6849 = vmatmul.mubr.msk.bf16.vlgmr.msra.gmra.mrb[160].mxu0 %vm4816_vm1, %v7514_v7  ;;  %6857 = vmatmul.mubr.msk.bf16.vlgmr.msra.gmra.mrb[160].mxu1 %vm4816_vm1, %v7514_v7 }
 0x654   : > { %4883 = vmatprep.mubr.bf16.mxu0 %v10036_v11  ;;  %4996 = vmatprep.mubr.bf16.mxu1 %v10036_v11 }
 0x65b   : > { %6850 = vmatmul.mubr.msk.bf16.gmra.mrb[164].mxu0 %vm4816_vm1, %v7515_v8  ;;  %6858 = vmatmul.mubr.msk.bf16.gmra.mrb[164].mxu1 %vm4816_vm1, %v7515_v8 }
 0x65c   : > { %4893 = vmatprep.mubr.bf16.mxu0 %v10036_v11  ;;  %5006 = vmatprep.mubr.bf16.mxu1 %v10036_v11 }
 0x663   : > { %6851 = vmatmul.mubr.msk.bf16.gmra.mrb[168].mxu0 %vm4816_vm1, %v7516_v9  ;;  %6859 = vmatmul.mubr.msk.bf16.gmra.mrb[168].mxu1 %vm4816_vm1, %v7516_v9 }
 0x664   : > { %4903 = vmatprep.mubr.bf16.mxu0 %v10036_v11  ;;  %5016 = vmatprep.mubr.bf16.mxu1 %v10036_v11 }
 0x66b   : > { %6852 = vmatmul.mubr.msk.bf16.gmra.mrb[172].mxu0 %vm4816_vm1, %v7517_v12  ;;  %6860 = vmatmul.mubr.msk.bf16.gmra.mrb[172].mxu1 %vm4816_vm1, %v7517_v12 }
 0x66c   : > { %4913 = vmatprep.mubr.bf16.mxu0 %v10036_v11  ;;  %5026 = vmatprep.mubr.bf16.mxu1 %v10036_v11 }
 0x673   : > { %6853 = vmatmul.mubr.msk.bf16.gmra.mrb[176].mxu0 %vm4816_vm1, %v7518_v13  ;;  %6861 = vmatmul.mubr.msk.bf16.gmra.mrb[176].mxu1 %vm4816_vm1, %v7518_v13 }
 0x674   : > { %4923 = vmatprep.mubr.bf16.mxu0 %v10036_v11  ;;  %5036 = vmatprep.mubr.bf16.mxu1 %v10036_v11 }
 0x67b   : > { %6854 = vmatmul.mubr.msk.bf16.gmra.mrb[180].mxu0 %vm4816_vm1, %v7519_v16  ;;  %6862 = vmatmul.mubr.msk.bf16.gmra.mrb[180].mxu1 %vm4816_vm1, %v7519_v16 }
 0x67c   : > { %4933 = vmatprep.mubr.bf16.mxu0 %v10036_v11  ;;  %5046 = vmatprep.mubr.bf16.mxu1 %v10036_v11 }
 0x683   : > { %6855 = vmatmul.mubr.msk.bf16.gmra.mrb[184].mxu0 %vm4816_vm1, %v7520_v18  ;;  %6863 = vmatmul.mubr.msk.bf16.gmra.mrb[184].mxu1 %vm4816_vm1, %v7520_v18 }
 0x684   : > { %4943 = vmatprep.mubr.bf16.mxu0 %v10036_v11  ;;  %5056 = vmatprep.mubr.bf16.mxu1 %v10036_v11 }
 0x68b   : > { %6856 = vmatmul.mubr.msk.bf16.gmra.mrb[188].mxu0 %vm4816_vm1, %v7521_v19  ;;  %6864 = vmatmul.mubr.msk.bf16.gmra.mrb[188].mxu1 %vm4816_vm1, %v7521_v19 }
 0x68c   : > { %5260 = vmatprep.mubr.bf16.mxu1 %v10036_v11  ;;  %5373 = vmatprep.mubr.bf16.mxu0 %v10036_v11 }
 0x726   : > { %v4875_v24 = vpop.f32.mrb[160].mxu0  ;;  %v4988_v25 = vpop.f32.mrb[160].mxu1 }
 0x727   : > { %v4876_v42 = vadd.f32 %v4875_v24, %v4659_v21  ;;  %v4989_v54 = vadd.f32 %v4988_v25, %v4659_v21  ;;  %v4877_v37 = vpop.f32.mrb[161].mxu0  ;;  %v4990_v3 = vpop.f32.mrb[161].mxu1 }
 0x728   : > { %v4878_v38 = vadd.f32 %v4877_v37, %v4659_v21  ;;  %v4991_v50 = vadd.f32 %v4990_v3, %v4659_v21  ;;  %v4879_v29 = vpop.f32.mrb[162].mxu0  ;;  %v4992_v41 = vpop.f32.mrb[162].mxu1 }
 0x729   : > { %5067 = vst [vmem:[%s8384_s0 + $0x600] sm:$0xff] %v4876_v42  ;;  %5069 = vst [vmem:[%s8384_s0 + $0x610] sm:$0xff] %v4989_v54  ;;  %v4880_v23 = vadd.f32 %v4879_v29, %v4664_v20  ;;  %v4993_v53 = vadd.f32 %v4992_v41, %v4664_v20  ;;  %v4881_v62 = vpop.f32.mrb[163].mxu0  ;;  %v4994_v61 = vpop.f32.mrb[163].mxu1 }
 0x72a   : > { %5068 = vst [vmem:[%s8384_s0 + $0x608] sm:$0xff] %v4878_v38  ;;  %5070 = vst [vmem:[%s8384_s0 + $0x618] sm:$0xff] %v4991_v50  ;;  %v4882_v1 = vadd.f32 %v4881_v62, %v4664_v20  ;;  %v4995_v2 = vadd.f32 %v4994_v61, %v4664_v20  ;;  %v4694_v25 = vpop.permute.xlu1 %4693 }
 0x72b   : > { %5071 = vst [vmem:[%s8384_s0 + $0x620] sm:$0xff] %v4880_v23  ;;  %v5148_v14 = vpack.c.bf16 %v4880_v23, %v4876_v42  ;;  %5073 = vst [vmem:[%s8384_s0 + $0x630] sm:$0xff] %v4993_v53  ;;  %v5150_v15 = vpack.c.bf16 %v4993_v53, %v4989_v54  ;;  %v4689_v42 = vpop.permute.xlu0 %4688 }
 0x72c   : > { %5072 = vst [vmem:[%s8384_s0 + $0x628] sm:$0xff] %v4882_v1  ;;  %v5149_v30 = vpack.c.bf16 %v4882_v1, %v4878_v38  ;;  %5074 = vst [vmem:[%s8384_s0 + $0x638] sm:$0xff] %v4995_v2  ;;  %v5151_v17 = vpack.c.bf16 %v4995_v2, %v4991_v50 }
 0x72e   : > { %v4885_v22 = vpop.f32.mrb[164].mxu0  ;;  %v4998_v27 = vpop.f32.mrb[164].mxu1  ;;  %5228 = vmatprep.subr.bf16.mxu1 %v5149_v30  ;;  %5341 = vmatprep.subr.bf16.mxu0 %v5151_v17 }
 0x72f   : > { %v4886_v28 = vadd.f32 %v4885_v22, %v4669_v10  ;;  %v4999_v49 = vadd.f32 %v4998_v27, %v4669_v10  ;;  %v4887_v33 = vpop.f32.mrb[165].mxu0  ;;  %v5000_v31 = vpop.f32.mrb[165].mxu1  ;;  %5229 = vmatpush1.bf16.msra.mxu1 %v5148_v14  ;;  %5342 = vmatpush1.bf16.msra.mxu0 %v5150_v15 }
 0x730   : > { %v4888_v32 = vadd.f32 %v4887_v33, %v4669_v10  ;;  %v5001_v34 = vadd.f32 %v5000_v31, %v4669_v10  ;;  %v4889_v35 = vpop.f32.mrb[166].mxu0  ;;  %v5002_v36 = vpop.f32.mrb[166].mxu1 }
 0x731   : > { %5075 = vst [vmem:[%s8384_s0 + $0x640] sm:$0xff] %v4886_v28  ;;  %5077 = vst [vmem:[%s8384_s0 + $0x650] sm:$0xff] %v4999_v49  ;;  %v4890_v39 = vadd.f32 %v4889_v35, %v4674_v26  ;;  %v5003_v40 = vadd.f32 %v5002_v36, %v4674_v26  ;;  %v4891_v43 = vpop.f32.mrb[167].mxu0  ;;  %v5004_v44 = vpop.f32.mrb[167].mxu1 }
 0x732   : > { %5076 = vst [vmem:[%s8384_s0 + $0x648] sm:$0xff] %v4888_v32  ;;  %5078 = vst [vmem:[%s8384_s0 + $0x658] sm:$0xff] %v5001_v34  ;;  %v4892_v45 = vadd.f32 %v4891_v43, %v4674_v26  ;;  %v5005_v46 = vadd.f32 %v5004_v44, %v4674_v26  ;;  %v4704_v27 = vpop.permute.xlu1 %4703 }
 0x733   : > { %5079 = vst [vmem:[%s8384_s0 + $0x660] sm:$0xff] %v4890_v39  ;;  %v5152_v47 = vpack.c.bf16 %v4890_v39, %v4886_v28  ;;  %5081 = vst [vmem:[%s8384_s0 + $0x670] sm:$0xff] %v5003_v40  ;;  %v5154_v48 = vpack.c.bf16 %v5003_v40, %v4999_v49  ;;  %v4699_v28 = vpop.permute.xlu0 %4698 }
 0x734   : > { %5080 = vst [vmem:[%s8384_s0 + $0x668] sm:$0xff] %v4892_v45  ;;  %v5153_v51 = vpack.c.bf16 %v4892_v45, %v4888_v32  ;;  %5082 = vst [vmem:[%s8384_s0 + $0x678] sm:$0xff] %v5005_v46  ;;  %v5155_v52 = vpack.c.bf16 %v5005_v46, %v5001_v34 }
 0x736   : > { %v4895_v57 = vpop.f32.mrb[168].mxu0  ;;  %v5008_v58 = vpop.f32.mrb[168].mxu1  ;;  %5230 = vmatprep.subr.bf16.mxu1 %v5153_v51  ;;  %5343 = vmatprep.subr.bf16.mxu0 %v5155_v52 }
 0x737   : > { %v4896_v59 = vadd.f32 %v4895_v57, %v4679_v56  ;;  %v5009_v60 = vadd.f32 %v5008_v58, %v4679_v56  ;;  %v4897_v63 = vpop.f32.mrb[169].mxu0  ;;  %v5010_v0 = vpop.f32.mrb[169].mxu1  ;;  %5231 = vmatpush1.bf16.msra.mxu1 %v5152_v47  ;;  %5344 = vmatpush1.bf16.msra.mxu0 %v5154_v48 }
 0x738   : > { %v4898_v4 = vadd.f32 %v4897_v63, %v4679_v56  ;;  %v5011_v5 = vadd.f32 %v5010_v0, %v4679_v56  ;;  %v4899_v6 = vpop.f32.mrb[170].mxu0  ;;  %v5012_v7 = vpop.f32.mrb[170].mxu1 }
 0x739   : > { %5083 = vst [vmem:[%s8384_s0 + $0x680] sm:$0xff] %v4896_v59  ;;  %5085 = vst [vmem:[%s8384_s0 + $0x690] sm:$0xff] %v5009_v60  ;;  %v4900_v8 = vadd.f32 %v4899_v6, %v4684_v55  ;;  %v5013_v9 = vadd.f32 %v5012_v7, %v4684_v55  ;;  %v4901_v12 = vpop.f32.mrb[171].mxu0  ;;  %v5014_v13 = vpop.f32.mrb[171].mxu1 }
 0x73a   : > { %5084 = vst [vmem:[%s8384_s0 + $0x688] sm:$0xff] %v4898_v4  ;;  %5086 = vst [vmem:[%s8384_s0 + $0x698] sm:$0xff] %v5011_v5  ;;  %v4902_v16 = vadd.f32 %v4901_v12, %v4684_v55  ;;  %v5015_v18 = vadd.f32 %v5014_v13, %v4684_v55  ;;  %v4714_v58 = vpop.permute.xlu1 %4713 }
 0x73b   : > { %5087 = vst [vmem:[%s8384_s0 + $0x6a0] sm:$0xff] %v4900_v8  ;;  %v5156_v19 = vpack.c.bf16 %v4900_v8, %v4896_v59  ;;  %5089 = vst [vmem:[%s8384_s0 + $0x6b0] sm:$0xff] %v5013_v9  ;;  %v5158_v20 = vpack.c.bf16 %v5013_v9, %v5009_v60  ;;  %v4709_v59 = vpop.permute.xlu0 %4708 }
 0x73c   : > { %5088 = vst [vmem:[%s8384_s0 + $0x6a8] sm:$0xff] %v4902_v16  ;;  %v5157_v21 = vpack.c.bf16 %v4902_v16, %v4898_v4  ;;  %5090 = vst [vmem:[%s8384_s0 + $0x6b8] sm:$0xff] %v5015_v18  ;;  %v5159_v24 = vpack.c.bf16 %v5015_v18, %v5011_v5 }
 0x73e   : > { %v4905_v54 = vpop.f32.mrb[172].mxu0  ;;  %v5018_v37 = vpop.f32.mrb[172].mxu1  ;;  %5232 = vmatprep.subr.bf16.mxu1 %v5157_v21  ;;  %5345 = vmatprep.subr.bf16.mxu0 %v5159_v24 }
 0x73f   : > { %v4906_v3 = vadd.f32 %v4905_v54, %v4689_v42  ;;  %v5019_v38 = vadd.f32 %v5018_v37, %v4689_v42  ;;  %v4907_v50 = vpop.f32.mrb[173].mxu0  ;;  %v5020_v29 = vpop.f32.mrb[173].mxu1  ;;  %5233 = vmatpush1.bf16.msra.mxu1 %v5156_v19  ;;  %5346 = vmatpush1.bf16.msra.mxu0 %v5158_v20 }
 0x740   : > { %v4908_v41 = vadd.f32 %v4907_v50, %v4689_v42  ;;  %v5021_v23 = vadd.f32 %v5020_v29, %v4689_v42  ;;  %v4909_v53 = vpop.f32.mrb[174].mxu0  ;;  %v5022_v62 = vpop.f32.mrb[174].mxu1 }
 0x741   : > { %5091 = vst [vmem:[%s8384_s0 + $0x6c0] sm:$0xff] %v4906_v3  ;;  %5093 = vst [vmem:[%s8384_s0 + $0x6d0] sm:$0xff] %v5019_v38  ;;  %v4910_v61 = vadd.f32 %v4909_v53, %v4694_v25  ;;  %v5023_v1 = vadd.f32 %v5022_v62, %v4694_v25  ;;  %v4911_v2 = vpop.f32.mrb[175].mxu0  ;;  %v5024_v14 = vpop.f32.mrb[175].mxu1 }
 0x742   : > { %5092 = vst [vmem:[%s8384_s0 + $0x6c8] sm:$0xff] %v4908_v41  ;;  %5094 = vst [vmem:[%s8384_s0 + $0x6d8] sm:$0xff] %v5021_v23  ;;  %v4912_v15 = vadd.f32 %v4911_v2, %v4694_v25  ;;  %v5025_v30 = vadd.f32 %v5024_v14, %v4694_v25  ;;  %v4724_v37 = vpop.permute.xlu1 %4723 }
 0x743   : > { %5095 = vst [vmem:[%s8384_s0 + $0x6e0] sm:$0xff] %v4910_v61  ;;  %v5160_v17 = vpack.c.bf16 %v4910_v61, %v4906_v3  ;;  %5097 = vst [vmem:[%s8384_s0 + $0x6f0] sm:$0xff] %v5023_v1  ;;  %v5162_v26 = vpack.c.bf16 %v5023_v1, %v5019_v38  ;;  %v4719_v3 = vpop.permute.xlu0 %4718 }
 0x744   : > { %5096 = vst [vmem:[%s8384_s0 + $0x6e8] sm:$0xff] %v4912_v15  ;;  %v5161_v10 = vpack.c.bf16 %v4912_v15, %v4908_v41  ;;  %5098 = vst [vmem:[%s8384_s0 + $0x6f8] sm:$0xff] %v5025_v30  ;;  %v5163_v22 = vpack.c.bf16 %v5025_v30, %v5021_v23 }
 0x746   : > { %v4915_v49 = vpop.f32.mrb[176].mxu0  ;;  %v5028_v33 = vpop.f32.mrb[176].mxu1  ;;  %5234 = vmatprep.subr.bf16.mxu1 %v5161_v10  ;;  %5347 = vmatprep.subr.bf16.mxu0 %v5163_v22 }
 0x747   : > { %v4916_v31 = vadd.f32 %v4915_v49, %v4699_v28  ;;  %v5029_v32 = vadd.f32 %v5028_v33, %v4699_v28  ;;  %v4917_v34 = vpop.f32.mrb[177].mxu0  ;;  %v5030_v35 = vpop.f32.mrb[177].mxu1  ;;  %5235 = vmatpush1.bf16.msra.mxu1 %v5160_v17  ;;  %5348 = vmatpush1.bf16.msra.mxu0 %v5162_v26 }
 0x748   : > { %v4918_v36 = vadd.f32 %v4917_v34, %v4699_v28  ;;  %v5031_v39 = vadd.f32 %v5030_v35, %v4699_v28  ;;  %v4919_v40 = vpop.f32.mrb[178].mxu0  ;;  %v5032_v43 = vpop.f32.mrb[178].mxu1 }
 0x749   : > { %5099 = vst [vmem:[%s8384_s0 + $0x700] sm:$0xff] %v4916_v31  ;;  %5101 = vst [vmem:[%s8384_s0 + $0x710] sm:$0xff] %v5029_v32  ;;  %v4920_v44 = vadd.f32 %v4919_v40, %v4704_v27  ;;  %v5033_v45 = vadd.f32 %v5032_v43, %v4704_v27  ;;  %v4921_v46 = vpop.f32.mrb[179].mxu0  ;;  %v5034_v47 = vpop.f32.mrb[179].mxu1 }
 0x74a   : > { %5100 = vst [vmem:[%s8384_s0 + $0x708] sm:$0xff] %v4918_v36  ;;  %5102 = vst [vmem:[%s8384_s0 + $0x718] sm:$0xff] %v5031_v39  ;;  %v4922_v48 = vadd.f32 %v4921_v46, %v4704_v27  ;;  %v5035_v51 = vadd.f32 %v5034_v47, %v4704_v27  ;;  %v4734_v33 = vpop.permute.xlu1 %4733 }
 0x74b   : > { %5103 = vst [vmem:[%s8384_s0 + $0x720] sm:$0xff] %v4920_v44  ;;  %v5164_v52 = vpack.c.bf16 %v4920_v44, %v4916_v31  ;;  %5105 = vst [vmem:[%s8384_s0 + $0x730] sm:$0xff] %v5033_v45  ;;  %v5166_v55 = vpack.c.bf16 %v5033_v45, %v5029_v32  ;;  %v4729_v31 = vpop.permute.xlu0 %4728 }
 0x74c   : > { %5104 = vst [vmem:[%s8384_s0 + $0x728] sm:$0xff] %v4922_v48  ;;  %v5165_v56 = vpack.c.bf16 %v4922_v48, %v4918_v36  ;;  %5106 = vst [vmem:[%s8384_s0 + $0x738] sm:$0xff] %v5035_v51  ;;  %v5167_v57 = vpack.c.bf16 %v5035_v51, %v5031_v39 }
 0x74e   : > { %v4925_v60 = vpop.f32.mrb[180].mxu0  ;;  %v5038_v63 = vpop.f32.mrb[180].mxu1  ;;  %5236 = vmatprep.subr.bf16.mxu1 %v5165_v56  ;;  %5349 = vmatprep.subr.bf16.mxu0 %v5167_v57 }
 0x74f   : > { %v4926_v0 = vadd.f32 %v4925_v60, %v4709_v59  ;;  %v5039_v4 = vadd.f32 %v5038_v63, %v4709_v59  ;;  %v4927_v5 = vpop.f32.mrb[181].mxu0  ;;  %v5040_v6 = vpop.f32.mrb[181].mxu1  ;;  %5237 = vmatpush1.bf16.msra.mxu1 %v5164_v52  ;;  %5350 = vmatpush1.bf16.msra.mxu0 %v5166_v55  ;;  %v7522_v63 = vld [vmem:[%s9958_s15 + $0xc0] sm:$0xff]  }
 0x750   : > { %v4928_v7 = vadd.f32 %v4927_v5, %v4709_v59  ;;  %v5041_v8 = vadd.f32 %v5040_v6, %v4709_v59  ;;  %v4929_v9 = vpop.f32.mrb[182].mxu0  ;;  %v5042_v12 = vpop.f32.mrb[182].mxu1  ;;  %v7525_v5 = vld [vmem:[%s9958_s15 + $0xd8] sm:$0xff]   ;;  %v7526_v6 = vld [vmem:[%s9958_s15 + $0xe0] sm:$0xff]  }
 0x751   : > { %5107 = vst [vmem:[%s8384_s0 + $0x740] sm:$0xff] %v4926_v0  ;;  %5109 = vst [vmem:[%s8384_s0 + $0x750] sm:$0xff] %v5039_v4  ;;  %v4930_v13 = vadd.f32 %v4929_v9, %v4714_v58  ;;  %v5043_v16 = vadd.f32 %v5042_v12, %v4714_v58  ;;  %v4931_v18 = vpop.f32.mrb[183].mxu0  ;;  %v5044_v19 = vpop.f32.mrb[183].mxu1  ;;  %v7529_v9 = vld [vmem:[%s9958_s15 + $0xf8] sm:$0xff]  }
 0x752   : > { %5108 = vst [vmem:[%s8384_s0 + $0x748] sm:$0xff] %v4928_v7  ;;  %5110 = vst [vmem:[%s8384_s0 + $0x758] sm:$0xff] %v5041_v8  ;;  %v4932_v20 = vadd.f32 %v4931_v18, %v4714_v58  ;;  %v5045_v21 = vadd.f32 %v5044_v19, %v4714_v58  ;;  %v5542_v12 = vpop.permute.xlu1 %5541 }
 0x753   : > { %5111 = vst [vmem:[%s8384_s0 + $0x760] sm:$0xff] %v4930_v13  ;;  %v5168_v24 = vpack.c.bf16 %v4930_v13, %v4926_v0  ;;  %5113 = vst [vmem:[%s8384_s0 + $0x770] sm:$0xff] %v5043_v16  ;;  %v5170_v25 = vpack.c.bf16 %v5043_v16, %v5039_v4  ;;  %v7523_v0 = vld [vmem:[%s9958_s15 + $0xc8] sm:$0xff]   ;;  %v7524_v4 = vld [vmem:[%s9958_s15 + $0xd0] sm:$0xff]   ;;  %v5537_v13 = vpop.permute.xlu0 %5536 }
 0x754   : > { %5112 = vst [vmem:[%s8384_s0 + $0x768] sm:$0xff] %v4932_v20  ;;  %v5169_v42 = vpack.c.bf16 %v4932_v20, %v4928_v7  ;;  %5114 = vst [vmem:[%s8384_s0 + $0x778] sm:$0xff] %v5045_v21  ;;  %v5171_v54 = vpack.c.bf16 %v5045_v21, %v5041_v8  ;;  %v7527_v7 = vld [vmem:[%s9958_s15 + $0xe8] sm:$0xff]   ;;  %v7528_v8 = vld [vmem:[%s9958_s15 + $0xf0] sm:$0xff]  }
 0x756   : > { %v4935_v38 = vpop.f32.mrb[184].mxu0  ;;  %v5048_v50 = vpop.f32.mrb[184].mxu1  ;;  %5238 = vmatprep.subr.bf16.mxu1 %v5169_v42  ;;  %5351 = vmatprep.subr.bf16.mxu0 %v5171_v54 }
 0x757   : > { %v4936_v29 = vadd.f32 %v4935_v38, %v4719_v3  ;;  %v5049_v41 = vadd.f32 %v5048_v50, %v4719_v3  ;;  %v4937_v23 = vpop.f32.mrb[185].mxu0  ;;  %v5050_v53 = vpop.f32.mrb[185].mxu1  ;;  %5239 = vmatpush1.bf16.msra.mxu1 %v5168_v24  ;;  %5352 = vmatpush1.bf16.msra.mxu0 %v5170_v25 }
 0x758   : > { %v4938_v62 = vadd.f32 %v4937_v23, %v4719_v3  ;;  %v5051_v61 = vadd.f32 %v5050_v53, %v4719_v3  ;;  %v4939_v1 = vpop.f32.mrb[186].mxu0  ;;  %v5052_v2 = vpop.f32.mrb[186].mxu1 }
 0x759   : > { %5115 = vst [vmem:[%s8384_s0 + $0x780] sm:$0xff] %v4936_v29  ;;  %5117 = vst [vmem:[%s8384_s0 + $0x790] sm:$0xff] %v5049_v41  ;;  %v4940_v14 = vadd.f32 %v4939_v1, %v4724_v37  ;;  %v5053_v15 = vadd.f32 %v5052_v2, %v4724_v37  ;;  %v4941_v30 = vpop.f32.mrb[187].mxu0  ;;  %v5054_v17 = vpop.f32.mrb[187].mxu1 }
 0x75a   : > { %5116 = vst [vmem:[%s8384_s0 + $0x788] sm:$0xff] %v4938_v62  ;;  %5118 = vst [vmem:[%s8384_s0 + $0x798] sm:$0xff] %v5051_v61  ;;  %v4942_v26 = vadd.f32 %v4941_v30, %v4724_v37  ;;  %v5055_v10 = vadd.f32 %v5054_v17, %v4724_v37  ;;  %v5552_v30 = vpop.permute.xlu1 %5551  ;;  %v5547_v17 = vpop.permute.xlu0 %5546 }
 0x75b   : > { %5119 = vst [vmem:[%s8384_s0 + $0x7a0] sm:$0xff] %v4940_v14  ;;  %v5172_v22 = vpack.c.bf16 %v4940_v14, %v4936_v29  ;;  %5121 = vst [vmem:[%s8384_s0 + $0x7b0] sm:$0xff] %v5053_v15  ;;  %v5174_v27 = vpack.c.bf16 %v5053_v15, %v5049_v41 }
 0x75c   : > { %5120 = vst [vmem:[%s8384_s0 + $0x7a8] sm:$0xff] %v4942_v26  ;;  %v5173_v28 = vpack.c.bf16 %v4942_v26, %v4938_v62  ;;  %5122 = vst [vmem:[%s8384_s0 + $0x7b8] sm:$0xff] %v5055_v10  ;;  %v5175_v49 = vpack.c.bf16 %v5055_v10, %v5051_v61 }
 0x75e   : > { %v4945_v32 = vpop.f32.mrb[188].mxu0  ;;  %v5058_v34 = vpop.f32.mrb[188].mxu1  ;;  %5240 = vmatprep.subr.bf16.mxu1 %v5173_v28  ;;  %5353 = vmatprep.subr.bf16.mxu0 %v5175_v49 }
 0x75f   : > { %v4946_v35 = vadd.f32 %v4945_v32, %v4729_v31  ;;  %v5059_v36 = vadd.f32 %v5058_v34, %v4729_v31  ;;  %v4947_v39 = vpop.f32.mrb[189].mxu0  ;;  %v5060_v40 = vpop.f32.mrb[189].mxu1  ;;  %5241 = vmatpush1.bf16.msra.mxu1 %v5172_v22  ;;  %5354 = vmatpush1.bf16.msra.mxu0 %v5174_v27 }
 0x760   : > { %v4948_v43 = vadd.f32 %v4947_v39, %v4729_v31  ;;  %v5061_v44 = vadd.f32 %v5060_v40, %v4729_v31  ;;  %v4949_v45 = vpop.f32.mrb[190].mxu0  ;;  %v5062_v46 = vpop.f32.mrb[190].mxu1 }
 0x761   : > { %5123 = vst [vmem:[%s8384_s0 + $0x7c0] sm:$0xff] %v4946_v35  ;;  %5125 = vst [vmem:[%s8384_s0 + $0x7d0] sm:$0xff] %v5059_v36  ;;  %v4950_v47 = vadd.f32 %v4949_v45, %v4734_v33  ;;  %v5063_v48 = vadd.f32 %v5062_v46, %v4734_v33  ;;  %v4951_v51 = vpop.f32.mrb[191].mxu0  ;;  %v5064_v52 = vpop.f32.mrb[191].mxu1 }
 0x762   : > { %5124 = vst [vmem:[%s8384_s0 + $0x7c8] sm:$0xff] %v4948_v43  ;;  %5126 = vst [vmem:[%s8384_s0 + $0x7d8] sm:$0xff] %v5061_v44  ;;  %v4952_v55 = vadd.f32 %v4951_v51, %v4734_v33  ;;  %v5065_v56 = vadd.f32 %v5064_v52, %v4734_v33 }
 0x763   : > { %5127 = vst [vmem:[%s8384_s0 + $0x7e0] sm:$0xff] %v4950_v47  ;;  %v5176_v57 = vpack.c.bf16 %v4950_v47, %v4946_v35  ;;  %5129 = vst [vmem:[%s8384_s0 + $0x7f0] sm:$0xff] %v5063_v48  ;;  %v5178_v58 = vpack.c.bf16 %v5063_v48, %v5059_v36 }
 0x764   : > { %5128 = vst [vmem:[%s8384_s0 + $0x7e8] sm:$0xff] %v4952_v55  ;;  %v5177_v59 = vpack.c.bf16 %v4952_v55, %v4948_v43  ;;  %5130 = vst [vmem:[%s8384_s0 + $0x7f8] sm:$0xff] %v5065_v56  ;;  %v5179_v60 = vpack.c.bf16 %v5065_v56, %v5061_v44 }
 0x766   : > { %5242 = vmatprep.subr.bf16.mxu1 %v5177_v59  ;;  %5355 = vmatprep.subr.bf16.mxu0 %v5179_v60 }
 0x767   : > { %5243 = vmatpush1.bf16.msra.mxu1 %v5176_v57  ;;  %5356 = vmatpush1.bf16.msra.mxu0 %v5178_v58 }
 0x76a   : > { %5261 = vmatmul.mubr.bf16.vlgmr.msra.gmra.mrb[80].mxu1 %v7522_v63  ;;  %5374 = vmatmul.mubr.bf16.vlgmr.msra.gmra.mrb[96].mxu0 %v7522_v63  ;;  %v5562_v63 = vpop.permute.xlu1 %5561 }
 0x76b   : > { %5270 = vmatprep.mubr.bf16.mxu1 %v10036_v11  ;;  %5383 = vmatprep.mubr.bf16.mxu0 %v10036_v11 }
 0x772   : > { %5271 = vmatmul.mubr.bf16.gmra.mrb[84].mxu1 %v7523_v0  ;;  %5384 = vmatmul.mubr.bf16.gmra.mrb[100].mxu0 %v7523_v0  ;;  %v5557_v0 = vpop.permute.xlu0 %5556 }
 0x773   : > { %5280 = vmatprep.mubr.bf16.mxu1 %v10036_v11  ;;  %5393 = vmatprep.mubr.bf16.mxu0 %v10036_v11 }
 0x77a   : > { %5281 = vmatmul.mubr.bf16.gmra.mrb[88].mxu1 %v7524_v4  ;;  %5394 = vmatmul.mubr.bf16.gmra.mrb[104].mxu0 %v7524_v4 }
 0x77b   : > { %5290 = vmatprep.mubr.bf16.mxu1 %v10036_v11  ;;  %5403 = vmatprep.mubr.bf16.mxu0 %v10036_v11 }
 0x782   : > { %5291 = vmatmul.mubr.bf16.gmra.mrb[92].mxu1 %v7525_v5  ;;  %5404 = vmatmul.mubr.bf16.gmra.mrb[108].mxu0 %v7525_v5 }
 0x783   : > { %5300 = vmatprep.mubr.bf16.mxu1 %v10036_v11  ;;  %5413 = vmatprep.mubr.bf16.mxu0 %v10036_v11 }
 0x78a   : > { %5301 = vmatmul.mubr.bf16.gmra.mrb[96].mxu1 %v7526_v6  ;;  %5414 = vmatmul.mubr.bf16.gmra.mrb[112].mxu0 %v7526_v6 }
 0x78b   : > { %5310 = vmatprep.mubr.bf16.mxu1 %v10036_v11  ;;  %5423 = vmatprep.mubr.bf16.mxu0 %v10036_v11 }
 0x792   : > { %5311 = vmatmul.mubr.bf16.gmra.mrb[100].mxu1 %v7527_v7  ;;  %5424 = vmatmul.mubr.bf16.gmra.mrb[116].mxu0 %v7527_v7 }
 0x793   : > { %5320 = vmatprep.mubr.bf16.mxu1 %v10036_v11  ;;  %5433 = vmatprep.mubr.bf16.mxu0 %v10036_v11 }
 0x79a   : > { %5321 = vmatmul.mubr.bf16.gmra.mrb[104].mxu1 %v7528_v8  ;;  %5434 = vmatmul.mubr.bf16.gmra.mrb[120].mxu0 %v7528_v8 }
 0x79b   : > { %5330 = vmatprep.mubr.bf16.mxu1 %v10036_v11  ;;  %5443 = vmatprep.mubr.bf16.mxu0 %v10036_v11 }
 0x7a2   : > { %5331 = vmatmul.mubr.bf16.gmra.mrb[108].mxu1 %v7529_v9  ;;  %5444 = vmatmul.mubr.bf16.gmra.mrb[124].mxu0 %v7529_v9 }
 0x7a3   : > { %5817 = vmatprep.mubr.bf16.mxu0 %v10036_v11  ;;  %5858 = vmatprep.mubr.bf16.mxu1 %v10036_v11 }
 0x83d   : > { %v5262_v16 = vpop.f32.mrb[80].mxu1  ;;  %v5375_v18 = vpop.f32.mrb[96].mxu0 }
 0x83e   : > { %v5614_v19 = vadd.f32 %v5537_v13, %v5262_v16  ;;  %v5616_v20 = vadd.f32 %v5537_v13, %v5375_v18  ;;  %v5264_v21 = vpop.f32.mrb[81].mxu1  ;;  %v5377_v24 = vpop.f32.mrb[97].mxu0 }
 0x83f   : > { %v5615_v25 = vadd.f32 %v5537_v13, %v5264_v21  ;;  %v5617_v42 = vadd.f32 %v5537_v13, %v5377_v24  ;;  %v5266_v54 = vpop.f32.mrb[82].mxu1  ;;  %v5379_v37 = vpop.f32.mrb[98].mxu0 }
 0x840   : > { %v5618_v3 = vadd.f32 %v5542_v12, %v5266_v54  ;;  %v5620_v38 = vadd.f32 %v5542_v12, %v5379_v37  ;;  %v5268_v50 = vpop.f32.mrb[83].mxu1  ;;  %v5381_v29 = vpop.f32.mrb[99].mxu0  ;;  %v5678_v53 = vmax.f32 %v5614_v19, 0.0  ;;  %v5680_v11 = vmax.f32 %v5616_v20, 0.0 }
 0x841   : > { %v5619_v41 = vadd.f32 %v5542_v12, %v5268_v50  ;;  %v5621_v23 = vadd.f32 %v5542_v12, %v5381_v29  ;;  %v5679_v1 = vmax.f32 %v5615_v25, 0.0  ;;  %v5681_v2 = vmax.f32 %v5617_v42, 0.0 }
 0x842   : > { %v5682_v62 = vmax.f32 %v5618_v3, 0.0  ;;  %v5684_v61 = vmax.f32 %v5620_v38, 0.0 }
 0x843   : > { %v5683_v14 = vmax.f32 %v5619_v41, 0.0  ;;  %v5685_v15 = vmax.f32 %v5621_v23, 0.0 }
 0x844   : > { %v5743_v26 = vpack.c.bf16 %v5682_v62, %v5678_v53  ;;  %v5745_v10 = vpack.c.bf16 %v5684_v61, %v5680_v11 }
 0x845   : > { %v5744_v22 = vpack.c.bf16 %v5683_v14, %v5679_v1  ;;  %v5746_v27 = vpack.c.bf16 %v5685_v15, %v5681_v2  ;;  %v5272_v28 = vpop.f32.mrb[84].mxu1  ;;  %v5385_v49 = vpop.f32.mrb[100].mxu0 }
 0x846   : > { %v5622_v33 = vadd.f32 %v5547_v17, %v5272_v28  ;;  %v5624_v31 = vadd.f32 %v5547_v17, %v5385_v49  ;;  %v5274_v32 = vpop.f32.mrb[85].mxu1  ;;  %v5387_v34 = vpop.f32.mrb[101].mxu0 }
 0x847   : > { %v5623_v35 = vadd.f32 %v5547_v17, %v5274_v32  ;;  %v5625_v36 = vadd.f32 %v5547_v17, %v5387_v34  ;;  %v5276_v39 = vpop.f32.mrb[86].mxu1  ;;  %v5389_v40 = vpop.f32.mrb[102].mxu0  ;;  %5785 = vmatprep.subr.bf16.mxu0 %v5744_v22  ;;  %5826 = vmatprep.subr.bf16.mxu1 %v5746_v27 }
 0x848   : > { %v5626_v43 = vadd.f32 %v5552_v30, %v5276_v39  ;;  %v5628_v44 = vadd.f32 %v5552_v30, %v5389_v40  ;;  %v5278_v45 = vpop.f32.mrb[87].mxu1  ;;  %v5391_v46 = vpop.f32.mrb[103].mxu0  ;;  %5786 = vmatpush1.bf16.msra.mxu0 %v5743_v26  ;;  %5827 = vmatpush1.bf16.msra.mxu1 %v5745_v10  ;;  %v5686_v51 = vmax.f32 %v5622_v33, 0.0  ;;  %v5688_v52 = vmax.f32 %v5624_v31, 0.0 }
 0x849   : > { %v5627_v47 = vadd.f32 %v5552_v30, %v5278_v45  ;;  %v5629_v48 = vadd.f32 %v5552_v30, %v5391_v46  ;;  %v5687_v57 = vmax.f32 %v5623_v35, 0.0  ;;  %v5689_v58 = vmax.f32 %v5625_v36, 0.0  ;;  %v5572_v1 = vpop.permute.xlu1 %5571  ;;  %v5567_v2 = vpop.permute.xlu0 %5566 }
 0x84a   : > { %v5690_v55 = vmax.f32 %v5626_v43, 0.0  ;;  %v5692_v56 = vmax.f32 %v5628_v44, 0.0 }
 0x84b   : > { %v5691_v59 = vmax.f32 %v5627_v47, 0.0  ;;  %v5693_v60 = vmax.f32 %v5629_v48, 0.0 }
 0x84c   : > { %v5747_v4 = vpack.c.bf16 %v5690_v55, %v5686_v51  ;;  %v5749_v5 = vpack.c.bf16 %v5692_v56, %v5688_v52 }
 0x84d   : > { %v5748_v6 = vpack.c.bf16 %v5691_v59, %v5687_v57  ;;  %v5750_v7 = vpack.c.bf16 %v5693_v60, %v5689_v58  ;;  %v5282_v8 = vpop.f32.mrb[88].mxu1  ;;  %v5395_v9 = vpop.f32.mrb[104].mxu0 }
 0x84e   : > { %v5630_v12 = vadd.f32 %v5557_v0, %v5282_v8  ;;  %v5632_v13 = vadd.f32 %v5557_v0, %v5395_v9  ;;  %v5284_v16 = vpop.f32.mrb[89].mxu1  ;;  %v5397_v18 = vpop.f32.mrb[105].mxu0 }
 0x84f   : > { %v5631_v19 = vadd.f32 %v5557_v0, %v5284_v16  ;;  %v5633_v20 = vadd.f32 %v5557_v0, %v5397_v18  ;;  %v5286_v21 = vpop.f32.mrb[90].mxu1  ;;  %v5399_v24 = vpop.f32.mrb[106].mxu0  ;;  %5787 = vmatprep.subr.bf16.mxu0 %v5748_v6  ;;  %5828 = vmatprep.subr.bf16.mxu1 %v5750_v7 }
 0x850   : > { %v5634_v25 = vadd.f32 %v5562_v63, %v5286_v21  ;;  %v5636_v42 = vadd.f32 %v5562_v63, %v5399_v24  ;;  %v5288_v54 = vpop.f32.mrb[91].mxu1  ;;  %v5401_v37 = vpop.f32.mrb[107].mxu0  ;;  %5788 = vmatpush1.bf16.msra.mxu0 %v5747_v4  ;;  %5829 = vmatpush1.bf16.msra.mxu1 %v5749_v5  ;;  %v5694_v50 = vmax.f32 %v5630_v12, 0.0  ;;  %v5696_v29 = vmax.f32 %v5632_v13, 0.0 }
 0x851   : > { %v5635_v3 = vadd.f32 %v5562_v63, %v5288_v54  ;;  %v5637_v38 = vadd.f32 %v5562_v63, %v5401_v37  ;;  %v5695_v53 = vmax.f32 %v5631_v19, 0.0  ;;  %v5697_v11 = vmax.f32 %v5633_v20, 0.0  ;;  %v5582_v57 = vpop.permute.xlu1 %5581  ;;  %v5577_v58 = vpop.permute.xlu0 %5576 }
 0x852   : > { %v5698_v41 = vmax.f32 %v5634_v25, 0.0  ;;  %v5700_v23 = vmax.f32 %v5636_v42, 0.0 }
 0x853   : > { %v5699_v62 = vmax.f32 %v5635_v3, 0.0  ;;  %v5701_v61 = vmax.f32 %v5637_v38, 0.0 }
 0x854   : > { %v5751_v14 = vpack.c.bf16 %v5698_v41, %v5694_v50  ;;  %v5753_v15 = vpack.c.bf16 %v5700_v23, %v5696_v29 }
 0x855   : > { %v5752_v30 = vpack.c.bf16 %v5699_v62, %v5695_v53  ;;  %v5754_v17 = vpack.c.bf16 %v5701_v61, %v5697_v11  ;;  %v5292_v26 = vpop.f32.mrb[92].mxu1  ;;  %v5405_v10 = vpop.f32.mrb[108].mxu0 }
 0x856   : > { %v5638_v22 = vadd.f32 %v5567_v2, %v5292_v26  ;;  %v5640_v27 = vadd.f32 %v5567_v2, %v5405_v10  ;;  %v5294_v28 = vpop.f32.mrb[93].mxu1  ;;  %v5407_v49 = vpop.f32.mrb[109].mxu0 }
 0x857   : > { %v5639_v33 = vadd.f32 %v5567_v2, %v5294_v28  ;;  %v5641_v31 = vadd.f32 %v5567_v2, %v5407_v49  ;;  %v5296_v32 = vpop.f32.mrb[94].mxu1  ;;  %v5409_v34 = vpop.f32.mrb[110].mxu0  ;;  %5789 = vmatprep.subr.bf16.mxu0 %v5752_v30  ;;  %5830 = vmatprep.subr.bf16.mxu1 %v5754_v17 }
 0x858   : > { %v5642_v35 = vadd.f32 %v5572_v1, %v5296_v32  ;;  %v5644_v36 = vadd.f32 %v5572_v1, %v5409_v34  ;;  %v5298_v39 = vpop.f32.mrb[95].mxu1  ;;  %v5411_v40 = vpop.f32.mrb[111].mxu0  ;;  %5790 = vmatpush1.bf16.msra.mxu0 %v5751_v14  ;;  %5831 = vmatpush1.bf16.msra.mxu1 %v5753_v15  ;;  %v5702_v45 = vmax.f32 %v5638_v22, 0.0  ;;  %v5704_v46 = vmax.f32 %v5640_v27, 0.0 }
 0x859   : > { %v5643_v43 = vadd.f32 %v5572_v1, %v5298_v39  ;;  %v5645_v44 = vadd.f32 %v5572_v1, %v5411_v40  ;;  %v5703_v51 = vmax.f32 %v5639_v33, 0.0  ;;  %v5705_v52 = vmax.f32 %v5641_v31, 0.0  ;;  %v5592_v53 = vpop.permute.xlu1 %5591  ;;  %v5587_v11 = vpop.permute.xlu0 %5586 }
 0x85a   : > { %v5706_v47 = vmax.f32 %v5642_v35, 0.0  ;;  %v5708_v48 = vmax.f32 %v5644_v36, 0.0 }
 0x85b   : > { %v5707_v55 = vmax.f32 %v5643_v43, 0.0  ;;  %v5709_v56 = vmax.f32 %v5645_v44, 0.0 }
 0x85c   : > { %v5755_v59 = vpack.c.bf16 %v5706_v47, %v5702_v45  ;;  %v5757_v60 = vpack.c.bf16 %v5708_v48, %v5704_v46 }
 0x85d   : > { %v5756_v63 = vpack.c.bf16 %v5707_v55, %v5703_v51  ;;  %v5758_v0 = vpack.c.bf16 %v5709_v56, %v5705_v52  ;;  %v5302_v4 = vpop.f32.mrb[96].mxu1  ;;  %v5415_v5 = vpop.f32.mrb[112].mxu0 }
 0x85e   : > { %v5646_v6 = vadd.f32 %v5577_v58, %v5302_v4  ;;  %v5648_v7 = vadd.f32 %v5577_v58, %v5415_v5  ;;  %v5304_v8 = vpop.f32.mrb[97].mxu1  ;;  %v5417_v9 = vpop.f32.mrb[113].mxu0 }
 0x85f   : > { %v5647_v12 = vadd.f32 %v5577_v58, %v5304_v8  ;;  %v5649_v13 = vadd.f32 %v5577_v58, %v5417_v9  ;;  %v5306_v16 = vpop.f32.mrb[98].mxu1  ;;  %v5419_v18 = vpop.f32.mrb[114].mxu0  ;;  %5791 = vmatprep.subr.bf16.mxu0 %v5756_v63  ;;  %5832 = vmatprep.subr.bf16.mxu1 %v5758_v0 }
 0x860   : > { %v5650_v19 = vadd.f32 %v5582_v57, %v5306_v16  ;;  %v5652_v20 = vadd.f32 %v5582_v57, %v5419_v18  ;;  %v5308_v21 = vpop.f32.mrb[99].mxu1  ;;  %v5421_v24 = vpop.f32.mrb[115].mxu0  ;;  %5792 = vmatpush1.bf16.msra.mxu0 %v5755_v59  ;;  %5833 = vmatpush1.bf16.msra.mxu1 %v5757_v60  ;;  %v5710_v54 = vmax.f32 %v5646_v6, 0.0  ;;  %v5712_v37 = vmax.f32 %v5648_v7, 0.0 }
 0x861   : > { %v5651_v25 = vadd.f32 %v5582_v57, %v5308_v21  ;;  %v5653_v42 = vadd.f32 %v5582_v57, %v5421_v24  ;;  %v5711_v50 = vmax.f32 %v5647_v12, 0.0  ;;  %v5713_v29 = vmax.f32 %v5649_v13, 0.0  ;;  %v5602_v51 = vpop.permute.xlu1 %5601  ;;  %v5597_v52 = vpop.permute.xlu0 %5596 }
 0x862   : > { %v5714_v3 = vmax.f32 %v5650_v19, 0.0  ;;  %v5716_v38 = vmax.f32 %v5652_v20, 0.0 }
 0x863   : > { %v5715_v41 = vmax.f32 %v5651_v25, 0.0  ;;  %v5717_v23 = vmax.f32 %v5653_v42, 0.0 }
 0x864   : > { %v5759_v62 = vpack.c.bf16 %v5714_v3, %v5710_v54  ;;  %v5761_v61 = vpack.c.bf16 %v5716_v38, %v5712_v37 }
 0x865   : > { %v5760_v1 = vpack.c.bf16 %v5715_v41, %v5711_v50  ;;  %v5762_v2 = vpack.c.bf16 %v5717_v23, %v5713_v29  ;;  %v5312_v14 = vpop.f32.mrb[100].mxu1  ;;  %v5425_v15 = vpop.f32.mrb[116].mxu0 }
 0x866   : > { %v5654_v30 = vadd.f32 %v5587_v11, %v5312_v14  ;;  %v5656_v17 = vadd.f32 %v5587_v11, %v5425_v15  ;;  %v5314_v26 = vpop.f32.mrb[101].mxu1  ;;  %v5427_v10 = vpop.f32.mrb[117].mxu0 }
 0x867   : > { %v5655_v22 = vadd.f32 %v5587_v11, %v5314_v26  ;;  %v5657_v27 = vadd.f32 %v5587_v11, %v5427_v10  ;;  %v5316_v28 = vpop.f32.mrb[102].mxu1  ;;  %v5429_v49 = vpop.f32.mrb[118].mxu0  ;;  %5793 = vmatprep.subr.bf16.mxu0 %v5760_v1  ;;  %5834 = vmatprep.subr.bf16.mxu1 %v5762_v2 }
 0x868   : > { %v5658_v33 = vadd.f32 %v5592_v53, %v5316_v28  ;;  %v5660_v31 = vadd.f32 %v5592_v53, %v5429_v49  ;;  %v5318_v32 = vpop.f32.mrb[103].mxu1  ;;  %v5431_v34 = vpop.f32.mrb[119].mxu0  ;;  %5794 = vmatpush1.bf16.msra.mxu0 %v5759_v62  ;;  %5835 = vmatpush1.bf16.msra.mxu1 %v5761_v61  ;;  %v5718_v39 = vmax.f32 %v5654_v30, 0.0  ;;  %v5720_v40 = vmax.f32 %v5656_v17, 0.0 }
 0x869   : > { %v5659_v35 = vadd.f32 %v5592_v53, %v5318_v32  ;;  %v5661_v36 = vadd.f32 %v5592_v53, %v5431_v34  ;;  %v5719_v45 = vmax.f32 %v5655_v22, 0.0  ;;  %v5721_v46 = vmax.f32 %v5657_v27, 0.0  ;;  %v5612_v50 = vpop.permute.xlu1 %5611  ;;  %v5607_v29 = vpop.permute.xlu0 %5606 }
 0x86a   : > { %v5722_v43 = vmax.f32 %v5658_v33, 0.0  ;;  %v5724_v44 = vmax.f32 %v5660_v31, 0.0 }
 0x86b   : > { %v5723_v47 = vmax.f32 %v5659_v35, 0.0  ;;  %v5725_v48 = vmax.f32 %v5661_v36, 0.0 }
 0x86c   : > { %v5763_v55 = vpack.c.bf16 %v5722_v43, %v5718_v39  ;;  %v5765_v56 = vpack.c.bf16 %v5724_v44, %v5720_v40 }
 0x86d   : > { %v5764_v57 = vpack.c.bf16 %v5723_v47, %v5719_v45  ;;  %v5766_v58 = vpack.c.bf16 %v5725_v48, %v5721_v46  ;;  %v5322_v59 = vpop.f32.mrb[104].mxu1  ;;  %v5435_v60 = vpop.f32.mrb[120].mxu0 }
 0x86e   : > { %v5662_v63 = vadd.f32 %v5597_v52, %v5322_v59  ;;  %v5664_v0 = vadd.f32 %v5597_v52, %v5435_v60  ;;  %v5324_v4 = vpop.f32.mrb[105].mxu1  ;;  %v5437_v5 = vpop.f32.mrb[121].mxu0  ;;  %v6022_v60 = vld [vmem:[%s8384_s0 + $0x138] sm:$0xff] (%p7699_p5) }
 0x86f   : > { %v5663_v6 = vadd.f32 %v5597_v52, %v5324_v4  ;;  %v5665_v7 = vadd.f32 %v5597_v52, %v5437_v5  ;;  %v5326_v8 = vpop.f32.mrb[106].mxu1  ;;  %v5439_v9 = vpop.f32.mrb[122].mxu0  ;;  %5795 = vmatprep.subr.bf16.mxu0 %v5764_v57  ;;  %5836 = vmatprep.subr.bf16.mxu1 %v5766_v58  ;;  %v5781_v52 = vlaneseq  ;;  %6023 = vst [vmem:[%s9422_s23 + $0x258] sm:$0xff] (%p7699_p5), %v6022_v60  ;;  %v6150_v60 = vld [vmem:[%s8384_s0 + $0x338] sm:$0xff] (%p7699_p5) }
 0x870   : > { %v5666_v12 = vadd.f32 %v5602_v51, %v5326_v8  ;;  %v5668_v13 = vadd.f32 %v5602_v51, %v5439_v9  ;;  %v5328_v16 = vpop.f32.mrb[107].mxu1  ;;  %v5441_v18 = vpop.f32.mrb[123].mxu0  ;;  %5796 = vmatpush1.bf16.msra.mxu0 %v5763_v55  ;;  %5837 = vmatpush1.bf16.msra.mxu1 %v5765_v56  ;;  %v5726_v21 = vmax.f32 %v5662_v63, 0.0  ;;  %v5728_v24 = vmax.f32 %v5664_v0, 0.0  ;;  %v6026_v0 = vld [vmem:[%s8384_s0 + $0x148] sm:$0xff] (%p7699_p5)  ;;  %6151 = vst [vmem:[%s9422_s23 + $0x658] sm:$0xff] (%p7699_p5), %v6150_v60 }
 0x871   : > { %v5667_v19 = vadd.f32 %v5602_v51, %v5328_v16  ;;  %v5669_v20 = vadd.f32 %v5602_v51, %v5441_v18  ;;  %v5727_v54 = vmax.f32 %v5663_v6, 0.0  ;;  %v5729_v37 = vmax.f32 %v5665_v7, 0.0  ;;  %v5742_v51 = vld [vmem:[%s9960_s17] sm:$0x1]  ;;  %v5779_v59 = vpop.permute.xlu0 %5778  ;;  %6027 = vst [vmem:[%s9422_s23 + $0x288] sm:$0xff] (%p7699_p5), %v6026_v0  ;;  %v6154_v0 = vld [vmem:[%s8384_s0 + $0x348] sm:$0xff] (%p7699_p5) }
 0x872   : > { %v5730_v25 = vmax.f32 %v5666_v12, 0.0  ;;  %v5732_v42 = vmax.f32 %v5668_v13, 0.0  ;;  %v5782_v55 = vshrl.u32 %v5781_v52, 7  ;;  %v7555_v56 = vmov 1966171168   ;;  %v6010_v52 = vld [vmem:[%s8384_s0 + $0x108] sm:$0xff] (%p7699_p5) }
 0x873   : > { %v5731_v3 = vmax.f32 %v5667_v19, 0.0  ;;  %v5733_v38 = vmax.f32 %v5669_v20, 0.0  ;;  %v5878_v57 = vunpack.c.l.s4 %v7555_v56  ;;  %v6014_v56 = vld [vmem:[%s8384_s0 + $0x118] sm:$0xff] (%p7699_p5)  ;;  %6011 = vst [vmem:[%s9422_s23 + $0x208] sm:$0xff] (%p7699_p5), %v6010_v52  ;;  %v6138_v52 = vld [vmem:[%s8384_s0 + $0x308] sm:$0xff] (%p7699_p5)  ;;  %6155 = vst [vmem:[%s9422_s23 + $0x688] sm:$0xff] (%p7699_p5), %v6154_v0 }
 0x874   : > { %v5767_v41 = vpack.c.bf16 %v5730_v25, %v5726_v21  ;;  %v5769_v23 = vpack.c.bf16 %v5732_v42, %v5728_v24  ;;  %v5783_v58 = vsub.s32 0, %v5782_v55  ;;  %6015 = vst [vmem:[%s9422_s23 + $0x218] sm:$0xff] (%p7699_p5), %v6014_v56  ;;  %6139 = vst [vmem:[%s9422_s23 + $0x608] sm:$0xff] (%p7699_p5), %v6138_v52  ;;  %v6142_v56 = vld [vmem:[%s8384_s0 + $0x318] sm:$0xff] (%p7699_p5)  ;;  %v6266_v52 = vld [vmem:[%s8384_s0 + $0x508] sm:$0xff] (%p7699_p5) }
 0x875   : > { %v5768_v53 = vpack.c.bf16 %v5731_v3, %v5727_v54  ;;  %v5770_v11 = vpack.c.bf16 %v5733_v38, %v5729_v37  ;;  %v5332_v62 = vpop.f32.mrb[108].mxu1  ;;  %v5445_v61 = vpop.f32.mrb[124].mxu0  ;;  %v5879_v63 = vunpack.c.0.s8 %v5878_v57  ;;  %v5915_v38 = vld [vmem:[%s1067_s22] sm:$0xf]  ;;  %6143 = vst [vmem:[%s9422_s23 + $0x618] sm:$0xff] (%p7699_p5), %v6142_v56  ;;  %6267 = vst [vmem:[%s9422_s23 + $0xa08] sm:$0xff] (%p7699_p5), %v6266_v52 }
 0x876   : > { %v5670_v1 = vadd.f32 %v5607_v29, %v5332_v62  ;;  %v5672_v2 = vadd.f32 %v5607_v29, %v5445_v61  ;;  %v5334_v14 = vpop.f32.mrb[109].mxu1  ;;  %v5447_v15 = vpop.f32.mrb[125].mxu0  ;;  %v5784_v4 = vrot.slane %v5779_v59, %v5783_v58  ;;  %v5952_v62 = vld [vmem:[%s8384_s0 + $0x20] sm:$0xff] (%p7699_p5)  ;;  %v5954_v61 = vld [vmem:[%s8384_s0 + $0x28] sm:$0xff] (%p7699_p5)  ;;  %v6020_v59 = vld [vmem:[%s8384_s0 + $0x130] sm:$0xff] (%p7699_p5) }
 0x877   : > { %v5671_v30 = vadd.f32 %v5607_v29, %v5334_v14  ;;  %v5673_v17 = vadd.f32 %v5607_v29, %v5447_v15  ;;  %v5336_v26 = vpop.f32.mrb[110].mxu1  ;;  %v5449_v10 = vpop.f32.mrb[126].mxu0  ;;  %5797 = vmatprep.subr.bf16.mxu0 %v5768_v53  ;;  %5838 = vmatprep.subr.bf16.mxu1 %v5770_v11  ;;  %v5882_v13 = vsub.s32 %v5879_v63, %v5782_v55  ;;  %v5948_v53 = vld [vmem:[%s8384_s0 + $0x10] sm:$0xff] (%p7699_p5)  ;;  %v5950_v11 = vld [vmem:[%s8384_s0 + $0x18] sm:$0xff] (%p7699_p5)  ;;  %v5960_v14 = vld [vmem:[%s8384_s0 + $0x40] sm:$0xff] (%p7699_p5) }
 0x878   : > { %v5674_v22 = vadd.f32 %v5612_v50, %v5336_v26  ;;  %v5676_v27 = vadd.f32 %v5612_v50, %v5449_v10  ;;  %v5338_v28 = vpop.f32.mrb[111].mxu1  ;;  %v5451_v49 = vpop.f32.mrb[127].mxu0  ;;  %5798 = vmatpush1.bf16.msra.mxu0 %v5767_v41  ;;  %5839 = vmatpush1.bf16.msra.mxu1 %v5769_v23  ;;  %v5734_v32 = vmax.f32 %v5670_v1, 0.0  ;;  %v5736_v34 = vmax.f32 %v5672_v2, 0.0  ;;  %v5944_v41 = vld [vmem:[%s8384_s0] sm:$0xff] (%p7699_p5)  ;;  %v5946_v23 = vld [vmem:[%s8384_s0 + $0x8] sm:$0xff] (%p7699_p5) }
 0x879   : > { %v5675_v33 = vadd.f32 %v5612_v50, %v5338_v28  ;;  %v5677_v31 = vadd.f32 %v5612_v50, %v5451_v49  ;;  %v5735_v39 = vmax.f32 %v5671_v30, 0.0  ;;  %v5737_v40 = vmax.f32 %v5673_v17, 0.0  ;;  %5945 = vst [vmem:[%s9422_s23] sm:$0xff] (%p7699_p5), %v5944_v41  ;;  %5947 = vst [vmem:[%s9422_s23 + $0x8] sm:$0xff] (%p7699_p5), %v5946_v23  ;;  %v5956_v1 = vld [vmem:[%s8384_s0 + $0x30] sm:$0xff] (%p7699_p5)  ;;  %v5958_v2 = vld [vmem:[%s8384_s0 + $0x38] sm:$0xff] (%p7699_p5) }
 0x87a   : > { %v5738_v35 = vmax.f32 %v5674_v22, 0.0  ;;  %v5740_v36 = vmax.f32 %v5676_v27, 0.0  ;;  %5949 = vst [vmem:[%s9422_s23 + $0x10] sm:$0xff] (%p7699_p5), %v5948_v53  ;;  %5951 = vst [vmem:[%s9422_s23 + $0x18] sm:$0xff] (%p7699_p5), %v5950_v11  ;;  %v5962_v15 = vld [vmem:[%s8384_s0 + $0x48] sm:$0xff] (%p7699_p5)  ;;  %v5964_v30 = vld [vmem:[%s8384_s0 + $0x50] sm:$0xff] (%p7699_p5) }
 0x87b   : > { %v5739_v43 = vmax.f32 %v5675_v33, 0.0  ;;  %v5741_v44 = vmax.f32 %v5677_v31, 0.0  ;;  %5953 = vst [vmem:[%s9422_s23 + $0x40] sm:$0xff] (%p7699_p5), %v5952_v62  ;;  %5955 = vst [vmem:[%s9422_s23 + $0x48] sm:$0xff] (%p7699_p5), %v5954_v61  ;;  %v5966_v17 = vld [vmem:[%s8384_s0 + $0x58] sm:$0xff] (%p7699_p5)  ;;  %v5968_v26 = vld [vmem:[%s8384_s0 + $0x60] sm:$0xff] (%p7699_p5) }
 0x87c   : > { %v5771_v45 = vpack.c.bf16 %v5738_v35, %v5734_v32  ;;  %v5773_v46 = vpack.c.bf16 %v5740_v36, %v5736_v34  ;;  %5957 = vst [vmem:[%s9422_s23 + $0x50] sm:$0xff] (%p7699_p5), %v5956_v1  ;;  %5959 = vst [vmem:[%s9422_s23 + $0x58] sm:$0xff] (%p7699_p5), %v5958_v2  ;;  %v5970_v10 = vld [vmem:[%s8384_s0 + $0x68] sm:$0xff] (%p7699_p5)  ;;  %v5972_v22 = vld [vmem:[%s8384_s0 + $0x70] sm:$0xff] (%p7699_p5) }
 0x87d   : > { %v5772_v47 = vpack.c.bf16 %v5739_v43, %v5735_v39  ;;  %v5774_v48 = vpack.c.bf16 %v5741_v44, %v5737_v40  ;;  %5961 = vst [vmem:[%s9422_s23 + $0x80] sm:$0xff] (%p7699_p5), %v5960_v14  ;;  %5963 = vst [vmem:[%s9422_s23 + $0x88] sm:$0xff] (%p7699_p5), %v5962_v15  ;;  %v5974_v27 = vld [vmem:[%s8384_s0 + $0x78] sm:$0xff] (%p7699_p5)  ;;  %v5976_v28 = vld [vmem:[%s8384_s0 + $0x80] sm:$0xff] (%p7699_p5) }
 0x87e   : > { %5965 = vst [vmem:[%s9422_s23 + $0x90] sm:$0xff] (%p7699_p5), %v5964_v30  ;;  %5967 = vst [vmem:[%s9422_s23 + $0x98] sm:$0xff] (%p7699_p5), %v5966_v17  ;;  %v5978_v49 = vld [vmem:[%s8384_s0 + $0x88] sm:$0xff] (%p7699_p5)  ;;  %v5980_v33 = vld [vmem:[%s8384_s0 + $0x90] sm:$0xff] (%p7699_p5) }
 0x87f   : > { %5799 = vmatprep.subr.bf16.mxu0 %v5772_v47  ;;  %5840 = vmatprep.subr.bf16.mxu1 %v5774_v48  ;;  %5969 = vst [vmem:[%s9422_s23 + $0xc0] sm:$0xff] (%p7699_p5), %v5968_v26  ;;  %5971 = vst [vmem:[%s9422_s23 + $0xc8] sm:$0xff] (%p7699_p5), %v5970_v10  ;;  %v5982_v31 = vld [vmem:[%s8384_s0 + $0x98] sm:$0xff] (%p7699_p5)  ;;  %v5984_v32 = vld [vmem:[%s8384_s0 + $0xa0] sm:$0xff] (%p7699_p5) }
 0x880   : > { %5800 = vmatpush1.bf16.msra.mxu0 %v5771_v45  ;;  %5841 = vmatpush1.bf16.msra.mxu1 %v5773_v46  ;;  %5973 = vst [vmem:[%s9422_s23 + $0xd0] sm:$0xff] (%p7699_p5), %v5972_v22  ;;  %5975 = vst [vmem:[%s9422_s23 + $0xd8] sm:$0xff] (%p7699_p5), %v5974_v27  ;;  %v5986_v34 = vld [vmem:[%s8384_s0 + $0xa8] sm:$0xff] (%p7699_p5)  ;;  %v5988_v35 = vld [vmem:[%s8384_s0 + $0xb0] sm:$0xff] (%p7699_p5) }
 0x881   : > { %5977 = vst [vmem:[%s9422_s23 + $0x100] sm:$0xff] (%p7699_p5), %v5976_v28  ;;  %5979 = vst [vmem:[%s9422_s23 + $0x108] sm:$0xff] (%p7699_p5), %v5978_v49  ;;  %v5990_v36 = vld [vmem:[%s8384_s0 + $0xb8] sm:$0xff] (%p7699_p5)  ;;  %v5992_v39 = vld [vmem:[%s8384_s0 + $0xc0] sm:$0xff] (%p7699_p5) }
 0x882   : > { %5981 = vst [vmem:[%s9422_s23 + $0x110] sm:$0xff] (%p7699_p5), %v5980_v33  ;;  %5983 = vst [vmem:[%s9422_s23 + $0x118] sm:$0xff] (%p7699_p5), %v5982_v31  ;;  %v5994_v40 = vld [vmem:[%s8384_s0 + $0xc8] sm:$0xff] (%p7699_p5)  ;;  %v5996_v43 = vld [vmem:[%s8384_s0 + $0xd0] sm:$0xff] (%p7699_p5) }
 0x883   : > { %5818 = vmatmul.mubr.bf16.vlgmr.msra.gmra.mrb[192].mxu0 %v5742_v51  ;;  %5859 = vmatmul.mubr.bf16.vlgmr.msra.gmra.mrb[192].mxu1 %v5742_v51  ;;  %5985 = vst [vmem:[%s9422_s23 + $0x140] sm:$0xff] (%p7699_p5), %v5984_v32  ;;  %5987 = vst [vmem:[%s9422_s23 + $0x148] sm:$0xff] (%p7699_p5), %v5986_v34  ;;  %v5998_v44 = vld [vmem:[%s8384_s0 + $0xd8] sm:$0xff] (%p7699_p5)  ;;  %v6000_v45 = vld [vmem:[%s8384_s0 + $0xe0] sm:$0xff] (%p7699_p5) }
 0x884   : > { %5989 = vst [vmem:[%s9422_s23 + $0x150] sm:$0xff] (%p7699_p5), %v5988_v35  ;;  %5991 = vst [vmem:[%s9422_s23 + $0x158] sm:$0xff] (%p7699_p5), %v5990_v36  ;;  %v6002_v46 = vld [vmem:[%s8384_s0 + $0xe8] sm:$0xff] (%p7699_p5)  ;;  %v6004_v47 = vld [vmem:[%s8384_s0 + $0xf0] sm:$0xff] (%p7699_p5) }
 0x885   : > { %5993 = vst [vmem:[%s9422_s23 + $0x180] sm:$0xff] (%p7699_p5), %v5992_v39  ;;  %5995 = vst [vmem:[%s9422_s23 + $0x188] sm:$0xff] (%p7699_p5), %v5994_v40  ;;  %v6006_v48 = vld [vmem:[%s8384_s0 + $0xf8] sm:$0xff] (%p7699_p5)  ;;  %v6008_v51 = vld [vmem:[%s8384_s0 + $0x100] sm:$0xff] (%p7699_p5) }
 0x886   : > { %5997 = vst [vmem:[%s9422_s23 + $0x190] sm:$0xff] (%p7699_p5), %v5996_v43  ;;  %5999 = vst [vmem:[%s9422_s23 + $0x198] sm:$0xff] (%p7699_p5), %v5998_v44  ;;  %v6012_v55 = vld [vmem:[%s8384_s0 + $0x110] sm:$0xff] (%p7699_p5)  ;;  %v6016_v57 = vld [vmem:[%s8384_s0 + $0x120] sm:$0xff] (%p7699_p5) }
 0x887   : > { %6001 = vst [vmem:[%s9422_s23 + $0x1c0] sm:$0xff] (%p7699_p5), %v6000_v45  ;;  %6003 = vst [vmem:[%s9422_s23 + $0x1c8] sm:$0xff] (%p7699_p5), %v6002_v46  ;;  %v6018_v58 = vld [vmem:[%s8384_s0 + $0x128] sm:$0xff] (%p7699_p5)  ;;  %v6024_v63 = vld [vmem:[%s8384_s0 + $0x140] sm:$0xff] (%p7699_p5) }
 0x888   : > { %6005 = vst [vmem:[%s9422_s23 + $0x1d0] sm:$0xff] (%p7699_p5), %v6004_v47  ;;  %6007 = vst [vmem:[%s9422_s23 + $0x1d8] sm:$0xff] (%p7699_p5), %v6006_v48  ;;  %v6072_v41 = vld [vmem:[%s8384_s0 + $0x200] sm:$0xff] (%p7699_p5)  ;;  %v6074_v23 = vld [vmem:[%s8384_s0 + $0x208] sm:$0xff] (%p7699_p5) }
 0x889   : > { %6009 = vst [vmem:[%s9422_s23 + $0x200] sm:$0xff] (%p7699_p5), %v6008_v51  ;;  %6013 = vst [vmem:[%s9422_s23 + $0x210] sm:$0xff] (%p7699_p5), %v6012_v55  ;;  %v6076_v53 = vld [vmem:[%s8384_s0 + $0x210] sm:$0xff] (%p7699_p5)  ;;  %v6078_v11 = vld [vmem:[%s8384_s0 + $0x218] sm:$0xff] (%p7699_p5) }
 0x88a   : > { %6017 = vst [vmem:[%s9422_s23 + $0x240] sm:$0xff] (%p7699_p5), %v6016_v57  ;;  %6019 = vst [vmem:[%s9422_s23 + $0x248] sm:$0xff] (%p7699_p5), %v6018_v58  ;;  %v6080_v62 = vld [vmem:[%s8384_s0 + $0x220] sm:$0xff] (%p7699_p5)  ;;  %v6082_v61 = vld [vmem:[%s8384_s0 + $0x228] sm:$0xff] (%p7699_p5) }
 0x88b   : > { %6021 = vst [vmem:[%s9422_s23 + $0x250] sm:$0xff] (%p7699_p5), %v6020_v59  ;;  %6025 = vst [vmem:[%s9422_s23 + $0x280] sm:$0xff] (%p7699_p5), %v6024_v63  ;;  %v6084_v1 = vld [vmem:[%s8384_s0 + $0x230] sm:$0xff] (%p7699_p5)  ;;  %v6086_v2 = vld [vmem:[%s8384_s0 + $0x238] sm:$0xff] (%p7699_p5) }
 0x88c   : > { %6073 = vst [vmem:[%s9422_s23 + $0x400] sm:$0xff] (%p7699_p5), %v6072_v41  ;;  %6075 = vst [vmem:[%s9422_s23 + $0x408] sm:$0xff] (%p7699_p5), %v6074_v23  ;;  %v6088_v14 = vld [vmem:[%s8384_s0 + $0x240] sm:$0xff] (%p7699_p5)  ;;  %v6090_v15 = vld [vmem:[%s8384_s0 + $0x248] sm:$0xff] (%p7699_p5) }
 0x88d   : > { %6077 = vst [vmem:[%s9422_s23 + $0x410] sm:$0xff] (%p7699_p5), %v6076_v53  ;;  %6079 = vst [vmem:[%s9422_s23 + $0x418] sm:$0xff] (%p7699_p5), %v6078_v11  ;;  %v6092_v30 = vld [vmem:[%s8384_s0 + $0x250] sm:$0xff] (%p7699_p5)  ;;  %v6094_v17 = vld [vmem:[%s8384_s0 + $0x258] sm:$0xff] (%p7699_p5) }
 0x88e   : > { %6081 = vst [vmem:[%s9422_s23 + $0x440] sm:$0xff] (%p7699_p5), %v6080_v62  ;;  %6083 = vst [vmem:[%s9422_s23 + $0x448] sm:$0xff] (%p7699_p5), %v6082_v61  ;;  %v6096_v26 = vld [vmem:[%s8384_s0 + $0x260] sm:$0xff] (%p7699_p5)  ;;  %v6098_v10 = vld [vmem:[%s8384_s0 + $0x268] sm:$0xff] (%p7699_p5) }
 0x88f   : > { %6085 = vst [vmem:[%s9422_s23 + $0x450] sm:$0xff] (%p7699_p5), %v6084_v1  ;;  %6087 = vst [vmem:[%s9422_s23 + $0x458] sm:$0xff] (%p7699_p5), %v6086_v2  ;;  %v6100_v22 = vld [vmem:[%s8384_s0 + $0x270] sm:$0xff] (%p7699_p5)  ;;  %v6102_v27 = vld [vmem:[%s8384_s0 + $0x278] sm:$0xff] (%p7699_p5) }
 0x890   : > { %6089 = vst [vmem:[%s9422_s23 + $0x480] sm:$0xff] (%p7699_p5), %v6088_v14  ;;  %6091 = vst [vmem:[%s9422_s23 + $0x488] sm:$0xff] (%p7699_p5), %v6090_v15  ;;  %v6104_v28 = vld [vmem:[%s8384_s0 + $0x280] sm:$0xff] (%p7699_p5)  ;;  %v6106_v49 = vld [vmem:[%s8384_s0 + $0x288] sm:$0xff] (%p7699_p5) }
 0x891   : > { %6093 = vst [vmem:[%s9422_s23 + $0x490] sm:$0xff] (%p7699_p5), %v6092_v30  ;;  %6095 = vst [vmem:[%s9422_s23 + $0x498] sm:$0xff] (%p7699_p5), %v6094_v17  ;;  %v6108_v33 = vld [vmem:[%s8384_s0 + $0x290] sm:$0xff] (%p7699_p5)  ;;  %v6110_v31 = vld [vmem:[%s8384_s0 + $0x298] sm:$0xff] (%p7699_p5) }
 0x892   : > { %6097 = vst [vmem:[%s9422_s23 + $0x4c0] sm:$0xff] (%p7699_p5), %v6096_v26  ;;  %6099 = vst [vmem:[%s9422_s23 + $0x4c8] sm:$0xff] (%p7699_p5), %v6098_v10  ;;  %v6112_v32 = vld [vmem:[%s8384_s0 + $0x2a0] sm:$0xff] (%p7699_p5)  ;;  %v6114_v34 = vld [vmem:[%s8384_s0 + $0x2a8] sm:$0xff] (%p7699_p5) }
 0x893   : > { %6101 = vst [vmem:[%s9422_s23 + $0x4d0] sm:$0xff] (%p7699_p5), %v6100_v22  ;;  %6103 = vst [vmem:[%s9422_s23 + $0x4d8] sm:$0xff] (%p7699_p5), %v6102_v27  ;;  %v6116_v35 = vld [vmem:[%s8384_s0 + $0x2b0] sm:$0xff] (%p7699_p5)  ;;  %v6118_v36 = vld [vmem:[%s8384_s0 + $0x2b8] sm:$0xff] (%p7699_p5) }
 0x894   : > { %6105 = vst [vmem:[%s9422_s23 + $0x500] sm:$0xff] (%p7699_p5), %v6104_v28  ;;  %6107 = vst [vmem:[%s9422_s23 + $0x508] sm:$0xff] (%p7699_p5), %v6106_v49  ;;  %v6120_v39 = vld [vmem:[%s8384_s0 + $0x2c0] sm:$0xff] (%p7699_p5)  ;;  %v6122_v40 = vld [vmem:[%s8384_s0 + $0x2c8] sm:$0xff] (%p7699_p5) }
 0x895   : > { %6109 = vst [vmem:[%s9422_s23 + $0x510] sm:$0xff] (%p7699_p5), %v6108_v33  ;;  %6111 = vst [vmem:[%s9422_s23 + $0x518] sm:$0xff] (%p7699_p5), %v6110_v31  ;;  %v6124_v43 = vld [vmem:[%s8384_s0 + $0x2d0] sm:$0xff] (%p7699_p5)  ;;  %v6126_v44 = vld [vmem:[%s8384_s0 + $0x2d8] sm:$0xff] (%p7699_p5) }
 0x896   : > { %6113 = vst [vmem:[%s9422_s23 + $0x540] sm:$0xff] (%p7699_p5), %v6112_v32  ;;  %6115 = vst [vmem:[%s9422_s23 + $0x548] sm:$0xff] (%p7699_p5), %v6114_v34  ;;  %v6128_v45 = vld [vmem:[%s8384_s0 + $0x2e0] sm:$0xff] (%p7699_p5)  ;;  %v6130_v46 = vld [vmem:[%s8384_s0 + $0x2e8] sm:$0xff] (%p7699_p5) }
 0x897   : > { %6117 = vst [vmem:[%s9422_s23 + $0x550] sm:$0xff] (%p7699_p5), %v6116_v35  ;;  %6119 = vst [vmem:[%s9422_s23 + $0x558] sm:$0xff] (%p7699_p5), %v6118_v36  ;;  %v6132_v47 = vld [vmem:[%s8384_s0 + $0x2f0] sm:$0xff] (%p7699_p5)  ;;  %v6134_v48 = vld [vmem:[%s8384_s0 + $0x2f8] sm:$0xff] (%p7699_p5) }
 0x898   : > { %6121 = vst [vmem:[%s9422_s23 + $0x580] sm:$0xff] (%p7699_p5), %v6120_v39  ;;  %6123 = vst [vmem:[%s9422_s23 + $0x588] sm:$0xff] (%p7699_p5), %v6122_v40  ;;  %v6136_v51 = vld [vmem:[%s8384_s0 + $0x300] sm:$0xff] (%p7699_p5)  ;;  %v6140_v55 = vld [vmem:[%s8384_s0 + $0x310] sm:$0xff] (%p7699_p5) }
 0x899   : > { %6125 = vst [vmem:[%s9422_s23 + $0x590] sm:$0xff] (%p7699_p5), %v6124_v43  ;;  %6127 = vst [vmem:[%s9422_s23 + $0x598] sm:$0xff] (%p7699_p5), %v6126_v44  ;;  %v6144_v57 = vld [vmem:[%s8384_s0 + $0x320] sm:$0xff] (%p7699_p5)  ;;  %v6146_v58 = vld [vmem:[%s8384_s0 + $0x328] sm:$0xff] (%p7699_p5) }
 0x89a   : > { %6129 = vst [vmem:[%s9422_s23 + $0x5c0] sm:$0xff] (%p7699_p5), %v6128_v45  ;;  %6131 = vst [vmem:[%s9422_s23 + $0x5c8] sm:$0xff] (%p7699_p5), %v6130_v46  ;;  %v6148_v59 = vld [vmem:[%s8384_s0 + $0x330] sm:$0xff] (%p7699_p5)  ;;  %v6152_v63 = vld [vmem:[%s8384_s0 + $0x340] sm:$0xff] (%p7699_p5) }
 0x89b   : > { %6133 = vst [vmem:[%s9422_s23 + $0x5d0] sm:$0xff] (%p7699_p5), %v6132_v47  ;;  %6135 = vst [vmem:[%s9422_s23 + $0x5d8] sm:$0xff] (%p7699_p5), %v6134_v48  ;;  %v6200_v41 = vld [vmem:[%s8384_s0 + $0x400] sm:$0xff] (%p7699_p5)  ;;  %v6202_v23 = vld [vmem:[%s8384_s0 + $0x408] sm:$0xff] (%p7699_p5) }
 0x89c   : > { %6137 = vst [vmem:[%s9422_s23 + $0x600] sm:$0xff] (%p7699_p5), %v6136_v51  ;;  %6141 = vst [vmem:[%s9422_s23 + $0x610] sm:$0xff] (%p7699_p5), %v6140_v55  ;;  %v6204_v53 = vld [vmem:[%s8384_s0 + $0x410] sm:$0xff] (%p7699_p5)  ;;  %v6206_v11 = vld [vmem:[%s8384_s0 + $0x418] sm:$0xff] (%p7699_p5) }
 0x89d   : > { %6145 = vst [vmem:[%s9422_s23 + $0x640] sm:$0xff] (%p7699_p5), %v6144_v57  ;;  %6147 = vst [vmem:[%s9422_s23 + $0x648] sm:$0xff] (%p7699_p5), %v6146_v58  ;;  %v6208_v62 = vld [vmem:[%s8384_s0 + $0x420] sm:$0xff] (%p7699_p5)  ;;  %v6210_v61 = vld [vmem:[%s8384_s0 + $0x428] sm:$0xff] (%p7699_p5) }
 0x89e   : > { %6149 = vst [vmem:[%s9422_s23 + $0x650] sm:$0xff] (%p7699_p5), %v6148_v59  ;;  %6153 = vst [vmem:[%s9422_s23 + $0x680] sm:$0xff] (%p7699_p5), %v6152_v63  ;;  %v6212_v1 = vld [vmem:[%s8384_s0 + $0x430] sm:$0xff] (%p7699_p5)  ;;  %v6214_v2 = vld [vmem:[%s8384_s0 + $0x438] sm:$0xff] (%p7699_p5) }
 0x89f   : > { %6201 = vst [vmem:[%s9422_s23 + $0x800] sm:$0xff] (%p7699_p5), %v6200_v41  ;;  %6203 = vst [vmem:[%s9422_s23 + $0x808] sm:$0xff] (%p7699_p5), %v6202_v23  ;;  %v6216_v14 = vld [vmem:[%s8384_s0 + $0x440] sm:$0xff] (%p7699_p5)  ;;  %v6218_v15 = vld [vmem:[%s8384_s0 + $0x448] sm:$0xff] (%p7699_p5) }
 0x8a0   : > { %6205 = vst [vmem:[%s9422_s23 + $0x810] sm:$0xff] (%p7699_p5), %v6204_v53  ;;  %6207 = vst [vmem:[%s9422_s23 + $0x818] sm:$0xff] (%p7699_p5), %v6206_v11  ;;  %v6220_v30 = vld [vmem:[%s8384_s0 + $0x450] sm:$0xff] (%p7699_p5)  ;;  %v6222_v17 = vld [vmem:[%s8384_s0 + $0x458] sm:$0xff] (%p7699_p5) }
 0x8a1   : > { %6209 = vst [vmem:[%s9422_s23 + $0x840] sm:$0xff] (%p7699_p5), %v6208_v62  ;;  %6211 = vst [vmem:[%s9422_s23 + $0x848] sm:$0xff] (%p7699_p5), %v6210_v61  ;;  %v6224_v26 = vld [vmem:[%s8384_s0 + $0x460] sm:$0xff] (%p7699_p5)  ;;  %v6226_v10 = vld [vmem:[%s8384_s0 + $0x468] sm:$0xff] (%p7699_p5) }
 0x8a2   : > { %6213 = vst [vmem:[%s9422_s23 + $0x850] sm:$0xff] (%p7699_p5), %v6212_v1  ;;  %6215 = vst [vmem:[%s9422_s23 + $0x858] sm:$0xff] (%p7699_p5), %v6214_v2  ;;  %v6228_v22 = vld [vmem:[%s8384_s0 + $0x470] sm:$0xff] (%p7699_p5)  ;;  %v6230_v27 = vld [vmem:[%s8384_s0 + $0x478] sm:$0xff] (%p7699_p5) }
 0x8a3   : > { %6217 = vst [vmem:[%s9422_s23 + $0x880] sm:$0xff] (%p7699_p5), %v6216_v14  ;;  %6219 = vst [vmem:[%s9422_s23 + $0x888] sm:$0xff] (%p7699_p5), %v6218_v15  ;;  %v6232_v28 = vld [vmem:[%s8384_s0 + $0x480] sm:$0xff] (%p7699_p5)  ;;  %v6234_v49 = vld [vmem:[%s8384_s0 + $0x488] sm:$0xff] (%p7699_p5) }
 0x8a4   : > { %6221 = vst [vmem:[%s9422_s23 + $0x890] sm:$0xff] (%p7699_p5), %v6220_v30  ;;  %6223 = vst [vmem:[%s9422_s23 + $0x898] sm:$0xff] (%p7699_p5), %v6222_v17  ;;  %v6236_v33 = vld [vmem:[%s8384_s0 + $0x490] sm:$0xff] (%p7699_p5)  ;;  %v6238_v31 = vld [vmem:[%s8384_s0 + $0x498] sm:$0xff] (%p7699_p5) }
 0x8a5   : > { %6225 = vst [vmem:[%s9422_s23 + $0x8c0] sm:$0xff] (%p7699_p5), %v6224_v26  ;;  %6227 = vst [vmem:[%s9422_s23 + $0x8c8] sm:$0xff] (%p7699_p5), %v6226_v10  ;;  %v6240_v32 = vld [vmem:[%s8384_s0 + $0x4a0] sm:$0xff] (%p7699_p5)  ;;  %v6242_v34 = vld [vmem:[%s8384_s0 + $0x4a8] sm:$0xff] (%p7699_p5) }
 0x8a6   : > { %6229 = vst [vmem:[%s9422_s23 + $0x8d0] sm:$0xff] (%p7699_p5), %v6228_v22  ;;  %6231 = vst [vmem:[%s9422_s23 + $0x8d8] sm:$0xff] (%p7699_p5), %v6230_v27  ;;  %v6244_v35 = vld [vmem:[%s8384_s0 + $0x4b0] sm:$0xff] (%p7699_p5)  ;;  %v6246_v36 = vld [vmem:[%s8384_s0 + $0x4b8] sm:$0xff] (%p7699_p5) }
 0x8a7   : > { %6233 = vst [vmem:[%s9422_s23 + $0x900] sm:$0xff] (%p7699_p5), %v6232_v28  ;;  %6235 = vst [vmem:[%s9422_s23 + $0x908] sm:$0xff] (%p7699_p5), %v6234_v49  ;;  %v6248_v39 = vld [vmem:[%s8384_s0 + $0x4c0] sm:$0xff] (%p7699_p5)  ;;  %v6250_v40 = vld [vmem:[%s8384_s0 + $0x4c8] sm:$0xff] (%p7699_p5) }
 0x8a8   : > { %6237 = vst [vmem:[%s9422_s23 + $0x910] sm:$0xff] (%p7699_p5), %v6236_v33  ;;  %6239 = vst [vmem:[%s9422_s23 + $0x918] sm:$0xff] (%p7699_p5), %v6238_v31  ;;  %v6252_v43 = vld [vmem:[%s8384_s0 + $0x4d0] sm:$0xff] (%p7699_p5)  ;;  %v6254_v44 = vld [vmem:[%s8384_s0 + $0x4d8] sm:$0xff] (%p7699_p5) }
 0x8a9   : > { %6241 = vst [vmem:[%s9422_s23 + $0x940] sm:$0xff] (%p7699_p5), %v6240_v32  ;;  %6243 = vst [vmem:[%s9422_s23 + $0x948] sm:$0xff] (%p7699_p5), %v6242_v34  ;;  %v6256_v45 = vld [vmem:[%s8384_s0 + $0x4e0] sm:$0xff] (%p7699_p5)  ;;  %v6258_v46 = vld [vmem:[%s8384_s0 + $0x4e8] sm:$0xff] (%p7699_p5) }
 0x8aa   : > { %6245 = vst [vmem:[%s9422_s23 + $0x950] sm:$0xff] (%p7699_p5), %v6244_v35  ;;  %6247 = vst [vmem:[%s9422_s23 + $0x958] sm:$0xff] (%p7699_p5), %v6246_v36  ;;  %v6260_v47 = vld [vmem:[%s8384_s0 + $0x4f0] sm:$0xff] (%p7699_p5)  ;;  %v6262_v48 = vld [vmem:[%s8384_s0 + $0x4f8] sm:$0xff] (%p7699_p5) }
 0x8ab   : > { %6249 = vst [vmem:[%s9422_s23 + $0x980] sm:$0xff] (%p7699_p5), %v6248_v39  ;;  %6251 = vst [vmem:[%s9422_s23 + $0x988] sm:$0xff] (%p7699_p5), %v6250_v40  ;;  %v6264_v51 = vld [vmem:[%s8384_s0 + $0x500] sm:$0xff] (%p7699_p5)  ;;  %v6268_v55 = vld [vmem:[%s8384_s0 + $0x510] sm:$0xff] (%p7699_p5) }
 0x8ac   : > { %6253 = vst [vmem:[%s9422_s23 + $0x990] sm:$0xff] (%p7699_p5), %v6252_v43  ;;  %6255 = vst [vmem:[%s9422_s23 + $0x998] sm:$0xff] (%p7699_p5), %v6254_v44  ;;  %v6270_v56 = vld [vmem:[%s8384_s0 + $0x518] sm:$0xff] (%p7699_p5)  ;;  %v6272_v57 = vld [vmem:[%s8384_s0 + $0x520] sm:$0xff] (%p7699_p5) }
 0x8ad   : > { %6257 = vst [vmem:[%s9422_s23 + $0x9c0] sm:$0xff] (%p7699_p5), %v6256_v45  ;;  %6259 = vst [vmem:[%s9422_s23 + $0x9c8] sm:$0xff] (%p7699_p5), %v6258_v46  ;;  %v6274_v58 = vld [vmem:[%s8384_s0 + $0x528] sm:$0xff] (%p7699_p5)  ;;  %v6276_v59 = vld [vmem:[%s8384_s0 + $0x530] sm:$0xff] (%p7699_p5) }
 0x8ae   : > { %6261 = vst [vmem:[%s9422_s23 + $0x9d0] sm:$0xff] (%p7699_p5), %v6260_v47  ;;  %6263 = vst [vmem:[%s9422_s23 + $0x9d8] sm:$0xff] (%p7699_p5), %v6262_v48  ;;  %v6278_v60 = vld [vmem:[%s8384_s0 + $0x538] sm:$0xff] (%p7699_p5)  ;;  %v6280_v63 = vld [vmem:[%s8384_s0 + $0x540] sm:$0xff] (%p7699_p5) }
 0x8af   : > { %6265 = vst [vmem:[%s9422_s23 + $0xa00] sm:$0xff] (%p7699_p5), %v6264_v51  ;;  %6269 = vst [vmem:[%s9422_s23 + $0xa10] sm:$0xff] (%p7699_p5), %v6268_v55  ;;  %v6282_v0 = vld [vmem:[%s8384_s0 + $0x548] sm:$0xff] (%p7699_p5)  ;;  %v6328_v41 = vld [vmem:[%s8384_s0 + $0x600] sm:$0xff] (%p7699_p5) }
 0x8b0   : > { %6271 = vst [vmem:[%s9422_s23 + $0xa18] sm:$0xff] (%p7699_p5), %v6270_v56  ;;  %6273 = vst [vmem:[%s9422_s23 + $0xa40] sm:$0xff] (%p7699_p5), %v6272_v57  ;;  %v6330_v23 = vld [vmem:[%s8384_s0 + $0x608] sm:$0xff] (%p7699_p5)  ;;  %v6332_v53 = vld [vmem:[%s8384_s0 + $0x610] sm:$0xff] (%p7699_p5) }
 0x8b1   : > { %6275 = vst [vmem:[%s9422_s23 + $0xa48] sm:$0xff] (%p7699_p5), %v6274_v58  ;;  %6277 = vst [vmem:[%s9422_s23 + $0xa50] sm:$0xff] (%p7699_p5), %v6276_v59  ;;  %v6334_v11 = vld [vmem:[%s8384_s0 + $0x618] sm:$0xff] (%p7699_p5)  ;;  %v6336_v62 = vld [vmem:[%s8384_s0 + $0x620] sm:$0xff] (%p7699_p5) }
 0x8b2   : > { %6279 = vst [vmem:[%s9422_s23 + $0xa58] sm:$0xff] (%p7699_p5), %v6278_v60  ;;  %6281 = vst [vmem:[%s9422_s23 + $0xa80] sm:$0xff] (%p7699_p5), %v6280_v63  ;;  %v6338_v61 = vld [vmem:[%s8384_s0 + $0x628] sm:$0xff] (%p7699_p5)  ;;  %v6340_v1 = vld [vmem:[%s8384_s0 + $0x630] sm:$0xff] (%p7699_p5) }
 0x8b3   : > { %6283 = vst [vmem:[%s9422_s23 + $0xa88] sm:$0xff] (%p7699_p5), %v6282_v0  ;;  %6329 = vst [vmem:[%s9422_s23 + $0xc00] sm:$0xff] (%p7699_p5), %v6328_v41  ;;  %v6342_v2 = vld [vmem:[%s8384_s0 + $0x638] sm:$0xff] (%p7699_p5)  ;;  %v6344_v14 = vld [vmem:[%s8384_s0 + $0x640] sm:$0xff] (%p7699_p5) }
 0x8b4   : > { %6331 = vst [vmem:[%s9422_s23 + $0xc08] sm:$0xff] (%p7699_p5), %v6330_v23  ;;  %6333 = vst [vmem:[%s9422_s23 + $0xc10] sm:$0xff] (%p7699_p5), %v6332_v53  ;;  %v6346_v15 = vld [vmem:[%s8384_s0 + $0x648] sm:$0xff] (%p7699_p5)  ;;  %v6348_v30 = vld [vmem:[%s8384_s0 + $0x650] sm:$0xff] (%p7699_p5) }
 0x8b5   : > { %6335 = vst [vmem:[%s9422_s23 + $0xc18] sm:$0xff] (%p7699_p5), %v6334_v11  ;;  %6337 = vst [vmem:[%s9422_s23 + $0xc40] sm:$0xff] (%p7699_p5), %v6336_v62  ;;  %v6350_v17 = vld [vmem:[%s8384_s0 + $0x658] sm:$0xff] (%p7699_p5)  ;;  %v6352_v26 = vld [vmem:[%s8384_s0 + $0x660] sm:$0xff] (%p7699_p5) }
 0x8b6   : > { %6339 = vst [vmem:[%s9422_s23 + $0xc48] sm:$0xff] (%p7699_p5), %v6338_v61  ;;  %6341 = vst [vmem:[%s9422_s23 + $0xc50] sm:$0xff] (%p7699_p5), %v6340_v1  ;;  %v6354_v10 = vld [vmem:[%s8384_s0 + $0x668] sm:$0xff] (%p7699_p5)  ;;  %v6356_v22 = vld [vmem:[%s8384_s0 + $0x670] sm:$0xff] (%p7699_p5) }
 0x8b7   : > { %6343 = vst [vmem:[%s9422_s23 + $0xc58] sm:$0xff] (%p7699_p5), %v6342_v2  ;;  %6345 = vst [vmem:[%s9422_s23 + $0xc80] sm:$0xff] (%p7699_p5), %v6344_v14  ;;  %v6358_v27 = vld [vmem:[%s8384_s0 + $0x678] sm:$0xff] (%p7699_p5)  ;;  %v6360_v28 = vld [vmem:[%s8384_s0 + $0x680] sm:$0xff] (%p7699_p5) }
 0x8b8   : > { %6347 = vst [vmem:[%s9422_s23 + $0xc88] sm:$0xff] (%p7699_p5), %v6346_v15  ;;  %6349 = vst [vmem:[%s9422_s23 + $0xc90] sm:$0xff] (%p7699_p5), %v6348_v30  ;;  %v6362_v49 = vld [vmem:[%s8384_s0 + $0x688] sm:$0xff] (%p7699_p5)  ;;  %v6364_v33 = vld [vmem:[%s8384_s0 + $0x690] sm:$0xff] (%p7699_p5) }
 0x8b9   : > { %6351 = vst [vmem:[%s9422_s23 + $0xc98] sm:$0xff] (%p7699_p5), %v6350_v17  ;;  %6353 = vst [vmem:[%s9422_s23 + $0xcc0] sm:$0xff] (%p7699_p5), %v6352_v26  ;;  %v6366_v31 = vld [vmem:[%s8384_s0 + $0x698] sm:$0xff] (%p7699_p5)  ;;  %v6368_v32 = vld [vmem:[%s8384_s0 + $0x6a0] sm:$0xff] (%p7699_p5) }
 0x8ba   : > { %6355 = vst [vmem:[%s9422_s23 + $0xcc8] sm:$0xff] (%p7699_p5), %v6354_v10  ;;  %6357 = vst [vmem:[%s9422_s23 + $0xcd0] sm:$0xff] (%p7699_p5), %v6356_v22  ;;  %v6370_v34 = vld [vmem:[%s8384_s0 + $0x6a8] sm:$0xff] (%p7699_p5)  ;;  %v6372_v35 = vld [vmem:[%s8384_s0 + $0x6b0] sm:$0xff] (%p7699_p5) }
 0x8bb   : > { %6359 = vst [vmem:[%s9422_s23 + $0xcd8] sm:$0xff] (%p7699_p5), %v6358_v27  ;;  %6361 = vst [vmem:[%s9422_s23 + $0xd00] sm:$0xff] (%p7699_p5), %v6360_v28  ;;  %v6374_v36 = vld [vmem:[%s8384_s0 + $0x6b8] sm:$0xff] (%p7699_p5)  ;;  %v6376_v39 = vld [vmem:[%s8384_s0 + $0x6c0] sm:$0xff] (%p7699_p5) }
 0x8bc   : > { %6363 = vst [vmem:[%s9422_s23 + $0xd08] sm:$0xff] (%p7699_p5), %v6362_v49  ;;  %6365 = vst [vmem:[%s9422_s23 + $0xd10] sm:$0xff] (%p7699_p5), %v6364_v33  ;;  %v6378_v40 = vld [vmem:[%s8384_s0 + $0x6c8] sm:$0xff] (%p7699_p5)  ;;  %v6380_v43 = vld [vmem:[%s8384_s0 + $0x6d0] sm:$0xff] (%p7699_p5) }
 0x8bd   : > { %6367 = vst [vmem:[%s9422_s23 + $0xd18] sm:$0xff] (%p7699_p5), %v6366_v31  ;;  %6369 = vst [vmem:[%s9422_s23 + $0xd40] sm:$0xff] (%p7699_p5), %v6368_v32  ;;  %v6382_v44 = vld [vmem:[%s8384_s0 + $0x6d8] sm:$0xff] (%p7699_p5)  ;;  %v6384_v45 = vld [vmem:[%s8384_s0 + $0x6e0] sm:$0xff] (%p7699_p5) }
 0x8be   : > { %6371 = vst [vmem:[%s9422_s23 + $0xd48] sm:$0xff] (%p7699_p5), %v6370_v34  ;;  %6373 = vst [vmem:[%s9422_s23 + $0xd50] sm:$0xff] (%p7699_p5), %v6372_v35  ;;  %v6386_v46 = vld [vmem:[%s8384_s0 + $0x6e8] sm:$0xff] (%p7699_p5)  ;;  %v6388_v47 = vld [vmem:[%s8384_s0 + $0x6f0] sm:$0xff] (%p7699_p5) }
 0x8bf   : > { %6375 = vst [vmem:[%s9422_s23 + $0xd58] sm:$0xff] (%p7699_p5), %v6374_v36  ;;  %6377 = vst [vmem:[%s9422_s23 + $0xd80] sm:$0xff] (%p7699_p5), %v6376_v39  ;;  %v6390_v48 = vld [vmem:[%s8384_s0 + $0x6f8] sm:$0xff] (%p7699_p5)  ;;  %v6392_v51 = vld [vmem:[%s8384_s0 + $0x700] sm:$0xff] (%p7699_p5) }
 0x8c0   : > { %6379 = vst [vmem:[%s9422_s23 + $0xd88] sm:$0xff] (%p7699_p5), %v6378_v40  ;;  %6381 = vst [vmem:[%s9422_s23 + $0xd90] sm:$0xff] (%p7699_p5), %v6380_v43  ;;  %v6394_v52 = vld [vmem:[%s8384_s0 + $0x708] sm:$0xff] (%p7699_p5)  ;;  %v6396_v55 = vld [vmem:[%s8384_s0 + $0x710] sm:$0xff] (%p7699_p5) }
 0x8c1   : > { %6383 = vst [vmem:[%s9422_s23 + $0xd98] sm:$0xff] (%p7699_p5), %v6382_v44  ;;  %6385 = vst [vmem:[%s9422_s23 + $0xdc0] sm:$0xff] (%p7699_p5), %v6384_v45  ;;  %v6398_v56 = vld [vmem:[%s8384_s0 + $0x718] sm:$0xff] (%p7699_p5)  ;;  %v6400_v57 = vld [vmem:[%s8384_s0 + $0x720] sm:$0xff] (%p7699_p5) }
 0x8c2   : > { %6387 = vst [vmem:[%s9422_s23 + $0xdc8] sm:$0xff] (%p7699_p5), %v6386_v46  ;;  %6389 = vst [vmem:[%s9422_s23 + $0xdd0] sm:$0xff] (%p7699_p5), %v6388_v47  ;;  %v6402_v58 = vld [vmem:[%s8384_s0 + $0x728] sm:$0xff] (%p7699_p5)  ;;  %v6404_v59 = vld [vmem:[%s8384_s0 + $0x730] sm:$0xff] (%p7699_p5) }
 0x8c3   : > { %6391 = vst [vmem:[%s9422_s23 + $0xdd8] sm:$0xff] (%p7699_p5), %v6390_v48  ;;  %6393 = vst [vmem:[%s9422_s23 + $0xe00] sm:$0xff] (%p7699_p5), %v6392_v51  ;;  %v6406_v60 = vld [vmem:[%s8384_s0 + $0x738] sm:$0xff] (%p7699_p5)  ;;  %v6408_v63 = vld [vmem:[%s8384_s0 + $0x740] sm:$0xff] (%p7699_p5) }
 0x8c4   : > { %6395 = vst [vmem:[%s9422_s23 + $0xe08] sm:$0xff] (%p7699_p5), %v6394_v52  ;;  %6397 = vst [vmem:[%s9422_s23 + $0xe10] sm:$0xff] (%p7699_p5), %v6396_v55  ;;  %v6410_v0 = vld [vmem:[%s8384_s0 + $0x748] sm:$0xff] (%p7699_p5) }
 0x8c5   : > { %6399 = vst [vmem:[%s9422_s23 + $0xe18] sm:$0xff] (%p7699_p5), %v6398_v56  ;;  %6401 = vst [vmem:[%s9422_s23 + $0xe40] sm:$0xff] (%p7699_p5), %v6400_v57 }
 0x8c6   : > { %6403 = vst [vmem:[%s9422_s23 + $0xe48] sm:$0xff] (%p7699_p5), %v6402_v58  ;;  %6405 = vst [vmem:[%s9422_s23 + $0xe50] sm:$0xff] (%p7699_p5), %v6404_v59 }
 0x8c7   : > { %6407 = vst [vmem:[%s9422_s23 + $0xe58] sm:$0xff] (%p7699_p5), %v6406_v60  ;;  %6409 = vst [vmem:[%s9422_s23 + $0xe80] sm:$0xff] (%p7699_p5), %v6408_v63 }
 0x8c8   : > { %6411 = vst [vmem:[%s9422_s23 + $0xe88] sm:$0xff] (%p7699_p5), %v6410_v0 }
 0x956   : > { %v5819_v5 = vpop.f32.mrb[192].mxu0  ;;  %v5860_v6 = vpop.f32.mrb[192].mxu1 }
 0x957   : > { %v5820_v7 = vadd.f32 %v5819_v5, %v5784_v4  ;;  %v5861_v8 = vadd.f32 %v5860_v6, %v5784_v4  ;;  %v5821_v9 = vpop.f32.mrb[193].mxu0  ;;  %v5862_v12 = vpop.f32.mrb[193].mxu1  ;;  %v6030_v5 = vld [vmem:[%s8384_s0 + $0x158] sm:$0xff] (%p7699_p5)  ;;  %v6032_v6 = vld [vmem:[%s8384_s0 + $0x160] sm:$0xff] (%p7699_p5) }
 0x958   : > { %v5822_v16 = vadd.f32 %v5821_v9, %v5784_v4  ;;  %v5863_v18 = vadd.f32 %v5862_v12, %v5784_v4  ;;  %v5823_v19 = vpop.f32.mrb[194].mxu0  ;;  %v5864_v20 = vpop.f32.mrb[194].mxu1  ;;  %v6028_v4 = vld [vmem:[%s8384_s0 + $0x150] sm:$0xff] (%p7699_p5)  ;;  %6031 = vst [vmem:[%s9422_s23 + $0x298] sm:$0xff] (%p7699_p5), %v6030_v5  ;;  %6033 = vst [vmem:[%s9422_s23 + $0x2c0] sm:$0xff] (%p7699_p5), %v6032_v6  ;;  %v6038_v9 = vld [vmem:[%s8384_s0 + $0x178] sm:$0xff] (%p7699_p5) }
 0x959   : > { %v5824_v21 = vpop.f32.mrb[195].mxu0  ;;  %v5865_v24 = vpop.f32.mrb[195].mxu1  ;;  %6029 = vst [vmem:[%s9422_s23 + $0x290] sm:$0xff] (%p7699_p5), %v6028_v4  ;;  %6039 = vst [vmem:[%s9422_s23 + $0x2d8] sm:$0xff] (%p7699_p5), %v6038_v9  ;;  %v6040_v12 = vld [vmem:[%s8384_s0 + $0x180] sm:$0xff] (%p7699_p5)  ;;  %v6050_v20 = vld [vmem:[%s8384_s0 + $0x1a8] sm:$0xff] (%p7699_p5) }
 0x95a   : > { %v6889_v25 = vpack.c.bf16 %v5822_v16, %v5820_v7  ;;  %v6890_v42 = vpack.c.bf16 %v5863_v18, %v5861_v8  ;;  %v6034_v7 = vld [vmem:[%s8384_s0 + $0x168] sm:$0xff] (%p7699_p5)  ;;  %v6036_v8 = vld [vmem:[%s8384_s0 + $0x170] sm:$0xff] (%p7699_p5)  ;;  %6041 = vst [vmem:[%s9422_s23 + $0x300] sm:$0xff] (%p7699_p5), %v6040_v12  ;;  %v6046_v18 = vld [vmem:[%s8384_s0 + $0x198] sm:$0xff] (%p7699_p5) }
 0x95b   : > { %6035 = vst [vmem:[%s9422_s23 + $0x2c8] sm:$0xff] (%p7699_p5), %v6034_v7  ;;  %6037 = vst [vmem:[%s9422_s23 + $0x2d0] sm:$0xff] (%p7699_p5), %v6036_v8  ;;  %v6044_v16 = vld [vmem:[%s8384_s0 + $0x190] sm:$0xff] (%p7699_p5)  ;;  %v6048_v19 = vld [vmem:[%s8384_s0 + $0x1a0] sm:$0xff] (%p7699_p5) }
 0x95c   : > { %v5883_v54 = vrot.slane %v6889_v25, %v5882_v13  ;;  %v5890_v37 = vrot.slane %v6890_v42, %v5882_v13  ;;  %6045 = vst [vmem:[%s9422_s23 + $0x310] sm:$0xff] (%p7699_p5), %v6044_v16  ;;  %6047 = vst [vmem:[%s9422_s23 + $0x318] sm:$0xff] (%p7699_p5), %v6046_v18  ;;  %v6052_v21 = vld [vmem:[%s8384_s0 + $0x1b0] sm:$0xff] (%p7699_p5)  ;;  %v6054_v24 = vld [vmem:[%s8384_s0 + $0x1b8] sm:$0xff] (%p7699_p5) }
 0x95d   : > { %5928 = sbr.rel (!%p7699_p5) target bundleno = 2437 (0x985), region = 246  ;;  %6049 = vst [vmem:[%s9422_s23 + $0x340] sm:$0xff] (%p7699_p5), %v6048_v19  ;;  %6051 = vst [vmem:[%s9422_s23 + $0x348] sm:$0xff] (%p7699_p5), %v6050_v20  ;;  %v6056_v25 = vld [vmem:[%s8384_s0 + $0x1c0] sm:$0xff] (%p7699_p5)  ;;  %v6058_v42 = vld [vmem:[%s8384_s0 + $0x1c8] sm:$0xff] (%p7699_p5) }
 0x95e   : > { %v5891_v3 = vcombine.low %v5883_v54, %v5890_v37  ;;  %6053 = vst [vmem:[%s9422_s23 + $0x350] sm:$0xff] (%p7699_p5), %v6052_v21  ;;  %6055 = vst [vmem:[%s9422_s23 + $0x358] sm:$0xff] (%p7699_p5), %v6054_v24  ;;  %v6060_v54 = vld [vmem:[%s8384_s0 + $0x1d0] sm:$0xff] (%p7699_p5)  ;;  %v6062_v37 = vld [vmem:[%s8384_s0 + $0x1d8] sm:$0xff] (%p7699_p5) }
 0x95f   : > { %6057 = vst [vmem:[%s9422_s23 + $0x380] sm:$0xff] (%p7699_p5), %v6056_v25  ;;  %6059 = vst [vmem:[%s9422_s23 + $0x388] sm:$0xff] (%p7699_p5), %v6058_v42  ;;  %v6156_v4 = vld [vmem:[%s8384_s0 + $0x350] sm:$0xff] (%p7699_p5)  ;;  %v6158_v5 = vld [vmem:[%s8384_s0 + $0x358] sm:$0xff] (%p7699_p5) }
 0x960   : > { %v5898_v50 = vrot.slane %v5891_v3, %v5882_v13  ;;  %v6042_v13 = vld [vmem:[%s8384_s0 + $0x188] sm:$0xff] (%p7699_p5)  ;;  %6061 = vst [vmem:[%s9422_s23 + $0x390] sm:$0xff] (%p7699_p5), %v6060_v54  ;;  %6063 = vst [vmem:[%s9422_s23 + $0x398] sm:$0xff] (%p7699_p5), %v6062_v37  ;;  %v6064_v3 = vld [vmem:[%s8384_s0 + $0x1e0] sm:$0xff] (%p7699_p5) }
 0x961   : > { %6043 = vst [vmem:[%s9422_s23 + $0x308] sm:$0xff] (%p7699_p5), %v6042_v13  ;;  %6065 = vst [vmem:[%s9422_s23 + $0x3c0] sm:$0xff] (%p7699_p5), %v6064_v3  ;;  %v6160_v6 = vld [vmem:[%s8384_s0 + $0x360] sm:$0xff] (%p7699_p5)  ;;  %v6162_v7 = vld [vmem:[%s8384_s0 + $0x368] sm:$0xff] (%p7699_p5) }
 0x962   : > { %v5916_v29 = vsel %vm5914_vm0, %v5898_v50, %v5915_v38  ;;  %v6066_v38 = vld [vmem:[%s8384_s0 + $0x1e8] sm:$0xff] (%p7699_p5)  ;;  %v6068_v50 = vld [vmem:[%s8384_s0 + $0x1f0] sm:$0xff] (%p7699_p5)  ;;  %6157 = vst [vmem:[%s9422_s23 + $0x690] sm:$0xff] (%p7699_p5), %v6156_v4  ;;  %6159 = vst [vmem:[%s9422_s23 + $0x698] sm:$0xff] (%p7699_p5), %v6158_v5 }
 0x963   : > { %5917 = vst [vmem:[%s1067_s22] sm:$0xf] %v5916_v29  ;;  %6067 = vst [vmem:[%s9422_s23 + $0x3c8] sm:$0xff] (%p7699_p5), %v6066_v38  ;;  %v6070_v29 = vld [vmem:[%s8384_s0 + $0x1f8] sm:$0xff] (%p7699_p5)  ;;  %v6164_v8 = vld [vmem:[%s8384_s0 + $0x370] sm:$0xff] (%p7699_p5) }
 0x964   : > { %6069 = vst [vmem:[%s9422_s23 + $0x3d0] sm:$0xff] %v6068_v50  ;;  %6071 = vst [vmem:[%s9422_s23 + $0x3d8] sm:$0xff] %v6070_v29  ;;  %v6166_v9 = vld [vmem:[%s8384_s0 + $0x378] sm:$0xff]  ;;  %v6168_v12 = vld [vmem:[%s8384_s0 + $0x380] sm:$0xff] }
 0x965   : > { %6161 = vst [vmem:[%s9422_s23 + $0x6c0] sm:$0xff] %v6160_v6  ;;  %6163 = vst [vmem:[%s9422_s23 + $0x6c8] sm:$0xff] %v6162_v7  ;;  %v6170_v13 = vld [vmem:[%s8384_s0 + $0x388] sm:$0xff]  ;;  %v6172_v16 = vld [vmem:[%s8384_s0 + $0x390] sm:$0xff] }
 0x966   : > { %6165 = vst [vmem:[%s9422_s23 + $0x6d0] sm:$0xff] %v6164_v8  ;;  %6167 = vst [vmem:[%s9422_s23 + $0x6d8] sm:$0xff] %v6166_v9  ;;  %v6174_v18 = vld [vmem:[%s8384_s0 + $0x398] sm:$0xff]  ;;  %v6176_v19 = vld [vmem:[%s8384_s0 + $0x3a0] sm:$0xff] }
 0x967   : > { %6169 = vst [vmem:[%s9422_s23 + $0x700] sm:$0xff] %v6168_v12  ;;  %6171 = vst [vmem:[%s9422_s23 + $0x708] sm:$0xff] %v6170_v13  ;;  %v6178_v20 = vld [vmem:[%s8384_s0 + $0x3a8] sm:$0xff]  ;;  %v6180_v21 = vld [vmem:[%s8384_s0 + $0x3b0] sm:$0xff] }
 0x968   : > { %6173 = vst [vmem:[%s9422_s23 + $0x710] sm:$0xff] %v6172_v16  ;;  %6175 = vst [vmem:[%s9422_s23 + $0x718] sm:$0xff] %v6174_v18  ;;  %v6182_v24 = vld [vmem:[%s8384_s0 + $0x3b8] sm:$0xff]  ;;  %v6184_v25 = vld [vmem:[%s8384_s0 + $0x3c0] sm:$0xff] }
 0x969   : > { %6177 = vst [vmem:[%s9422_s23 + $0x740] sm:$0xff] %v6176_v19  ;;  %6179 = vst [vmem:[%s9422_s23 + $0x748] sm:$0xff] %v6178_v20  ;;  %v6186_v42 = vld [vmem:[%s8384_s0 + $0x3c8] sm:$0xff]  ;;  %v6188_v54 = vld [vmem:[%s8384_s0 + $0x3d0] sm:$0xff] }
 0x96a   : > { %6181 = vst [vmem:[%s9422_s23 + $0x750] sm:$0xff] %v6180_v21  ;;  %6183 = vst [vmem:[%s9422_s23 + $0x758] sm:$0xff] %v6182_v24  ;;  %v6190_v37 = vld [vmem:[%s8384_s0 + $0x3d8] sm:$0xff]  ;;  %v6192_v3 = vld [vmem:[%s8384_s0 + $0x3e0] sm:$0xff] }
 0x96b   : > { %6185 = vst [vmem:[%s9422_s23 + $0x780] sm:$0xff] %v6184_v25  ;;  %6187 = vst [vmem:[%s9422_s23 + $0x788] sm:$0xff] %v6186_v42  ;;  %v6194_v38 = vld [vmem:[%s8384_s0 + $0x3e8] sm:$0xff]  ;;  %v6196_v50 = vld [vmem:[%s8384_s0 + $0x3f0] sm:$0xff] }
 0x96c   : > { %6189 = vst [vmem:[%s9422_s23 + $0x790] sm:$0xff] %v6188_v54  ;;  %6191 = vst [vmem:[%s9422_s23 + $0x798] sm:$0xff] %v6190_v37  ;;  %v6198_v29 = vld [vmem:[%s8384_s0 + $0x3f8] sm:$0xff]  ;;  %v6284_v4 = vld [vmem:[%s8384_s0 + $0x550] sm:$0xff] }
 0x96d   : > { %6193 = vst [vmem:[%s9422_s23 + $0x7c0] sm:$0xff] %v6192_v3  ;;  %6195 = vst [vmem:[%s9422_s23 + $0x7c8] sm:$0xff] %v6194_v38  ;;  %v6286_v5 = vld [vmem:[%s8384_s0 + $0x558] sm:$0xff]  ;;  %v6288_v6 = vld [vmem:[%s8384_s0 + $0x560] sm:$0xff] }
 0x96e   : > { %6197 = vst [vmem:[%s9422_s23 + $0x7d0] sm:$0xff] %v6196_v50  ;;  %6199 = vst [vmem:[%s9422_s23 + $0x7d8] sm:$0xff] %v6198_v29  ;;  %v6290_v7 = vld [vmem:[%s8384_s0 + $0x568] sm:$0xff]  ;;  %v6292_v8 = vld [vmem:[%s8384_s0 + $0x570] sm:$0xff] }
 0x96f   : > { %6285 = vst [vmem:[%s9422_s23 + $0xa90] sm:$0xff] %v6284_v4  ;;  %6287 = vst [vmem:[%s9422_s23 + $0xa98] sm:$0xff] %v6286_v5  ;;  %v6294_v9 = vld [vmem:[%s8384_s0 + $0x578] sm:$0xff]  ;;  %v6296_v12 = vld [vmem:[%s8384_s0 + $0x580] sm:$0xff] }
 0x970   : > { %6289 = vst [vmem:[%s9422_s23 + $0xac0] sm:$0xff] %v6288_v6  ;;  %6291 = vst [vmem:[%s9422_s23 + $0xac8] sm:$0xff] %v6290_v7  ;;  %v6298_v13 = vld [vmem:[%s8384_s0 + $0x588] sm:$0xff]  ;;  %v6300_v16 = vld [vmem:[%s8384_s0 + $0x590] sm:$0xff] }
 0x971   : > { %6293 = vst [vmem:[%s9422_s23 + $0xad0] sm:$0xff] %v6292_v8  ;;  %6295 = vst [vmem:[%s9422_s23 + $0xad8] sm:$0xff] %v6294_v9  ;;  %v6302_v18 = vld [vmem:[%s8384_s0 + $0x598] sm:$0xff]  ;;  %v6304_v19 = vld [vmem:[%s8384_s0 + $0x5a0] sm:$0xff] }
 0x972   : > { %6297 = vst [vmem:[%s9422_s23 + $0xb00] sm:$0xff] %v6296_v12  ;;  %6299 = vst [vmem:[%s9422_s23 + $0xb08] sm:$0xff] %v6298_v13  ;;  %v6306_v20 = vld [vmem:[%s8384_s0 + $0x5a8] sm:$0xff]  ;;  %v6308_v21 = vld [vmem:[%s8384_s0 + $0x5b0] sm:$0xff] }
 0x973   : > { %6301 = vst [vmem:[%s9422_s23 + $0xb10] sm:$0xff] %v6300_v16  ;;  %6303 = vst [vmem:[%s9422_s23 + $0xb18] sm:$0xff] %v6302_v18  ;;  %v6310_v24 = vld [vmem:[%s8384_s0 + $0x5b8] sm:$0xff]  ;;  %v6312_v25 = vld [vmem:[%s8384_s0 + $0x5c0] sm:$0xff] }
 0x974   : > { %6305 = vst [vmem:[%s9422_s23 + $0xb40] sm:$0xff] %v6304_v19  ;;  %6307 = vst [vmem:[%s9422_s23 + $0xb48] sm:$0xff] %v6306_v20  ;;  %v6314_v42 = vld [vmem:[%s8384_s0 + $0x5c8] sm:$0xff]  ;;  %v6316_v54 = vld [vmem:[%s8384_s0 + $0x5d0] sm:$0xff] }
 0x975   : > { %6309 = vst [vmem:[%s9422_s23 + $0xb50] sm:$0xff] %v6308_v21  ;;  %6311 = vst [vmem:[%s9422_s23 + $0xb58] sm:$0xff] %v6310_v24  ;;  %v6318_v37 = vld [vmem:[%s8384_s0 + $0x5d8] sm:$0xff]  ;;  %v6320_v3 = vld [vmem:[%s8384_s0 + $0x5e0] sm:$0xff] }
 0x976   : > { %6313 = vst [vmem:[%s9422_s23 + $0xb80] sm:$0xff] %v6312_v25  ;;  %6315 = vst [vmem:[%s9422_s23 + $0xb88] sm:$0xff] %v6314_v42  ;;  %v6322_v38 = vld [vmem:[%s8384_s0 + $0x5e8] sm:$0xff]  ;;  %v6324_v50 = vld [vmem:[%s8384_s0 + $0x5f0] sm:$0xff] }
 0x977   : > { %6317 = vst [vmem:[%s9422_s23 + $0xb90] sm:$0xff] %v6316_v54  ;;  %6319 = vst [vmem:[%s9422_s23 + $0xb98] sm:$0xff] %v6318_v37  ;;  %v6326_v29 = vld [vmem:[%s8384_s0 + $0x5f8] sm:$0xff]  ;;  %v6412_v4 = vld [vmem:[%s8384_s0 + $0x750] sm:$0xff] }
 0x978   : > { %6321 = vst [vmem:[%s9422_s23 + $0xbc0] sm:$0xff] %v6320_v3  ;;  %6323 = vst [vmem:[%s9422_s23 + $0xbc8] sm:$0xff] %v6322_v38  ;;  %v6414_v5 = vld [vmem:[%s8384_s0 + $0x758] sm:$0xff]  ;;  %v6416_v6 = vld [vmem:[%s8384_s0 + $0x760] sm:$0xff] }
 0x979   : > { %6325 = vst [vmem:[%s9422_s23 + $0xbd0] sm:$0xff] %v6324_v50  ;;  %6327 = vst [vmem:[%s9422_s23 + $0xbd8] sm:$0xff] %v6326_v29  ;;  %v6418_v7 = vld [vmem:[%s8384_s0 + $0x768] sm:$0xff]  ;;  %v6420_v8 = vld [vmem:[%s8384_s0 + $0x770] sm:$0xff] }
 0x97a   : > { %6413 = vst [vmem:[%s9422_s23 + $0xe90] sm:$0xff] %v6412_v4  ;;  %6415 = vst [vmem:[%s9422_s23 + $0xe98] sm:$0xff] %v6414_v5  ;;  %v6422_v9 = vld [vmem:[%s8384_s0 + $0x778] sm:$0xff]  ;;  %v6424_v12 = vld [vmem:[%s8384_s0 + $0x780] sm:$0xff] }
 0x97b   : > { %6417 = vst [vmem:[%s9422_s23 + $0xec0] sm:$0xff] %v6416_v6  ;;  %6419 = vst [vmem:[%s9422_s23 + $0xec8] sm:$0xff] %v6418_v7  ;;  %v6426_v13 = vld [vmem:[%s8384_s0 + $0x788] sm:$0xff]  ;;  %v6428_v16 = vld [vmem:[%s8384_s0 + $0x790] sm:$0xff] }
 0x97c   : > { %6421 = vst [vmem:[%s9422_s23 + $0xed0] sm:$0xff] %v6420_v8  ;;  %6423 = vst [vmem:[%s9422_s23 + $0xed8] sm:$0xff] %v6422_v9  ;;  %v6430_v18 = vld [vmem:[%s8384_s0 + $0x798] sm:$0xff]  ;;  %v6432_v19 = vld [vmem:[%s8384_s0 + $0x7a0] sm:$0xff] }
 0x97d   : > { %6425 = vst [vmem:[%s9422_s23 + $0xf00] sm:$0xff] %v6424_v12  ;;  %6427 = vst [vmem:[%s9422_s23 + $0xf08] sm:$0xff] %v6426_v13  ;;  %v6434_v20 = vld [vmem:[%s8384_s0 + $0x7a8] sm:$0xff]  ;;  %v6436_v21 = vld [vmem:[%s8384_s0 + $0x7b0] sm:$0xff] }
 0x97e   : > { %6429 = vst [vmem:[%s9422_s23 + $0xf10] sm:$0xff] %v6428_v16  ;;  %6431 = vst [vmem:[%s9422_s23 + $0xf18] sm:$0xff] %v6430_v18  ;;  %v6438_v24 = vld [vmem:[%s8384_s0 + $0x7b8] sm:$0xff]  ;;  %v6440_v25 = vld [vmem:[%s8384_s0 + $0x7c0] sm:$0xff] }
 0x97f   : > { %6433 = vst [vmem:[%s9422_s23 + $0xf40] sm:$0xff] %v6432_v19  ;;  %6435 = vst [vmem:[%s9422_s23 + $0xf48] sm:$0xff] %v6434_v20  ;;  %v6442_v42 = vld [vmem:[%s8384_s0 + $0x7c8] sm:$0xff]  ;;  %v6444_v54 = vld [vmem:[%s8384_s0 + $0x7d0] sm:$0xff] }
 0x980   : > { %6437 = vst [vmem:[%s9422_s23 + $0xf50] sm:$0xff] %v6436_v21  ;;  %6439 = vst [vmem:[%s9422_s23 + $0xf58] sm:$0xff] %v6438_v24  ;;  %v6446_v37 = vld [vmem:[%s8384_s0 + $0x7d8] sm:$0xff]  ;;  %v6448_v3 = vld [vmem:[%s8384_s0 + $0x7e0] sm:$0xff] }
 0x981   : > { %6441 = vst [vmem:[%s9422_s23 + $0xf80] sm:$0xff] %v6440_v25  ;;  %6443 = vst [vmem:[%s9422_s23 + $0xf88] sm:$0xff] %v6442_v42  ;;  %v6450_v38 = vld [vmem:[%s8384_s0 + $0x7e8] sm:$0xff]  ;;  %v6452_v50 = vld [vmem:[%s8384_s0 + $0x7f0] sm:$0xff] }
 0x982   : > { %6445 = vst [vmem:[%s9422_s23 + $0xf90] sm:$0xff] %v6444_v54  ;;  %6447 = vst [vmem:[%s9422_s23 + $0xf98] sm:$0xff] %v6446_v37  ;;  %v6454_v29 = vld [vmem:[%s8384_s0 + $0x7f8] sm:$0xff] }
 0x983   : > { %6449 = vst [vmem:[%s9422_s23 + $0xfc0] sm:$0xff] %v6448_v3  ;;  %6451 = vst [vmem:[%s9422_s23 + $0xfc8] sm:$0xff] %v6450_v38 }
 0x984   : > { %6453 = vst [vmem:[%s9422_s23 + $0xfd0] sm:$0xff] %v6452_v50  ;;  %6455 = vst [vmem:[%s9422_s23 + $0xfd8] sm:$0xff] %v6454_v29 }
 0x985 PF: > { %s10099_s2 = sld [smem:[#allocation8_spill]]  ;;  %s10100_s18 = sld [smem:[#allocation9_spill]] }
 0x986   : > { %s10101_s23 = smov %s7548_s24 }
 0x98b   : > { %p30_p11 = scmp.ge.s32.totalorder %s10099_s2, 4   ;;  %s10102_s24 = smov %s10100_s18 }
 0x98d   :  { %32 = sbr.rel (!%p30_p11) target bundleno = 9 (0x9), region = 339 }

// kernel: decoder_forward.3
= control target key start
LH: loop header
LB: loop body
LE: loop exit
PB: predicated region body
PF: predicated region fallthrough
CT: control target
= control target key end

     0   :  { %s1615_s12 = smov 0   ;;  %s1617_s13 = smov 0   ;;  %s1952_s0 = inlined_call_operand.vmem [shape: bf16[4,1,16,16], index: 0, kind: input, shape index: {}]   ;;  %s1953_s1 = inlined_call_operand.vmem [shape: bf16[512,16], index: 1, kind: input, shape index: {}]   ;;  %s1954_s2 = inlined_call_operand.vmem [shape: bf16[16,512], index: 2, kind: input, shape index: {}]   ;;  %s1955_s3 = inlined_call_operand.vmem [shape: f32[4,1,512,512], index: 3, kind: output, shape index: {}]  }
   0x1   :  { %s1619_s14 = smov 0   ;;  %s1621_s15 = smov 0  }
   0x2   :  { %s1623_s16 = smov 0  }
   0x3 LB: > { %s25_s17 = sadd.s32 1, %s1584_s14  ;;  %s32_s18 = sadd.s32 1, %s1588_s15  ;;  %s1592_s16 = sphi %s1623_s16, %s13_s16   ;;  %s1588_s15 = sphi %s1621_s15, %s1959_s15   ;;  %s1584_s14 = sphi %s1619_s14, %s1958_s14   ;;  %s1580_s13 = sphi %s1617_s13, %s1957_s13   ;;  %s1576_s12 = sphi %s1615_s12, %s1956_s12  }
   0x4   : > { %p26_p0 = scmp.ge.s32.totalorder %s25_s17, 4  ;;  %p1199_p1 = scmp.ge.s32.totalorder %s1592_s16, 1 }
   0x5   : > { %p177_p2 = scmp.lt.s32.totalorder %s1592_s16, 17 }
   0x6   : > { %s1961_s17 = smov (%p26_p0, %s25_s17), 0  ;;  %s1963_s18 = smov (!%p26_p0, %s32_s18), %s1588_s15 }
   0x7   : > { %p178_p3 = pnand %p1199_p1, %p177_p2  ;;  %p34_p4 = scmp.ge.s32.totalorder %s1963_s18, 4 }
   0x8   : > { %v1283_v0 = vld [vmem:[%s1954_s2 + $0x4] ss:$16 sps:$4 sm:$0xff] (!%p178_p3)   ;;  %p219_p5 = scmp.lt.s32.totalorder (!%p178_p3), %s1580_s13, 3  ;;  %v1285_v1 = vld [vmem:[%s1954_s2 + $0xc] ss:$16 sps:$4 sm:$0xff] (!%p178_p3)   ;;  %v1594_v2 = vmov (!%p178_p3), 0  }
   0x9   : > { %s1965_s18 = smov (%p34_p4, %s1963_s18), 0  ;;  %181 = sbr.rel (%p178_p3) target bundleno = 599 (0x257), region = 32 }
   0xa   : > { %317 = vmatprep.mubr.bf16.mxu0 (!%p178_p3), %v1594_v2  ;;  %360 = vmatprep.mubr.bf16.mxu1 (!%p178_p3), %v1594_v2  ;;  %s1202_s23 = sshll.u32 (!%p178_p3), %s1576_s12, 4  ;;  %v1287_v3 = vld [vmem:[%s1954_s2] ss:$16 sps:$4 sm:$0xff] (!%p178_p3)   ;;  %v1288_v4 = vld [vmem:[%s1954_s2 + $0x8] ss:$16 sps:$4 sm:$0xff] (!%p178_p3)   ;;  %vm281_vm0 = vcmask (!%p178_p3), 130048  }
   0xb   : > { %285 = vmatprep.subr.bf16.mxu0 (!%p178_p3), %v1283_v0  ;;  %328 = vmatprep.subr.bf16.mxu1 (!%p178_p3), %v1285_v1  ;;  %p229_p6 = scmp.lt.s32.totalorder (!%p178_p3), %s1202_s23, 63 }
   0xc   : > { %286 = vmatpush1.bf16.msra.mxu0 (!%p178_p3), %v1287_v3  ;;  %329 = vmatpush1.bf16.msra.mxu1 (!%p178_p3), %v1288_v4 }
  0x10   : > { %s1967_s13 = smov (!%p219_p5, %s1580_s13), 3  ;;  %s1969_s23 = smov (!%p229_p6, %s1202_s23), 63 }
  0x11   : > { %s1241_s28 = sshll.u32 %s1967_s13, 3  ;;  %s1206_s5 = sshll.u32 %s1967_s13, 8 }
  0x12   : > { %s227_s4 = scalar_lea.vmem %s1952_s0, %s1241_s28  ;;  %s1203_s6 = sshll.u32 %s1969_s23, 2 }
  0x13   : > { %v1289_v5 = vld [vmem:[%s227_s4] sm:$0xff]   ;;  %s1670_s9 = scalar_lea.vmem %s1953_s1, %s1203_s6  ;;  %s1672_s10 = sadd.s32 %s1206_s5, %s1203_s6 }
  0x14   : > { %1213 = vmatmul.mubr.msk.bf16.vlgmr.msra.gmra.mrb[0].mxu0 %vm281_vm0, %v1289_v5  ;;  %1214 = vmatmul.mubr.msk.bf16.vlgmr.msra.gmra.mrb[0].mxu1 %vm281_vm0, %v1289_v5  ;;  %v1290_v18 = vld [vmem:[%s1670_s9] sm:$0xff]   ;;  %v1291_v19 = vld [vmem:[%s1670_s9 + $0x8] sm:$0xff]   ;;  %v1292_v20 = vld [vmem:[%s1670_s9 + $0x10] sm:$0xff]   ;;  %s1207_s11 = sshll.u32 %s1672_s10, 3 }
  0x15   : > { %487 = vmatprep.mubr.bf16.mxu0 %v1594_v2  ;;  %600 = vmatprep.mubr.bf16.mxu1 %v1594_v2  ;;  %v1293_v21 = vld [vmem:[%s1670_s9 + $0x18] sm:$0xff]   ;;  %v1294_v22 = vld [vmem:[%s1670_s9 + $0x20] sm:$0xff]   ;;  %v1295_v23 = vld [vmem:[%s1670_s9 + $0x28] sm:$0xff]   ;;  %s1749_s19 = scalar_lea.vmem %s1955_s3, %s1207_s11 }
  0x16   : > { %v1296_v24 = vld [vmem:[%s1670_s9 + $0x30] sm:$0xff]   ;;  %v1297_v25 = vld [vmem:[%s1670_s9 + $0x38] sm:$0xff]  }
  0xe7   : > { %v319_v6 = vpop.f32.mrb[0].mxu0  ;;  %v362_v7 = vpop.f32.mrb[0].mxu1 }
  0xe8   : > { %v321_v8 = vpop.f32.mrb[1].mxu0  ;;  %v364_v9 = vpop.f32.mrb[1].mxu1 }
  0xe9   : > { %v323_v10 = vpop.f32.mrb[2].mxu0  ;;  %v366_v11 = vpop.f32.mrb[2].mxu1 }
  0xea   : > { %v387_v12 = vpack.c.bf16 %v323_v10, %v319_v6  ;;  %v389_v13 = vpack.c.bf16 %v366_v11, %v362_v7  ;;  %v325_v14 = vpop.f32.mrb[3].mxu0  ;;  %v368_v15 = vpop.f32.mrb[3].mxu1 }
  0xeb   : > { %v388_v16 = vpack.c.bf16 %v325_v14, %v321_v8  ;;  %v390_v17 = vpack.c.bf16 %v368_v15, %v364_v9 }
  0xed   : > { %455 = vmatprep.subr.bf16.mxu0 %v388_v16  ;;  %568 = vmatprep.subr.bf16.mxu1 %v390_v17 }
  0xee   : > { %456 = vmatpush1.bf16.msra.mxu0 %v387_v12  ;;  %569 = vmatpush1.bf16.msra.mxu1 %v389_v13 }
  0xf1   : > { %1223 = vmatmul.mubr.msk.bf16.vlgmr.msra.gmra.mrb[4].mxu0 %vm281_vm0, %v1290_v18  ;;  %1231 = vmatmul.mubr.msk.bf16.vlgmr.msra.gmra.mrb[4].mxu1 %vm281_vm0, %v1290_v18 }
  0xf2   : > { %497 = vmatprep.mubr.bf16.mxu0 %v1594_v2  ;;  %610 = vmatprep.mubr.bf16.mxu1 %v1594_v2 }
  0xf9   : > { %1224 = vmatmul.mubr.msk.bf16.gmra.mrb[8].mxu0 %vm281_vm0, %v1291_v19  ;;  %1232 = vmatmul.mubr.msk.bf16.gmra.mrb[8].mxu1 %vm281_vm0, %v1291_v19 }
  0xfa   : > { %507 = vmatprep.mubr.bf16.mxu0 %v1594_v2  ;;  %620 = vmatprep.mubr.bf16.mxu1 %v1594_v2 }
 0x101   : > { %1225 = vmatmul.mubr.msk.bf16.gmra.mrb[12].mxu0 %vm281_vm0, %v1292_v20  ;;  %1233 = vmatmul.mubr.msk.bf16.gmra.mrb[12].mxu1 %vm281_vm0, %v1292_v20 }
 0x102   : > { %517 = vmatprep.mubr.bf16.mxu0 %v1594_v2  ;;  %630 = vmatprep.mubr.bf16.mxu1 %v1594_v2 }
 0x109   : > { %1226 = vmatmul.mubr.msk.bf16.gmra.mrb[16].mxu0 %vm281_vm0, %v1293_v21  ;;  %1234 = vmatmul.mubr.msk.bf16.gmra.mrb[16].mxu1 %vm281_vm0, %v1293_v21 }
 0x10a   : > { %527 = vmatprep.mubr.bf16.mxu0 %v1594_v2  ;;  %640 = vmatprep.mubr.bf16.mxu1 %v1594_v2 }
 0x111   : > { %1227 = vmatmul.mubr.msk.bf16.gmra.mrb[20].mxu0 %vm281_vm0, %v1294_v22  ;;  %1235 = vmatmul.mubr.msk.bf16.gmra.mrb[20].mxu1 %vm281_vm0, %v1294_v22 }
 0x112   : > { %537 = vmatprep.mubr.bf16.mxu0 %v1594_v2  ;;  %650 = vmatprep.mubr.bf16.mxu1 %v1594_v2 }
 0x119   : > { %1228 = vmatmul.mubr.msk.bf16.gmra.mrb[24].mxu0 %vm281_vm0, %v1295_v23  ;;  %1236 = vmatmul.mubr.msk.bf16.gmra.mrb[24].mxu1 %vm281_vm0, %v1295_v23 }
 0x11a   : > { %547 = vmatprep.mubr.bf16.mxu0 %v1594_v2  ;;  %660 = vmatprep.mubr.bf16.mxu1 %v1594_v2 }
 0x121   : > { %1229 = vmatmul.mubr.msk.bf16.gmra.mrb[28].mxu0 %vm281_vm0, %v1296_v24  ;;  %1237 = vmatmul.mubr.msk.bf16.gmra.mrb[28].mxu1 %vm281_vm0, %v1296_v24 }
 0x122   : > { %557 = vmatprep.mubr.bf16.mxu0 %v1594_v2  ;;  %670 = vmatprep.mubr.bf16.mxu1 %v1594_v2 }
 0x129   : > { %1230 = vmatmul.mubr.msk.bf16.gmra.mrb[32].mxu0 %vm281_vm0, %v1297_v25  ;;  %1238 = vmatmul.mubr.msk.bf16.gmra.mrb[32].mxu1 %vm281_vm0, %v1297_v25 }
 0x1c4   : > { %v489_v26 = vpop.f32.mrb[4].mxu0  ;;  %v602_v27 = vpop.f32.mrb[4].mxu1 }
 0x1c5   : > { %v681_v28 = vsub.f32 0.0, %v489_v26  ;;  %v683_v29 = vsub.f32 0.0, %v602_v27  ;;  %v491_v30 = vpop.f32.mrb[5].mxu0  ;;  %v604_v31 = vpop.f32.mrb[5].mxu1 }
 0x1c6   : > { %v682_v32 = vsub.f32 0.0, %v491_v30  ;;  %v684_v33 = vsub.f32 0.0, %v604_v31  ;;  %v493_v34 = vpop.f32.mrb[6].mxu0  ;;  %v606_v35 = vpop.f32.mrb[6].mxu1 }
 0x1c7   : > { %v745_v36 = vmul.f32 1.442695, %v681_v28  ;;  %v749_v37 = vmul.f32 1.442695, %v683_v29  ;;  %v685_v38 = vsub.f32 0.0, %v493_v34  ;;  %v687_v39 = vsub.f32 0.0, %v606_v35 }
 0x1c8   : > { %v747_v40 = vmul.f32 1.442695, %v682_v32  ;;  %v751_v41 = vmul.f32 1.442695, %v684_v33  ;;  %v495_v42 = vpop.f32.mrb[7].mxu0  ;;  %v608_v43 = vpop.f32.mrb[7].mxu1 }
 0x1c9   : > { %1298 = vpow2.f32 %v745_v36  ;;  %v753_v44 = vmul.f32 1.442695, %v685_v38  ;;  %v686_v45 = vsub.f32 0.0, %v495_v42  ;;  %v757_v46 = vmul.f32 1.442695, %v687_v39 }
 0x1ca   : > { %1300 = vpow2.f32 %v749_v37  ;;  %v688_v47 = vsub.f32 0.0, %v608_v43 }
 0x1cb   : > { %1302 = vpow2.f32 %v747_v40  ;;  %v755_v48 = vmul.f32 1.442695, %v686_v45 }
 0x1cc   : > { %1304 = vpow2.f32 %v751_v41  ;;  %v759_v49 = vmul.f32 1.442695, %v688_v47  ;;  %v499_v50 = vpop.f32.mrb[8].mxu0  ;;  %v612_v51 = vpop.f32.mrb[8].mxu1 }
 0x1cd   : > { %1306 = vpow2.f32 %v753_v44  ;;  %v689_v52 = vsub.f32 0.0, %v499_v50  ;;  %v691_v53 = vsub.f32 0.0, %v612_v51  ;;  %v501_v54 = vpop.f32.mrb[9].mxu0  ;;  %v614_v55 = vpop.f32.mrb[9].mxu1 }
 0x1ce   : > { %1308 = vpow2.f32 %v757_v46  ;;  %v690_v56 = vsub.f32 0.0, %v501_v54  ;;  %v692_v57 = vsub.f32 0.0, %v614_v55  ;;  %v503_v58 = vpop.f32.mrb[10].mxu0  ;;  %v1714_v59 = vpop.f32.mrb[10].mxu1 }
 0x1cf   : > { %1310 = vpow2.f32 %v755_v48  ;;  %v761_v60 = vmul.f32 1.442695, %v689_v52  ;;  %v765_v61 = vmul.f32 1.442695, %v691_v53  ;;  %v693_v62 = vsub.f32 0.0, %v503_v58  ;;  %v1716_v63 = vpop.f32.mrb[11].mxu0 }
 0x1d0   : > { %1312 = vpow2.f32 %v759_v49  ;;  %v763_v0 = vmul.f32 1.442695, %v690_v56  ;;  %v767_v1 = vmul.f32 1.442695, %v692_v57  ;;  %v1718_v2 = vpop.f32.mrb[11].mxu1  ;;  %v695_v29 = vsub.f32 0.0, %v1714_v59 }
 0x1d1   : > { %1314 = vpow2.f32 %v761_v60  ;;  %v769_v3 = vmul.f32 1.442695, %v693_v62  ;;  %v694_v32 = vsub.f32 0.0, %v1716_v63  ;;  %v696_v36 = vsub.f32 0.0, %v1718_v2 }
 0x1d2   : > { %1316 = vpow2.f32 %v765_v61  ;;  %v773_v46 = vmul.f32 1.442695, %v695_v29 }
 0x1d3   : > { %v1299_v4 = vpop.eup %1298  ;;  %1318 = vpow2.f32 %v763_v0  ;;  %v771_v52 = vmul.f32 1.442695, %v694_v32  ;;  %v775_v56 = vmul.f32 1.442695, %v696_v36 }
 0x1d4   : > { %v1301_v5 = vpop.eup %1300  ;;  %v873_v6 = vadd.f32 1.0, %v1299_v4  ;;  %1320 = vpow2.f32 %v767_v1  ;;  %v1720_v7 = vpop.f32.mrb[12].mxu0 }
 0x1d5   : > { %v1722_v8 = vpop.f32.mrb[12].mxu1  ;;  %v1303_v9 = vpop.eup %1302  ;;  %v875_v10 = vadd.f32 1.0, %v1301_v5  ;;  %1322 = vpow2.f32 %v769_v3  ;;  %v697_v41 = vsub.f32 0.0, %v1720_v7 }
 0x1d6   : > { %v1724_v11 = vpop.f32.mrb[13].mxu0  ;;  %v1726_v12 = vpop.f32.mrb[13].mxu1  ;;  %1324 = vrcp.f32 %v873_v6  ;;  %v874_v14 = vadd.f32 1.0, %v1303_v9  ;;  %v699_v47 = vsub.f32 0.0, %v1722_v8 }
 0x1d7   : > { %v1305_v13 = vpop.eup %1304  ;;  %v1728_v15 = vpop.f32.mrb[14].mxu0  ;;  %1326 = vrcp.f32 %v875_v10  ;;  %v698_v53 = vsub.f32 0.0, %v1724_v11  ;;  %v700_v57 = vsub.f32 0.0, %v1726_v12  ;;  %v777_v59 = vmul.f32 1.442695, %v697_v41 }
 0x1d8   : > { %v1730_v16 = vpop.f32.mrb[14].mxu1  ;;  %v1307_v17 = vpop.eup %1306  ;;  %v876_v18 = vadd.f32 1.0, %v1305_v13  ;;  %1328 = vrcp.f32 %v874_v14  ;;  %v701_v60 = vsub.f32 0.0, %v1728_v15  ;;  %v781_v62 = vmul.f32 1.442695, %v699_v47 }
 0x1d9   : > { %v1732_v19 = vpop.f32.mrb[15].mxu0  ;;  %v1309_v20 = vpop.eup %1308  ;;  %v877_v21 = vadd.f32 1.0, %v1307_v17  ;;  %v703_v63 = vsub.f32 0.0, %v1730_v16  ;;  %v779_v1 = vmul.f32 1.442695, %v698_v53 }
 0x1da   : > { %v1734_v22 = vpop.f32.mrb[15].mxu1  ;;  %v1311_v23 = vpop.eup %1310  ;;  %1330 = vrcp.f32 %v876_v18  ;;  %v879_v24 = vadd.f32 1.0, %v1309_v20  ;;  %v702_v2 = vsub.f32 0.0, %v1732_v19  ;;  %v783_v6 = vmul.f32 1.442695, %v700_v57 }
 0x1db   : > { %v1313_v25 = vpop.eup %1312  ;;  %1332 = vrcp.f32 %v877_v21  ;;  %v878_v26 = vadd.f32 1.0, %v1311_v23  ;;  %v704_v7 = vsub.f32 0.0, %v1734_v22  ;;  %v785_v11 = vmul.f32 1.442695, %v701_v60 }
 0x1dc   : > { %v1315_v27 = vpop.eup %1314  ;;  %1334 = vrcp.f32 %v879_v24  ;;  %v880_v28 = vadd.f32 1.0, %v1313_v25  ;;  %v1739_v33 = vpop.f32.mrb[16].mxu0  ;;  %v789_v16 = vmul.f32 1.442695, %v703_v63  ;;  %v787_v20 = vmul.f32 1.442695, %v702_v2 }
 0x1dd   : > { %v1317_v30 = vpop.eup %1316  ;;  %1336 = vrcp.f32 %v878_v26  ;;  %v881_v31 = vadd.f32 1.0, %v1315_v27  ;;  %v1742_v37 = vpop.f32.mrb[16].mxu1  ;;  %v705_v12 = vsub.f32 0.0, %v1739_v33  ;;  %v791_v23 = vmul.f32 1.442695, %v704_v7 }
 0x1de   : > { %v1319_v34 = vpop.eup %1318  ;;  %1338 = vrcp.f32 %v880_v28  ;;  %v883_v35 = vadd.f32 1.0, %v1317_v30  ;;  %v1744_v38 = vpop.f32.mrb[17].mxu0  ;;  %v707_v17 = vsub.f32 0.0, %v1742_v37 }
 0x1df   : > { %v1321_v39 = vpop.eup %1320  ;;  %1340 = vrcp.f32 %v881_v31  ;;  %v882_v40 = vadd.f32 1.0, %v1319_v34  ;;  %v1752_v42 = vpop.f32.mrb[17].mxu1  ;;  %v793_v25 = vmul.f32 1.442695, %v705_v12 }
 0x1e0   : > { %v1754_v43 = vpop.f32.mrb[18].mxu0  ;;  %v1323_v44 = vpop.eup %1322  ;;  %1342 = vrcp.f32 %v883_v35  ;;  %v884_v45 = vadd.f32 1.0, %v1321_v39  ;;  %v797_v27 = vmul.f32 1.442695, %v707_v17  ;;  %v708_v2 = vsub.f32 0.0, %v1752_v42 }
 0x1e1   : > { %v1757_v48 = vpop.f32.mrb[18].mxu1  ;;  %v1759_v49 = vpop.f32.mrb[19].mxu0  ;;  %1344 = vrcp.f32 %v882_v40  ;;  %v885_v51 = vadd.f32 1.0, %v1323_v44 }
 0x1e2   : > { %v1325_v50 = vpop.eup %1324  ;;  %v1762_v54 = vpop.f32.mrb[19].mxu1  ;;  %1346 = vrcp.f32 %v884_v45  ;;  %v711_v17 = vsub.f32 0.0, %v1757_v48 }
 0x1e3   : > { %v1327_v55 = vpop.eup %1326  ;;  %1001 = vst [vmem:[%s1749_s19] sm:$0xff] %v1325_v50  ;;  %1348 = vrcp.f32 %v885_v51 }
 0x1e4   : > { %v1329_v58 = vpop.eup %1328  ;;  %1003 = vst [vmem:[%s1749_s19 + $0x10] sm:$0xff] %v1327_v55  ;;  %1350 = vpow2.f32 %v773_v46  ;;  %v1772_v3 = vpop.f32.mrb[20].mxu0 }
 0x1e5   : > { %v1331_v61 = vpop.eup %1330  ;;  %1002 = vst [vmem:[%s1749_s19 + $0x8] sm:$0xff] %v1329_v58  ;;  %1352 = vpow2.f32 %v771_v52  ;;  %v1774_v4 = vpop.f32.mrb[20].mxu1 }
 0x1e6   : > { %v1333_v0 = vpop.eup %1332  ;;  %1004 = vst [vmem:[%s1749_s19 + $0x18] sm:$0xff] %v1331_v61  ;;  %1354 = vpow2.f32 %v775_v56  ;;  %v1778_v8 = vpop.f32.mrb[21].mxu0  ;;  %v706_v61 = vsub.f32 0.0, %v1744_v38 }
 0x1e7   : > { %v1335_v5 = vpop.eup %1334  ;;  %1005 = vst [vmem:[%s1749_s19 + $0x20] sm:$0xff] %v1333_v0  ;;  %v1780_v9 = vpop.f32.mrb[21].mxu1  ;;  %1356 = vpow2.f32 %v777_v59 }
 0x1e8   : > { %v1337_v10 = vpop.eup %1336  ;;  %1007 = vst [vmem:[%s1749_s19 + $0x30] sm:$0xff] %v1335_v5  ;;  %v1784_v13 = vpop.f32.mrb[22].mxu0  ;;  %1358 = vpow2.f32 %v781_v62 }
 0x1e9   : > { %v1786_v14 = vpop.f32.mrb[22].mxu1  ;;  %v1339_v15 = vpop.eup %1338  ;;  %1006 = vst [vmem:[%s1749_s19 + $0x28] sm:$0xff] %v1337_v10  ;;  %1360 = vpow2.f32 %v779_v1 }
 0x1ea   : > { %v1790_v18 = vpop.f32.mrb[23].mxu0  ;;  %v1341_v19 = vpop.eup %1340  ;;  %1008 = vst [vmem:[%s1749_s19 + $0x38] sm:$0xff] %v1339_v15  ;;  %1362 = vpow2.f32 %v783_v6 }
 0x1eb   : > { %v1793_v21 = vpop.f32.mrb[23].mxu1  ;;  %v1343_v22 = vpop.eup %1342  ;;  %1009 = vst [vmem:[%s1749_s19 + $0x40] sm:$0xff] %v1341_v19  ;;  %1364 = vpow2.f32 %v785_v11  ;;  %v709_v11 = vsub.f32 0.0, %v1754_v43 }
 0x1ec   : > { %v1345_v24 = vpop.eup %1344  ;;  %1011 = vst [vmem:[%s1749_s19 + $0x50] sm:$0xff] %v1343_v22  ;;  %1366 = vpow2.f32 %v789_v16  ;;  %v1799_v29 = vpop.f32.mrb[24].mxu0  ;;  %v795_v22 = vmul.f32 1.442695, %v706_v61 }
 0x1ed   : > { %v1347_v26 = vpop.eup %1346  ;;  %1010 = vst [vmem:[%s1749_s19 + $0x48] sm:$0xff] %v1345_v24  ;;  %1368 = vpow2.f32 %v787_v20  ;;  %v1801_v30 = vpop.f32.mrb[24].mxu1  ;;  %v801_v48 = vmul.f32 1.442695, %v709_v11 }
 0x1ee   : > { %v1349_v28 = vpop.eup %1348  ;;  %1012 = vst [vmem:[%s1749_s19 + $0x58] sm:$0xff] %v1347_v26  ;;  %1370 = vpow2.f32 %v791_v23  ;;  %v1804_v32 = vpop.f32.mrb[25].mxu0  ;;  %v710_v23 = vsub.f32 0.0, %v1759_v49  ;;  %v712_v26 = vsub.f32 0.0, %v1762_v54  ;;  %v715_v49 = vsub.f32 0.0, %v1774_v4 }
 0x1ef   : > { %v1351_v31 = vpop.eup %1350  ;;  %1013 = vst [vmem:[%s1749_s19 + $0x60] sm:$0xff] %v1349_v28  ;;  %v1806_v33 = vpop.f32.mrb[25].mxu1  ;;  %1372 = vpow2.f32 %v793_v25  ;;  %v799_v25 = vmul.f32 1.442695, %v708_v2  ;;  %v713_v28 = vsub.f32 0.0, %v1772_v3 }
 0x1f0   : > { %v1353_v34 = vpop.eup %1352  ;;  %v887_v35 = vadd.f32 1.0, %v1351_v31  ;;  %v1808_v36 = vpop.f32.mrb[26].mxu0  ;;  %1374 = vpow2.f32 %v797_v27  ;;  %v803_v54 = vmul.f32 1.442695, %v710_v23  ;;  %v807_v4 = vmul.f32 1.442695, %v712_v26 }
 0x1f1   : > { %v1810_v37 = vpop.f32.mrb[26].mxu1  ;;  %v1355_v39 = vpop.eup %1354  ;;  %v886_v40 = vadd.f32 1.0, %v1353_v34  ;;  %v805_v34 = vmul.f32 1.442695, %v711_v17 }
 0x1f2   : > { %v1812_v41 = vpop.f32.mrb[27].mxu0  ;;  %v1357_v44 = vpop.eup %1356  ;;  %1376 = vrcp.f32 %v887_v35  ;;  %v888_v45 = vadd.f32 1.0, %v1355_v39 }
 0x1f3   : > { %v1814_v46 = vpop.f32.mrb[27].mxu1  ;;  %v1359_v47 = vpop.eup %1358  ;;  %1378 = vrcp.f32 %v886_v40  ;;  %v889_v50 = vadd.f32 1.0, %v1357_v44  ;;  %v714_v44 = vsub.f32 0.0, %v1778_v8  ;;  %v809_v8 = vmul.f32 1.442695, %v713_v28 }
 0x1f4   : > { %v1361_v51 = vpop.eup %1360  ;;  %1380 = vrcp.f32 %v888_v45  ;;  %v891_v52 = vadd.f32 1.0, %v1359_v47  ;;  %v1816_v58 = vpop.f32.mrb[28].mxu0 }
 0x1f5   : > { %v1363_v53 = vpop.eup %1362  ;;  %1382 = vrcp.f32 %v889_v50  ;;  %v890_v55 = vadd.f32 1.0, %v1361_v51  ;;  %v1819_v62 = vpop.f32.mrb[28].mxu1  ;;  %v716_v50 = vsub.f32 0.0, %v1780_v9  ;;  %v719_v9 = vsub.f32 0.0, %v1786_v14 }
 0x1f6   : > { %v1365_v56 = vpop.eup %1364  ;;  %1384 = vrcp.f32 %v891_v52  ;;  %v892_v57 = vadd.f32 1.0, %v1363_v53  ;;  %v1821_v63 = vpop.f32.mrb[29].mxu0 }
 0x1f7   : > { %v1367_v59 = vpop.eup %1366  ;;  %1386 = vrcp.f32 %v890_v55  ;;  %v893_v60 = vadd.f32 1.0, %v1365_v56  ;;  %v1824_v5 = vpop.f32.mrb[29].mxu1  ;;  %v717_v55 = vsub.f32 0.0, %v1784_v13  ;;  %v815_v2 = vmul.f32 1.442695, %v716_v50 }
 0x1f8   : > { %v1369_v0 = vpop.eup %1368  ;;  %1388 = vrcp.f32 %v892_v57  ;;  %v895_v1 = vadd.f32 1.0, %v1367_v59  ;;  %v1826_v6 = vpop.f32.mrb[30].mxu0  ;;  %v813_v59 = vmul.f32 1.442695, %v715_v49  ;;  %v821_v11 = vmul.f32 1.442695, %v719_v9 }
 0x1f9   : > { %v1371_v7 = vpop.eup %1370  ;;  %1390 = vrcp.f32 %v893_v60  ;;  %v894_v10 = vadd.f32 1.0, %v1369_v0  ;;  %v1829_v12 = vpop.f32.mrb[30].mxu1  ;;  %v811_v0 = vmul.f32 1.442695, %v714_v44  ;;  %v817_v14 = vmul.f32 1.442695, %v717_v55 }
 0x1fa   : > { %v1831_v38 = vpop.f32.mrb[31].mxu0  ;;  %v1373_v15 = vpop.eup %1372  ;;  %1392 = vrcp.f32 %v895_v1  ;;  %v896_v16 = vadd.f32 1.0, %v1371_v7  ;;  %v718_v1 = vsub.f32 0.0, %v1790_v18  ;;  %v720_v44 = vsub.f32 0.0, %v1793_v21 }
 0x1fb   : > { %v1834_v42 = vpop.f32.mrb[31].mxu1  ;;  %v1375_v19 = vpop.eup %1374  ;;  %1394 = vrcp.f32 %v894_v10  ;;  %v897_v20 = vadd.f32 1.0, %v1373_v15  ;;  %v721_v50 = vsub.f32 0.0, %v1799_v29  ;;  %v723_v55 = vsub.f32 0.0, %v1801_v30 }
 0x1fc   : > { %v1377_v43 = vpop.eup %1376  ;;  %1396 = vrcp.f32 %v896_v16  ;;  %v899_v24 = vadd.f32 1.0, %v1375_v19  ;;  %v1842_v35 = vpop.f32.mrb[32].mxu0  ;;  %v819_v16 = vmul.f32 1.442695, %v718_v1  ;;  %v722_v9 = vsub.f32 0.0, %v1804_v32 }
 0x1fd   : > { %v1379_v27 = vpop.eup %1378  ;;  %1015 = vst [vmem:[%s1749_s19 + $0x70] sm:$0xff] %v1377_v43  ;;  %1398 = vrcp.f32 %v897_v20  ;;  %v1844_v39 = vpop.f32.mrb[32].mxu1  ;;  %v724_v1 = vsub.f32 0.0, %v1806_v33  ;;  %v725_v30 = vsub.f32 0.0, %v1808_v36  ;;  %v727_v32 = vsub.f32 0.0, %v1810_v37 }
 0x1fe   : > { %v1381_v31 = vpop.eup %1380  ;;  %1014 = vst [vmem:[%s1749_s19 + $0x68] sm:$0xff] %v1379_v27  ;;  %1400 = vrcp.f32 %v899_v24  ;;  %v1848_v45 = vpop.f32.mrb[33].mxu0  ;;  %v726_v33 = vsub.f32 0.0, %v1812_v41  ;;  %v728_v36 = vsub.f32 0.0, %v1814_v46  ;;  %v729_v37 = vsub.f32 0.0, %v1816_v58 }
 0x1ff   : > { %v1383_v40 = vpop.eup %1382  ;;  %1016 = vst [vmem:[%s1749_s19 + $0x78] sm:$0xff] %v1381_v31  ;;  %1402 = vpow2.f32 %v795_v22  ;;  %v1850_v3 = vpop.f32.mrb[33].mxu1  ;;  %v731_v41 = vsub.f32 0.0, %v1819_v62  ;;  %v730_v46 = vsub.f32 0.0, %v1821_v63 }
 0x200   : > { %v1385_v47 = vpop.eup %1384  ;;  %1017 = vst [vmem:[%s1749_s19 + $0x80] sm:$0xff] %v1383_v40  ;;  %1404 = vpow2.f32 %v799_v25  ;;  %v1854_v51 = vpop.f32.mrb[34].mxu0  ;;  %v839_v58 = vmul.f32 1.442695, %v728_v36  ;;  %v841_v62 = vmul.f32 1.442695, %v729_v37 }
 0x201   : > { %v1856_v52 = vpop.f32.mrb[34].mxu1  ;;  %v1387_v53 = vpop.eup %1386  ;;  %1019 = vst [vmem:[%s1749_s19 + $0x90] sm:$0xff] %v1385_v47  ;;  %1406 = vpow2.f32 %v801_v48  ;;  %v843_v63 = vmul.f32 1.442695, %v730_v46 }
 0x202   : > { %v1860_v56 = vpop.f32.mrb[35].mxu0  ;;  %v1389_v57 = vpop.eup %1388  ;;  %1018 = vst [vmem:[%s1749_s19 + $0x88] sm:$0xff] %v1387_v53  ;;  %1408 = vpow2.f32 %v805_v34 }
 0x203   : > { %v1864_v60 = vpop.f32.mrb[35].mxu1  ;;  %v1391_v61 = vpop.eup %1390  ;;  %1020 = vst [vmem:[%s1749_s19 + $0x98] sm:$0xff] %v1389_v57  ;;  %1410 = vpow2.f32 %v803_v54 }
 0x204   : > { %v1393_v13 = vpop.eup %1392  ;;  %1021 = vst [vmem:[%s1749_s19 + $0xa0] sm:$0xff] %v1391_v61  ;;  %1412 = vpow2.f32 %v807_v4 }
 0x205   : > { %v1395_v7 = vpop.eup %1394  ;;  %1023 = vst [vmem:[%s1749_s19 + $0xb0] sm:$0xff] %v1393_v13  ;;  %1414 = vpow2.f32 %v809_v8 }
 0x206   : > { %v1397_v10 = vpop.eup %1396  ;;  %1022 = vst [vmem:[%s1749_s19 + $0xa8] sm:$0xff] %v1395_v7  ;;  %1416 = vpow2.f32 %v813_v59 }
 0x207   : > { %v1399_v15 = vpop.eup %1398  ;;  %1024 = vst [vmem:[%s1749_s19 + $0xb8] sm:$0xff] %v1397_v10  ;;  %1418 = vpow2.f32 %v811_v0  ;;  %v823_v0 = vmul.f32 1.442695, %v720_v44 }
 0x208   : > { %v1401_v17 = vpop.eup %1400  ;;  %1025 = vst [vmem:[%s1749_s19 + $0xc0] sm:$0xff] %v1399_v15  ;;  %1420 = vpow2.f32 %v815_v2  ;;  %v825_v2 = vmul.f32 1.442695, %v721_v50 }
 0x209   : > { %v1403_v18 = vpop.eup %1402  ;;  %1027 = vst [vmem:[%s1749_s19 + $0xd0] sm:$0xff] %v1401_v17  ;;  %1422 = vpow2.f32 %v817_v14  ;;  %v829_v14 = vmul.f32 1.442695, %v723_v55 }
 0x20a   : > { %v1405_v19 = vpop.eup %1404  ;;  %v898_v20 = vadd.f32 1.0, %v1403_v18  ;;  %1424 = vpow2.f32 %v821_v11  ;;  %v827_v11 = vmul.f32 1.442695, %v722_v9  ;;  %v833_v18 = vmul.f32 1.442695, %v725_v30 }
 0x20b   : > { %v1407_v22 = vpop.eup %1406  ;;  %v900_v23 = vadd.f32 1.0, %v1405_v19  ;;  %1426 = vpow2.f32 %v819_v16  ;;  %v831_v16 = vmul.f32 1.442695, %v724_v1  ;;  %v733_v1 = vsub.f32 0.0, %v1826_v6 }
 0x20c   : > { %v1409_v43 = vpop.eup %1408  ;;  %1428 = vrcp.f32 %v898_v20  ;;  %v901_v24 = vadd.f32 1.0, %v1407_v22  ;;  %v837_v20 = vmul.f32 1.442695, %v727_v32 }
 0x20d   : > { %v1411_v25 = vpop.eup %1410  ;;  %1430 = vrcp.f32 %v900_v23  ;;  %v903_v26 = vadd.f32 1.0, %v1409_v43  ;;  %v835_v23 = vmul.f32 1.442695, %v726_v33 }
 0x20e   : > { %v1413_v27 = vpop.eup %1412  ;;  %1432 = vrcp.f32 %v901_v24  ;;  %v902_v48 = vadd.f32 1.0, %v1411_v25  ;;  %v732_v24 = vsub.f32 0.0, %v1824_v5 }
 0x20f   : > { %v1415_v28 = vpop.eup %1414  ;;  %1434 = vrcp.f32 %v903_v26  ;;  %v904_v31 = vadd.f32 1.0, %v1413_v27  ;;  %v845_v27 = vmul.f32 1.442695, %v731_v41 }
 0x210   : > { %v1417_v34 = vpop.eup %1416  ;;  %1436 = vrcp.f32 %v902_v48  ;;  %v905_v49 = vadd.f32 1.0, %v1415_v28 }
 0x211   : > { %v1419_v40 = vpop.eup %1418  ;;  %1438 = vrcp.f32 %v904_v31  ;;  %v907_v54 = vadd.f32 1.0, %v1417_v34  ;;  %v847_v31 = vmul.f32 1.442695, %v732_v24 }
 0x212   : > { %v1421_v47 = vpop.eup %1420  ;;  %1440 = vrcp.f32 %v905_v49  ;;  %v906_v4 = vadd.f32 1.0, %v1419_v40 }
 0x213   : > { %v1423_v53 = vpop.eup %1422  ;;  %1442 = vrcp.f32 %v907_v54  ;;  %v908_v8 = vadd.f32 1.0, %v1421_v47 }
 0x214   : > { %v1425_v57 = vpop.eup %1424  ;;  %1444 = vrcp.f32 %v906_v4  ;;  %v909_v59 = vadd.f32 1.0, %v1423_v53 }
 0x215   : > { %v1427_v61 = vpop.eup %1426  ;;  %1446 = vrcp.f32 %v908_v8  ;;  %v911_v21 = vadd.f32 1.0, %v1425_v57 }
 0x216   : > { %v1429_v13 = vpop.eup %1428  ;;  %1448 = vrcp.f32 %v909_v59  ;;  %v910_v29 = vadd.f32 1.0, %v1427_v61 }
 0x217   : > { %v1431_v7 = vpop.eup %1430  ;;  %1026 = vst [vmem:[%s1749_s19 + $0xc8] sm:$0xff] %v1429_v13  ;;  %1450 = vrcp.f32 %v911_v21 }
 0x218   : > { %v1433_v10 = vpop.eup %1432  ;;  %1028 = vst [vmem:[%s1749_s19 + $0xd8] sm:$0xff] %v1431_v7  ;;  %1452 = vrcp.f32 %v910_v29 }
 0x219   : > { %v1435_v15 = vpop.eup %1434  ;;  %1029 = vst [vmem:[%s1749_s19 + $0xe0] sm:$0xff] %v1433_v10  ;;  %1454 = vpow2.f32 %v823_v0 }
 0x21a   : > { %v1437_v17 = vpop.eup %1436  ;;  %1031 = vst [vmem:[%s1749_s19 + $0xf0] sm:$0xff] %v1435_v15  ;;  %1456 = vpow2.f32 %v825_v2  ;;  %v735_v2 = vsub.f32 0.0, %v1829_v12  ;;  %v849_v15 = vmul.f32 1.442695, %v733_v1 }
 0x21b   : > { %v1439_v19 = vpop.eup %1438  ;;  %1030 = vst [vmem:[%s1749_s19 + $0xe8] sm:$0xff] %v1437_v17  ;;  %1458 = vpow2.f32 %v829_v14  ;;  %v734_v14 = vsub.f32 0.0, %v1831_v38  ;;  %v739_v38 = vsub.f32 0.0, %v1844_v39  ;;  %v741_v39 = vsub.f32 0.0, %v1854_v51 }
 0x21c   : > { %v1441_v22 = vpop.eup %1440  ;;  %1032 = vst [vmem:[%s1749_s19 + $0xf8] sm:$0xff] %v1439_v19  ;;  %1460 = vpow2.f32 %v827_v11  ;;  %v736_v11 = vsub.f32 0.0, %v1834_v42  ;;  %v853_v17 = vmul.f32 1.442695, %v735_v2  ;;  %v738_v42 = vsub.f32 0.0, %v1848_v45 }
 0x21d   : > { %v1443_v43 = vpop.eup %1442  ;;  %1033 = vst [vmem:[%s1749_s19 + $0x100] sm:$0xff] %v1441_v22  ;;  %1462 = vpow2.f32 %v831_v16  ;;  %v737_v16 = vsub.f32 0.0, %v1842_v35  ;;  %v851_v37 = vmul.f32 1.442695, %v734_v14  ;;  %v740_v35 = vsub.f32 0.0, %v1850_v3 }
 0x21e   : > { %v1445_v25 = vpop.eup %1444  ;;  %1035 = vst [vmem:[%s1749_s19 + $0x110] sm:$0xff] %v1443_v43  ;;  %1464 = vpow2.f32 %v833_v18  ;;  %v861_v46 = vmul.f32 1.442695, %v739_v38  ;;  %v743_v45 = vsub.f32 0.0, %v1856_v52  ;;  %v742_v3 = vsub.f32 0.0, %v1860_v56 }
 0x21f   : > { %v1447_v26 = vpop.eup %1446  ;;  %1034 = vst [vmem:[%s1749_s19 + $0x108] sm:$0xff] %v1445_v25  ;;  %1466 = vpow2.f32 %v837_v20  ;;  %v855_v20 = vmul.f32 1.442695, %v736_v11  ;;  %v857_v22 = vmul.f32 1.442695, %v737_v16  ;;  %v744_v25 = vsub.f32 0.0, %v1864_v60 }
 0x220   : > { %v1449_v48 = vpop.eup %1448  ;;  %1036 = vst [vmem:[%s1749_s19 + $0x118] sm:$0xff] %v1447_v26  ;;  %1468 = vpow2.f32 %v835_v23  ;;  %v863_v51 = vmul.f32 1.442695, %v740_v35  ;;  %v865_v52 = vmul.f32 1.442695, %v741_v39 }
 0x221   : > { %v1451_v28 = vpop.eup %1450  ;;  %1037 = vst [vmem:[%s1749_s19 + $0x120] sm:$0xff] %v1449_v48  ;;  %1470 = vpow2.f32 %v839_v58  ;;  %v859_v58 = vmul.f32 1.442695, %v738_v42  ;;  %v867_v56 = vmul.f32 1.442695, %v742_v3 }
 0x222   : > { %v1453_v34 = vpop.eup %1452  ;;  %1039 = vst [vmem:[%s1749_s19 + $0x130] sm:$0xff] %v1451_v28  ;;  %1472 = vpow2.f32 %v841_v62  ;;  %v871_v28 = vmul.f32 1.442695, %v744_v25 }
 0x223   : > { %v1455_v5 = vpop.eup %1454  ;;  %1038 = vst [vmem:[%s1749_s19 + $0x128] sm:$0xff] %v1453_v34  ;;  %1474 = vpow2.f32 %v845_v27  ;;  %v869_v27 = vmul.f32 1.442695, %v743_v45 }
 0x224   : > { %v1457_v49 = vpop.eup %1456  ;;  %v912_v40 = vadd.f32 1.0, %v1455_v5  ;;  %1476 = vpow2.f32 %v843_v63 }
 0x225   : > { %v1459_v54 = vpop.eup %1458  ;;  %v913_v44 = vadd.f32 1.0, %v1457_v49  ;;  %1478 = vpow2.f32 %v847_v31 }
 0x226   : > { %v1461_v47 = vpop.eup %1460  ;;  %1480 = vrcp.f32 %v912_v40  ;;  %v915_v4 = vadd.f32 1.0, %v1459_v54 }
 0x227   : > { %v1463_v50 = vpop.eup %1462  ;;  %1482 = vrcp.f32 %v913_v44  ;;  %v914_v53 = vadd.f32 1.0, %v1461_v47 }
 0x228   : > { %v1465_v8 = vpop.eup %1464  ;;  %1484 = vrcp.f32 %v915_v4  ;;  %v916_v55 = vadd.f32 1.0, %v1463_v50 }
 0x229   : > { %v1467_v57 = vpop.eup %1466  ;;  %1486 = vrcp.f32 %v914_v53  ;;  %v917_v59 = vadd.f32 1.0, %v1465_v8 }
 0x22a   : > { %v1469_v9 = vpop.eup %1468  ;;  %1488 = vrcp.f32 %v916_v55  ;;  %v919_v61 = vadd.f32 1.0, %v1467_v57 }
 0x22b   : > { %v1471_v21 = vpop.eup %1470  ;;  %1490 = vrcp.f32 %v917_v59  ;;  %v918_v0 = vadd.f32 1.0, %v1469_v9 }
 0x22c   : > { %v1473_v13 = vpop.eup %1472  ;;  %1492 = vrcp.f32 %v919_v61  ;;  %v920_v29 = vadd.f32 1.0, %v1471_v21 }
 0x22d   : > { %v1475_v30 = vpop.eup %1474  ;;  %1494 = vrcp.f32 %v918_v0  ;;  %v921_v7 = vadd.f32 1.0, %v1473_v13 }
 0x22e   : > { %v1477_v32 = vpop.eup %1476  ;;  %1496 = vrcp.f32 %v920_v29  ;;  %v923_v10 = vadd.f32 1.0, %v1475_v30 }
 0x22f   : > { %v1479_v33 = vpop.eup %1478  ;;  %1498 = vrcp.f32 %v921_v7  ;;  %v922_v6 = vadd.f32 1.0, %v1477_v32 }
 0x230   : > { %v1481_v36 = vpop.eup %1480  ;;  %1500 = vrcp.f32 %v923_v10  ;;  %v924_v12 = vadd.f32 1.0, %v1479_v33 }
 0x231   : > { %v1483_v18 = vpop.eup %1482  ;;  %1040 = vst [vmem:[%s1749_s19 + $0x138] sm:$0xff] %v1481_v36  ;;  %1502 = vrcp.f32 %v922_v6 }
 0x232   : > { %v1485_v19 = vpop.eup %1484  ;;  %1041 = vst [vmem:[%s1749_s19 + $0x140] sm:$0xff] %v1483_v18  ;;  %1504 = vrcp.f32 %v924_v12 }
 0x233   : > { %v1487_v41 = vpop.eup %1486  ;;  %1043 = vst [vmem:[%s1749_s19 + $0x150] sm:$0xff] %v1485_v19  ;;  %1506 = vpow2.f32 %v849_v15 }
 0x234   : > { %v1489_v23 = vpop.eup %1488  ;;  %1042 = vst [vmem:[%s1749_s19 + $0x148] sm:$0xff] %v1487_v41  ;;  %1508 = vpow2.f32 %v853_v17 }
 0x235   : > { %v1491_v43 = vpop.eup %1490  ;;  %1044 = vst [vmem:[%s1749_s19 + $0x158] sm:$0xff] %v1489_v23  ;;  %1510 = vpow2.f32 %v851_v37 }
 0x236   : > { %v1493_v24 = vpop.eup %1492  ;;  %1045 = vst [vmem:[%s1749_s19 + $0x160] sm:$0xff] %v1491_v43  ;;  %1512 = vpow2.f32 %v855_v20 }
 0x237   : > { %v1495_v62 = vpop.eup %1494  ;;  %1047 = vst [vmem:[%s1749_s19 + $0x170] sm:$0xff] %v1493_v24  ;;  %1514 = vpow2.f32 %v857_v22 }
 0x238   : > { %v1497_v26 = vpop.eup %1496  ;;  %1046 = vst [vmem:[%s1749_s19 + $0x168] sm:$0xff] %v1495_v62  ;;  %1516 = vpow2.f32 %v861_v46 }
 0x239   : > { %v1499_v48 = vpop.eup %1498  ;;  %1048 = vst [vmem:[%s1749_s19 + $0x178] sm:$0xff] %v1497_v26  ;;  %1518 = vpow2.f32 %v859_v58 }
 0x23a   : > { %v1501_v63 = vpop.eup %1500  ;;  %1049 = vst [vmem:[%s1749_s19 + $0x180] sm:$0xff] %v1499_v48  ;;  %1520 = vpow2.f32 %v863_v51 }
 0x23b   : > { %v1503_v60 = vpop.eup %1502  ;;  %1051 = vst [vmem:[%s1749_s19 + $0x190] sm:$0xff] %v1501_v63  ;;  %1522 = vpow2.f32 %v865_v52 }
 0x23c   : > { %v1505_v31 = vpop.eup %1504  ;;  %1050 = vst [vmem:[%s1749_s19 + $0x188] sm:$0xff] %v1503_v60  ;;  %1524 = vpow2.f32 %v869_v27 }
 0x23d   : > { %v1507_v34 = vpop.eup %1506  ;;  %1052 = vst [vmem:[%s1749_s19 + $0x198] sm:$0xff] %v1505_v31  ;;  %1526 = vpow2.f32 %v867_v56 }
 0x23e   : > { %v1509_v5 = vpop.eup %1508  ;;  %v925_v49 = vadd.f32 1.0, %v1507_v34  ;;  %1528 = vpow2.f32 %v871_v28 }
 0x23f   : > { %v1511_v40 = vpop.eup %1510  ;;  %v927_v54 = vadd.f32 1.0, %v1509_v5 }
 0x240   : > { %v1513_v44 = vpop.eup %1512  ;;  %1530 = vrcp.f32 %v925_v49  ;;  %v926_v47 = vadd.f32 1.0, %v1511_v40 }
 0x241   : > { %v1515_v4 = vpop.eup %1514  ;;  %1532 = vrcp.f32 %v927_v54  ;;  %v928_v50 = vadd.f32 1.0, %v1513_v44 }
 0x242   : > { %v1517_v53 = vpop.eup %1516  ;;  %1534 = vrcp.f32 %v926_v47  ;;  %v929_v8 = vadd.f32 1.0, %v1515_v4 }
 0x243   : > { %v1519_v55 = vpop.eup %1518  ;;  %1536 = vrcp.f32 %v928_v50  ;;  %v931_v57 = vadd.f32 1.0, %v1517_v53 }
 0x244   : > { %v1521_v59 = vpop.eup %1520  ;;  %1538 = vrcp.f32 %v929_v8  ;;  %v930_v9 = vadd.f32 1.0, %v1519_v55 }
 0x245   : > { %v1523_v61 = vpop.eup %1522  ;;  %1540 = vrcp.f32 %v931_v57  ;;  %v932_v21 = vadd.f32 1.0, %v1521_v59 }
 0x246   : > { %v1525_v0 = vpop.eup %1524  ;;  %1542 = vrcp.f32 %v930_v9  ;;  %v933_v1 = vadd.f32 1.0, %v1523_v61 }
 0x247   : > { %v1527_v13 = vpop.eup %1526  ;;  %1544 = vrcp.f32 %v932_v21  ;;  %v935_v29 = vadd.f32 1.0, %v1525_v0 }
 0x248   : > { %v1529_v2 = vpop.eup %1528  ;;  %1546 = vrcp.f32 %v933_v1  ;;  %v934_v30 = vadd.f32 1.0, %v1527_v13 }
 0x249   : > { %1548 = vrcp.f32 %v935_v29  ;;  %v936_v7 = vadd.f32 1.0, %v1529_v2 }
 0x24a   : > { %v1531_v14 = vpop.eup %1530  ;;  %1550 = vrcp.f32 %v934_v30 }
 0x24b   : > { %v1533_v32 = vpop.eup %1532  ;;  %1053 = vst [vmem:[%s1749_s19 + $0x1a0] sm:$0xff] %v1531_v14  ;;  %1552 = vrcp.f32 %v936_v7 }
 0x24c   : > { %v1535_v10 = vpop.eup %1534  ;;  %1055 = vst [vmem:[%s1749_s19 + $0x1b0] sm:$0xff] %v1533_v32 }
 0x24d   : > { %v1537_v11 = vpop.eup %1536  ;;  %1054 = vst [vmem:[%s1749_s19 + $0x1a8] sm:$0xff] %v1535_v10 }
 0x24e   : > { %v1539_v33 = vpop.eup %1538  ;;  %1056 = vst [vmem:[%s1749_s19 + $0x1b8] sm:$0xff] %v1537_v11 }
 0x24f   : > { %v1541_v6 = vpop.eup %1540  ;;  %1057 = vst [vmem:[%s1749_s19 + $0x1c0] sm:$0xff] %v1539_v33 }
 0x250   : > { %v1543_v15 = vpop.eup %1542  ;;  %1059 = vst [vmem:[%s1749_s19 + $0x1d0] sm:$0xff] %v1541_v6 }
 0x251   : > { %v1545_v16 = vpop.eup %1544  ;;  %1058 = vst [vmem:[%s1749_s19 + $0x1c8] sm:$0xff] %v1543_v15 }
 0x252   : > { %v1547_v36 = vpop.eup %1546  ;;  %1060 = vst [vmem:[%s1749_s19 + $0x1d8] sm:$0xff] %v1545_v16 }
 0x253   : > { %v1549_v12 = vpop.eup %1548  ;;  %1061 = vst [vmem:[%s1749_s19 + $0x1e0] sm:$0xff] %v1547_v36 }
 0x254   : > { %v1551_v17 = vpop.eup %1550  ;;  %1063 = vst [vmem:[%s1749_s19 + $0x1f0] sm:$0xff] %v1549_v12 }
 0x255   : > { %v1553_v38 = vpop.eup %1552  ;;  %1062 = vst [vmem:[%s1749_s19 + $0x1e8] sm:$0xff] %v1551_v17 }
 0x256   : > { %1064 = vst [vmem:[%s1749_s19 + $0x1f8] sm:$0xff] %v1553_v38 }
 0x257 PF: > { %s13_s16 = sadd.s32 1, %s1592_s16   ;;  %s1956_s12 = smov %s1584_s14 }
 0x258   : > { %p10_p7 = scmp.ge.s32.totalorder %s13_s16, 18   ;;  %s1957_s13 = smov %s1588_s15 }
 0x259   : > { %s1958_s14 = smov %s1961_s17  ;;  %s1959_s15 = smov %s1965_s18 }
 0x25a   :  { %12 = sbr.rel (!%p10_p7) target bundleno = 3 (0x3), region = 65 }

</bundles_post_ra>
